<compile_context>
chip_gen: v5e
topology: v5e:2x2
jax: 0.10.0
libtpu: 0.0.40
codegen_flags: <defaults>
</compile_context>

<pallas_src>
import functools
import math

import jax
import jax.numpy as jnp
from jax.experimental import pallas as pl
from jax.experimental.pallas import tpu as pltpu


def _layernorm(x, g, b, eps=1e-5):
    mu = jnp.mean(x, axis=-1, keepdims=True)
    var = jnp.mean((x - mu) ** 2, axis=-1, keepdims=True)
    return (x - mu) * jax.lax.rsqrt(var + eps) * g + b


def fact_layer_kernel(x_ref,
                      cpe_w_ref, cpe_b_ref, tapmask_ref, pool_ref, hmask_ref,
                      g1_ref, be1_ref,
                      wq_ref, bq_ref,
                      wmap_ref, wk_ref,
                      wv_ref, bv_ref,
                      wp_ref, bp_ref,
                      g2_ref, be2_ref,
                      w1_ref, b1_ref,
                      w2_ref, b2_ref,
                      o_ref,
                      *, H, W, depth, G):
    N = H * W
    GN = G * N
    C = x_ref.shape[-1]
    f32, bf16 = jnp.float32, jnp.bfloat16

    # (G, N, C) -> (G*N, C): merge of leading dims, layout-free.
    x = x_ref[...].reshape(GN, C).astype(f32)
    cpe_w = cpe_w_ref[...]                     # (9, C)   shared across blocks
    cpe_b = cpe_b_ref[...]                     # (1, C)
    tmask = tapmask_ref[...]                   # (G*N, 9) per-tap 0/1 validity
    pool = pool_ref[...]                       # (M, N)   bf16 0/1 pooling matrix
    hmask = hmask_ref[...]                     # (C, C)   block-diag(head) * qk_scale

    taps = [(dh, dw) for dh in (-1, 0, 1) for dw in (-1, 0, 1)]

    for blk in range(depth):                   # depth == 2 -> statically unrolled
        # ---- ConvPosEnc: depthwise 3x3, zero pad, + bias, + residual -------------
        # Off-center taps are XLU sublane rolls of the flat (G*N, C) tile; the
        # precomputed masks zero the padded (and batch-crossing) contributions.
        cpe = x * cpe_w[4:5, :]                                   # center tap
        for tap, (dh, dw) in enumerate(taps):
            if dh == 0 and dw == 0:
                continue
            off = dh * W + dw                                     # |off| <= W+1 < N
            rolled = pltpu.roll(x, shift=(-off) % GN, axis=0)     # rolled[n] = x[n+off]
            cpe = cpe + rolled * cpe_w[tap:tap + 1, :] * tmask[:, tap:tap + 1]
        x = x + cpe + cpe_b

        # ---- norm1 + FactorizedAttention + residual ------------------------------
        identity = x
        xn = _layernorm(x, g1_ref[blk], be1_ref[blk])

        attn_parts = []
        for g in range(G):                     # per-batch: pool / softmax / context
            xn_g = xn[g * N:(g + 1) * N, :]
            # kv: depthwise 4x4 / stride-4 conv == per-tap channel scale + window pool
            xs = xn_g.astype(bf16) * wmap_ref[blk]                          # (N, C) bf16
            kvf = jnp.dot(pool, xs, preferred_element_type=f32)             # (M, C)
            kvfb = kvf.astype(bf16)
            k = jnp.dot(kvfb, wk_ref[blk], preferred_element_type=f32)      # (M, C)
            v = jnp.dot(kvfb, wv_ref[blk], preferred_element_type=f32) + bv_ref[blk]

            # softmax over the M kv tokens (per head-channel column); approx recip (EUP)
            ek = jnp.exp(k - jnp.max(k, axis=0, keepdims=True))
            sk = ek * pl.reciprocal(jnp.sum(ek, axis=0, keepdims=True), approx=True)

            # per-head context softmax(k)^T @ v; cross-head terms removed by the
            # precomputed block-diagonal mask (already multiplied by qk-scale)
            kvmat = jax.lax.dot_general(sk, v, (((0,), (0,)), ((), ())),
                                        preferred_element_type=f32) * hmask  # (C, C)

            # Algebraic fusion of q-projection and output projection (tiny f32 GEMMs):
            #   attn = xn @ (wq @ kvmat @ wp) + bq @ (kvmat @ wp) + bp
            kvp = jnp.dot(kvmat, wp_ref[blk], preferred_element_type=f32)    # (C, C)
            wcomb = jnp.dot(wq_ref[blk], kvp, preferred_element_type=f32)    # (C, C)
            bcomb = jnp.dot(bq_ref[blk], kvp, preferred_element_type=f32) + bp_ref[blk]
            attn_parts.append(
                jnp.dot(xn_g.astype(bf16), wcomb.astype(bf16),
                        preferred_element_type=f32) + bcomb)                 # (N, C)

        attn = attn_parts[0] if G == 1 else jnp.concatenate(attn_parts, axis=0)
        x = identity + attn          # drop_path_rate = 0, proj_drop = 0 -> identity

        # ---- norm2 + MLP (Linear -> tanh-GELU -> Linear) + residual --------------
        identity = x
        xn = _layernorm(x, g2_ref[blk], be2_ref[blk])
        h1 = jnp.dot(xn.astype(bf16), w1_ref[blk],
                     preferred_element_type=f32) + b1_ref[blk]
        # tanh-approx GELU: runs on the EUP slot instead of a long erf VPU polynomial.
        h1 = 0.5 * h1 * (1.0 + jnp.tanh(0.7978845608028654
                                        * (h1 + 0.044715 * h1 * h1 * h1)))
        out = jnp.dot(h1.astype(bf16), w2_ref[blk],
                      preferred_element_type=f32) + b2_ref[blk]
        x = identity + out

    o_ref[...] = x.reshape(G, N, C).astype(o_ref.dtype)


def fact_layer_forward(x, params, hw_shape, *, num_heads=8, kv_kernel=4, kv_stride=4,
                       batch_group=None):
    """x: (B, N, C) NLC input. Returns (B, C, H, W), like FacTLayer.forward."""
    B, N, C = x.shape
    H, W = hw_shape
    assert N == H * W and H % kv_stride == 0 and W % kv_stride == 0
    assert kv_kernel == kv_stride, "pool-matmul path assumes non-overlapping kv windows"
    Ho, Wo = H // kv_stride, W // kv_stride
    M = Ho * Wo
    d = C // num_heads
    scale = d ** -0.5
    blocks = params["blocks"]
    depth = len(blocks)
    Chid = blocks[0]["w_fc1"].shape[1]
    f32, bf16 = jnp.float32, jnp.bfloat16

    # Batch group G: stack G batch elements per grid step so the flattened (G*N, C)
    # GEMM LHS fills the MXU rows (128 on v5e, 256 on v6e/v7x) and the per-step
    # overhead is amortized.  Must divide B.  (At large B this still leaves >=2 grid
    # steps per TensorCore for pipeline overlap on v7x.)
    if batch_group is None:
        target = max(1, 256 // max(N, 1))
        G = 1
        for cand in range(min(B, max(target, 1)), 0, -1):
            if B % cand == 0:
                G = cand
                break
    else:
        G = batch_group
    assert B % G == 0

    # --- tiny precomputed helper tensors (no in-kernel iota / div / mod) ----------
    n_idx = jnp.arange(N, dtype=jnp.int32)
    h_pos, w_pos = n_idx // W, n_idx % W
    # per-tap validity of the 3x3 CPE taps (tap = (dh+1)*3 + (dw+1))
    tap_cols = []
    for dh in (-1, 0, 1):
        for dw in (-1, 0, 1):
            ok = ((h_pos + dh >= 0) & (h_pos + dh < H)
                  & (w_pos + dw >= 0) & (w_pos + dw < W))
            tap_cols.append(ok)
    tapmask = jnp.tile(jnp.stack(tap_cols, axis=1).astype(f32), (G, 1))     # (G*N, 9)

    m_of_n = (h_pos // kv_stride) * Wo + (w_pos // kv_stride)               # (N,)
    pool = (jnp.arange(M, dtype=jnp.int32)[:, None] == m_of_n[None, :]).astype(bf16)  # (M, N)
    tap_of_n = (h_pos % kv_stride) * kv_kernel + (w_pos % kv_stride)        # (N,)
    c_idx = jnp.arange(C, dtype=jnp.int32)
    hmask = (scale * ((c_idx[:, None] // d) == (c_idx[None, :] // d))).astype(f32)  # (C, C)

    # --- stack per-block weights on a leading depth axis --------------------------
    # GEMM weights used with bf16 activations -> bf16; wq/bq/wp/bp feed the tiny f32
    # combine GEMMs so they stay f32; wmap is the largest constant -> bf16.
    st = lambda key, dt=f32: jnp.stack([b[key] for b in blocks]).astype(dt)
    args = (params["cpe_w"].astype(f32), params["cpe_b"].astype(f32),
            tapmask, pool, hmask,
            st("g1"), st("beta1"),
            st("wq"), st("bq"),
            jnp.stack([b["wkv"][tap_of_n] for b in blocks]).astype(bf16),   # wmap (D,N,C)
            st("wk", bf16),
            st("wv", bf16), st("bv"),
            st("wp"), st("bp"),
            st("g2"), st("beta2"),
            st("w_fc1", bf16), st("b_fc1"),
            st("w_fc2", bf16), st("b_fc2"))

    def full_spec(a):
        nd = a.ndim
        return pl.BlockSpec(a.shape, lambda b, _nd=nd: (0,) * _nd)

    kernel = functools.partial(fact_layer_kernel, H=H, W=W, depth=depth, G=G)

    gemm_flops = depth * B * 2 * (M * N * C + 3 * M * C * C + N * C * C
                                  + 2 * N * C * Chid + 3 * C * C * C)
    cost = pl.CostEstimate(
        flops=gemm_flops,
        transcendentals=depth * B * (M * C + N * Chid),
        bytes_accessed=2 * x.size * x.dtype.itemsize
                       + sum(a.size * a.dtype.itemsize for a in args))

    y = pl.pallas_call(
        kernel,
        out_shape=jax.ShapeDtypeStruct((B, N, C), x.dtype),
        grid=(B // G,),
        in_specs=[pl.BlockSpec((G, N, C), lambda b: (b, 0, 0))]
                 + [full_spec(a) for a in args],
        out_specs=pl.BlockSpec((G, N, C), lambda b: (b, 0, 0)),
        input_output_aliases={0: 0},
        cost_estimate=cost,
        compiler_params=pltpu.CompilerParams(
            dimension_semantics=("parallel",),
            # Toy shapes fit easily; at production shapes raise toward 64-96 MiB on
            # v5e/v6e (128 MiB physical) and keep <=~48 MiB on v7x (tile N instead).
            vmem_limit_bytes=32 * 1024 * 1024),
    )(x, *args)

    # nlc_to_nchw: (B, N, C) -> (B, C, H, W)
    return y.reshape(B, H, W, C).transpose(0, 3, 1, 2)


# ------------------------------ parameter init --------------------------------
def init_params(key, dim, depth=2, num_heads=8, mlp_ratio=4, kv_kernel=4):
    hidden = dim * mlp_ratio
    ks = jax.random.split(key, 2 + depth)

    def rnd(k, shape, scale):
        return (scale * jax.random.normal(k, shape)).astype(jnp.float32)

    params = {
        "cpe_w": rnd(ks[0], (9, dim), 1.0 / 3.0),          # torch (dim,1,3,3) depthwise
        "cpe_b": rnd(ks[1], (1, dim), 0.02),
        "blocks": [],
    }
    for i in range(depth):
        bk = jax.random.split(ks[2 + i], 12)
        s = 1.0 / math.sqrt(dim)
        params["blocks"].append({
            "g1": jnp.ones((1, dim), jnp.float32),
            "beta1": jnp.zeros((1, dim), jnp.float32),
            "wq": rnd(bk[0], (dim, dim), s), "bq": rnd(bk[1], (1, dim), 0.02),
            "wkv": rnd(bk[2], (kv_kernel * kv_kernel, dim), 0.25),
            "wk": rnd(bk[3], (dim, dim), s),
            "wv": rnd(bk[4], (dim, dim), s), "bv": rnd(bk[5], (1, dim), 0.02),
            "wp": rnd(bk[6], (dim, dim), s), "bp": rnd(bk[7], (1, dim), 0.02),
            "g2": jnp.ones((1, dim), jnp.float32),
            "beta2": jnp.zeros((1, dim), jnp.float32),
            "w_fc1": rnd(bk[8], (dim, hidden), s), "b_fc1": rnd(bk[9], (1, hidden), 0.02),
            "w_fc2": rnd(bk[10], (hidden, dim), 1.0 / math.sqrt(hidden)),
            "b_fc2": rnd(bk[11], (1, dim), 0.02),
        })
    return params


# ------------------------ pure-JAX reference (f32) ----------------------------
def _dwconv_nhwc(xh, w_flat, ksize, stride, padding):
    B, H, W, C = xh.shape
    rhs = w_flat.reshape(ksize, ksize, 1, C)
    return jax.lax.conv_general_dilated(
        xh, rhs, window_strides=(stride, stride), padding=padding,
        dimension_numbers=("NHWC", "HWIO", "NHWC"), feature_group_count=C)


def ref_forward(x, params, hw_shape, *, num_heads=8, kv_kernel=4, kv_stride=4):
    B, N, C = x.shape
    H, W = hw_shape
    d = C // num_heads
    scale = d ** -0.5
    for blk in params["blocks"]:
        xh = x.reshape(B, H, W, C)
        x = x + _dwconv_nhwc(xh, params["cpe_w"], 3, 1, "SAME").reshape(B, N, C) + params["cpe_b"]
        identity = x
        xn = _layernorm(x, blk["g1"], blk["beta1"])
        q = xn @ blk["wq"] + blk["bq"]
        kvf = _dwconv_nhwc(xn.reshape(B, H, W, C), blk["wkv"], kv_kernel, kv_stride,
                           "VALID").reshape(B, -1, C)
        k = kvf @ blk["wk"]
        v = kvf @ blk["wv"] + blk["bv"]
        to_heads = lambda t: t.reshape(B, -1, num_heads, d).transpose(0, 2, 1, 3)
        qh, kh, vh = to_heads(q), to_heads(k), to_heads(v)
        kvh = jnp.einsum("bhnk,bhnv->bhkv", jax.nn.softmax(kh, axis=2), vh)
        attn = scale * jnp.einsum("bhnk,bhkv->bhnv", qh, kvh)
        attn = attn.transpose(0, 2, 1, 3).reshape(B, N, C)
        x = identity + (attn @ blk["wp"] + blk["bp"])
        identity = x
        xn = _layernorm(x, blk["g2"], blk["beta2"])
        h1 = jax.nn.gelu(xn @ blk["w_fc1"] + blk["b_fc1"], approximate=False)
        x = identity + (h1 @ blk["w_fc2"] + blk["b_fc2"])
    return x.reshape(B, H, W, C).transpose(0, 3, 1, 2)


if __name__ == "__main__":
    B, dim, H, W = 2, 32, 8, 8
    num_heads, depth, mlp_ratio, kv_k, kv_s = 8, 2, 4, 4, 4

    key = jax.random.PRNGKey(0)
    kx, kp = jax.random.split(key)
    x = jax.random.normal(kx, (B, H * W, dim), dtype=jnp.float32)   # NLC input
    params = init_params(kp, dim, depth, num_heads, mlp_ratio, kv_k)

    fwd = jax.jit(functools.partial(fact_layer_forward, hw_shape=(H, W),
                                    num_heads=num_heads, kv_kernel=kv_k,
                                    kv_stride=kv_s))
    y = jax.block_until_ready(fwd(x, params))
    assert y.shape == (B, dim, H, W), y.shape

    y_ref = jax.block_until_ready(
        ref_forward(x, params, (H, W), num_heads=num_heads,
                    kv_kernel=kv_k, kv_stride=kv_s))

    # Kernel uses bf16 GEMM operands (f32 accumulation), a bf16 kv-scale map,
    # pl.reciprocal(approx=True) in the softmax and tanh-approx GELU; the reference
    # is pure f32 with exact erf-GELU, so tolerances are loosened accordingly.
    max_err = float(jnp.max(jnp.abs(y - y_ref)))
    mean_err = float(jnp.mean(jnp.abs(y - y_ref)))
    assert jnp.allclose(y, y_ref, atol=0.2, rtol=0.1), (max_err, mean_err)
    assert mean_err < 0.06, (max_err, mean_err)

    print("KERNEL_OK")
</pallas_src>

<mosaic_0001>
module attributes {stable_mosaic.version = 11 : i64} {
  func.func @fact_layer_kernel(%arg0: i32, %arg1: memref<2x64x32xf32, #tpu.memory_space<vmem>>, %arg2: memref<9x32xf32, #tpu.memory_space<vmem>>, %arg3: memref<1x32xf32, #tpu.memory_space<vmem>>, %arg4: memref<128x9xf32, #tpu.memory_space<vmem>>, %arg5: memref<4x64xbf16, #tpu.memory_space<vmem>>, %arg6: memref<32x32xf32, #tpu.memory_space<vmem>>, %arg7: memref<2x1x32xf32, #tpu.memory_space<vmem>>, %arg8: memref<2x1x32xf32, #tpu.memory_space<vmem>>, %arg9: memref<2x32x32xf32, #tpu.memory_space<vmem>>, %arg10: memref<2x1x32xf32, #tpu.memory_space<vmem>>, %arg11: memref<2x64x32xbf16, #tpu.memory_space<vmem>>, %arg12: memref<2x32x32xbf16, #tpu.memory_space<vmem>>, %arg13: memref<2x32x32xbf16, #tpu.memory_space<vmem>>, %arg14: memref<2x1x32xf32, #tpu.memory_space<vmem>>, %arg15: memref<2x32x32xf32, #tpu.memory_space<vmem>>, %arg16: memref<2x1x32xf32, #tpu.memory_space<vmem>>, %arg17: memref<2x1x32xf32, #tpu.memory_space<vmem>>, %arg18: memref<2x1x32xf32, #tpu.memory_space<vmem>>, %arg19: memref<2x32x128xbf16, #tpu.memory_space<vmem>>, %arg20: memref<2x1x128xf32, #tpu.memory_space<vmem>>, %arg21: memref<2x128x32xbf16, #tpu.memory_space<vmem>>, %arg22: memref<2x1x32xf32, #tpu.memory_space<vmem>>, %arg23: memref<2x64x32xf32, #tpu.memory_space<vmem>>) attributes {dimension_semantics = [#tpu.dimension_semantics<parallel>], iteration_bounds = array<i64: 1>, scalar_prefetch = 0 : i64, scratch_operands = 0 : i64, tpu.core_type = #tpu.core_type<tc>, window_params = [{transform_indices = @transform_0, window_bounds = array<i64: 2, 64, 32>}, {pipeline_mode = #tpu.pipeline_mode<synchronous>, transform_indices = @transform_1, window_bounds = array<i64: 9, 32>}, {pipeline_mode = #tpu.pipeline_mode<synchronous>, transform_indices = @transform_2, window_bounds = array<i64: 1, 32>}, {pipeline_mode = #tpu.pipeline_mode<synchronous>, transform_indices = @transform_3, window_bounds = array<i64: 128, 9>}, {pipeline_mode = #tpu.pipeline_mode<synchronous>, transform_indices = @transform_4, window_bounds = array<i64: 4, 64>}, {pipeline_mode = #tpu.pipeline_mode<synchronous>, transform_indices = @transform_5, window_bounds = array<i64: 32, 32>}, {pipeline_mode = #tpu.pipeline_mode<synchronous>, transform_indices = @transform_6, window_bounds = array<i64: 2, 1, 32>}, {pipeline_mode = #tpu.pipeline_mode<synchronous>, transform_indices = @transform_7, window_bounds = array<i64: 2, 1, 32>}, {pipeline_mode = #tpu.pipeline_mode<synchronous>, transform_indices = @transform_8, window_bounds = array<i64: 2, 32, 32>}, {pipeline_mode = #tpu.pipeline_mode<synchronous>, transform_indices = @transform_9, window_bounds = array<i64: 2, 1, 32>}, {pipeline_mode = #tpu.pipeline_mode<synchronous>, transform_indices = @transform_10, window_bounds = array<i64: 2, 64, 32>}, {pipeline_mode = #tpu.pipeline_mode<synchronous>, transform_indices = @transform_11, window_bounds = array<i64: 2, 32, 32>}, {pipeline_mode = #tpu.pipeline_mode<synchronous>, transform_indices = @transform_12, window_bounds = array<i64: 2, 32, 32>}, {pipeline_mode = #tpu.pipeline_mode<synchronous>, transform_indices = @transform_13, window_bounds = array<i64: 2, 1, 32>}, {pipeline_mode = #tpu.pipeline_mode<synchronous>, transform_indices = @transform_14, window_bounds = array<i64: 2, 32, 32>}, {pipeline_mode = #tpu.pipeline_mode<synchronous>, transform_indices = @transform_15, window_bounds = array<i64: 2, 1, 32>}, {pipeline_mode = #tpu.pipeline_mode<synchronous>, transform_indices = @transform_16, window_bounds = array<i64: 2, 1, 32>}, {pipeline_mode = #tpu.pipeline_mode<synchronous>, transform_indices = @transform_17, window_bounds = array<i64: 2, 1, 32>}, {pipeline_mode = #tpu.pipeline_mode<synchronous>, transform_indices = @transform_18, window_bounds = array<i64: 2, 32, 128>}, {pipeline_mode = #tpu.pipeline_mode<synchronous>, transform_indices = @transform_19, window_bounds = array<i64: 2, 1, 128>}, {pipeline_mode = #tpu.pipeline_mode<synchronous>, transform_indices = @transform_20, window_bounds = array<i64: 2, 128, 32>}, {pipeline_mode = #tpu.pipeline_mode<synchronous>, transform_indices = @transform_21, window_bounds = array<i64: 2, 1, 32>}, {transform_indices = @transform_22, window_bounds = array<i64: 2, 64, 32>}]} {
    %c0 = arith.constant 0 : index
    %c0_0 = arith.constant 0 : index
    %c0_1 = arith.constant 0 : index
    %0 = vector.load %arg1[%c0, %c0_0, %c0_1] : memref<2x64x32xf32, #tpu.memory_space<vmem>>, vector<2x64x32xf32>
    %1 = vector.shape_cast %0 : vector<2x64x32xf32> to vector<128x32xf32>
    %c0_2 = arith.constant 0 : index
    %c0_3 = arith.constant 0 : index
    %2 = vector.load %arg2[%c0_2, %c0_3] : memref<9x32xf32, #tpu.memory_space<vmem>>, vector<9x32xf32>
    %c0_4 = arith.constant 0 : index
    %c0_5 = arith.constant 0 : index
    %3 = vector.load %arg3[%c0_4, %c0_5] : memref<1x32xf32, #tpu.memory_space<vmem>>, vector<1x32xf32>
    %c0_6 = arith.constant 0 : index
    %c0_7 = arith.constant 0 : index
    %4 = vector.load %arg4[%c0_6, %c0_7] : memref<128x9xf32, #tpu.memory_space<vmem>>, vector<128x9xf32>
    %c0_8 = arith.constant 0 : index
    %c0_9 = arith.constant 0 : index
    %5 = vector.load %arg5[%c0_8, %c0_9] : memref<4x64xbf16, #tpu.memory_space<vmem>>, vector<4x64xbf16>
    %c0_10 = arith.constant 0 : index
    %c0_11 = arith.constant 0 : index
    %6 = vector.load %arg6[%c0_10, %c0_11] : memref<32x32xf32, #tpu.memory_space<vmem>>, vector<32x32xf32>
    %7 = vector.extract_strided_slice %2 {offsets = [4, 0], sizes = [1, 32], strides = [1, 1]} : vector<9x32xf32> to vector<1x32xf32>
    %8 = vector.broadcast %7 : vector<1x32xf32> to vector<128x32xf32>
    %9 = arith.mulf %1, %8 : vector<128x32xf32>
    %c9_i32 = arith.constant 9 : i32
    %10 = tpu.dynamic_rotate %1 by %c9_i32 dim 0 : vector<128x32xf32>, i32 -> vector<128x32xf32>
    %11 = vector.extract_strided_slice %2 {offsets = [0, 0], sizes = [1, 32], strides = [1, 1]} : vector<9x32xf32> to vector<1x32xf32>
    %12 = vector.broadcast %11 : vector<1x32xf32> to vector<128x32xf32>
    %13 = arith.mulf %10, %12 : vector<128x32xf32>
    %14 = vector.extract_strided_slice %4 {offsets = [0, 0], sizes = [128, 1], strides = [1, 1]} : vector<128x9xf32> to vector<128x1xf32>
    %15 = vector.broadcast %14 : vector<128x1xf32> to vector<128x32xf32>
    %16 = arith.mulf %13, %15 : vector<128x32xf32>
    %17 = arith.addf %9, %16 : vector<128x32xf32>
    %c8_i32 = arith.constant 8 : i32
    %18 = tpu.dynamic_rotate %1 by %c8_i32 dim 0 : vector<128x32xf32>, i32 -> vector<128x32xf32>
    %19 = vector.extract_strided_slice %2 {offsets = [1, 0], sizes = [1, 32], strides = [1, 1]} : vector<9x32xf32> to vector<1x32xf32>
    %20 = vector.broadcast %19 : vector<1x32xf32> to vector<128x32xf32>
    %21 = arith.mulf %18, %20 : vector<128x32xf32>
    %22 = vector.extract_strided_slice %4 {offsets = [0, 1], sizes = [128, 1], strides = [1, 1]} : vector<128x9xf32> to vector<128x1xf32>
    %23 = vector.broadcast %22 : vector<128x1xf32> to vector<128x32xf32>
    %24 = arith.mulf %21, %23 : vector<128x32xf32>
    %25 = arith.addf %17, %24 : vector<128x32xf32>
    %c7_i32 = arith.constant 7 : i32
    %26 = tpu.dynamic_rotate %1 by %c7_i32 dim 0 : vector<128x32xf32>, i32 -> vector<128x32xf32>
    %27 = vector.extract_strided_slice %2 {offsets = [2, 0], sizes = [1, 32], strides = [1, 1]} : vector<9x32xf32> to vector<1x32xf32>
    %28 = vector.broadcast %27 : vector<1x32xf32> to vector<128x32xf32>
    %29 = arith.mulf %26, %28 : vector<128x32xf32>
    %30 = vector.extract_strided_slice %4 {offsets = [0, 2], sizes = [128, 1], strides = [1, 1]} : vector<128x9xf32> to vector<128x1xf32>
    %31 = vector.broadcast %30 : vector<128x1xf32> to vector<128x32xf32>
    %32 = arith.mulf %29, %31 : vector<128x32xf32>
    %33 = arith.addf %25, %32 : vector<128x32xf32>
    %c1_i32 = arith.constant 1 : i32
    %34 = tpu.dynamic_rotate %1 by %c1_i32 dim 0 : vector<128x32xf32>, i32 -> vector<128x32xf32>
    %35 = vector.extract_strided_slice %2 {offsets = [3, 0], sizes = [1, 32], strides = [1, 1]} : vector<9x32xf32> to vector<1x32xf32>
    %36 = vector.broadcast %35 : vector<1x32xf32> to vector<128x32xf32>
    %37 = arith.mulf %34, %36 : vector<128x32xf32>
    %38 = vector.extract_strided_slice %4 {offsets = [0, 3], sizes = [128, 1], strides = [1, 1]} : vector<128x9xf32> to vector<128x1xf32>
    %39 = vector.broadcast %38 : vector<128x1xf32> to vector<128x32xf32>
    %40 = arith.mulf %37, %39 : vector<128x32xf32>
    %41 = arith.addf %33, %40 : vector<128x32xf32>
    %c127_i32 = arith.constant 127 : i32
    %42 = tpu.dynamic_rotate %1 by %c127_i32 dim 0 : vector<128x32xf32>, i32 -> vector<128x32xf32>
    %43 = vector.extract_strided_slice %2 {offsets = [5, 0], sizes = [1, 32], strides = [1, 1]} : vector<9x32xf32> to vector<1x32xf32>
    %44 = vector.broadcast %43 : vector<1x32xf32> to vector<128x32xf32>
    %45 = arith.mulf %42, %44 : vector<128x32xf32>
    %46 = vector.extract_strided_slice %4 {offsets = [0, 5], sizes = [128, 1], strides = [1, 1]} : vector<128x9xf32> to vector<128x1xf32>
    %47 = vector.broadcast %46 : vector<128x1xf32> to vector<128x32xf32>
    %48 = arith.mulf %45, %47 : vector<128x32xf32>
    %49 = arith.addf %41, %48 : vector<128x32xf32>
    %c121_i32 = arith.constant 121 : i32
    %50 = tpu.dynamic_rotate %1 by %c121_i32 dim 0 : vector<128x32xf32>, i32 -> vector<128x32xf32>
    %51 = vector.extract_strided_slice %2 {offsets = [6, 0], sizes = [1, 32], strides = [1, 1]} : vector<9x32xf32> to vector<1x32xf32>
    %52 = vector.broadcast %51 : vector<1x32xf32> to vector<128x32xf32>
    %53 = arith.mulf %50, %52 : vector<128x32xf32>
    %54 = vector.extract_strided_slice %4 {offsets = [0, 6], sizes = [128, 1], strides = [1, 1]} : vector<128x9xf32> to vector<128x1xf32>
    %55 = vector.broadcast %54 : vector<128x1xf32> to vector<128x32xf32>
    %56 = arith.mulf %53, %55 : vector<128x32xf32>
    %57 = arith.addf %49, %56 : vector<128x32xf32>
    %c120_i32 = arith.constant 120 : i32
    %58 = tpu.dynamic_rotate %1 by %c120_i32 dim 0 : vector<128x32xf32>, i32 -> vector<128x32xf32>
    %59 = vector.extract_strided_slice %2 {offsets = [7, 0], sizes = [1, 32], strides = [1, 1]} : vector<9x32xf32> to vector<1x32xf32>
    %60 = vector.broadcast %59 : vector<1x32xf32> to vector<128x32xf32>
    %61 = arith.mulf %58, %60 : vector<128x32xf32>
    %62 = vector.extract_strided_slice %4 {offsets = [0, 7], sizes = [128, 1], strides = [1, 1]} : vector<128x9xf32> to vector<128x1xf32>
    %63 = vector.broadcast %62 : vector<128x1xf32> to vector<128x32xf32>
    %64 = arith.mulf %61, %63 : vector<128x32xf32>
    %65 = arith.addf %57, %64 : vector<128x32xf32>
    %c119_i32 = arith.constant 119 : i32
    %66 = tpu.dynamic_rotate %1 by %c119_i32 dim 0 : vector<128x32xf32>, i32 -> vector<128x32xf32>
    %67 = vector.extract_strided_slice %2 {offsets = [8, 0], sizes = [1, 32], strides = [1, 1]} : vector<9x32xf32> to vector<1x32xf32>
    %68 = vector.broadcast %67 : vector<1x32xf32> to vector<128x32xf32>
    %69 = arith.mulf %66, %68 : vector<128x32xf32>
    %70 = vector.extract_strided_slice %4 {offsets = [0, 8], sizes = [128, 1], strides = [1, 1]} : vector<128x9xf32> to vector<128x1xf32>
    %71 = vector.broadcast %70 : vector<128x1xf32> to vector<128x32xf32>
    %72 = arith.mulf %69, %71 : vector<128x32xf32>
    %73 = arith.addf %65, %72 : vector<128x32xf32>
    %74 = arith.addf %1, %73 : vector<128x32xf32>
    %75 = vector.broadcast %3 : vector<1x32xf32> to vector<128x32xf32>
    %76 = arith.addf %74, %75 : vector<128x32xf32>
    %c0_12 = arith.constant 0 : index
    %c0_13 = arith.constant 0 : index
    %c0_14 = arith.constant 0 : index
    %77 = vector.load %arg7[%c0_12, %c0_13, %c0_14] : memref<2x1x32xf32, #tpu.memory_space<vmem>>, vector<1x1x32xf32>
    %78 = vector.shape_cast %77 : vector<1x1x32xf32> to vector<1x32xf32>
    %c0_15 = arith.constant 0 : index
    %c0_16 = arith.constant 0 : index
    %c0_17 = arith.constant 0 : index
    %79 = vector.load %arg8[%c0_15, %c0_16, %c0_17] : memref<2x1x32xf32, #tpu.memory_space<vmem>>, vector<1x1x32xf32>
    %80 = vector.shape_cast %79 : vector<1x1x32xf32> to vector<1x32xf32>
    %cst = arith.constant dense<0.000000e+00> : vector<128xf32>
    %81 = vector.multi_reduction <add>, %76, %cst [1] : vector<128x32xf32> to vector<128xf32>
    %82 = vector.shape_cast %81 : vector<128xf32> to vector<128x1xf32>
    %cst_18 = arith.constant 3.200000e+01 : f32
    %83 = vector.broadcast %cst_18 : f32 to vector<128x1xf32>
    %84 = arith.divf %82, %83 : vector<128x1xf32>
    %85 = vector.broadcast %84 : vector<128x1xf32> to vector<128x32xf32>
    %86 = arith.subf %76, %85 : vector<128x32xf32>
    %87 = arith.mulf %86, %86 : vector<128x32xf32>
    %cst_19 = arith.constant dense<0.000000e+00> : vector<128xf32>
    %88 = vector.multi_reduction <add>, %87, %cst_19 [1] : vector<128x32xf32> to vector<128xf32>
    %89 = vector.shape_cast %88 : vector<128xf32> to vector<128x1xf32>
    %cst_20 = arith.constant 3.200000e+01 : f32
    %90 = vector.broadcast %cst_20 : f32 to vector<128x1xf32>
    %91 = arith.divf %89, %90 : vector<128x1xf32>
    %92 = vector.broadcast %84 : vector<128x1xf32> to vector<128x32xf32>
    %93 = arith.subf %76, %92 : vector<128x32xf32>
    %cst_21 = arith.constant 9.99999974E-6 : f32
    %94 = vector.broadcast %cst_21 : f32 to vector<128x1xf32>
    %95 = arith.addf %91, %94 : vector<128x1xf32>
    %96 = math.rsqrt %95 : vector<128x1xf32>
    %97 = vector.broadcast %96 : vector<128x1xf32> to vector<128x32xf32>
    %98 = arith.mulf %93, %97 : vector<128x32xf32>
    %99 = vector.broadcast %78 : vector<1x32xf32> to vector<128x32xf32>
    %100 = arith.mulf %98, %99 : vector<128x32xf32>
    %101 = vector.broadcast %80 : vector<1x32xf32> to vector<128x32xf32>
    %102 = arith.addf %100, %101 : vector<128x32xf32>
    %103 = vector.extract_strided_slice %102 {offsets = [0, 0], sizes = [64, 32], strides = [1, 1]} : vector<128x32xf32> to vector<64x32xf32>
    %104 = arith.truncf %103 : vector<64x32xf32> to vector<64x32xbf16>
    %c0_22 = arith.constant 0 : index
    %c0_23 = arith.constant 0 : index
    %c0_24 = arith.constant 0 : index
    %105 = vector.load %arg11[%c0_22, %c0_23, %c0_24] : memref<2x64x32xbf16, #tpu.memory_space<vmem>>, vector<1x64x32xbf16>
    %106 = vector.shape_cast %105 : vector<1x64x32xbf16> to vector<64x32xbf16>
    %107 = arith.mulf %104, %106 : vector<64x32xbf16>
    %cst_25 = arith.constant dense<0.000000e+00> : vector<4x32xf32>
    %108 = tpu.matmul %5, %107, %cst_25 {dimension_numbers = #tpu.dot_dimension_numbers<[1], [0], [0], [1], [0, 0, 1, 1], [], []>} : vector<4x64xbf16>, vector<64x32xbf16>, vector<4x32xf32> -> vector<4x32xf32>
    %109 = arith.truncf %108 : vector<4x32xf32> to vector<4x32xbf16>
    %c0_26 = arith.constant 0 : index
    %c0_27 = arith.constant 0 : index
    %c0_28 = arith.constant 0 : index
    %110 = vector.load %arg12[%c0_26, %c0_27, %c0_28] : memref<2x32x32xbf16, #tpu.memory_space<vmem>>, vector<1x32x32xbf16>
    %111 = vector.shape_cast %110 : vector<1x32x32xbf16> to vector<32x32xbf16>
    %cst_29 = arith.constant dense<0.000000e+00> : vector<4x32xf32>
    %112 = tpu.matmul %109, %111, %cst_29 {dimension_numbers = #tpu.dot_dimension_numbers<[1], [0], [0], [1], [0, 0, 1, 1], [], []>} : vector<4x32xbf16>, vector<32x32xbf16>, vector<4x32xf32> -> vector<4x32xf32>
    %c0_30 = arith.constant 0 : index
    %c0_31 = arith.constant 0 : index
    %c0_32 = arith.constant 0 : index
    %113 = vector.load %arg13[%c0_30, %c0_31, %c0_32] : memref<2x32x32xbf16, #tpu.memory_space<vmem>>, vector<1x32x32xbf16>
    %114 = vector.shape_cast %113 : vector<1x32x32xbf16> to vector<32x32xbf16>
    %cst_33 = arith.constant dense<0.000000e+00> : vector<4x32xf32>
    %115 = tpu.matmul %109, %114, %cst_33 {dimension_numbers = #tpu.dot_dimension_numbers<[1], [0], [0], [1], [0, 0, 1, 1], [], []>} : vector<4x32xbf16>, vector<32x32xbf16>, vector<4x32xf32> -> vector<4x32xf32>
    %c0_34 = arith.constant 0 : index
    %c0_35 = arith.constant 0 : index
    %c0_36 = arith.constant 0 : index
    %116 = vector.load %arg14[%c0_34, %c0_35, %c0_36] : memref<2x1x32xf32, #tpu.memory_space<vmem>>, vector<1x1x32xf32>
    %117 = vector.shape_cast %116 : vector<1x1x32xf32> to vector<1x32xf32>
    %118 = vector.broadcast %117 : vector<1x32xf32> to vector<4x32xf32>
    %119 = arith.addf %115, %118 : vector<4x32xf32>
    %cst_37 = arith.constant dense<0xFF800000> : vector<32xf32>
    %120 = vector.multi_reduction <maximumf>, %112, %cst_37 [0] : vector<4x32xf32> to vector<32xf32>
    %121 = vector.shape_cast %120 : vector<32xf32> to vector<1x32xf32>
    %122 = vector.broadcast %121 : vector<1x32xf32> to vector<4x32xf32>
    %123 = arith.subf %112, %122 : vector<4x32xf32>
    %124 = math.exp %123 : vector<4x32xf32>
    %cst_38 = arith.constant dense<0.000000e+00> : vector<32xf32>
    %125 = vector.multi_reduction <add>, %124, %cst_38 [0] : vector<4x32xf32> to vector<32xf32>
    %126 = vector.shape_cast %125 : vector<32xf32> to vector<1x32xf32>
    %127 = tpu.reciprocal %126 {approx = true} : vector<1x32xf32> -> vector<1x32xf32>
    %128 = vector.broadcast %127 : vector<1x32xf32> to vector<4x32xf32>
    %129 = arith.mulf %124, %128 : vector<4x32xf32>
    %cst_39 = arith.constant dense<0.000000e+00> : vector<32x32xf32>
    %130 = tpu.matmul %129, %119, %cst_39 {dimension_numbers = #tpu.dot_dimension_numbers<[0], [0], [1], [1], [0, 1, 1, 1], [], []>} : vector<4x32xf32>, vector<4x32xf32>, vector<32x32xf32> -> vector<32x32xf32>
    %131 = arith.mulf %130, %6 : vector<32x32xf32>
    %c0_40 = arith.constant 0 : index
    %c0_41 = arith.constant 0 : index
    %c0_42 = arith.constant 0 : index
    %132 = vector.load %arg15[%c0_40, %c0_41, %c0_42] : memref<2x32x32xf32, #tpu.memory_space<vmem>>, vector<1x32x32xf32>
    %133 = vector.shape_cast %132 : vector<1x32x32xf32> to vector<32x32xf32>
    %cst_43 = arith.constant dense<0.000000e+00> : vector<32x32xf32>
    %134 = tpu.matmul %131, %133, %cst_43 {dimension_numbers = #tpu.dot_dimension_numbers<[1], [0], [0], [1], [0, 0, 1, 1], [], []>} : vector<32x32xf32>, vector<32x32xf32>, vector<32x32xf32> -> vector<32x32xf32>
    %c0_44 = arith.constant 0 : index
    %c0_45 = arith.constant 0 : index
    %c0_46 = arith.constant 0 : index
    %135 = vector.load %arg9[%c0_44, %c0_45, %c0_46] : memref<2x32x32xf32, #tpu.memory_space<vmem>>, vector<1x32x32xf32>
    %136 = vector.shape_cast %135 : vector<1x32x32xf32> to vector<32x32xf32>
    %cst_47 = arith.constant dense<0.000000e+00> : vector<32x32xf32>
    %137 = tpu.matmul %136, %134, %cst_47 {dimension_numbers = #tpu.dot_dimension_numbers<[1], [0], [0], [1], [0, 0, 1, 1], [], []>} : vector<32x32xf32>, vector<32x32xf32>, vector<32x32xf32> -> vector<32x32xf32>
    %c0_48 = arith.constant 0 : index
    %c0_49 = arith.constant 0 : index
    %c0_50 = arith.constant 0 : index
    %138 = vector.load %arg10[%c0_48, %c0_49, %c0_50] : memref<2x1x32xf32, #tpu.memory_space<vmem>>, vector<1x1x32xf32>
    %139 = vector.shape_cast %138 : vector<1x1x32xf32> to vector<1x32xf32>
    %cst_51 = arith.constant dense<0.000000e+00> : vector<1x32xf32>
    %140 = tpu.matmul %139, %134, %cst_51 {dimension_numbers = #tpu.dot_dimension_numbers<[1], [0], [0], [1], [0, 0, 1, 1], [], []>} : vector<1x32xf32>, vector<32x32xf32>, vector<1x32xf32> -> vector<1x32xf32>
    %c0_52 = arith.constant 0 : index
    %c0_53 = arith.constant 0 : index
    %c0_54 = arith.constant 0 : index
    %141 = vector.load %arg16[%c0_52, %c0_53, %c0_54] : memref<2x1x32xf32, #tpu.memory_space<vmem>>, vector<1x1x32xf32>
    %142 = vector.shape_cast %141 : vector<1x1x32xf32> to vector<1x32xf32>
    %143 = arith.addf %140, %142 : vector<1x32xf32>
    %144 = arith.truncf %103 : vector<64x32xf32> to vector<64x32xbf16>
    %145 = arith.truncf %137 : vector<32x32xf32> to vector<32x32xbf16>
    %cst_55 = arith.constant dense<0.000000e+00> : vector<64x32xf32>
    %146 = tpu.matmul %144, %145, %cst_55 {dimension_numbers = #tpu.dot_dimension_numbers<[1], [0], [0], [1], [0, 0, 1, 1], [], []>} : vector<64x32xbf16>, vector<32x32xbf16>, vector<64x32xf32> -> vector<64x32xf32>
    %147 = vector.broadcast %143 : vector<1x32xf32> to vector<64x32xf32>
    %148 = arith.addf %146, %147 : vector<64x32xf32>
    %149 = vector.extract_strided_slice %102 {offsets = [64, 0], sizes = [64, 32], strides = [1, 1]} : vector<128x32xf32> to vector<64x32xf32>
    %150 = arith.truncf %149 : vector<64x32xf32> to vector<64x32xbf16>
    %c0_56 = arith.constant 0 : index
    %c0_57 = arith.constant 0 : index
    %c0_58 = arith.constant 0 : index
    %151 = vector.load %arg11[%c0_56, %c0_57, %c0_58] : memref<2x64x32xbf16, #tpu.memory_space<vmem>>, vector<1x64x32xbf16>
    %152 = vector.shape_cast %151 : vector<1x64x32xbf16> to vector<64x32xbf16>
    %153 = arith.mulf %150, %152 : vector<64x32xbf16>
    %cst_59 = arith.constant dense<0.000000e+00> : vector<4x32xf32>
    %154 = tpu.matmul %5, %153, %cst_59 {dimension_numbers = #tpu.dot_dimension_numbers<[1], [0], [0], [1], [0, 0, 1, 1], [], []>} : vector<4x64xbf16>, vector<64x32xbf16>, vector<4x32xf32> -> vector<4x32xf32>
    %155 = arith.truncf %154 : vector<4x32xf32> to vector<4x32xbf16>
    %c0_60 = arith.constant 0 : index
    %c0_61 = arith.constant 0 : index
    %c0_62 = arith.constant 0 : index
    %156 = vector.load %arg12[%c0_60, %c0_61, %c0_62] : memref<2x32x32xbf16, #tpu.memory_space<vmem>>, vector<1x32x32xbf16>
    %157 = vector.shape_cast %156 : vector<1x32x32xbf16> to vector<32x32xbf16>
    %cst_63 = arith.constant dense<0.000000e+00> : vector<4x32xf32>
    %158 = tpu.matmul %155, %157, %cst_63 {dimension_numbers = #tpu.dot_dimension_numbers<[1], [0], [0], [1], [0, 0, 1, 1], [], []>} : vector<4x32xbf16>, vector<32x32xbf16>, vector<4x32xf32> -> vector<4x32xf32>
    %c0_64 = arith.constant 0 : index
    %c0_65 = arith.constant 0 : index
    %c0_66 = arith.constant 0 : index
    %159 = vector.load %arg13[%c0_64, %c0_65, %c0_66] : memref<2x32x32xbf16, #tpu.memory_space<vmem>>, vector<1x32x32xbf16>
    %160 = vector.shape_cast %159 : vector<1x32x32xbf16> to vector<32x32xbf16>
    %cst_67 = arith.constant dense<0.000000e+00> : vector<4x32xf32>
    %161 = tpu.matmul %155, %160, %cst_67 {dimension_numbers = #tpu.dot_dimension_numbers<[1], [0], [0], [1], [0, 0, 1, 1], [], []>} : vector<4x32xbf16>, vector<32x32xbf16>, vector<4x32xf32> -> vector<4x32xf32>
    %c0_68 = arith.constant 0 : index
    %c0_69 = arith.constant 0 : index
    %c0_70 = arith.constant 0 : index
    %162 = vector.load %arg14[%c0_68, %c0_69, %c0_70] : memref<2x1x32xf32, #tpu.memory_space<vmem>>, vector<1x1x32xf32>
    %163 = vector.shape_cast %162 : vector<1x1x32xf32> to vector<1x32xf32>
    %164 = vector.broadcast %163 : vector<1x32xf32> to vector<4x32xf32>
    %165 = arith.addf %161, %164 : vector<4x32xf32>
    %cst_71 = arith.constant dense<0xFF800000> : vector<32xf32>
    %166 = vector.multi_reduction <maximumf>, %158, %cst_71 [0] : vector<4x32xf32> to vector<32xf32>
    %167 = vector.shape_cast %166 : vector<32xf32> to vector<1x32xf32>
    %168 = vector.broadcast %167 : vector<1x32xf32> to vector<4x32xf32>
    %169 = arith.subf %158, %168 : vector<4x32xf32>
    %170 = math.exp %169 : vector<4x32xf32>
    %cst_72 = arith.constant dense<0.000000e+00> : vector<32xf32>
    %171 = vector.multi_reduction <add>, %170, %cst_72 [0] : vector<4x32xf32> to vector<32xf32>
    %172 = vector.shape_cast %171 : vector<32xf32> to vector<1x32xf32>
    %173 = tpu.reciprocal %172 {approx = true} : vector<1x32xf32> -> vector<1x32xf32>
    %174 = vector.broadcast %173 : vector<1x32xf32> to vector<4x32xf32>
    %175 = arith.mulf %170, %174 : vector<4x32xf32>
    %cst_73 = arith.constant dense<0.000000e+00> : vector<32x32xf32>
    %176 = tpu.matmul %175, %165, %cst_73 {dimension_numbers = #tpu.dot_dimension_numbers<[0], [0], [1], [1], [0, 1, 1, 1], [], []>} : vector<4x32xf32>, vector<4x32xf32>, vector<32x32xf32> -> vector<32x32xf32>
    %177 = arith.mulf %176, %6 : vector<32x32xf32>
    %c0_74 = arith.constant 0 : index
    %c0_75 = arith.constant 0 : index
    %c0_76 = arith.constant 0 : index
    %178 = vector.load %arg15[%c0_74, %c0_75, %c0_76] : memref<2x32x32xf32, #tpu.memory_space<vmem>>, vector<1x32x32xf32>
    %179 = vector.shape_cast %178 : vector<1x32x32xf32> to vector<32x32xf32>
    %cst_77 = arith.constant dense<0.000000e+00> : vector<32x32xf32>
    %180 = tpu.matmul %177, %179, %cst_77 {dimension_numbers = #tpu.dot_dimension_numbers<[1], [0], [0], [1], [0, 0, 1, 1], [], []>} : vector<32x32xf32>, vector<32x32xf32>, vector<32x32xf32> -> vector<32x32xf32>
    %c0_78 = arith.constant 0 : index
    %c0_79 = arith.constant 0 : index
    %c0_80 = arith.constant 0 : index
    %181 = vector.load %arg9[%c0_78, %c0_79, %c0_80] : memref<2x32x32xf32, #tpu.memory_space<vmem>>, vector<1x32x32xf32>
    %182 = vector.shape_cast %181 : vector<1x32x32xf32> to vector<32x32xf32>
    %cst_81 = arith.constant dense<0.000000e+00> : vector<32x32xf32>
    %183 = tpu.matmul %182, %180, %cst_81 {dimension_numbers = #tpu.dot_dimension_numbers<[1], [0], [0], [1], [0, 0, 1, 1], [], []>} : vector<32x32xf32>, vector<32x32xf32>, vector<32x32xf32> -> vector<32x32xf32>
    %c0_82 = arith.constant 0 : index
    %c0_83 = arith.constant 0 : index
    %c0_84 = arith.constant 0 : index
    %184 = vector.load %arg10[%c0_82, %c0_83, %c0_84] : memref<2x1x32xf32, #tpu.memory_space<vmem>>, vector<1x1x32xf32>
    %185 = vector.shape_cast %184 : vector<1x1x32xf32> to vector<1x32xf32>
    %cst_85 = arith.constant dense<0.000000e+00> : vector<1x32xf32>
    %186 = tpu.matmul %185, %180, %cst_85 {dimension_numbers = #tpu.dot_dimension_numbers<[1], [0], [0], [1], [0, 0, 1, 1], [], []>} : vector<1x32xf32>, vector<32x32xf32>, vector<1x32xf32> -> vector<1x32xf32>
    %c0_86 = arith.constant 0 : index
    %c0_87 = arith.constant 0 : index
    %c0_88 = arith.constant 0 : index
    %187 = vector.load %arg16[%c0_86, %c0_87, %c0_88] : memref<2x1x32xf32, #tpu.memory_space<vmem>>, vector<1x1x32xf32>
    %188 = vector.shape_cast %187 : vector<1x1x32xf32> to vector<1x32xf32>
    %189 = arith.addf %186, %188 : vector<1x32xf32>
    %190 = arith.truncf %149 : vector<64x32xf32> to vector<64x32xbf16>
    %191 = arith.truncf %183 : vector<32x32xf32> to vector<32x32xbf16>
    %cst_89 = arith.constant dense<0.000000e+00> : vector<64x32xf32>
    %192 = tpu.matmul %190, %191, %cst_89 {dimension_numbers = #tpu.dot_dimension_numbers<[1], [0], [0], [1], [0, 0, 1, 1], [], []>} : vector<64x32xbf16>, vector<32x32xbf16>, vector<64x32xf32> -> vector<64x32xf32>
    %193 = vector.broadcast %189 : vector<1x32xf32> to vector<64x32xf32>
    %194 = arith.addf %192, %193 : vector<64x32xf32>
    %195 = tpu.concatenate %148, %194 in 0 : vector<64x32xf32>, vector<64x32xf32> -> vector<128x32xf32>
    %196 = arith.addf %76, %195 : vector<128x32xf32>
    %c0_90 = arith.constant 0 : index
    %c0_91 = arith.constant 0 : index
    %c0_92 = arith.constant 0 : index
    %197 = vector.load %arg17[%c0_90, %c0_91, %c0_92] : memref<2x1x32xf32, #tpu.memory_space<vmem>>, vector<1x1x32xf32>
    %198 = vector.shape_cast %197 : vector<1x1x32xf32> to vector<1x32xf32>
    %c0_93 = arith.constant 0 : index
    %c0_94 = arith.constant 0 : index
    %c0_95 = arith.constant 0 : index
    %199 = vector.load %arg18[%c0_93, %c0_94, %c0_95] : memref<2x1x32xf32, #tpu.memory_space<vmem>>, vector<1x1x32xf32>
    %200 = vector.shape_cast %199 : vector<1x1x32xf32> to vector<1x32xf32>
    %cst_96 = arith.constant dense<0.000000e+00> : vector<128xf32>
    %201 = vector.multi_reduction <add>, %196, %cst_96 [1] : vector<128x32xf32> to vector<128xf32>
    %202 = vector.shape_cast %201 : vector<128xf32> to vector<128x1xf32>
    %cst_97 = arith.constant 3.200000e+01 : f32
    %203 = vector.broadcast %cst_97 : f32 to vector<128x1xf32>
    %204 = arith.divf %202, %203 : vector<128x1xf32>
    %205 = vector.broadcast %204 : vector<128x1xf32> to vector<128x32xf32>
    %206 = arith.subf %196, %205 : vector<128x32xf32>
    %207 = arith.mulf %206, %206 : vector<128x32xf32>
    %cst_98 = arith.constant dense<0.000000e+00> : vector<128xf32>
    %208 = vector.multi_reduction <add>, %207, %cst_98 [1] : vector<128x32xf32> to vector<128xf32>
    %209 = vector.shape_cast %208 : vector<128xf32> to vector<128x1xf32>
    %cst_99 = arith.constant 3.200000e+01 : f32
    %210 = vector.broadcast %cst_99 : f32 to vector<128x1xf32>
    %211 = arith.divf %209, %210 : vector<128x1xf32>
    %212 = vector.broadcast %204 : vector<128x1xf32> to vector<128x32xf32>
    %213 = arith.subf %196, %212 : vector<128x32xf32>
    %cst_100 = arith.constant 9.99999974E-6 : f32
    %214 = vector.broadcast %cst_100 : f32 to vector<128x1xf32>
    %215 = arith.addf %211, %214 : vector<128x1xf32>
    %216 = math.rsqrt %215 : vector<128x1xf32>
    %217 = vector.broadcast %216 : vector<128x1xf32> to vector<128x32xf32>
    %218 = arith.mulf %213, %217 : vector<128x32xf32>
    %219 = vector.broadcast %198 : vector<1x32xf32> to vector<128x32xf32>
    %220 = arith.mulf %218, %219 : vector<128x32xf32>
    %221 = vector.broadcast %200 : vector<1x32xf32> to vector<128x32xf32>
    %222 = arith.addf %220, %221 : vector<128x32xf32>
    %223 = arith.truncf %222 : vector<128x32xf32> to vector<128x32xbf16>
    %c0_101 = arith.constant 0 : index
    %c0_102 = arith.constant 0 : index
    %c0_103 = arith.constant 0 : index
    %224 = vector.load %arg19[%c0_101, %c0_102, %c0_103] : memref<2x32x128xbf16, #tpu.memory_space<vmem>>, vector<1x32x128xbf16>
    %225 = vector.shape_cast %224 : vector<1x32x128xbf16> to vector<32x128xbf16>
    %cst_104 = arith.constant dense<0.000000e+00> : vector<128x128xf32>
    %226 = tpu.matmul %223, %225, %cst_104 {dimension_numbers = #tpu.dot_dimension_numbers<[1], [0], [0], [1], [0, 0, 1, 1], [], []>} : vector<128x32xbf16>, vector<32x128xbf16>, vector<128x128xf32> -> vector<128x128xf32>
    %c0_105 = arith.constant 0 : index
    %c0_106 = arith.constant 0 : index
    %c0_107 = arith.constant 0 : index
    %227 = vector.load %arg20[%c0_105, %c0_106, %c0_107] : memref<2x1x128xf32, #tpu.memory_space<vmem>>, vector<1x1x128xf32>
    %228 = vector.shape_cast %227 : vector<1x1x128xf32> to vector<1x128xf32>
    %229 = vector.broadcast %228 : vector<1x128xf32> to vector<128x128xf32>
    %230 = arith.addf %226, %229 : vector<128x128xf32>
    %cst_108 = arith.constant 5.000000e-01 : f32
    %231 = vector.broadcast %cst_108 : f32 to vector<128x128xf32>
    %232 = arith.mulf %231, %230 : vector<128x128xf32>
    %cst_109 = arith.constant 4.471500e-02 : f32
    %233 = vector.broadcast %cst_109 : f32 to vector<128x128xf32>
    %234 = arith.mulf %233, %230 : vector<128x128xf32>
    %235 = arith.mulf %234, %230 : vector<128x128xf32>
    %236 = arith.mulf %235, %230 : vector<128x128xf32>
    %237 = arith.addf %230, %236 : vector<128x128xf32>
    %cst_110 = arith.constant 0.797884583 : f32
    %238 = vector.broadcast %cst_110 : f32 to vector<128x128xf32>
    %239 = arith.mulf %238, %237 : vector<128x128xf32>
    %240 = math.tanh %239 : vector<128x128xf32>
    %cst_111 = arith.constant 1.000000e+00 : f32
    %241 = vector.broadcast %cst_111 : f32 to vector<128x128xf32>
    %242 = arith.addf %241, %240 : vector<128x128xf32>
    %243 = arith.mulf %232, %242 : vector<128x128xf32>
    %244 = arith.truncf %243 : vector<128x128xf32> to vector<128x128xbf16>
    %c0_112 = arith.constant 0 : index
    %c0_113 = arith.constant 0 : index
    %c0_114 = arith.constant 0 : index
    %245 = vector.load %arg21[%c0_112, %c0_113, %c0_114] : memref<2x128x32xbf16, #tpu.memory_space<vmem>>, vector<1x128x32xbf16>
    %246 = vector.shape_cast %245 : vector<1x128x32xbf16> to vector<128x32xbf16>
    %cst_115 = arith.constant dense<0.000000e+00> : vector<128x32xf32>
    %247 = tpu.matmul %244, %246, %cst_115 {dimension_numbers = #tpu.dot_dimension_numbers<[1], [0], [0], [1], [0, 0, 1, 1], [], []>} : vector<128x128xbf16>, vector<128x32xbf16>, vector<128x32xf32> -> vector<128x32xf32>
    %c0_116 = arith.constant 0 : index
    %c0_117 = arith.constant 0 : index
    %c0_118 = arith.constant 0 : index
    %248 = vector.load %arg22[%c0_116, %c0_117, %c0_118] : memref<2x1x32xf32, #tpu.memory_space<vmem>>, vector<1x1x32xf32>
    %249 = vector.shape_cast %248 : vector<1x1x32xf32> to vector<1x32xf32>
    %250 = vector.broadcast %249 : vector<1x32xf32> to vector<128x32xf32>
    %251 = arith.addf %247, %250 : vector<128x32xf32>
    %252 = arith.addf %196, %251 : vector<128x32xf32>
    %253 = vector.extract_strided_slice %2 {offsets = [4, 0], sizes = [1, 32], strides = [1, 1]} : vector<9x32xf32> to vector<1x32xf32>
    %254 = vector.broadcast %253 : vector<1x32xf32> to vector<128x32xf32>
    %255 = arith.mulf %252, %254 : vector<128x32xf32>
    %c9_i32_119 = arith.constant 9 : i32
    %256 = tpu.dynamic_rotate %252 by %c9_i32_119 dim 0 : vector<128x32xf32>, i32 -> vector<128x32xf32>
    %257 = vector.extract_strided_slice %2 {offsets = [0, 0], sizes = [1, 32], strides = [1, 1]} : vector<9x32xf32> to vector<1x32xf32>
    %258 = vector.broadcast %257 : vector<1x32xf32> to vector<128x32xf32>
    %259 = arith.mulf %256, %258 : vector<128x32xf32>
    %260 = vector.extract_strided_slice %4 {offsets = [0, 0], sizes = [128, 1], strides = [1, 1]} : vector<128x9xf32> to vector<128x1xf32>
    %261 = vector.broadcast %260 : vector<128x1xf32> to vector<128x32xf32>
    %262 = arith.mulf %259, %261 : vector<128x32xf32>
    %263 = arith.addf %255, %262 : vector<128x32xf32>
    %c8_i32_120 = arith.constant 8 : i32
    %264 = tpu.dynamic_rotate %252 by %c8_i32_120 dim 0 : vector<128x32xf32>, i32 -> vector<128x32xf32>
    %265 = vector.extract_strided_slice %2 {offsets = [1, 0], sizes = [1, 32], strides = [1, 1]} : vector<9x32xf32> to vector<1x32xf32>
    %266 = vector.broadcast %265 : vector<1x32xf32> to vector<128x32xf32>
    %267 = arith.mulf %264, %266 : vector<128x32xf32>
    %268 = vector.extract_strided_slice %4 {offsets = [0, 1], sizes = [128, 1], strides = [1, 1]} : vector<128x9xf32> to vector<128x1xf32>
    %269 = vector.broadcast %268 : vector<128x1xf32> to vector<128x32xf32>
    %270 = arith.mulf %267, %269 : vector<128x32xf32>
    %271 = arith.addf %263, %270 : vector<128x32xf32>
    %c7_i32_121 = arith.constant 7 : i32
    %272 = tpu.dynamic_rotate %252 by %c7_i32_121 dim 0 : vector<128x32xf32>, i32 -> vector<128x32xf32>
    %273 = vector.extract_strided_slice %2 {offsets = [2, 0], sizes = [1, 32], strides = [1, 1]} : vector<9x32xf32> to vector<1x32xf32>
    %274 = vector.broadcast %273 : vector<1x32xf32> to vector<128x32xf32>
    %275 = arith.mulf %272, %274 : vector<128x32xf32>
    %276 = vector.extract_strided_slice %4 {offsets = [0, 2], sizes = [128, 1], strides = [1, 1]} : vector<128x9xf32> to vector<128x1xf32>
    %277 = vector.broadcast %276 : vector<128x1xf32> to vector<128x32xf32>
    %278 = arith.mulf %275, %277 : vector<128x32xf32>
    %279 = arith.addf %271, %278 : vector<128x32xf32>
    %c1_i32_122 = arith.constant 1 : i32
    %280 = tpu.dynamic_rotate %252 by %c1_i32_122 dim 0 : vector<128x32xf32>, i32 -> vector<128x32xf32>
    %281 = vector.extract_strided_slice %2 {offsets = [3, 0], sizes = [1, 32], strides = [1, 1]} : vector<9x32xf32> to vector<1x32xf32>
    %282 = vector.broadcast %281 : vector<1x32xf32> to vector<128x32xf32>
    %283 = arith.mulf %280, %282 : vector<128x32xf32>
    %284 = vector.extract_strided_slice %4 {offsets = [0, 3], sizes = [128, 1], strides = [1, 1]} : vector<128x9xf32> to vector<128x1xf32>
    %285 = vector.broadcast %284 : vector<128x1xf32> to vector<128x32xf32>
    %286 = arith.mulf %283, %285 : vector<128x32xf32>
    %287 = arith.addf %279, %286 : vector<128x32xf32>
    %c127_i32_123 = arith.constant 127 : i32
    %288 = tpu.dynamic_rotate %252 by %c127_i32_123 dim 0 : vector<128x32xf32>, i32 -> vector<128x32xf32>
    %289 = vector.extract_strided_slice %2 {offsets = [5, 0], sizes = [1, 32], strides = [1, 1]} : vector<9x32xf32> to vector<1x32xf32>
    %290 = vector.broadcast %289 : vector<1x32xf32> to vector<128x32xf32>
    %291 = arith.mulf %288, %290 : vector<128x32xf32>
    %292 = vector.extract_strided_slice %4 {offsets = [0, 5], sizes = [128, 1], strides = [1, 1]} : vector<128x9xf32> to vector<128x1xf32>
    %293 = vector.broadcast %292 : vector<128x1xf32> to vector<128x32xf32>
    %294 = arith.mulf %291, %293 : vector<128x32xf32>
    %295 = arith.addf %287, %294 : vector<128x32xf32>
    %c121_i32_124 = arith.constant 121 : i32
    %296 = tpu.dynamic_rotate %252 by %c121_i32_124 dim 0 : vector<128x32xf32>, i32 -> vector<128x32xf32>
    %297 = vector.extract_strided_slice %2 {offsets = [6, 0], sizes = [1, 32], strides = [1, 1]} : vector<9x32xf32> to vector<1x32xf32>
    %298 = vector.broadcast %297 : vector<1x32xf32> to vector<128x32xf32>
    %299 = arith.mulf %296, %298 : vector<128x32xf32>
    %300 = vector.extract_strided_slice %4 {offsets = [0, 6], sizes = [128, 1], strides = [1, 1]} : vector<128x9xf32> to vector<128x1xf32>
    %301 = vector.broadcast %300 : vector<128x1xf32> to vector<128x32xf32>
    %302 = arith.mulf %299, %301 : vector<128x32xf32>
    %303 = arith.addf %295, %302 : vector<128x32xf32>
    %c120_i32_125 = arith.constant 120 : i32
    %304 = tpu.dynamic_rotate %252 by %c120_i32_125 dim 0 : vector<128x32xf32>, i32 -> vector<128x32xf32>
    %305 = vector.extract_strided_slice %2 {offsets = [7, 0], sizes = [1, 32], strides = [1, 1]} : vector<9x32xf32> to vector<1x32xf32>
    %306 = vector.broadcast %305 : vector<1x32xf32> to vector<128x32xf32>
    %307 = arith.mulf %304, %306 : vector<128x32xf32>
    %308 = vector.extract_strided_slice %4 {offsets = [0, 7], sizes = [128, 1], strides = [1, 1]} : vector<128x9xf32> to vector<128x1xf32>
    %309 = vector.broadcast %308 : vector<128x1xf32> to vector<128x32xf32>
    %310 = arith.mulf %307, %309 : vector<128x32xf32>
    %311 = arith.addf %303, %310 : vector<128x32xf32>
    %c119_i32_126 = arith.constant 119 : i32
    %312 = tpu.dynamic_rotate %252 by %c119_i32_126 dim 0 : vector<128x32xf32>, i32 -> vector<128x32xf32>
    %313 = vector.extract_strided_slice %2 {offsets = [8, 0], sizes = [1, 32], strides = [1, 1]} : vector<9x32xf32> to vector<1x32xf32>
    %314 = vector.broadcast %313 : vector<1x32xf32> to vector<128x32xf32>
    %315 = arith.mulf %312, %314 : vector<128x32xf32>
    %316 = vector.extract_strided_slice %4 {offsets = [0, 8], sizes = [128, 1], strides = [1, 1]} : vector<128x9xf32> to vector<128x1xf32>
    %317 = vector.broadcast %316 : vector<128x1xf32> to vector<128x32xf32>
    %318 = arith.mulf %315, %317 : vector<128x32xf32>
    %319 = arith.addf %311, %318 : vector<128x32xf32>
    %320 = arith.addf %252, %319 : vector<128x32xf32>
    %321 = vector.broadcast %3 : vector<1x32xf32> to vector<128x32xf32>
    %322 = arith.addf %320, %321 : vector<128x32xf32>
    %c1 = arith.constant 1 : index
    %c0_127 = arith.constant 0 : index
    %c0_128 = arith.constant 0 : index
    %323 = vector.load %arg7[%c1, %c0_127, %c0_128] : memref<2x1x32xf32, #tpu.memory_space<vmem>>, vector<1x1x32xf32>
    %324 = vector.shape_cast %323 : vector<1x1x32xf32> to vector<1x32xf32>
    %c1_129 = arith.constant 1 : index
    %c0_130 = arith.constant 0 : index
    %c0_131 = arith.constant 0 : index
    %325 = vector.load %arg8[%c1_129, %c0_130, %c0_131] : memref<2x1x32xf32, #tpu.memory_space<vmem>>, vector<1x1x32xf32>
    %326 = vector.shape_cast %325 : vector<1x1x32xf32> to vector<1x32xf32>
    %cst_132 = arith.constant dense<0.000000e+00> : vector<128xf32>
    %327 = vector.multi_reduction <add>, %322, %cst_132 [1] : vector<128x32xf32> to vector<128xf32>
    %328 = vector.shape_cast %327 : vector<128xf32> to vector<128x1xf32>
    %cst_133 = arith.constant 3.200000e+01 : f32
    %329 = vector.broadcast %cst_133 : f32 to vector<128x1xf32>
    %330 = arith.divf %328, %329 : vector<128x1xf32>
    %331 = vector.broadcast %330 : vector<128x1xf32> to vector<128x32xf32>
    %332 = arith.subf %322, %331 : vector<128x32xf32>
    %333 = arith.mulf %332, %332 : vector<128x32xf32>
    %cst_134 = arith.constant dense<0.000000e+00> : vector<128xf32>
    %334 = vector.multi_reduction <add>, %333, %cst_134 [1] : vector<128x32xf32> to vector<128xf32>
    %335 = vector.shape_cast %334 : vector<128xf32> to vector<128x1xf32>
    %cst_135 = arith.constant 3.200000e+01 : f32
    %336 = vector.broadcast %cst_135 : f32 to vector<128x1xf32>
    %337 = arith.divf %335, %336 : vector<128x1xf32>
    %338 = vector.broadcast %330 : vector<128x1xf32> to vector<128x32xf32>
    %339 = arith.subf %322, %338 : vector<128x32xf32>
    %cst_136 = arith.constant 9.99999974E-6 : f32
    %340 = vector.broadcast %cst_136 : f32 to vector<128x1xf32>
    %341 = arith.addf %337, %340 : vector<128x1xf32>
    %342 = math.rsqrt %341 : vector<128x1xf32>
    %343 = vector.broadcast %342 : vector<128x1xf32> to vector<128x32xf32>
    %344 = arith.mulf %339, %343 : vector<128x32xf32>
    %345 = vector.broadcast %324 : vector<1x32xf32> to vector<128x32xf32>
    %346 = arith.mulf %344, %345 : vector<128x32xf32>
    %347 = vector.broadcast %326 : vector<1x32xf32> to vector<128x32xf32>
    %348 = arith.addf %346, %347 : vector<128x32xf32>
    %349 = vector.extract_strided_slice %348 {offsets = [0, 0], sizes = [64, 32], strides = [1, 1]} : vector<128x32xf32> to vector<64x32xf32>
    %350 = arith.truncf %349 : vector<64x32xf32> to vector<64x32xbf16>
    %c1_137 = arith.constant 1 : index
    %c0_138 = arith.constant 0 : index
    %c0_139 = arith.constant 0 : index
    %351 = vector.load %arg11[%c1_137, %c0_138, %c0_139] : memref<2x64x32xbf16, #tpu.memory_space<vmem>>, vector<1x64x32xbf16>
    %352 = vector.shape_cast %351 : vector<1x64x32xbf16> to vector<64x32xbf16>
    %353 = arith.mulf %350, %352 : vector<64x32xbf16>
    %cst_140 = arith.constant dense<0.000000e+00> : vector<4x32xf32>
    %354 = tpu.matmul %5, %353, %cst_140 {dimension_numbers = #tpu.dot_dimension_numbers<[1], [0], [0], [1], [0, 0, 1, 1], [], []>} : vector<4x64xbf16>, vector<64x32xbf16>, vector<4x32xf32> -> vector<4x32xf32>
    %355 = arith.truncf %354 : vector<4x32xf32> to vector<4x32xbf16>
    %c1_141 = arith.constant 1 : index
    %c0_142 = arith.constant 0 : index
    %c0_143 = arith.constant 0 : index
    %356 = vector.load %arg12[%c1_141, %c0_142, %c0_143] : memref<2x32x32xbf16, #tpu.memory_space<vmem>>, vector<1x32x32xbf16>
    %357 = vector.shape_cast %356 : vector<1x32x32xbf16> to vector<32x32xbf16>
    %cst_144 = arith.constant dense<0.000000e+00> : vector<4x32xf32>
    %358 = tpu.matmul %355, %357, %cst_144 {dimension_numbers = #tpu.dot_dimension_numbers<[1], [0], [0], [1], [0, 0, 1, 1], [], []>} : vector<4x32xbf16>, vector<32x32xbf16>, vector<4x32xf32> -> vector<4x32xf32>
    %c1_145 = arith.constant 1 : index
    %c0_146 = arith.constant 0 : index
    %c0_147 = arith.constant 0 : index
    %359 = vector.load %arg13[%c1_145, %c0_146, %c0_147] : memref<2x32x32xbf16, #tpu.memory_space<vmem>>, vector<1x32x32xbf16>
    %360 = vector.shape_cast %359 : vector<1x32x32xbf16> to vector<32x32xbf16>
    %cst_148 = arith.constant dense<0.000000e+00> : vector<4x32xf32>
    %361 = tpu.matmul %355, %360, %cst_148 {dimension_numbers = #tpu.dot_dimension_numbers<[1], [0], [0], [1], [0, 0, 1, 1], [], []>} : vector<4x32xbf16>, vector<32x32xbf16>, vector<4x32xf32> -> vector<4x32xf32>
    %c1_149 = arith.constant 1 : index
    %c0_150 = arith.constant 0 : index
    %c0_151 = arith.constant 0 : index
    %362 = vector.load %arg14[%c1_149, %c0_150, %c0_151] : memref<2x1x32xf32, #tpu.memory_space<vmem>>, vector<1x1x32xf32>
    %363 = vector.shape_cast %362 : vector<1x1x32xf32> to vector<1x32xf32>
    %364 = vector.broadcast %363 : vector<1x32xf32> to vector<4x32xf32>
    %365 = arith.addf %361, %364 : vector<4x32xf32>
    %cst_152 = arith.constant dense<0xFF800000> : vector<32xf32>
    %366 = vector.multi_reduction <maximumf>, %358, %cst_152 [0] : vector<4x32xf32> to vector<32xf32>
    %367 = vector.shape_cast %366 : vector<32xf32> to vector<1x32xf32>
    %368 = vector.broadcast %367 : vector<1x32xf32> to vector<4x32xf32>
    %369 = arith.subf %358, %368 : vector<4x32xf32>
    %370 = math.exp %369 : vector<4x32xf32>
    %cst_153 = arith.constant dense<0.000000e+00> : vector<32xf32>
    %371 = vector.multi_reduction <add>, %370, %cst_153 [0] : vector<4x32xf32> to vector<32xf32>
    %372 = vector.shape_cast %371 : vector<32xf32> to vector<1x32xf32>
    %373 = tpu.reciprocal %372 {approx = true} : vector<1x32xf32> -> vector<1x32xf32>
    %374 = vector.broadcast %373 : vector<1x32xf32> to vector<4x32xf32>
    %375 = arith.mulf %370, %374 : vector<4x32xf32>
    %cst_154 = arith.constant dense<0.000000e+00> : vector<32x32xf32>
    %376 = tpu.matmul %375, %365, %cst_154 {dimension_numbers = #tpu.dot_dimension_numbers<[0], [0], [1], [1], [0, 1, 1, 1], [], []>} : vector<4x32xf32>, vector<4x32xf32>, vector<32x32xf32> -> vector<32x32xf32>
    %377 = arith.mulf %376, %6 : vector<32x32xf32>
    %c1_155 = arith.constant 1 : index
    %c0_156 = arith.constant 0 : index
    %c0_157 = arith.constant 0 : index
    %378 = vector.load %arg15[%c1_155, %c0_156, %c0_157] : memref<2x32x32xf32, #tpu.memory_space<vmem>>, vector<1x32x32xf32>
    %379 = vector.shape_cast %378 : vector<1x32x32xf32> to vector<32x32xf32>
    %cst_158 = arith.constant dense<0.000000e+00> : vector<32x32xf32>
    %380 = tpu.matmul %377, %379, %cst_158 {dimension_numbers = #tpu.dot_dimension_numbers<[1], [0], [0], [1], [0, 0, 1, 1], [], []>} : vector<32x32xf32>, vector<32x32xf32>, vector<32x32xf32> -> vector<32x32xf32>
    %c1_159 = arith.constant 1 : index
    %c0_160 = arith.constant 0 : index
    %c0_161 = arith.constant 0 : index
    %381 = vector.load %arg9[%c1_159, %c0_160, %c0_161] : memref<2x32x32xf32, #tpu.memory_space<vmem>>, vector<1x32x32xf32>
    %382 = vector.shape_cast %381 : vector<1x32x32xf32> to vector<32x32xf32>
    %cst_162 = arith.constant dense<0.000000e+00> : vector<32x32xf32>
    %383 = tpu.matmul %382, %380, %cst_162 {dimension_numbers = #tpu.dot_dimension_numbers<[1], [0], [0], [1], [0, 0, 1, 1], [], []>} : vector<32x32xf32>, vector<32x32xf32>, vector<32x32xf32> -> vector<32x32xf32>
    %c1_163 = arith.constant 1 : index
    %c0_164 = arith.constant 0 : index
    %c0_165 = arith.constant 0 : index
    %384 = vector.load %arg10[%c1_163, %c0_164, %c0_165] : memref<2x1x32xf32, #tpu.memory_space<vmem>>, vector<1x1x32xf32>
    %385 = vector.shape_cast %384 : vector<1x1x32xf32> to vector<1x32xf32>
    %cst_166 = arith.constant dense<0.000000e+00> : vector<1x32xf32>
    %386 = tpu.matmul %385, %380, %cst_166 {dimension_numbers = #tpu.dot_dimension_numbers<[1], [0], [0], [1], [0, 0, 1, 1], [], []>} : vector<1x32xf32>, vector<32x32xf32>, vector<1x32xf32> -> vector<1x32xf32>
    %c1_167 = arith.constant 1 : index
    %c0_168 = arith.constant 0 : index
    %c0_169 = arith.constant 0 : index
    %387 = vector.load %arg16[%c1_167, %c0_168, %c0_169] : memref<2x1x32xf32, #tpu.memory_space<vmem>>, vector<1x1x32xf32>
    %388 = vector.shape_cast %387 : vector<1x1x32xf32> to vector<1x32xf32>
    %389 = arith.addf %386, %388 : vector<1x32xf32>
    %390 = arith.truncf %349 : vector<64x32xf32> to vector<64x32xbf16>
    %391 = arith.truncf %383 : vector<32x32xf32> to vector<32x32xbf16>
    %cst_170 = arith.constant dense<0.000000e+00> : vector<64x32xf32>
    %392 = tpu.matmul %390, %391, %cst_170 {dimension_numbers = #tpu.dot_dimension_numbers<[1], [0], [0], [1], [0, 0, 1, 1], [], []>} : vector<64x32xbf16>, vector<32x32xbf16>, vector<64x32xf32> -> vector<64x32xf32>
    %393 = vector.broadcast %389 : vector<1x32xf32> to vector<64x32xf32>
    %394 = arith.addf %392, %393 : vector<64x32xf32>
    %395 = vector.extract_strided_slice %348 {offsets = [64, 0], sizes = [64, 32], strides = [1, 1]} : vector<128x32xf32> to vector<64x32xf32>
    %396 = arith.truncf %395 : vector<64x32xf32> to vector<64x32xbf16>
    %c1_171 = arith.constant 1 : index
    %c0_172 = arith.constant 0 : index
    %c0_173 = arith.constant 0 : index
    %397 = vector.load %arg11[%c1_171, %c0_172, %c0_173] : memref<2x64x32xbf16, #tpu.memory_space<vmem>>, vector<1x64x32xbf16>
    %398 = vector.shape_cast %397 : vector<1x64x32xbf16> to vector<64x32xbf16>
    %399 = arith.mulf %396, %398 : vector<64x32xbf16>
    %cst_174 = arith.constant dense<0.000000e+00> : vector<4x32xf32>
    %400 = tpu.matmul %5, %399, %cst_174 {dimension_numbers = #tpu.dot_dimension_numbers<[1], [0], [0], [1], [0, 0, 1, 1], [], []>} : vector<4x64xbf16>, vector<64x32xbf16>, vector<4x32xf32> -> vector<4x32xf32>
    %401 = arith.truncf %400 : vector<4x32xf32> to vector<4x32xbf16>
    %c1_175 = arith.constant 1 : index
    %c0_176 = arith.constant 0 : index
    %c0_177 = arith.constant 0 : index
    %402 = vector.load %arg12[%c1_175, %c0_176, %c0_177] : memref<2x32x32xbf16, #tpu.memory_space<vmem>>, vector<1x32x32xbf16>
    %403 = vector.shape_cast %402 : vector<1x32x32xbf16> to vector<32x32xbf16>
    %cst_178 = arith.constant dense<0.000000e+00> : vector<4x32xf32>
    %404 = tpu.matmul %401, %403, %cst_178 {dimension_numbers = #tpu.dot_dimension_numbers<[1], [0], [0], [1], [0, 0, 1, 1], [], []>} : vector<4x32xbf16>, vector<32x32xbf16>, vector<4x32xf32> -> vector<4x32xf32>
    %c1_179 = arith.constant 1 : index
    %c0_180 = arith.constant 0 : index
    %c0_181 = arith.constant 0 : index
    %405 = vector.load %arg13[%c1_179, %c0_180, %c0_181] : memref<2x32x32xbf16, #tpu.memory_space<vmem>>, vector<1x32x32xbf16>
    %406 = vector.shape_cast %405 : vector<1x32x32xbf16> to vector<32x32xbf16>
    %cst_182 = arith.constant dense<0.000000e+00> : vector<4x32xf32>
    %407 = tpu.matmul %401, %406, %cst_182 {dimension_numbers = #tpu.dot_dimension_numbers<[1], [0], [0], [1], [0, 0, 1, 1], [], []>} : vector<4x32xbf16>, vector<32x32xbf16>, vector<4x32xf32> -> vector<4x32xf32>
    %c1_183 = arith.constant 1 : index
    %c0_184 = arith.constant 0 : index
    %c0_185 = arith.constant 0 : index
    %408 = vector.load %arg14[%c1_183, %c0_184, %c0_185] : memref<2x1x32xf32, #tpu.memory_space<vmem>>, vector<1x1x32xf32>
    %409 = vector.shape_cast %408 : vector<1x1x32xf32> to vector<1x32xf32>
    %410 = vector.broadcast %409 : vector<1x32xf32> to vector<4x32xf32>
    %411 = arith.addf %407, %410 : vector<4x32xf32>
    %cst_186 = arith.constant dense<0xFF800000> : vector<32xf32>
    %412 = vector.multi_reduction <maximumf>, %404, %cst_186 [0] : vector<4x32xf32> to vector<32xf32>
    %413 = vector.shape_cast %412 : vector<32xf32> to vector<1x32xf32>
    %414 = vector.broadcast %413 : vector<1x32xf32> to vector<4x32xf32>
    %415 = arith.subf %404, %414 : vector<4x32xf32>
    %416 = math.exp %415 : vector<4x32xf32>
    %cst_187 = arith.constant dense<0.000000e+00> : vector<32xf32>
    %417 = vector.multi_reduction <add>, %416, %cst_187 [0] : vector<4x32xf32> to vector<32xf32>
    %418 = vector.shape_cast %417 : vector<32xf32> to vector<1x32xf32>
    %419 = tpu.reciprocal %418 {approx = true} : vector<1x32xf32> -> vector<1x32xf32>
    %420 = vector.broadcast %419 : vector<1x32xf32> to vector<4x32xf32>
    %421 = arith.mulf %416, %420 : vector<4x32xf32>
    %cst_188 = arith.constant dense<0.000000e+00> : vector<32x32xf32>
    %422 = tpu.matmul %421, %411, %cst_188 {dimension_numbers = #tpu.dot_dimension_numbers<[0], [0], [1], [1], [0, 1, 1, 1], [], []>} : vector<4x32xf32>, vector<4x32xf32>, vector<32x32xf32> -> vector<32x32xf32>
    %423 = arith.mulf %422, %6 : vector<32x32xf32>
    %c1_189 = arith.constant 1 : index
    %c0_190 = arith.constant 0 : index
    %c0_191 = arith.constant 0 : index
    %424 = vector.load %arg15[%c1_189, %c0_190, %c0_191] : memref<2x32x32xf32, #tpu.memory_space<vmem>>, vector<1x32x32xf32>
    %425 = vector.shape_cast %424 : vector<1x32x32xf32> to vector<32x32xf32>
    %cst_192 = arith.constant dense<0.000000e+00> : vector<32x32xf32>
    %426 = tpu.matmul %423, %425, %cst_192 {dimension_numbers = #tpu.dot_dimension_numbers<[1], [0], [0], [1], [0, 0, 1, 1], [], []>} : vector<32x32xf32>, vector<32x32xf32>, vector<32x32xf32> -> vector<32x32xf32>
    %c1_193 = arith.constant 1 : index
    %c0_194 = arith.constant 0 : index
    %c0_195 = arith.constant 0 : index
    %427 = vector.load %arg9[%c1_193, %c0_194, %c0_195] : memref<2x32x32xf32, #tpu.memory_space<vmem>>, vector<1x32x32xf32>
    %428 = vector.shape_cast %427 : vector<1x32x32xf32> to vector<32x32xf32>
    %cst_196 = arith.constant dense<0.000000e+00> : vector<32x32xf32>
    %429 = tpu.matmul %428, %426, %cst_196 {dimension_numbers = #tpu.dot_dimension_numbers<[1], [0], [0], [1], [0, 0, 1, 1], [], []>} : vector<32x32xf32>, vector<32x32xf32>, vector<32x32xf32> -> vector<32x32xf32>
    %c1_197 = arith.constant 1 : index
    %c0_198 = arith.constant 0 : index
    %c0_199 = arith.constant 0 : index
    %430 = vector.load %arg10[%c1_197, %c0_198, %c0_199] : memref<2x1x32xf32, #tpu.memory_space<vmem>>, vector<1x1x32xf32>
    %431 = vector.shape_cast %430 : vector<1x1x32xf32> to vector<1x32xf32>
    %cst_200 = arith.constant dense<0.000000e+00> : vector<1x32xf32>
    %432 = tpu.matmul %431, %426, %cst_200 {dimension_numbers = #tpu.dot_dimension_numbers<[1], [0], [0], [1], [0, 0, 1, 1], [], []>} : vector<1x32xf32>, vector<32x32xf32>, vector<1x32xf32> -> vector<1x32xf32>
    %c1_201 = arith.constant 1 : index
    %c0_202 = arith.constant 0 : index
    %c0_203 = arith.constant 0 : index
    %433 = vector.load %arg16[%c1_201, %c0_202, %c0_203] : memref<2x1x32xf32, #tpu.memory_space<vmem>>, vector<1x1x32xf32>
    %434 = vector.shape_cast %433 : vector<1x1x32xf32> to vector<1x32xf32>
    %435 = arith.addf %432, %434 : vector<1x32xf32>
    %436 = arith.truncf %395 : vector<64x32xf32> to vector<64x32xbf16>
    %437 = arith.truncf %429 : vector<32x32xf32> to vector<32x32xbf16>
    %cst_204 = arith.constant dense<0.000000e+00> : vector<64x32xf32>
    %438 = tpu.matmul %436, %437, %cst_204 {dimension_numbers = #tpu.dot_dimension_numbers<[1], [0], [0], [1], [0, 0, 1, 1], [], []>} : vector<64x32xbf16>, vector<32x32xbf16>, vector<64x32xf32> -> vector<64x32xf32>
    %439 = vector.broadcast %435 : vector<1x32xf32> to vector<64x32xf32>
    %440 = arith.addf %438, %439 : vector<64x32xf32>
    %441 = tpu.concatenate %394, %440 in 0 : vector<64x32xf32>, vector<64x32xf32> -> vector<128x32xf32>
    %442 = arith.addf %322, %441 : vector<128x32xf32>
    %c1_205 = arith.constant 1 : index
    %c0_206 = arith.constant 0 : index
    %c0_207 = arith.constant 0 : index
    %443 = vector.load %arg17[%c1_205, %c0_206, %c0_207] : memref<2x1x32xf32, #tpu.memory_space<vmem>>, vector<1x1x32xf32>
    %444 = vector.shape_cast %443 : vector<1x1x32xf32> to vector<1x32xf32>
    %c1_208 = arith.constant 1 : index
    %c0_209 = arith.constant 0 : index
    %c0_210 = arith.constant 0 : index
    %445 = vector.load %arg18[%c1_208, %c0_209, %c0_210] : memref<2x1x32xf32, #tpu.memory_space<vmem>>, vector<1x1x32xf32>
    %446 = vector.shape_cast %445 : vector<1x1x32xf32> to vector<1x32xf32>
    %cst_211 = arith.constant dense<0.000000e+00> : vector<128xf32>
    %447 = vector.multi_reduction <add>, %442, %cst_211 [1] : vector<128x32xf32> to vector<128xf32>
    %448 = vector.shape_cast %447 : vector<128xf32> to vector<128x1xf32>
    %cst_212 = arith.constant 3.200000e+01 : f32
    %449 = vector.broadcast %cst_212 : f32 to vector<128x1xf32>
    %450 = arith.divf %448, %449 : vector<128x1xf32>
    %451 = vector.broadcast %450 : vector<128x1xf32> to vector<128x32xf32>
    %452 = arith.subf %442, %451 : vector<128x32xf32>
    %453 = arith.mulf %452, %452 : vector<128x32xf32>
    %cst_213 = arith.constant dense<0.000000e+00> : vector<128xf32>
    %454 = vector.multi_reduction <add>, %453, %cst_213 [1] : vector<128x32xf32> to vector<128xf32>
    %455 = vector.shape_cast %454 : vector<128xf32> to vector<128x1xf32>
    %cst_214 = arith.constant 3.200000e+01 : f32
    %456 = vector.broadcast %cst_214 : f32 to vector<128x1xf32>
    %457 = arith.divf %455, %456 : vector<128x1xf32>
    %458 = vector.broadcast %450 : vector<128x1xf32> to vector<128x32xf32>
    %459 = arith.subf %442, %458 : vector<128x32xf32>
    %cst_215 = arith.constant 9.99999974E-6 : f32
    %460 = vector.broadcast %cst_215 : f32 to vector<128x1xf32>
    %461 = arith.addf %457, %460 : vector<128x1xf32>
    %462 = math.rsqrt %461 : vector<128x1xf32>
    %463 = vector.broadcast %462 : vector<128x1xf32> to vector<128x32xf32>
    %464 = arith.mulf %459, %463 : vector<128x32xf32>
    %465 = vector.broadcast %444 : vector<1x32xf32> to vector<128x32xf32>
    %466 = arith.mulf %464, %465 : vector<128x32xf32>
    %467 = vector.broadcast %446 : vector<1x32xf32> to vector<128x32xf32>
    %468 = arith.addf %466, %467 : vector<128x32xf32>
    %469 = arith.truncf %468 : vector<128x32xf32> to vector<128x32xbf16>
    %c1_216 = arith.constant 1 : index
    %c0_217 = arith.constant 0 : index
    %c0_218 = arith.constant 0 : index
    %470 = vector.load %arg19[%c1_216, %c0_217, %c0_218] : memref<2x32x128xbf16, #tpu.memory_space<vmem>>, vector<1x32x128xbf16>
    %471 = vector.shape_cast %470 : vector<1x32x128xbf16> to vector<32x128xbf16>
    %cst_219 = arith.constant dense<0.000000e+00> : vector<128x128xf32>
    %472 = tpu.matmul %469, %471, %cst_219 {dimension_numbers = #tpu.dot_dimension_numbers<[1], [0], [0], [1], [0, 0, 1, 1], [], []>} : vector<128x32xbf16>, vector<32x128xbf16>, vector<128x128xf32> -> vector<128x128xf32>
    %c1_220 = arith.constant 1 : index
    %c0_221 = arith.constant 0 : index
    %c0_222 = arith.constant 0 : index
    %473 = vector.load %arg20[%c1_220, %c0_221, %c0_222] : memref<2x1x128xf32, #tpu.memory_space<vmem>>, vector<1x1x128xf32>
    %474 = vector.shape_cast %473 : vector<1x1x128xf32> to vector<1x128xf32>
    %475 = vector.broadcast %474 : vector<1x128xf32> to vector<128x128xf32>
    %476 = arith.addf %472, %475 : vector<128x128xf32>
    %cst_223 = arith.constant 5.000000e-01 : f32
    %477 = vector.broadcast %cst_223 : f32 to vector<128x128xf32>
    %478 = arith.mulf %477, %476 : vector<128x128xf32>
    %cst_224 = arith.constant 4.471500e-02 : f32
    %479 = vector.broadcast %cst_224 : f32 to vector<128x128xf32>
    %480 = arith.mulf %479, %476 : vector<128x128xf32>
    %481 = arith.mulf %480, %476 : vector<128x128xf32>
    %482 = arith.mulf %481, %476 : vector<128x128xf32>
    %483 = arith.addf %476, %482 : vector<128x128xf32>
    %cst_225 = arith.constant 0.797884583 : f32
    %484 = vector.broadcast %cst_225 : f32 to vector<128x128xf32>
    %485 = arith.mulf %484, %483 : vector<128x128xf32>
    %486 = math.tanh %485 : vector<128x128xf32>
    %cst_226 = arith.constant 1.000000e+00 : f32
    %487 = vector.broadcast %cst_226 : f32 to vector<128x128xf32>
    %488 = arith.addf %487, %486 : vector<128x128xf32>
    %489 = arith.mulf %478, %488 : vector<128x128xf32>
    %490 = arith.truncf %489 : vector<128x128xf32> to vector<128x128xbf16>
    %c1_227 = arith.constant 1 : index
    %c0_228 = arith.constant 0 : index
    %c0_229 = arith.constant 0 : index
    %491 = vector.load %arg21[%c1_227, %c0_228, %c0_229] : memref<2x128x32xbf16, #tpu.memory_space<vmem>>, vector<1x128x32xbf16>
    %492 = vector.shape_cast %491 : vector<1x128x32xbf16> to vector<128x32xbf16>
    %cst_230 = arith.constant dense<0.000000e+00> : vector<128x32xf32>
    %493 = tpu.matmul %490, %492, %cst_230 {dimension_numbers = #tpu.dot_dimension_numbers<[1], [0], [0], [1], [0, 0, 1, 1], [], []>} : vector<128x128xbf16>, vector<128x32xbf16>, vector<128x32xf32> -> vector<128x32xf32>
    %c1_231 = arith.constant 1 : index
    %c0_232 = arith.constant 0 : index
    %c0_233 = arith.constant 0 : index
    %494 = vector.load %arg22[%c1_231, %c0_232, %c0_233] : memref<2x1x32xf32, #tpu.memory_space<vmem>>, vector<1x1x32xf32>
    %495 = vector.shape_cast %494 : vector<1x1x32xf32> to vector<1x32xf32>
    %496 = vector.broadcast %495 : vector<1x32xf32> to vector<128x32xf32>
    %497 = arith.addf %493, %496 : vector<128x32xf32>
    %498 = arith.addf %442, %497 : vector<128x32xf32>
    %499 = vector.shape_cast %498 : vector<128x32xf32> to vector<2x64x32xf32>
    %c0_234 = arith.constant 0 : index
    %c0_235 = arith.constant 0 : index
    %c0_236 = arith.constant 0 : index
    %500 = vector.load %arg23[%c0_234, %c0_235, %c0_236] : memref<2x64x32xf32, #tpu.memory_space<vmem>>, vector<2x64x32xf32>
    tpu.vector_store %arg23[%c0_234, %c0_235, %c0_236], %499 {strides = array<i32>} : memref<2x64x32xf32, #tpu.memory_space<vmem>>, vector<2x64x32xf32>,
    return
  }
  func.func @transform_0(%arg0: i32) -> (i32, i32, i32) {
    %c0_i32 = arith.constant 0 : i32
    %c0_i32_0 = arith.constant 0 : i32
    %c0_i32_1 = arith.constant 0 : i32
    return %arg0, %c0_i32, %c0_i32_0 : i32, i32, i32
  }
  func.func @transform_1(%arg0: i32) -> (i32, i32) {
    %c0_i32 = arith.constant 0 : i32
    %c0_i32_0 = arith.constant 0 : i32
    %c0_i32_1 = arith.constant 0 : i32
    return %c0_i32, %c0_i32_0 : i32, i32
  }
  func.func @transform_2(%arg0: i32) -> (i32, i32) {
    %c0_i32 = arith.constant 0 : i32
    %c0_i32_0 = arith.constant 0 : i32
    %c0_i32_1 = arith.constant 0 : i32
    return %c0_i32, %c0_i32_0 : i32, i32
  }
  func.func @transform_3(%arg0: i32) -> (i32, i32) {
    %c0_i32 = arith.constant 0 : i32
    %c0_i32_0 = arith.constant 0 : i32
    %c0_i32_1 = arith.constant 0 : i32
    return %c0_i32, %c0_i32_0 : i32, i32
  }
  func.func @transform_4(%arg0: i32) -> (i32, i32) {
    %c0_i32 = arith.constant 0 : i32
    %c0_i32_0 = arith.constant 0 : i32
    %c0_i32_1 = arith.constant 0 : i32
    return %c0_i32, %c0_i32_0 : i32, i32
  }
  func.func @transform_5(%arg0: i32) -> (i32, i32) {
    %c0_i32 = arith.constant 0 : i32
    %c0_i32_0 = arith.constant 0 : i32
    %c0_i32_1 = arith.constant 0 : i32
    return %c0_i32, %c0_i32_0 : i32, i32
  }
  func.func @transform_6(%arg0: i32) -> (i32, i32, i32) {
    %c0_i32 = arith.constant 0 : i32
    %c0_i32_0 = arith.constant 0 : i32
    %c0_i32_1 = arith.constant 0 : i32
    %c0_i32_2 = arith.constant 0 : i32
    return %c0_i32, %c0_i32_0, %c0_i32_1 : i32, i32, i32
  }
  func.func @transform_7(%arg0: i32) -> (i32, i32, i32) {
    %c0_i32 = arith.constant 0 : i32
    %c0_i32_0 = arith.constant 0 : i32
    %c0_i32_1 = arith.constant 0 : i32
    %c0_i32_2 = arith.constant 0 : i32
    return %c0_i32, %c0_i32_0, %c0_i32_1 : i32, i32, i32
  }
  func.func @transform_8(%arg0: i32) -> (i32, i32, i32) {
    %c0_i32 = arith.constant 0 : i32
    %c0_i32_0 = arith.constant 0 : i32
    %c0_i32_1 = arith.constant 0 : i32
    %c0_i32_2 = arith.constant 0 : i32
    return %c0_i32, %c0_i32_0, %c0_i32_1 : i32, i32, i32
  }
  func.func @transform_9(%arg0: i32) -> (i32, i32, i32) {
    %c0_i32 = arith.constant 0 : i32
    %c0_i32_0 = arith.constant 0 : i32
    %c0_i32_1 = arith.constant 0 : i32
    %c0_i32_2 = arith.constant 0 : i32
    return %c0_i32, %c0_i32_0, %c0_i32_1 : i32, i32, i32
  }
  func.func @transform_10(%arg0: i32) -> (i32, i32, i32) {
    %c0_i32 = arith.constant 0 : i32
    %c0_i32_0 = arith.constant 0 : i32
    %c0_i32_1 = arith.constant 0 : i32
    %c0_i32_2 = arith.constant 0 : i32
    return %c0_i32, %c0_i32_0, %c0_i32_1 : i32, i32, i32
  }
  func.func @transform_11(%arg0: i32) -> (i32, i32, i32) {
    %c0_i32 = arith.constant 0 : i32
    %c0_i32_0 = arith.constant 0 : i32
    %c0_i32_1 = arith.constant 0 : i32
    %c0_i32_2 = arith.constant 0 : i32
    return %c0_i32, %c0_i32_0, %c0_i32_1 : i32, i32, i32
  }
  func.func @transform_12(%arg0: i32) -> (i32, i32, i32) {
    %c0_i32 = arith.constant 0 : i32
    %c0_i32_0 = arith.constant 0 : i32
    %c0_i32_1 = arith.constant 0 : i32
    %c0_i32_2 = arith.constant 0 : i32
    return %c0_i32, %c0_i32_0, %c0_i32_1 : i32, i32, i32
  }
  func.func @transform_13(%arg0: i32) -> (i32, i32, i32) {
    %c0_i32 = arith.constant 0 : i32
    %c0_i32_0 = arith.constant 0 : i32
    %c0_i32_1 = arith.constant 0 : i32
    %c0_i32_2 = arith.constant 0 : i32
    return %c0_i32, %c0_i32_0, %c0_i32_1 : i32, i32, i32
  }
  func.func @transform_14(%arg0: i32) -> (i32, i32, i32) {
    %c0_i32 = arith.constant 0 : i32
    %c0_i32_0 = arith.constant 0 : i32
    %c0_i32_1 = arith.constant 0 : i32
    %c0_i32_2 = arith.constant 0 : i32
    return %c0_i32, %c0_i32_0, %c0_i32_1 : i32, i32, i32
  }
  func.func @transform_15(%arg0: i32) -> (i32, i32, i32) {
    %c0_i32 = arith.constant 0 : i32
    %c0_i32_0 = arith.constant 0 : i32
    %c0_i32_1 = arith.constant 0 : i32
    %c0_i32_2 = arith.constant 0 : i32
    return %c0_i32, %c0_i32_0, %c0_i32_1 : i32, i32, i32
  }
  func.func @transform_16(%arg0: i32) -> (i32, i32, i32) {
    %c0_i32 = arith.constant 0 : i32
    %c0_i32_0 = arith.constant 0 : i32
    %c0_i32_1 = arith.constant 0 : i32
    %c0_i32_2 = arith.constant 0 : i32
    return %c0_i32, %c0_i32_0, %c0_i32_1 : i32, i32, i32
  }
  func.func @transform_17(%arg0: i32) -> (i32, i32, i32) {
    %c0_i32 = arith.constant 0 : i32
    %c0_i32_0 = arith.constant 0 : i32
    %c0_i32_1 = arith.constant 0 : i32
    %c0_i32_2 = arith.constant 0 : i32
    return %c0_i32, %c0_i32_0, %c0_i32_1 : i32, i32, i32
  }
  func.func @transform_18(%arg0: i32) -> (i32, i32, i32) {
    %c0_i32 = arith.constant 0 : i32
    %c0_i32_0 = arith.constant 0 : i32
    %c0_i32_1 = arith.constant 0 : i32
    %c0_i32_2 = arith.constant 0 : i32
    return %c0_i32, %c0_i32_0, %c0_i32_1 : i32, i32, i32
  }
  func.func @transform_19(%arg0: i32) -> (i32, i32, i32) {
    %c0_i32 = arith.constant 0 : i32
    %c0_i32_0 = arith.constant 0 : i32
    %c0_i32_1 = arith.constant 0 : i32
    %c0_i32_2 = arith.constant 0 : i32
    return %c0_i32, %c0_i32_0, %c0_i32_1 : i32, i32, i32
  }
  func.func @transform_20(%arg0: i32) -> (i32, i32, i32) {
    %c0_i32 = arith.constant 0 : i32
    %c0_i32_0 = arith.constant 0 : i32
    %c0_i32_1 = arith.constant 0 : i32
    %c0_i32_2 = arith.constant 0 : i32
    return %c0_i32, %c0_i32_0, %c0_i32_1 : i32, i32, i32
  }
  func.func @transform_21(%arg0: i32) -> (i32, i32, i32) {
    %c0_i32 = arith.constant 0 : i32
    %c0_i32_0 = arith.constant 0 : i32
    %c0_i32_1 = arith.constant 0 : i32
    %c0_i32_2 = arith.constant 0 : i32
    return %c0_i32, %c0_i32_0, %c0_i32_1 : i32, i32, i32
  }
  func.func @transform_22(%arg0: i32) -> (i32, i32, i32) {
    %c0_i32 = arith.constant 0 : i32
    %c0_i32_0 = arith.constant 0 : i32
    %c0_i32_1 = arith.constant 0 : i32
    return %arg0, %c0_i32, %c0_i32_0 : i32, i32, i32
  }
}

</mosaic_0001>

<bundles_post_ra>
// kernel: fact_layer_forward.1
= control target key start
LH: loop header
LB: loop body
LE: loop exit
PB: predicated region body
PF: predicated region fallthrough
CT: control target
= control target key end

     0   :  { %v10383_v0 = vmov 1   ;;  %v10385_v1 = vmov 0   ;;  %v10379_v6 = vmov 2   ;;  %v10377_v7 = vmov 5   ;;  %s10341_s3 = inlined_call_operand.vmem [shape: f32[128,9], index: 3, kind: input, shape index: {}]   ;;  %s10342_s1 = inlined_call_operand.vmem [shape: f32[9,32], index: 1, kind: input, shape index: {}]   ;;  %s10343_s2 = inlined_call_operand.vmem [shape: f32[1,32], index: 2, kind: input, shape index: {}]   ;;  %s10344_s0 = inlined_call_operand.vmem [shape: f32[2,64,32], index: 0, kind: input, shape index: {}, may-alias: {0,22}]   ;;  %s10345_s6 = inlined_call_operand.vmem [shape: f32[2,1,32], index: 6, kind: input, shape index: {}]   ;;  %s10346_s7 = inlined_call_operand.vmem [shape: f32[2,1,32], index: 7, kind: input, shape index: {}]   ;;  %s10347_s10 = inlined_call_operand.vmem [shape: bf16[2,64,32], index: 10, kind: input, shape index: {}]   ;;  %s10348_s4 = inlined_call_operand.vmem [shape: bf16[4,64], index: 4, kind: input, shape index: {}]   ;;  %s10349_s11 = inlined_call_operand.vmem [shape: bf16[2,32,32], index: 11, kind: input, shape index: {}]   ;;  %s10350_s12 = inlined_call_operand.vmem [shape: bf16[2,32,32], index: 12, kind: input, shape index: {}]   ;;  %s10351_s13 = inlined_call_operand.vmem [shape: f32[2,1,32], index: 13, kind: input, shape index: {}]   ;;  %s10352_s14 = inlined_call_operand.vmem [shape: f32[2,32,32], index: 14, kind: input, shape index: {}]   ;;  %s10353_s5 = inlined_call_operand.vmem [shape: f32[32,32], index: 5, kind: input, shape index: {}]   ;;  %s10354_s8 = inlined_call_operand.vmem [shape: f32[2,32,32], index: 8, kind: input, shape index: {}]   ;;  %s10355_s9 = inlined_call_operand.vmem [shape: f32[2,1,32], index: 9, kind: input, shape index: {}]   ;;  %s10356_s15 = inlined_call_operand.vmem [shape: f32[2,1,32], index: 15, kind: input, shape index: {}]   ;;  %s10357_s16 = inlined_call_operand.vmem [shape: f32[2,1,32], index: 16, kind: input, shape index: {}]   ;;  %s10358_s17 = inlined_call_operand.vmem [shape: f32[2,1,32], index: 17, kind: input, shape index: {}]   ;;  %s10359_s18 = inlined_call_operand.vmem [shape: bf16[2,32,128], index: 18, kind: input, shape index: {}]   ;;  %s10360_s19 = inlined_call_operand.vmem [shape: f32[2,1,128], index: 19, kind: input, shape index: {}]   ;;  %s10361_s20 = inlined_call_operand.vmem [shape: bf16[2,128,32], index: 20, kind: input, shape index: {}]   ;;  %s10362_s21 = inlined_call_operand.vmem [shape: f32[2,1,32], index: 21, kind: input, shape index: {}]   ;;  %s10363_s22 = inlined_call_operand.vmem [shape: f32[2,64,32], index: 22, kind: output, shape index: {}, may-alias: {0,22}]  }
   0x1   :  { %10607 = sst [smem:[#allocation151_spill]] %s10341_s3  ;;  %5866 = vset.pattern.permute.xlu1 %v10383_v0  ;;  %5867 = vset.pattern.permute.xlu2 %v10385_v1  ;;  %v10381_v8 = vmov 7   ;;  %v10375_v9 = vmov 3   ;;  %v10373_v13 = vmov 6   ;;  %v10371_v15 = vmov 8  }
   0x2   :  { %10608 = sst [smem:[#allocation152_spill]] %s10342_s1  ;;  %5865 = vset.pattern.permute.xlu0 %v10385_v1  ;;  %v145_v44 = vlaneseq  ;;  %vm1154_vm2 = vcmask 261120  }
   0x3   :  { %10609 = sst [smem:[#allocation153_spill]] %s10343_s2 }
   0x4   :  { %10610 = sst [smem:[#allocation154_spill]] %s10344_s0  ;;  %v6557_v46 = vshrl.u32 %v145_v44, 7 }
   0x5   :  { %10611 = sst [smem:[#allocation155_spill]] %s10345_s6 }
   0x6   :  { %10612 = sst [smem:[#allocation156_spill]] %s10346_s7  ;;  %vm147_vm0 = vcmp.lt.s32.totalorder %v6557_v46, 1  ;;  %vm422_vm1 = vcmp.lt.s32.totalorder %v6557_v46, 7 }
   0x7   :  { %10613 = sst [smem:[#allocation157_spill]] %s10347_s10 }
   0x8   :  { %s10614_s29 = sld [smem:[#allocation151_spill]] }
   0x9   :  { %s10644_s3 = sld [smem:[#allocation154_spill]] }
   0xa   :  { %s10647_s10 = sld [smem:[#allocation152_spill]] }
   0xb   :  { %s10677_s0 = sld [smem:[#allocation153_spill]] }
   0xc   :  { %s10736_s25 = sld [smem:[#allocation155_spill]] }
   0xd   :  { %s10737_s27 = sld [smem:[#allocation156_spill]] }
   0xe   :  { %v6351_v2 = vld [vmem:[%s10614_s29 + $0x30] sm:$0xff]  ;;  %v6356_v3 = vld [vmem:[%s10614_s29 + $0x20] sm:$0xff]  ;;  %v6365_v4 = vld [vmem:[%s10614_s29 + $0x38] sm:$0xff]  ;;  %s10738_s1 = sld [smem:[#allocation157_spill]] }
   0xf   :  { %335 = vperm.xlu1 %5866, %v6351_v2   ;;  %213 = vperm.xlu0 %5865, %v6351_v2   ;;  %v6370_v5 = vld [vmem:[%s10614_s29 + $0x28] sm:$0xff]  ;;  %v6390_v10 = vld [vmem:[%s10614_s29 + $0x18] sm:$0xff]  ;;  %v6396_v11 = vld [vmem:[%s10614_s29 + $0x10] sm:$0xff] }
  0x10   :  { %203 = vperm.xlu2 %5867, %v6356_v3   ;;  %v6411_v12 = vld [vmem:[%s10614_s29 + $0x8] sm:$0xff]  ;;  %v6432_v14 = vld [vmem:[%s10614_s29] sm:$0xff]  ;;  %v6597_v57 = vld [vmem:[%s10644_s3 + $0x30] sm:$0xff] }
  0x11   :  { %v6562_v47 = vld [vmem:[%s10644_s3 + $0x20] sm:$0xff]  ;;  %v6567_v48 = vld [vmem:[%s10644_s3 + $0x28] sm:$0xff]  ;;  %v6604_v59 = vld [vmem:[%s10644_s3 + $0x18] sm:$0xff]  ;;  %v135_v62 = vrot.slane %v6597_v57, 7  ;;  %v412_v63 = vrot.slane %v6597_v57, 1 }
  0x12   :  { %v6579_v51 = vld [vmem:[%s10647_s10] sm:$0xff]  ;;  %v133_v52 = vrot.slane %v6562_v47, 7  ;;  %v134_v53 = vrot.slane %v6567_v48, 7 }
  0x13   :  { %v6586_v54 = vperm.slane %v6579_v51, 0  ;;  %v6607_v60 = vperm.slane %v6579_v51, 4 }
  0x14   :  { %v6590_v55 = vsel %vm147_vm0, %v133_v52, %v134_v53  ;;  %v6633_v44 = vsel %vm147_vm0, %v134_v53, %v135_v62 }
  0x15   :  { %v171_v61 = vmul.f32 %v6586_v54, %v6590_v55  ;;  %v172_v53 = vmul.f32 %v6586_v54, %v6633_v44 }
  0x17   :  { %339 = vperm.xlu1 %5866, %v6365_v4   ;;  %218 = vperm.xlu0 %5865, %v6365_v4  }
  0x18   :  { %208 = vperm.xlu2 %5867, %v6370_v5  }
  0x1f   :  { %5868 = vset.pattern.permute.xlu1 %v10379_v6  ;;  %5876 = vset.pattern.permute.xlu0 %v10377_v7 }
  0x20   :  { %5869 = vset.pattern.permute.xlu2 %v10383_v0  ;;  %485 = vperm.xlu1 %5868, %v6365_v4  }
  0x21   :  { %707 = vperm.xlu0 %5876, %v6351_v2   ;;  %327 = vperm.xlu2 %5869, %v6356_v3  }
  0x28   :  { %5870 = vset.pattern.permute.xlu1 %v10383_v0 }
  0x29   :  { %5889 = vset.pattern.permute.xlu0 %v10381_v8  ;;  %5871 = vset.pattern.permute.xlu2 %v10375_v9 }
  0x2a   :  { %937 = vperm.xlu0 %5889, %v6365_v4   ;;  %331 = vperm.xlu1 %5870, %v6370_v5  }
  0x2b   :  { %594 = vperm.xlu2 %5871, %v6351_v2  }
  0x32   :  { %5890 = vset.pattern.permute.xlu0 %v10379_v6  ;;  %5872 = vset.pattern.permute.xlu1 %v10385_v1 }
  0x33   :  { %5873 = vset.pattern.permute.xlu2 %v10385_v1  ;;  %481 = vperm.xlu0 %5890, %v6351_v2  }
  0x34   :  { %198 = vperm.xlu2 %5873, %v6390_v10   ;;  %193 = vperm.xlu1 %5872, %v6396_v11  }
  0x3b   :  { %465 = vperm.xlu0 %5890, %v6396_v11  }
  0x3c   :  { %5875 = vset.pattern.permute.xlu2 %v10379_v6  ;;  %5874 = vset.pattern.permute.xlu1 %v10379_v6 }
  0x3d   :  { %477 = vperm.xlu2 %5875, %v6370_v5   ;;  %473 = vperm.xlu1 %5874, %v6356_v3  }
  0x43   :  { %461 = vperm.xlu0 %5890, %v6411_v12  }
  0x45   :  { %5878 = vset.pattern.permute.xlu2 %v10383_v0  ;;  %5877 = vset.pattern.permute.xlu1 %v10377_v7 }
  0x46   :  { %319 = vperm.xlu2 %5878, %v6396_v11   ;;  %711 = vperm.xlu1 %5877, %v6365_v4  }
  0x4b   :  { %5899 = vset.pattern.permute.xlu0 %v10375_v9 }
  0x4c   :  { %598 = vperm.xlu0 %5899, %v6365_v4  }
  0x4e   :  { %5880 = vset.pattern.permute.xlu2 %v10375_v9  ;;  %5879 = vset.pattern.permute.xlu1 %v10383_v0 }
  0x4f   :  { %586 = vperm.xlu2 %5880, %v6356_v3   ;;  %323 = vperm.xlu1 %5879, %v6390_v10  }
  0x54   :  { %590 = vperm.xlu0 %5899, %v6370_v5  }
  0x57   :  { %5882 = vset.pattern.permute.xlu2 %v10373_v13  ;;  %5881 = vset.pattern.permute.xlu1 %v10373_v13 }
  0x58   :  { %824 = vperm.xlu2 %5882, %v6365_v4   ;;  %820 = vperm.xlu1 %5881, %v6351_v2  }
  0x5c   :  { %570 = vperm.xlu0 %5899, %v6432_v14  }
  0x60   :  { %5884 = vset.pattern.permute.xlu2 %v10385_v1  ;;  %5883 = vset.pattern.permute.xlu1 %v10385_v1 }
  0x61   :  { %188 = vperm.xlu2 %5884, %v6411_v12   ;;  %183 = vperm.xlu1 %5883, %v6432_v14  }
  0x64   :  { %5908 = vset.pattern.permute.xlu0 %v10371_v15 }
  0x65   :  { %1042 = vperm.xlu0 %5908, %v6370_v5  }
  0x69   :  { %5886 = vset.pattern.permute.xlu2 %v10377_v7  ;;  %5885 = vset.pattern.permute.xlu1 %v10379_v6 }
  0x6a   :  { %699 = vperm.xlu2 %5886, %v6356_v3   ;;  %v6444_v16 = vpop.permute.xlu2 %203  ;;  %469 = vperm.xlu1 %5885, %v6390_v10  }
  0x6b   :  { %10615 = vst [vmem:[#allocation2_spill] sm:$0xff] %v6444_v16 }
  0x6d   :  { %5909 = vset.pattern.permute.xlu0 %v10373_v13 }
  0x6e   :  { %812 = vperm.xlu0 %5909, %v6356_v3  }
  0x72   :  { %5888 = vset.pattern.permute.xlu2 %v10381_v8  ;;  %v6450_v17 = vpop.permute.xlu2 %208  ;;  %5887 = vset.pattern.permute.xlu1 %v10377_v7 }
  0x73   :  { %10616 = vst [vmem:[#allocation3_spill] sm:$0xff] %v6450_v17  ;;  %933 = vperm.xlu2 %5888, %v6351_v2   ;;  %703 = vperm.xlu1 %5887, %v6370_v5  }
  0x76   :  { %796 = vperm.xlu0 %5909, %v6432_v14  }
  0x7b   :  { %5892 = vset.pattern.permute.xlu2 %v10383_v0  ;;  %5891 = vset.pattern.permute.xlu1 %v10383_v0  ;;  %v6459_v18 = vpop.permute.xlu2 %327  ;;  %v6659_v0 = vperm.slane %v6579_v51, 3 }
  0x7c   :  { %315 = vperm.xlu2 %5892, %v6411_v12   ;;  %10617 = vst [vmem:[#allocation4_spill] sm:$0xff] %v6459_v18  ;;  %311 = vperm.xlu1 %5891, %v6432_v14  }
  0x7d   :  { %10653 = vst [vmem:[#allocation38_spill] sm:$0xff] %v6659_v0 }
  0x7e   :  { %5918 = vset.pattern.permute.xlu0 %v10381_v8 }
  0x7f   :  { %913 = vperm.xlu0 %5918, %v6411_v12  }
  0x81   :  { %v6464_v19 = vpop.permute.xlu1 %335  ;;  %v6504_v29 = vpop.permute.xlu0 %213 }
  0x82   :  { %10618 = vst [vmem:[#allocation5_spill] sm:$0xff] %v6464_v19 }
  0x83   :  { %10628 = vst [vmem:[#allocation15_spill] sm:$0xff] %v6504_v29 }
  0x84   :  { %5894 = vset.pattern.permute.xlu2 %v10375_v9  ;;  %5893 = vset.pattern.permute.xlu1 %v10375_v9 }
  0x85   :  { %582 = vperm.xlu2 %5894, %v6390_v10   ;;  %v6469_v20 = vpop.permute.xlu2 %594  ;;  %578 = vperm.xlu1 %5893, %v6396_v11  }
  0x86   :  { %10619 = vst [vmem:[#allocation6_spill] sm:$0xff] %v6469_v20 }
  0x87   :  { %5921 = vset.pattern.permute.xlu0 %v10385_v1 }
  0x89   :  { %v6473_v21 = vpop.permute.xlu1 %339  ;;  %v6515_v32 = vpop.permute.xlu0 %218 }
  0x8a   :  { %10620 = vst [vmem:[#allocation7_spill] sm:$0xff] %v6473_v21 }
  0x8b   :  { %10631 = vst [vmem:[#allocation18_spill] sm:$0xff] %v6515_v32 }
  0x8d   :  { %5896 = vset.pattern.permute.xlu2 %v10371_v15  ;;  %5895 = vset.pattern.permute.xlu1 %v10373_v13 }
  0x8e   :  { %1046 = vperm.xlu2 %5896, %v6351_v2   ;;  %v6478_v22 = vpop.permute.xlu2 %198  ;;  %816 = vperm.xlu1 %5895, %v6370_v5   ;;  %v411_v2 = vrot.slane %v6567_v48, 1 }
  0x8f   :  { %10621 = vst [vmem:[#allocation8_spill] sm:$0xff] %v6478_v22 }
  0x92   :  { %v6481_v23 = vpop.permute.xlu1 %485 }
  0x93   :  { %10622 = vst [vmem:[#allocation9_spill] sm:$0xff] %v6481_v23  ;;  %v6524_v35 = vpop.permute.xlu0 %707 }
  0x94   :  { %10634 = vst [vmem:[#allocation21_spill] sm:$0xff] %v6524_v35 }
  0x96   :  { %5898 = vset.pattern.permute.xlu2 %v10379_v6  ;;  %5897 = vset.pattern.permute.xlu1 %v10371_v15 }
  0x97   :  { %457 = vperm.xlu2 %5898, %v6432_v14   ;;  %v6486_v24 = vpop.permute.xlu2 %477  ;;  %1050 = vperm.xlu1 %5897, %v6365_v4   ;;  %v6620_v4 = vperm.slane %v6579_v51, 1 }
  0x98   :  { %10623 = vst [vmem:[#allocation10_spill] sm:$0xff] %v6486_v24 }
  0x99   :  { %10651 = vst [vmem:[#allocation36_spill] sm:$0xff] %v6620_v4 }
  0x9c   :  { %v6489_v25 = vpop.permute.xlu1 %331  ;;  %v6535_v38 = vpop.permute.xlu0 %937 }
  0x9d   :  { %10624 = vst [vmem:[#allocation11_spill] sm:$0xff] %v6489_v25 }
  0x9e   :  { %10637 = vst [vmem:[#allocation24_spill] sm:$0xff] %v6535_v38 }
  0x9f   :  { %5901 = vset.pattern.permute.xlu2 %v10377_v7  ;;  %5900 = vset.pattern.permute.xlu1 %v10377_v7 }
  0xa0   :  { %695 = vperm.xlu2 %5901, %v6390_v10   ;;  %v6494_v26 = vpop.permute.xlu2 %319  ;;  %691 = vperm.xlu1 %5900, %v6396_v11  }
  0xa1   :  { %10625 = vst [vmem:[#allocation12_spill] sm:$0xff] %v6494_v26 }
  0xa5   :  { %v6545_v41 = vpop.permute.xlu0 %481 }
  0xa6   :  { %v6497_v27 = vpop.permute.xlu1 %193  ;;  %10640 = vst [vmem:[#allocation27_spill] sm:$0xff] %v6545_v41 }
  0xa7   :  { %10626 = vst [vmem:[#allocation13_spill] sm:$0xff] %v6497_v27 }
  0xa8   :  { %5903 = vset.pattern.permute.xlu2 %v10381_v8  ;;  %5902 = vset.pattern.permute.xlu1 %v10381_v8 }
  0xa9   :  { %929 = vperm.xlu2 %5903, %v6370_v5   ;;  %v6502_v28 = vpop.permute.xlu2 %586  ;;  %925 = vperm.xlu1 %5902, %v6356_v3   ;;  %v10392_v5 = vrot.slane %v6604_v59, 7 }
  0xaa   :  { %10627 = vst [vmem:[#allocation14_spill] sm:$0xff] %v6502_v28 }
  0xab   :  { %v6656_v6 = vsel %vm147_vm0, %v10392_v5, %v133_v52 }
  0xad   :  { %v6555_v45 = vpop.permute.xlu0 %465 }
  0xae   :  { %10643 = vst [vmem:[#allocation30_spill] sm:$0xff] %v6555_v45 }
  0xaf   :  { %v6507_v30 = vpop.permute.xlu1 %473 }
  0xb0   :  { %10629 = vst [vmem:[#allocation16_spill] sm:$0xff] %v6507_v30 }
  0xb1   :  { %5905 = vset.pattern.permute.xlu2 %v10373_v13  ;;  %5904 = vset.pattern.permute.xlu1 %v10375_v9 }
  0xb2   :  { %804 = vperm.xlu2 %5905, %v6396_v11   ;;  %v6512_v31 = vpop.permute.xlu2 %824  ;;  %574 = vperm.xlu1 %5904, %v6411_v12  }
  0xb3   :  { %10630 = vst [vmem:[#allocation17_spill] sm:$0xff] %v6512_v31 }
  0xb5   :  { %v6592_v56 = vpop.permute.xlu0 %461 }
  0xb6   :  { %10648 = vst [vmem:[#allocation33_spill] sm:$0xff] %v6592_v56 }
  0xb8   :  { %v6517_v33 = vpop.permute.xlu1 %711 }
  0xb9   :  { %10632 = vst [vmem:[#allocation19_spill] sm:$0xff] %v6517_v33 }
  0xba   :  { %5907 = vset.pattern.permute.xlu2 %v10371_v15  ;;  %5906 = vset.pattern.permute.xlu1 %v10373_v13 }
  0xbb   :  { %v6521_v34 = vpop.permute.xlu2 %188  ;;  %1038 = vperm.xlu2 %5907, %v6356_v3   ;;  %808 = vperm.xlu1 %5906, %v6390_v10  }
  0xbc   :  { %10633 = vst [vmem:[#allocation20_spill] sm:$0xff] %v6521_v34 }
  0xc1   :  { %v6527_v36 = vpop.permute.xlu1 %323 }
  0xc2   :  { %10635 = vst [vmem:[#allocation22_spill] sm:$0xff] %v6527_v36  ;;  %v10657_v36 = vmov 1  }
  0xc3   :  { %5911 = vset.pattern.permute.xlu2 %v10377_v7  ;;  %5910 = vset.pattern.permute.xlu1 %v10377_v7  ;;  %v6650_v7 = vpop.permute.xlu0 %598 }
  0xc4   :  { %v6531_v37 = vpop.permute.xlu2 %699  ;;  %687 = vperm.xlu2 %5911, %v6411_v12   ;;  %683 = vperm.xlu1 %5910, %v6432_v14   ;;  %10652 = vst [vmem:[#allocation37_spill] sm:$0xff] %v6650_v7 }
  0xc5   :  { %10636 = vst [vmem:[#allocation23_spill] sm:$0xff] %v6531_v37 }
  0xca   :  { %v6537_v39 = vpop.permute.xlu1 %820 }
  0xcb   :  { %10638 = vst [vmem:[#allocation25_spill] sm:$0xff] %v6537_v39 }
  0xcc   :  { %5913 = vset.pattern.permute.xlu2 %v10381_v8  ;;  %5912 = vset.pattern.permute.xlu1 %v10381_v8 }
  0xcd   :  { %v6541_v40 = vpop.permute.xlu2 %933  ;;  %921 = vperm.xlu2 %5913, %v6390_v10   ;;  %917 = vperm.xlu1 %5912, %v6396_v11  }
  0xce   :  { %10639 = vst [vmem:[#allocation26_spill] sm:$0xff] %v6541_v40 }
  0xd3   :  { %v6547_v42 = vpop.permute.xlu1 %183 }
  0xd4   :  { %10641 = vst [vmem:[#allocation28_spill] sm:$0xff] %v6547_v42 }
  0xd5   :  { %5915 = vset.pattern.permute.xlu2 %v10371_v15  ;;  %5914 = vset.pattern.permute.xlu1 %v10373_v13  ;;  %v300_v13 = vmul.f32 %v6620_v4, %v6567_v48 }
  0xd6   :  { %v6551_v43 = vpop.permute.xlu2 %315  ;;  %1030 = vperm.xlu2 %5915, %v6396_v11   ;;  %800 = vperm.xlu1 %5914, %v6411_v12   ;;  %v119_v11 = vmul.f32 %v6607_v60, %v6597_v57 }
  0xd7   :  { %10642 = vst [vmem:[#allocation29_spill] sm:$0xff] %v6551_v43  ;;  %v380_v52 = vmul.f32 %v6464_v19, %v300_v13  ;;  %v6686_v13 = vld [vmem:[%s10644_s3 + $0x40] sm:$0xff]  ;;  %v118_v43 = vmul.f32 %v6607_v60, %v6567_v48 }
  0xd8   :  { %10659 = vst [vmem:[#allocation42_spill] sm:$0xff] %v6686_v13  ;;  %v414_v56 = vrot.slane %v6686_v13, 1 }
  0xdc   :  { %v6569_v49 = vpop.permute.xlu1 %469 }
  0xdd   :  { %10645 = vst [vmem:[#allocation31_spill] sm:$0xff] %v6569_v49  ;;  %v10656_v49 = vmov 0  }
  0xde   :  { %5917 = vset.pattern.permute.xlu2 %v10381_v8  ;;  %5916 = vset.pattern.permute.xlu1 %v10371_v15 }
  0xdf   :  { %v6573_v50 = vpop.permute.xlu2 %582  ;;  %909 = vperm.xlu2 %5917, %v6432_v14   ;;  %1034 = vperm.xlu1 %5916, %v6390_v10   ;;  %v6626_v10 = vsel %vm422_vm1, %v411_v2, %v412_v63 }
  0xe0   :  { %10646 = vst [vmem:[#allocation32_spill] sm:$0xff] %v6573_v50  ;;  %v6665_v50 = vperm.slane %v6579_v51, 5 }
  0xe2   :  { %10655 = vst [vmem:[#allocation40_spill] sm:$0xff] %v6665_v50 }
  0xe5   :  { %v6599_v58 = vpop.permute.xlu1 %703 }
  0xe6   :  { %10649 = vst [vmem:[#allocation34_spill] sm:$0xff] %v6599_v58 }
  0xe7   :  { %5919 = vset.pattern.permute.xlu2 %v10371_v15  ;;  %1022 = vperm.xlu1 %5916, %v6432_v14   ;;  %v267_v14 = vmul.f32 %v6504_v29, %v171_v61  ;;  %v6641_v15 = vld [vmem:[%s10644_s3 + $0x38] sm:$0xff] }
  0xe8   :  { %v6616_v3 = vpop.permute.xlu2 %1046  ;;  %1026 = vperm.xlu2 %5919, %v6411_v12   ;;  %v6636_v12 = vperm.slane %v6579_v51, 2  ;;  %v413_v9 = vrot.slane %v6641_v15, 1  ;;  %v136_v1 = vrot.slane %v6641_v15, 7  ;;  %v120_v42 = vmul.f32 %v6607_v60, %v6641_v15 }
  0xe9   :  { %10650 = vst [vmem:[#allocation35_spill] sm:$0xff] %v6616_v3  ;;  %v283_v8 = vadd.f32 %v267_v14, %v119_v11 }
  0xea   :  { %v446_v61 = vmul.f32 %v6636_v12, %v6626_v10  ;;  %v6673_v11 = vsel %vm422_vm1, %v412_v63, %v413_v9  ;;  %v559_v63 = vmul.f32 %v6659_v0, %v6633_v44 }
  0xeb   :  { %v396_v19 = vadd.f32 %v380_v52, %v283_v8  ;;  %v299_v8 = vmul.f32 %v6620_v4, %v6562_v47  ;;  %v6709_v52 = vperm.slane %v6579_v51, 6 }
  0xec   :  { %v526_v14 = vmul.f32 %v6545_v41, %v446_v61  ;;  %v6692_v61 = vsel %vm147_vm0, %v135_v62, %v136_v1  ;;  %v301_v41 = vmul.f32 %v6620_v4, %v6597_v57 }
  0xed   :  { %10660 = vst [vmem:[#allocation43_spill] sm:$0xff] %v6692_v61  ;;  %v560_v45 = vmul.f32 %v6659_v0, %v6692_v61 }
  0xee   :  { %v6662_v29 = vpop.permute.xlu1 %311  ;;  %v542_v62 = vadd.f32 %v526_v14, %v396_v19  ;;  %10662 = vst [vmem:[#allocation44_spill] sm:$0xff] %v6709_v52  ;;  %v785_v19 = vmul.f32 %v6709_v52, %v6692_v61  ;;  %v381_v14 = vmul.f32 %v6473_v21, %v301_v41  ;;  %v6736_v41 = vsel %vm422_vm1, %v413_v9, %v414_v56  ;;  %v10706_v61 = vld [vmem:[#allocation8_spill] sm:$0xff] }
  0xef   :  { %10654 = vst [vmem:[#allocation39_spill] sm:$0xff] %v6662_v29  ;;  %5926 = vset.pattern.permute.xlu1 %v10657_v36  ;;  %v170_v29 = vmul.f32 %v6586_v54, %v6656_v6  ;;  %v447_v36 = vmul.f32 %v6636_v12, %v6673_v11  ;;  %v640_v21 = vmul.f32 %v6650_v7, %v560_v45 }
  0xf0   :  { %5920 = vset.pattern.permute.xlu2 %v10656_v49  ;;  %v268_v49 = vmul.f32 %v6515_v32, %v172_v53  ;;  %v672_v53 = vmul.f32 %v6665_v50, %v6673_v11  ;;  %v10661_v32 = vrot.slane %v6562_v47, 1  ;;  %10666 = vst [vmem:[#allocation48_spill] sm:$0xff] %v6736_v41 }
  0xf1   :  { %v6676_v5 = vpop.permute.xlu2 %457  ;;  %v266_v22 = vmul.f32 %v6450_v17, %v170_v29  ;;  %v527_v26 = vmul.f32 %v6481_v23, %v447_v36  ;;  %v6726_v29 = vperm.slane %v6579_v51, 7  ;;  %v6741_v36 = vld [vmem:[%s10647_s10 + $0x8] ss:$0 sm:$0xff] }
  0xf2   :  { %10658 = vst [vmem:[#allocation41_spill] sm:$0xff] %v6676_v5  ;;  %v6704_v5 = vsel %vm422_vm1, %v10661_v32, %v411_v2  ;;  %v284_v34 = vadd.f32 %v268_v49, %v120_v42  ;;  %v639_v32 = vmul.f32 %v6469_v20, %v559_v63  ;;  %v6728_v42 = vpop.permute.xlu0 %590  ;;  %v752_v63 = vmul.f32 %v6524_v35, %v672_v53  ;;  %v6749_v53 = vld [vmem:[%s10644_s3 + $0x10] sm:$0xff] }
  0xf3   :  { %v445_v27 = vmul.f32 %v6636_v12, %v6704_v5  ;;  %10663 = vst [vmem:[#allocation45_spill] sm:$0xff] %v6726_v29  ;;  %v379_v2 = vmul.f32 %v6489_v25, %v299_v8  ;;  %v282_v51 = vadd.f32 %v266_v22, %v118_v43  ;;  %v10668_v8 = vrot.slane %v6686_v13, 7 }
  0xf4   :  { %10664 = vst [vmem:[#allocation46_spill] sm:$0xff] %v6728_v42  ;;  %v655_v20 = vadd.f32 %v639_v32, %v542_v62  ;;  %v397_v23 = vadd.f32 %v381_v14, %v284_v34  ;;  %v558_v62 = vmul.f32 %v6659_v0, %v6590_v55  ;;  %v865_v22 = vmul.f32 %v6537_v39, %v785_v19  ;;  %v6772_v19 = vld [vmem:[%s10644_s3 + $0x48] sm:$0xff] }
  0xf5   :  { %v6755_v9 = vsel %vm147_vm0, %v136_v1, %v10668_v8  ;;  %v898_v34 = vmul.f32 %v6726_v29, %v6641_v15  ;;  %v525_v45 = vmul.f32 %v6486_v24, %v445_v27  ;;  %v673_v32 = vmul.f32 %v6665_v50, %v6736_v41  ;;  %10670 = vst [vmem:[#allocation51_spill] sm:$0xff] %v6772_v19 }
  0xf6   :  { %10669 = vst [vmem:[#allocation50_spill] sm:$0xff] %v6755_v9  ;;  %v543_v43 = vadd.f32 %v527_v26, %v397_v23  ;;  %v395_v14 = vadd.f32 %v379_v2, %v282_v51  ;;  %v768_v7 = vadd.f32 %v752_v63, %v655_v20  ;;  %v671_v1 = vmul.f32 %v6665_v50, %v6626_v10 }
  0xf7   :  { %v6730_v49 = vpop.permute.xlu1 %578  ;;  %v1011_v8 = vmul.f32 %v6741_v36, %v6736_v41  ;;  %v786_v26 = vmul.f32 %v6709_v52, %v6755_v9  ;;  %v638_v2 = vmul.f32 %v6728_v42, %v558_v62  ;;  %v978_v63 = vmul.f32 %v6541_v40, %v898_v34 }
  0xf8   :  { %10665 = vst [vmem:[#allocation47_spill] sm:$0xff] %v6730_v49  ;;  %v656_v27 = vadd.f32 %v640_v21, %v543_v43  ;;  %v881_v20 = vadd.f32 %v865_v22, %v768_v7  ;;  %v784_v51 = vmul.f32 %v6709_v52, %v6633_v44  ;;  %v753_v39 = vmul.f32 %v6517_v33, %v673_v32 }
  0xf9   :  { %v10416_v24 = vrot.slane %v6772_v19, 1  ;;  %v541_v25 = vadd.f32 %v525_v45, %v395_v14  ;;  %v751_v23 = vmul.f32 %v6599_v58, %v671_v1  ;;  %v1091_v41 = vmul.f32 %v6616_v3, %v1011_v8  ;;  %v10697_v58 = vld [vmem:[#allocation12_spill] sm:$0xff] }
  0xfa   :  { %v6744_v17 = vpop.permute.xlu2 %695  ;;  %v6782_v35 = vpop.permute.xlu0 %570  ;;  %v10673_v7 = vrot.slane %v6604_v59, 7  ;;  %v10674_v62 = vrot.slane %v6749_v53, 7  ;;  %v899_v22 = vmul.f32 %v6726_v29, %v6686_v13  ;;  %v866_v34 = vmul.f32 %v6512_v31, %v786_v26 }
  0xfb   :  { %10667 = vst [vmem:[#allocation49_spill] sm:$0xff] %v6744_v17  ;;  %v769_v43 = vadd.f32 %v753_v39, %v656_v27  ;;  %v654_v45 = vadd.f32 %v638_v2, %v541_v25  ;;  %v994_v32 = vadd.f32 %v978_v63, %v881_v20  ;;  %v897_v1 = vmul.f32 %v6726_v29, %v6597_v57 }
  0xfc   :  { %10671 = vst [vmem:[#allocation52_spill] sm:$0xff] %v6782_v35  ;;  %v6795_v44 = vsel %vm147_vm0, %v10674_v62, %v10673_v7  ;;  %v6809_v7 = vsel %vm422_vm1, %v414_v56, %v10416_v24  ;;  %v979_v25 = vmul.f32 %v6535_v38, %v899_v22  ;;  %v10417_v26 = vrot.slane %v6604_v59, 1 }
  0xfd   :  { %10676 = vst [vmem:[#allocation55_spill] sm:$0xff] %v6809_v7  ;;  %v767_v62 = vadd.f32 %v751_v23, %v654_v45  ;;  %v1107_v3 = vadd.f32 %v1091_v41, %v994_v32  ;;  %v169_v39 = vmul.f32 %v6586_v54, %v6795_v44  ;;  %v1010_v27 = vmul.f32 %v6741_v36, %v6673_v11  ;;  %v6824_v41 = vld [vmem:[%s10677_s0] ss:$0 sm:$0xff] }
  0xfe   :  { %v882_v63 = vadd.f32 %v866_v34, %v769_v43  ;;  %v1012_v56 = vmul.f32 %v6741_v36, %v6809_v7  ;;  %v298_v11 = vmul.f32 %v6620_v4, %v6604_v59  ;;  %v10678_v34 = vrot.slane %v6562_v47, 1 }
  0xff   :  { %v1123_v23 = vadd.f32 %v1107_v3, %v6597_v57  ;;  %v265_v22 = vmul.f32 %v6444_v16, %v169_v39 }
 0x100   :  { %v6787_v21 = vpop.permute.xlu1 %816  ;;  %v6837_v57 = vsel %vm422_vm1, %v10417_v26, %v10678_v34  ;;  %v378_v26 = vmul.f32 %v6459_v18, %v298_v11 }
 0x101   :  { %10672 = vst [vmem:[#allocation53_spill] sm:$0xff] %v6787_v21  ;;  %v864_v14 = vmul.f32 %v6787_v21, %v784_v51  ;;  %v117_v51 = vmul.f32 %v6607_v60, %v6562_v47  ;;  %v6848_v24 = vadd.f32 %v6824_v41, %v1123_v23  ;;  %v10696_v21 = vrot.slane %v6749_v53, 7 }
 0x102   :  { %v6839_v3 = vpop.permute.xlu0 %1042  ;;  %v1007_v13 = vmul.f32 %v6741_v36, %v6837_v57 }
 0x103   :  { %v6803_v8 = vpop.permute.xlu2 %929  ;;  %v880_v2 = vadd.f32 %v864_v14, %v767_v62  ;;  %10679 = vst [vmem:[#allocation56_spill] sm:$0xff] %v6839_v3  ;;  %v1090_v45 = vmul.f32 %v6839_v3, %v1010_v27  ;;  %v995_v14 = vadd.f32 %v979_v25, %v882_v63  ;;  %v444_v62 = vmul.f32 %v6636_v12, %v6837_v57 }
 0x104   :  { %10675 = vst [vmem:[#allocation54_spill] sm:$0xff] %v6803_v8  ;;  %v977_v20 = vmul.f32 %v6803_v8, %v897_v1  ;;  %v281_v34 = vadd.f32 %v265_v22, %v117_v51  ;;  %v557_v25 = vmul.f32 %v6659_v0, %v6656_v6 }
 0x105   :  { %10681 = vst [vmem:[#allocation58_spill] sm:$0xff] %v6848_v24  ;;  %v524_v27 = vmul.f32 %v6507_v30, %v444_v62 }
 0x106   :  { %v993_v32 = vadd.f32 %v977_v20, %v880_v2  ;;  %v1173_v2 = vsel %vm1154_vm2, %v6848_v24, 0.0  ;;  %v394_v63 = vadd.f32 %v378_v26, %v281_v34  ;;  %v637_v22 = vmul.f32 %v6502_v28, %v557_v25 }
 0x108   :  { %v1106_v38 = vadd.f32 %v1090_v45, %v993_v32  ;;  %v540_v11 = vadd.f32 %v524_v27, %v394_v63 }
 0x109   :  { %v6841_v43 = vpop.permute.xlu1 %1050 }
 0x10a   :  { %10680 = vst [vmem:[#allocation57_spill] sm:$0xff] %v6841_v43  ;;  %v1092_v1 = vmul.f32 %v6841_v43, %v1012_v56  ;;  %v670_v56 = vmul.f32 %v6665_v50, %v6704_v5  ;;  %v1122_v51 = vadd.f32 %v1106_v38, %v6567_v48  ;;  %v6872_v45 = vpop.permute.xlu0 %812  ;;  %v1009_v38 = vmul.f32 %v6741_v36, %v6626_v10  ;;  %v6894_v10 = vld [vmem:[%s10644_s3 + $0x8] sm:$0xff] }
 0x10b   :  { %10685 = vst [vmem:[#allocation62_spill] sm:$0xff] %v6872_v45 }
 0x10c   :  { %v1108_v39 = vadd.f32 %v1092_v1, %v995_v14  ;;  %v6852_v33 = vpop.permute.xlu2 %804  ;;  %v750_v26 = vmul.f32 %v6531_v37, %v670_v56  ;;  %v6876_v32 = vadd.f32 %v6824_v41, %v1122_v51  ;;  %v653_v14 = vadd.f32 %v637_v22, %v540_v11 }
 0x10d   :  { %10682 = vst [vmem:[#allocation59_spill] sm:$0xff] %v6852_v33  ;;  %v130_v11 = vrot.slane %v6894_v10, 7  ;;  %v10699_v37 = vrot.slane %v6604_v59, 1 }
 0x10e   :  { %v1124_v31 = vadd.f32 %v1108_v39, %v6641_v15  ;;  %10686 = vst [vmem:[#allocation63_spill] sm:$0xff] %v6876_v32  ;;  %v896_v39 = vmul.f32 %v6726_v29, %v6567_v48  ;;  %v766_v34 = vadd.f32 %v750_v26, %v653_v14  ;;  %v6899_v48 = vld [vmem:[%s10644_s3] sm:$0xff] }
 0x10f   :  { %v6946_v8 = vsel %vm147_vm0, %v130_v11, %v10696_v21  ;;  %v10700_v21 = vld [vmem:[#allocation30_spill] sm:$0xff] }
 0x110   :  { %v6860_v20 = vadd.f32 %v6824_v41, %v1124_v31  ;;  %v783_v31 = vmul.f32 %v6709_v52, %v6590_v55  ;;  %v1170_v55 = vsel %vm1154_vm2, %v6876_v32, 0.0 }
 0x111   :  { %1174 = vadd.xlane.f32.xlu1 %v1173_v2 }
 0x112   :  { %10683 = vst [vmem:[#allocation60_spill] sm:$0xff] %v6860_v20  ;;  %v6864_v23 = vpop.permute.xlu1 %691  ;;  %v1176_v15 = vsel %vm1154_vm2, %v6860_v20, 0.0  ;;  %v863_v1 = vmul.f32 %v6872_v45, %v783_v31  ;;  %v129_v31 = vrot.slane %v6899_v48, 7  ;;  %v406_v45 = vrot.slane %v6899_v48, 1 }
 0x113   :  { %10684 = vst [vmem:[#allocation61_spill] sm:$0xff] %v6864_v23  ;;  %1177 = vadd.xlane.f32.xlu2 %v1176_v15 }
 0x114   :  { %v879_v27 = vadd.f32 %v863_v1, %v766_v34  ;;  %v408_v34 = vrot.slane %v6749_v53, 1 }
 0x115   :  { %v6879_v62 = vpop.permute.xlu2 %1038 }
 0x116   :  { %10687 = vst [vmem:[#allocation64_spill] sm:$0xff] %v6879_v62  ;;  %v1089_v2 = vmul.f32 %v6879_v62, %v1009_v38  ;;  %v6915_v38 = vsel %vm147_vm0, %v129_v31, %v130_v11  ;;  %v6960_v28 = vsel %vm422_vm1, %v408_v34, %v10699_v37 }
 0x11b   :  { %v6887_v25 = vpop.permute.xlu1 %925  ;;  %1171 = vadd.xlane.f32.xlu2 %v1170_v55  ;;  %v167_v55 = vmul.f32 %v6586_v54, %v6915_v38 }
 0x11c   :  { %10688 = vst [vmem:[#allocation65_spill] sm:$0xff] %v6887_v25  ;;  %v976_v63 = vmul.f32 %v6887_v25, %v896_v39  ;;  %v407_v39 = vrot.slane %v6894_v10, 1 }
 0x11e   :  { %v992_v56 = vadd.f32 %v976_v63, %v879_v27  ;;  %v6901_v51 = vpop.permute.xlu2 %687  ;;  %v6924_v27 = vld [vmem:[%s10644_s3 + $0x78] sm:$0xff]  ;;  %v6930_v63 = vsel %vm422_vm1, %v407_v39, %v408_v34  ;;  %v6981_v18 = vsel %vm422_vm1, %v406_v45, %v407_v39 }
 0x11f   :  { %10689 = vst [vmem:[#allocation66_spill] sm:$0xff] %v6901_v51  ;;  %v144_v40 = vrot.slane %v6924_v27, 7  ;;  %v442_v3 = vmul.f32 %v6636_v12, %v6930_v63  ;;  %v441_v16 = vmul.f32 %v6636_v12, %v6981_v18 }
 0x120   :  { %v1105_v15 = vadd.f32 %v1089_v2, %v992_v56  ;;  %10692 = vst [vmem:[#allocation69_spill] sm:$0xff] %v6924_v27 }
 0x121   :  { %v6951_v25 = vsel %vm147_vm0, %v144_v40, %v129_v31  ;;  %v522_v11 = vmul.f32 %v10700_v21, %v442_v3  ;;  %v668_v31 = vmul.f32 %v6665_v50, %v6960_v28  ;;  %10704 = vst [vmem:[#allocation76_spill] sm:$0xff] %v6981_v18  ;;  %v295_v21 = vmul.f32 %v6620_v4, %v6899_v48 }
 0x122   :  { %v1121_v22 = vadd.f32 %v1105_v15, %v6562_v47  ;;  %v296_v15 = vmul.f32 %v6620_v4, %v6894_v10  ;;  %10698 = vst [vmem:[#allocation72_spill] sm:$0xff] %v6951_v25 }
 0x124   :  { %v6906_v26 = vpop.permute.xlu1 %574  ;;  %v6909_v14 = vadd.f32 %v6824_v41, %v1121_v22  ;;  %v115_v22 = vmul.f32 %v6607_v60, %v6749_v53  ;;  %v376_v62 = vmul.f32 %v10697_v58, %v296_v15  ;;  %v166_v15 = vmul.f32 %v6586_v54, %v6951_v25 }
 0x125   :  { %10690 = vst [vmem:[#allocation67_spill] sm:$0xff] %v6906_v26 }
 0x126   :  { %10691 = vst [vmem:[#allocation68_spill] sm:$0xff] %v6909_v14  ;;  %v1167_v1 = vsel %vm1154_vm2, %v6909_v14, 0.0 }
 0x127   :  { %1168 = vadd.xlane.f32.xlu0 %v1167_v1  ;;  %v6926_v2 = vpop.permute.xlu2 %921  ;;  %v10695_v1 = vld [vmem:[#allocation13_spill] sm:$0xff] }
 0x128   :  { %10693 = vst [vmem:[#allocation70_spill] sm:$0xff] %v6926_v2  ;;  %v263_v43 = vmul.f32 %v10695_v1, %v167_v55  ;;  %v555_v55 = vmul.f32 %v6659_v0, %v6946_v8  ;;  %v781_v1 = vmul.f32 %v6709_v52, %v6795_v44 }
 0x12a   :  { %v279_v42 = vadd.f32 %v263_v43, %v115_v22  ;;  %v6966_v43 = vld [vmem:[%s10644_s3 + $0x70] sm:$0xff]  ;;  %v168_v22 = vmul.f32 %v6586_v54, %v6946_v8  ;;  %v635_v37 = vmul.f32 %v6730_v49, %v555_v55  ;;  %v114_v55 = vmul.f32 %v6607_v60, %v6894_v10 }
 0x12b   :  { %10701 = vst [vmem:[#allocation73_spill] sm:$0xff] %v6966_v43  ;;  %v10705_v49 = vld [vmem:[#allocation20_spill] sm:$0xff]  ;;  %v10707_v9 = vrot.slane %v6966_v43, 7  ;;  %v10711_v43 = vld [vmem:[#allocation22_spill] sm:$0xff] }
 0x12c   :  { %v392_v30 = vadd.f32 %v376_v62, %v279_v42  ;;  %v748_v42 = vmul.f32 %v6864_v23, %v668_v31  ;;  %v116_v62 = vmul.f32 %v6607_v60, %v6604_v59  ;;  %v262_v39 = vmul.f32 %v10705_v49, %v166_v15  ;;  %v10709_v23 = vld [vmem:[#allocation29_spill] sm:$0xff] }
 0x12d   :  { %v6932_v56 = vpop.permute.xlu1 %808  ;;  %v264_v7 = vmul.f32 %v10706_v61, %v168_v22  ;;  %v7003_v31 = vsel %vm147_vm0, %v10707_v9, %v144_v40  ;;  %v375_v19 = vmul.f32 %v10709_v23, %v295_v21  ;;  %v443_v15 = vmul.f32 %v6636_v12, %v6960_v28  ;;  %v10710_v21 = vld [vmem:[#allocation33_spill] sm:$0xff] }
 0x12e   :  { %10694 = vst [vmem:[#allocation71_spill] sm:$0xff] %v6932_v56  ;;  %v538_v58 = vadd.f32 %v522_v11, %v392_v30  ;;  %v297_v30 = vmul.f32 %v6620_v4, %v6749_v53  ;;  %v861_v49 = vmul.f32 %v6852_v33, %v781_v1  ;;  %v554_v40 = vmul.f32 %v6659_v0, %v6915_v38  ;;  %v7020_v1 = vpop.permute.xlu0 %796 }
 0x12f   :  { %10708 = vst [vmem:[#allocation77_spill] sm:$0xff] %v7003_v31  ;;  %v280_v9 = vadd.f32 %v264_v7, %v116_v62  ;;  %v521_v23 = vmul.f32 %v10710_v21, %v441_v16  ;;  %v165_v22 = vmul.f32 %v6586_v54, %v7003_v31  ;;  %v10715_v62 = vld [vmem:[#allocation31_spill] sm:$0xff] }
 0x130   :  { %v6975_v34 = vpop.permute.xlu2 %1030  ;;  %v651_v11 = vadd.f32 %v635_v37, %v538_v58  ;;  %v894_v58 = vmul.f32 %v6726_v29, %v6604_v59  ;;  %v278_v37 = vadd.f32 %v262_v39, %v114_v55  ;;  %v377_v14 = vmul.f32 %v10711_v43, %v297_v30  ;;  %10712 = vst [vmem:[#allocation78_spill] sm:$0xff] %v7020_v1 }
 0x131   :  { %10702 = vst [vmem:[#allocation74_spill] sm:$0xff] %v6975_v34  ;;  %v294_v55 = vmul.f32 %v6620_v4, %v6924_v27  ;;  %v10713_v39 = vrot.slane %v6924_v27, 1  ;;  %v523_v30 = vmul.f32 %v10715_v62, %v443_v15  ;;  %v1087_v21 = vmul.f32 %v6975_v34, %v1007_v13 }
 0x132   :  { %v764_v61 = vadd.f32 %v748_v42, %v651_v11  ;;  %v391_v42 = vadd.f32 %v375_v19, %v278_v37  ;;  %v556_v11 = vmul.f32 %v6659_v0, %v6795_v44  ;;  %v667_v37 = vmul.f32 %v6665_v50, %v6930_v63 }
 0x133   :  { %v7030_v7 = vsel %vm422_vm1, %v10713_v39, %v406_v45  ;;  %v634_v43 = vmul.f32 %v6906_v26, %v554_v40  ;;  %v393_v31 = vadd.f32 %v377_v14, %v280_v9  ;;  %v113_v45 = vmul.f32 %v6607_v60, %v6899_v48  ;;  %v10717_v39 = vld [vmem:[#allocation28_spill] sm:$0xff] }
 0x134   :  { %v877_v19 = vadd.f32 %v861_v49, %v764_v61  ;;  %v261_v27 = vmul.f32 %v10717_v39, %v165_v22  ;;  %v440_v13 = vmul.f32 %v6636_v12, %v7030_v7  ;;  %v669_v61 = vmul.f32 %v6665_v50, %v6837_v57 }
 0x135   :  { %v537_v49 = vadd.f32 %v521_v23, %v391_v42  ;;  %v539_v15 = vadd.f32 %v523_v30, %v393_v31  ;;  %v747_v14 = vmul.f32 %v6901_v51, %v667_v37  ;;  %v780_v22 = vmul.f32 %v6709_v52, %v6946_v8  ;;  %v10721_v42 = vld [vmem:[#allocation41_spill] sm:$0xff] }
 0x136   :  { %v6977_v3 = vpop.permute.xlu1 %683  ;;  %v782_v57 = vmul.f32 %v6709_v52, %v6656_v6  ;;  %v7058_v23 = vpop.permute.xlu0 %913  ;;  %v520_v8 = vmul.f32 %v10721_v42, %v440_v13  ;;  %v666_v13 = vmul.f32 %v6665_v50, %v6981_v18 }
 0x137   :  { %10703 = vst [vmem:[#allocation75_spill] sm:$0xff] %v6977_v3  ;;  %v650_v9 = vadd.f32 %v634_v43, %v537_v49  ;;  %v1006_v43 = vmul.f32 %v6741_v36, %v6960_v28  ;;  %v895_v28 = vmul.f32 %v6726_v29, %v6562_v47 }
 0x138   :  { %10720 = vst [vmem:[#allocation81_spill] sm:$0xff] %v7058_v23 }
 0x139   :  { %v7036_v33 = vpop.permute.xlu2 %909 }
 0x13a   :  { %10716 = vst [vmem:[#allocation80_spill] sm:$0xff] %v7036_v33 }
 0x13f   :  { %v7032_v16 = vpop.permute.xlu1 %917 }
 0x140   :  { %10714 = vst [vmem:[#allocation79_spill] sm:$0xff] %v7032_v16  ;;  %v974_v44 = vmul.f32 %v7032_v16, %v894_v58  ;;  %v10718_v58 = vld [vmem:[#allocation32_spill] sm:$0xff]  ;;  %v10719_v16 = vld [vmem:[#allocation39_spill] sm:$0xff] }
 0x141   :  { %v636_v34 = vmul.f32 %v10718_v58, %v556_v11  ;;  %v374_v62 = vmul.f32 %v10719_v16, %v294_v55  ;;  %v749_v11 = vmul.f32 %v6744_v17, %v669_v61 }
 0x142   :  { %v990_v4 = vadd.f32 %v974_v44, %v877_v19  ;;  %v893_v19 = vmul.f32 %v6726_v29, %v6749_v53  ;;  %v277_v44 = vadd.f32 %v261_v27, %v113_v45  ;;  %v7072_v6 = vpop.permute.xlu2 %1026 }
 0x143   :  { %10724 = vst [vmem:[#allocation84_spill] sm:$0xff] %v7072_v6  ;;  %v652_v30 = vadd.f32 %v636_v34, %v539_v15  ;;  %v1086_v34 = vmul.f32 %v7072_v6, %v1006_v43 }
 0x144   :  { %v1103_v40 = vadd.f32 %v1087_v21, %v990_v4  ;;  %v553_v4 = vmul.f32 %v6659_v0, %v6951_v25  ;;  %v390_v21 = vadd.f32 %v374_v62, %v277_v44  ;;  %v973_v45 = vmul.f32 %v7058_v23, %v893_v19  ;;  %v7618_v25 = vld [vmem:[%s10647_s10 + $0x8] ss:$0 sm:$0xff] }
 0x145   :  { %v862_v62 = vmul.f32 %v6932_v56, %v782_v57  ;;  %v746_v44 = vmul.f32 %v6977_v3, %v666_v13  ;;  %v1008_v57 = vmul.f32 %v6741_v36, %v6704_v5 }
 0x146   :  { %v1119_v31 = vadd.f32 %v1103_v40, %v6749_v53  ;;  %v763_v53 = vadd.f32 %v747_v14, %v650_v9  ;;  %v633_v15 = vmul.f32 %v6782_v35, %v553_v4  ;;  %v536_v40 = vadd.f32 %v520_v8, %v390_v21 }
 0x147   :  { %v765_v14 = vadd.f32 %v749_v11, %v652_v30  ;;  %v779_v9 = vmul.f32 %v6709_v52, %v6915_v38  ;;  %v892_v38 = vmul.f32 %v6726_v29, %v6894_v10 }
 0x148   :  { %v7067_v55 = vpop.permute.xlu1 %800  ;;  %v7070_v27 = vadd.f32 %v6824_v41, %v1119_v31 }
 0x149   :  { %10722 = vst [vmem:[#allocation82_spill] sm:$0xff] %v7067_v55  ;;  %v860_v37 = vmul.f32 %v7067_v55, %v780_v22  ;;  %v975_v22 = vmul.f32 %v6926_v2, %v895_v28  ;;  %v878_v19 = vadd.f32 %v862_v62, %v765_v14  ;;  %v859_v43 = vmul.f32 %v7020_v1, %v779_v9  ;;  %v5788_v2 = vld [vmem:[%s10350_s12] sm:$0xff] }
 0x14a   :  { %10723 = vst [vmem:[#allocation83_spill] sm:$0xff] %v7070_v27  ;;  %v1161_v61 = vsel %vm1154_vm2, %v7070_v27, 0.0  ;;  %v972_v62 = vmul.f32 %v7036_v33, %v892_v38 }
 0x14b   :  { %v876_v49 = vadd.f32 %v860_v37, %v763_v53  ;;  %1162 = vadd.xlane.f32.xlu1 %v1161_v61  ;;  %v649_v53 = vadd.f32 %v633_v15, %v536_v40  ;;  %v991_v8 = vadd.f32 %v975_v22, %v878_v19  ;;  %v1005_v61 = vmul.f32 %v6741_v36, %v6930_v63 }
 0x14c   :  { %v6230_v63 = vmov 32.0  }
 0x14d   :  { %v989_v47 = vadd.f32 %v973_v45, %v876_v49  ;;  %v762_v21 = vadd.f32 %v746_v44, %v649_v53  ;;  %5987 = vrcp.f32 %v6230_v63 }
 0x14f   :  { %v1102_v31 = vadd.f32 %v1086_v34, %v989_v47  ;;  %v875_v28 = vadd.f32 %v859_v43, %v762_v21 }
 0x151   :  { %v7092_v37 = vpop.permute.xlu1 %1034  ;;  %v1118_v4 = vadd.f32 %v1102_v31, %v6894_v10  ;;  %v988_v34 = vadd.f32 %v972_v62, %v875_v28 }
 0x152   :  { %10725 = vst [vmem:[#allocation85_spill] sm:$0xff] %v7092_v37  ;;  %v1088_v11 = vmul.f32 %v7092_v37, %v1008_v57 }
 0x153   :  { %v7099_v30 = vadd.f32 %v6824_v41, %v1118_v4  ;;  %v5988_v47 = vpop.eup %5987 }
 0x154   :  { %v1104_v45 = vadd.f32 %v1088_v11, %v991_v8  ;;  %v1204_v22 = vmul.f32 32.0, %v5988_v47  ;;  %vm1208_vm3 = vweird.f32 %v5988_v47 }
 0x155   :  { %10726 = vst [vmem:[#allocation86_spill] sm:$0xff] %v7099_v30  ;;  %v1158_v5 = vsel %vm1154_vm2, %v7099_v30, 0.0 }
 0x156   :  { %v1120_v13 = vadd.f32 %v1104_v45, %v6604_v59  ;;  %1159 = vadd.xlane.f32.xlu1 %v1158_v5  ;;  %v1205_v19 = vsub.f32 1.0, %v1204_v22 }
 0x158   :  { %v7108_v10 = vadd.f32 %v6824_v41, %v1120_v13  ;;  %v1206_v44 = vmul.f32 %v5988_v47, %v1205_v19 }
 0x159   :  { %v7110_v49 = vpop.permute.xlu1 %1022 }
 0x15a   :  { %10727 = vst [vmem:[#allocation87_spill] sm:$0xff] %v7108_v10  ;;  %v1085_v15 = vmul.f32 %v7110_v49, %v1005_v61  ;;  %v1164_v40 = vsel %vm1154_vm2, %v7108_v10, 0.0  ;;  %v1207_v57 = vadd.f32 %v5988_v47, %v1206_v44 }
 0x15b   :  { %10728 = vst [vmem:[#allocation88_spill] sm:$0xff] %v7110_v49  ;;  %1165 = vadd.xlane.f32.xlu2 %v1164_v40  ;;  %v10731_v40 = vld [vmem:[#allocation68_spill] sm:$0xff] }
 0x15c   :  { %v1101_v14 = vadd.f32 %v1085_v15, %v988_v34  ;;  %v7121_v31 = vsel %vm1208_vm3, %v5988_v47, %v1207_v57 }
 0x15d   :  { %10730 = vst [vmem:[#allocation90_spill] sm:$0xff] %v7121_v31 }
 0x15e   :  { %v1117_v9 = vadd.f32 %v1101_v14, %v6899_v48 }
 0x160   :  { %v7117_v59 = vadd.f32 %v6824_v41, %v1117_v9 }
 0x162   :  { %10729 = vst [vmem:[#allocation89_spill] sm:$0xff] %v7117_v59  ;;  %v1155_v36 = vsel %vm1154_vm2, %v7117_v59, 0.0 }
 0x163   :  { %1156 = vadd.xlane.f32.xlu0 %v1155_v36 }
 0x184   :  { %v1175_v53 = vpop.xlane.xlu1 %1174 }
 0x185   :  { %v1216_v48 = vmul.f32 %v7121_v31, %v1175_v53 }
 0x186   :  { %v1178_v43 = vpop.xlane.xlu2 %1177 }
 0x187   :  { %v7125_v41 = vsub.f32 %v6848_v24, %v1216_v48  ;;  %v1217_v4 = vmul.f32 %v7121_v31, %v1178_v43 }
 0x189   :  { %v7129_v21 = vsub.f32 %v6860_v20, %v1217_v4  ;;  %v1248_v38 = vmul.f32 %v7125_v41, %v7125_v41 }
 0x18b   :  { %v1276_v8 = vsel %vm1154_vm2, %v1248_v38, 0.0  ;;  %v1249_v11 = vmul.f32 %v7129_v21, %v7129_v21 }
 0x18c   :  { %1277 = vadd.xlane.f32.xlu2 %v1276_v8 }
 0x18d   :  { %v1279_v45 = vsel %vm1154_vm2, %v1249_v11, 0.0 }
 0x18e   :  { %v1172_v5 = vpop.xlane.xlu2 %1171  ;;  %1280 = vadd.xlane.f32.xlu0 %v1279_v45 }
 0x18f   :  { %v1215_v28 = vmul.f32 %v7121_v31, %v1172_v5 }
 0x191   :  { %v7139_v62 = vsub.f32 %v6876_v32, %v1215_v28  ;;  %v7485_v32 = vld [vmem:[%s10644_s3 + $0x68] sm:$0xff] }
 0x193   :  { %v1247_v13 = vmul.f32 %v7139_v62, %v7139_v62 }
 0x195   :  { %v1273_v61 = vsel %vm1154_vm2, %v1247_v13, 0.0 }
 0x196   :  { %1274 = vadd.xlane.f32.xlu2 %v1273_v61 }
 0x19a   :  { %v1169_v34 = vpop.xlane.xlu0 %1168 }
 0x19b   :  { %v1214_v15 = vmul.f32 %v7121_v31, %v1169_v34 }
 0x19d   :  { %v7146_v14 = vsub.f32 %v10731_v40, %v1214_v15 }
 0x19f   :  { %v1246_v9 = vmul.f32 %v7146_v14, %v7146_v14 }
 0x1a1   :  { %v1270_v36 = vsel %vm1154_vm2, %v1246_v9, 0.0  ;;  %v7182_v9 = vld [vmem:[%s10614_s29 + $0x78] sm:$0xff] }
 0x1a2   :  { %1271 = vadd.xlane.f32.xlu1 %v1270_v36  ;;  %v7188_v36 = vld [vmem:[%s10614_s29 + $0x60] sm:$0xff] }
 0x1be   :  { %v1163_v63 = vpop.xlane.xlu1 %1162 }
 0x1bf   :  { %v1212_v47 = vmul.f32 %v7121_v31, %v1163_v63  ;;  %v7194_v63 = vld [vmem:[%s10614_s29 + $0x70] sm:$0xff] }
 0x1c1   :  { %v7153_v22 = vsub.f32 %v7070_v27, %v1212_v47  ;;  %v10732_v47 = vmov 7  }
 0x1c3   :  { %v1244_v19 = vmul.f32 %v7153_v22, %v7153_v22 }
 0x1c5   :  { %v1264_v44 = vsel %vm1154_vm2, %v1244_v19, 0.0  ;;  %v10733_v19 = vmov 1  }
 0x1c6   :  { %1265 = vadd.xlane.f32.xlu0 %v1264_v44 }
 0x1c9   :  { %v1160_v57 = vpop.xlane.xlu1 %1159 }
 0x1ca   :  { %v1211_v53 = vmul.f32 %v7121_v31, %v1160_v57 }
 0x1cc   :  { %v7160_v48 = vsub.f32 %v7099_v30, %v1211_v53 }
 0x1ce   :  { %v1166_v43 = vpop.xlane.xlu2 %1165  ;;  %v1243_v4 = vmul.f32 %v7160_v48, %v7160_v48 }
 0x1cf   :  { %v1213_v38 = vmul.f32 %v7121_v31, %v1166_v43  ;;  %v7205_v43 = vld [vmem:[%s10614_s29 + $0x68] sm:$0xff] }
 0x1d0   :  { %v1261_v8 = vsel %vm1154_vm2, %v1243_v4, 0.0 }
 0x1d1   :  { %v7167_v11 = vsub.f32 %v7108_v10, %v1213_v38  ;;  %1262 = vadd.xlane.f32.xlu0 %v1261_v8 }
 0x1d3   :  { %v1245_v45 = vmul.f32 %v7167_v11, %v7167_v11 }
 0x1d5   :  { %v1267_v5 = vsel %vm1154_vm2, %v1245_v45, 0.0 }
 0x1d6   :  { %1268 = vadd.xlane.f32.xlu1 %v1267_v5  ;;  %v1157_v28 = vpop.xlane.xlu0 %1156 }
 0x1d7   :  { %v1210_v13 = vmul.f32 %v7121_v31, %v1157_v28 }
 0x1d9   :  { %v7174_v61 = vsub.f32 %v7117_v59, %v1210_v13  ;;  %v10734_v13 = vmov 2  }
 0x1db   :  { %v1242_v34 = vmul.f32 %v7174_v61, %v7174_v61 }
 0x1dd   :  { %v1258_v15 = vsel %vm1154_vm2, %v1242_v34, 0.0 }
 0x1de   :  { %1259 = vadd.xlane.f32.xlu2 %v1258_v15 }
 0x1e5   :  { %258 = vperm.xlu0 %5921, %v7182_v9  }
 0x1ed   :  { %248 = vperm.xlu0 %5921, %v7205_v43  }
 0x1ef   :  { %359 = vperm.xlu1 %5926, %v7188_v36  }
 0x1f5   :  { %5925 = vset.pattern.permute.xlu0 %v10734_v13 }
 0x1f6   :  { %253 = vperm.xlu2 %5920, %v7194_v63   ;;  %517 = vperm.xlu0 %5925, %v7182_v9  }
 0x1f7   :  { %5940 = vset.pattern.permute.xlu1 %v10732_v47 }
 0x1f8   :  { %965 = vperm.xlu1 %5940, %v7194_v63  }
 0x1fe   :  { %5922 = vset.pattern.permute.xlu2 %v10733_v19  ;;  %505 = vperm.xlu0 %5925, %v7188_v36  }
 0x1ff   :  { %v1278_v44 = vpop.xlane.xlu2 %1277  ;;  %367 = vperm.xlu2 %5922, %v7194_v63  }
 0x200   :  { %v1312_v57 = vmul.f32 %v1278_v44, %v7121_v31  ;;  %5942 = vset.pattern.permute.xlu1 %v10733_v19 }
 0x201   :  { %v1281_v53 = vpop.xlane.xlu0 %1280 }
 0x202   :  { %v1328_v4 = vadd.f32 1e-05, %v1312_v57  ;;  %v1313_v38 = vmul.f32 %v1281_v53, %v7121_v31 }
 0x204   :  { %5989 = vrsqrt.f32 %v1328_v4  ;;  %v1329_v8 = vadd.f32 1e-05, %v1313_v38  ;;  %v10735_v38 = vmov 0   ;;  %vm1404_vm5 = vweird.f32 %v1328_v4 }
 0x206   :  { %5991 = vrsqrt.f32 %v1329_v8  ;;  %vm1414_vm8 = vweird.f32 %v1329_v8 }
 0x207   :  { %371 = vperm.xlu2 %5922, %v7182_v9  }
 0x209   :  { %v1275_v45 = vpop.xlane.xlu2 %1274 }
 0x20a   :  { %v5990_v5 = vpop.eup %5989  ;;  %v1311_v28 = vmul.f32 %v1275_v45, %v7121_v31 }
 0x20b   :  { %v1399_v34 = vmul.f32 %v5990_v5, %v1328_v4  ;;  %vm1405_vm4 = vweird.f32 %v5990_v5 }
 0x20c   :  { %v5992_v15 = vpop.eup %5991  ;;  %v1327_v44 = vadd.f32 1e-05, %v1311_v28  ;;  %vm1406_vm7 = vmor %vm1404_vm5, %vm1405_vm4  ;;  %v7220_v28 = vld [vmem:[%s10736_s25] ss:$0 sm:$0xff] }
 0x20d   :  { %v1400_v57 = vmul.f32 %v5990_v5, %v1399_v34  ;;  %v1409_v53 = vmul.f32 %v5992_v15, %v1329_v8  ;;  %vm1415_vm6 = vweird.f32 %v5992_v15 }
 0x20e   :  { %5993 = vrsqrt.f32 %v1327_v44  ;;  %vm1416_vm9 = vmor %vm1414_vm8, %vm1415_vm6  ;;  %vm1394_vm11 = vweird.f32 %v1327_v44 }
 0x20f   :  { %v1401_v49 = vmul.f32 0.5, %v1400_v57  ;;  %v1410_v6 = vmul.f32 %v5992_v15, %v1409_v53  ;;  %5923 = vset.pattern.permute.xlu2 %v10735_v38 }
 0x210   :  { %243 = vperm.xlu2 %5923, %v7188_v36  }
 0x211   :  { %v1402_v23 = vsub.f32 1.5, %v1401_v49  ;;  %v1411_v35 = vmul.f32 0.5, %v1410_v6  ;;  %v7227_v6 = vld [vmem:[%s10737_s27] ss:$0 sm:$0xff] }
 0x213   :  { %v1403_v45 = vmul.f32 %v5990_v5, %v1402_v23  ;;  %v1412_v42 = vsub.f32 1.5, %v1411_v35 }
 0x214   :  { %v5994_v16 = vpop.eup %5993 }
 0x215   :  { %v1407_v34 = vsel %vm1406_vm7, %v5990_v5, %v1403_v45  ;;  %v1413_v57 = vmul.f32 %v5992_v15, %v1412_v42  ;;  %v1389_v53 = vmul.f32 %v5994_v16, %v1327_v44  ;;  %v1272_v49 = vpop.xlane.xlu1 %1271  ;;  %vm1395_vm10 = vweird.f32 %v5994_v16 }
 0x216   :  { %v1310_v23 = vmul.f32 %v1272_v49, %v7121_v31  ;;  %v1504_v35 = vmul.f32 %v1407_v34, %v7125_v41  ;;  %vm1396_vm12 = vmor %vm1394_vm11, %vm1395_vm10 }
 0x217   :  { %v1417_v4 = vsel %vm1416_vm9, %v5992_v15, %v1413_v57  ;;  %v1390_v39 = vmul.f32 %v5994_v16, %v1389_v53  ;;  %v7238_v15 = vld [vmem:[%s10614_s29 + $0x50] sm:$0xff] }
 0x218   :  { %v1326_v55 = vadd.f32 1e-05, %v1310_v23  ;;  %5924 = vset.pattern.permute.xlu2 %v10734_v13  ;;  %v1505_v42 = vmul.f32 %v1417_v4, %v7129_v21  ;;  %v1523_v8 = vmul.f32 %v7220_v28, %v1504_v35  ;;  %v7243_v21 = vld [vmem:[%s10738_s1 + $0x18] sm:$0xff]   ;;  %497 = vperm.xlu0 %5925, %v7238_v15  }
 0x219   :  { %v1391_v5 = vmul.f32 0.5, %v1390_v39  ;;  %513 = vperm.xlu2 %5924, %v7194_v63   ;;  %10739 = vst [vmem:[#allocation91_spill] sm:$0xff] %v7243_v21  ;;  %v10467_v23 = vunpack.c.l.bf16 %v7243_v21  ;;  %v10466_v35 = vunpack.c.h.bf16 %v7243_v21 }
 0x21a   :  { %5995 = vrsqrt.f32 %v1326_v55  ;;  %v1524_v41 = vmul.f32 %v7220_v28, %v1505_v42  ;;  %v1542_v45 = vadd.f32 %v7227_v6, %v1523_v8  ;;  %vm1384_vm14 = vweird.f32 %v1326_v55 }
 0x21b   :  { %v1392_v34 = vsub.f32 1.5, %v1391_v5 }
 0x21c   :  { %v1543_v39 = vadd.f32 %v7227_v6, %v1524_v41  ;;  %v1558_v57 = vpack.c.bf16 %v1542_v45, %v1542_v45 }
 0x21d   :  { %v1393_v53 = vmul.f32 %v5994_v16, %v1392_v34 }
 0x21e   :  { %v1559_v49 = vpack.c.bf16 %v1543_v39, %v1543_v39  ;;  %v1574_v4 = vunpack.c.l.bf16 %v1558_v57  ;;  %v1913_v51 = vunpack.c.l.b16 %v1558_v57  ;;  %v10741_v39 = vmov 5  }
 0x21f   :  { %v1397_v42 = vsel %vm1396_vm12, %v5994_v16, %v1393_v53 }
 0x220   :  { %v5996_v8 = vpop.eup %5995  ;;  %v1575_v5 = vunpack.c.l.bf16 %v1559_v49  ;;  %v1914_v1 = vunpack.c.l.b16 %v1559_v49  ;;  %v1503_v41 = vmul.f32 %v1397_v42, %v7139_v62  ;;  %v1590_v44 = vmul.f32 %v10467_v23, %v1574_v4  ;;  %5936 = vset.pattern.permute.xlu0 %v10741_v39 }
 0x221   :  { %v1379_v33 = vmul.f32 %v5996_v8, %v1326_v55  ;;  %5927 = vset.pattern.permute.xlu2 %v10733_v19  ;;  %743 = vperm.xlu0 %5936, %v7182_v9   ;;  %vm1385_vm13 = vweird.f32 %v5996_v8  ;;  %v10742_v4 = vmov 3  }
 0x222   :  { %363 = vperm.xlu2 %5927, %v7205_v43   ;;  %v1591_v45 = vmul.f32 %v10466_v35, %v1575_v5  ;;  %v7256_v34 = vpack.c.b16 %v1914_v1, %v1913_v51  ;;  %v1522_v62 = vmul.f32 %v7220_v28, %v1503_v41  ;;  %vm1386_vm15 = vmor %vm1384_vm14, %vm1385_vm13  ;;  %v7270_v41 = vld [vmem:[%s10738_s1 + $0x10] sm:$0xff]  }
 0x223   :  { %v1380_v16 = vmul.f32 %v5996_v8, %v1379_v33  ;;  %10743 = vst [vmem:[#allocation93_spill] sm:$0xff] %v7270_v41 }
 0x224   :  { %10740 = vst [vmem:[#allocation92_spill] sm:$0xff] %v7256_v34  ;;  %v1595_v57 = vpack.c.bf16 %v1591_v45, %v1590_v44  ;;  %v1541_v51 = vadd.f32 %v7227_v6, %v1522_v62 }
 0x225   :  { %v1381_v53 = vmul.f32 0.5, %v1380_v16  ;;  %v10465_v16 = vunpack.c.l.bf16 %v7270_v41 }
 0x226   :  { %1604 = vmatpush.bf16.msra.mxu0 %v1595_v57  ;;  %v1557_v44 = vpack.c.bf16 %v1541_v51, %v1541_v51 }
 0x227   :  { %v1382_v49 = vsub.f32 1.5, %v1381_v53 }
 0x228   :  { %v1573_v57 = vunpack.c.l.bf16 %v1557_v44  ;;  %v1912_v62 = vunpack.c.l.b16 %v1557_v44 }
 0x229   :  { %v1383_v42 = vmul.f32 %v5996_v8, %v1382_v49  ;;  %735 = vperm.xlu0 %5936, %v7205_v43  }
 0x22a   :  { %5928 = vset.pattern.permute.xlu2 %v10742_v4 }
 0x22b   :  { %v1387_v1 = vsel %vm1386_vm15, %v5996_v8, %v1383_v42  ;;  %626 = vperm.xlu2 %5928, %v7194_v63   ;;  %v10464_v8 = vunpack.c.h.bf16 %v7270_v41  ;;  %vm1596_vm15 = vcmask 523264   ;;  %v10783_v41 = vld [vmem:[#allocation36_spill] sm:$0xff] }
 0x22c   :  { %v1502_v33 = vmul.f32 %v1387_v1, %v7146_v14  ;;  %v308_v21 = vmul.f32 %v10783_v41, %v7485_v32 }
 0x22d   :  { %v1589_v42 = vmul.f32 %v10464_v8, %v1573_v57 }
 0x22e   :  { %v1521_v5 = vmul.f32 %v7220_v28, %v1502_v33 }
 0x230   :  { %v1540_v55 = vadd.f32 %v7227_v6, %v1521_v5  ;;  %v7288_v5 = vld [vmem:[%s10614_s29 + $0x58] sm:$0xff] }
 0x231   :  { %5939 = vset.pattern.permute.xlu0 %v10742_v4 }
 0x232   :  { %v1556_v45 = vpack.c.bf16 %v1540_v55, %v1540_v55  ;;  %630 = vperm.xlu0 %5939, %v7182_v9  }
 0x233   :  { %5929 = vset.pattern.permute.xlu2 %v10735_v38 }
 0x234   :  { %233 = vperm.xlu2 %5929, %v7238_v15   ;;  %v1572_v14 = vunpack.c.l.bf16 %v1556_v45  ;;  %v1911_v53 = vunpack.c.l.b16 %v1556_v45 }
 0x236   :  { %v1588_v49 = vmul.f32 %v10465_v16, %v1572_v14  ;;  %v7283_v51 = vpack.c.b16 %v1912_v62, %v1911_v53  ;;  %v10745_v16 = vmov 6  }
 0x238   :  { %10744 = vst [vmem:[#allocation94_spill] sm:$0xff] %v7283_v51  ;;  %v1594_v1 = vpack.c.bf16 %v1589_v42, %v1588_v49  ;;  %v10501_v51 = vrot.slane %v7485_v32, 1 }
 0x239   :  { %v1266_v33 = vpop.xlane.xlu0 %1265 }
 0x23a   :  { %v1308_v55 = vmul.f32 %v1266_v33, %v7121_v31  ;;  %1605 = vmatpush.bf16.msra.mxu0 %v1594_v1  ;;  %618 = vperm.xlu0 %5939, %v7188_v36  }
 0x23c   :  { %v1324_v44 = vadd.f32 1e-05, %v1308_v55  ;;  %238 = vperm.xlu2 %5929, %v7288_v5  }
 0x23e   :  { %5997 = vrsqrt.f32 %v1324_v44  ;;  %vm1364_vm4 = vweird.f32 %v1324_v44 }
 0x242   :  { %610 = vperm.xlu0 %5939, %v7238_v15  }
 0x244   :  { %v5998_v45 = vpop.eup %5997  ;;  %5930 = vset.pattern.permute.xlu2 %v10734_v13  ;;  %v1263_v57 = vpop.xlane.xlu0 %1262 }
 0x245   :  { %v1359_v14 = vmul.f32 %v5998_v45, %v1324_v44  ;;  %v1307_v53 = vmul.f32 %v1263_v57, %v7121_v31  ;;  %509 = vperm.xlu2 %5930, %v7205_v43   ;;  %vm1365_vm3 = vweird.f32 %v5998_v45 }
 0x246   :  { %vm1366_vm5 = vmor %vm1364_vm4, %vm1365_vm3  ;;  %vm1679_vm3 = vcmask 257024   ;;  %vm1744_vm4 = vcmask 1043456  }
 0x247   :  { %v1360_v62 = vmul.f32 %v5998_v45, %v1359_v14  ;;  %v1323_v49 = vadd.f32 1e-05, %v1307_v53 }
 0x249   :  { %v1361_v42 = vmul.f32 0.5, %v1360_v62  ;;  %5999 = vrsqrt.f32 %v1323_v49  ;;  %v1269_v1 = vpop.xlane.xlu1 %1268  ;;  %vm1354_vm7 = vweird.f32 %v1323_v49 }
 0x24a   :  { %v1309_v33 = vmul.f32 %v1269_v1, %v7121_v31  ;;  %5944 = vset.pattern.permute.xlu0 %v10745_v16 }
 0x24b   :  { %v1362_v55 = vsub.f32 1.5, %v1361_v42  ;;  %856 = vperm.xlu0 %5944, %v7182_v9  }
 0x24c   :  { %v1325_v8 = vadd.f32 1e-05, %v1309_v33 }
 0x24d   :  { %5931 = vset.pattern.permute.xlu2 %v10741_v39  ;;  %v1363_v35 = vmul.f32 %v5998_v45, %v1362_v55 }
 0x24e   :  { %6001 = vrsqrt.f32 %v1325_v8  ;;  %739 = vperm.xlu2 %5931, %v7194_v63   ;;  %vm1374_vm10 = vweird.f32 %v1325_v8 }
 0x24f   :  { %v6000_v57 = vpop.eup %5999  ;;  %v1367_v1 = vsel %vm1366_vm5, %v5998_v45, %v1363_v35  ;;  %v7312_v45 = vld [vmem:[%s10614_s29 + $0x40] sm:$0xff]  ;;  %vm1731_vm5 = vcmask 31744  }
 0x250   :  { %v1349_v14 = vmul.f32 %v6000_v57, %v1323_v49  ;;  %v1500_v37 = vmul.f32 %v1367_v1, %v7153_v22  ;;  %vm1355_vm6 = vweird.f32 %v6000_v57  ;;  %343 = vperm.xlu1 %5942, %v7312_v45  }
 0x251   :  { %v1260_v53 = vpop.xlane.xlu2 %1259  ;;  %vm1356_vm8 = vmor %vm1354_vm7, %vm1355_vm6 }
 0x252   :  { %v1350_v62 = vmul.f32 %v6000_v57, %v1349_v14  ;;  %v1306_v42 = vmul.f32 %v1260_v53, %v7121_v31  ;;  %v1519_v22 = vmul.f32 %v7220_v28, %v1500_v37 }
 0x253   :  { %840 = vperm.xlu0 %5944, %v7288_v5  }
 0x254   :  { %v6002_v33 = vpop.eup %6001  ;;  %v1351_v23 = vmul.f32 0.5, %v1350_v62  ;;  %v1322_v3 = vadd.f32 1e-05, %v1306_v42  ;;  %v1538_v42 = vadd.f32 %v7227_v6, %v1519_v22 }
 0x255   :  { %v1369_v26 = vmul.f32 %v6002_v33, %v1325_v8  ;;  %vm1375_vm9 = vweird.f32 %v6002_v33 }
 0x256   :  { %v1352_v56 = vsub.f32 1.5, %v1351_v23  ;;  %6003 = vrsqrt.f32 %v1322_v3  ;;  %5932 = vset.pattern.permute.xlu2 %v10733_v19  ;;  %vm1376_vm11 = vmor %vm1374_vm10, %vm1375_vm9  ;;  %vm1344_vm13 = vweird.f32 %v1322_v3 }
 0x257   :  { %v1370_v44 = vmul.f32 %v6002_v33, %v1369_v26  ;;  %351 = vperm.xlu2 %5932, %v7238_v15  }
 0x258   :  { %v1353_v55 = vmul.f32 %v6000_v57, %v1352_v56  ;;  %5945 = vset.pattern.permute.xlu1 %v10742_v4 }
 0x259   :  { %v1371_v14 = vmul.f32 0.5, %v1370_v44  ;;  %v7307_v35 = vpop.permute.xlu2 %253  ;;  %614 = vperm.xlu1 %5945, %v7288_v5  }
 0x25a   :  { %10746 = vst [vmem:[#allocation95_spill] sm:$0xff] %v7307_v35  ;;  %v1357_v23 = vsel %vm1356_vm8, %v6000_v57, %v1353_v55 }
 0x25b   :  { %v1372_v53 = vsub.f32 1.5, %v1371_v14  ;;  %v1499_v49 = vmul.f32 %v1357_v23, %v7160_v48  ;;  %5957 = vset.pattern.permute.xlu0 %v10732_v47  ;;  %v1554_v14 = vpack.c.bf16 %v1538_v42, %v1538_v42  ;;  %v7328_v48 = vld [vmem:[%s10738_s1 + $0x8] sm:$0xff]  }
 0x25c   :  { %v6004_v26 = vpop.eup %6003  ;;  %957 = vperm.xlu0 %5957, %v7188_v36   ;;  %10748 = vst [vmem:[#allocation97_spill] sm:$0xff] %v7328_v48 }
 0x25d   :  { %v1373_v62 = vmul.f32 %v6002_v33, %v1372_v53  ;;  %v1339_v56 = vmul.f32 %v6004_v26, %v1322_v3  ;;  %vm1345_vm12 = vweird.f32 %v6004_v26  ;;  %v10475_v53 = vunpack.c.l.bf16 %v7328_v48 }
 0x25e   :  { %vm1346_vm14 = vmor %vm1344_vm13, %vm1345_vm12  ;;  %v1570_v42 = vunpack.c.l.bf16 %v1554_v14 }
 0x25f   :  { %v1377_v1 = vsel %vm1376_vm11, %v6002_v33, %v1373_v62  ;;  %v1340_v44 = vmul.f32 %v6004_v26, %v1339_v56  ;;  %355 = vperm.xlu2 %5932, %v7288_v5   ;;  %v1518_v33 = vmul.f32 %v7220_v28, %v1499_v49  ;;  %v10472_v56 = vunpack.c.h.bf16 %v7328_v48 }
 0x260   :  { %v1501_v37 = vmul.f32 %v1377_v1, %v7167_v11 }
 0x261   :  { %v1341_v57 = vmul.f32 0.5, %v1340_v44  ;;  %v7322_v55 = vpop.permute.xlu2 %367  ;;  %v1537_v1 = vadd.f32 %v7227_v6, %v1518_v33  ;;  %5947 = vset.pattern.permute.xlu1 %v10745_v16 }
 0x262   :  { %10747 = vst [vmem:[#allocation96_spill] sm:$0xff] %v7322_v55  ;;  %v1520_v8 = vmul.f32 %v7220_v28, %v1501_v37  ;;  %848 = vperm.xlu1 %5947, %v7205_v43  }
 0x263   :  { %v1342_v22 = vsub.f32 1.5, %v1341_v57 }
 0x264   :  { %v1539_v11 = vadd.f32 %v7227_v6, %v1520_v8  ;;  %949 = vperm.xlu0 %5957, %v7238_v15   ;;  %v1909_v8 = vunpack.c.l.b16 %v1554_v14 }
 0x265   :  { %v1343_v23 = vmul.f32 %v6004_v26, %v1342_v22  ;;  %v1586_v22 = vmul.f32 %v10475_v53, %v1570_v42  ;;  %v5786_v53 = vld [vmem:[%s10349_s11] sm:$0xff] }
 0x266   :  { %v1555_v62 = vpack.c.bf16 %v1539_v11, %v1539_v11  ;;  %v1553_v11 = vpack.c.bf16 %v1537_v1, %v1537_v1 }
 0x267   :  { %v1347_v49 = vsel %vm1346_vm14, %v6004_v26, %v1343_v23  ;;  %5933 = vset.pattern.permute.xlu2 %v10742_v4 }
 0x268   :  { %v1498_v44 = vmul.f32 %v1347_v49, %v7174_v61  ;;  %622 = vperm.xlu2 %5933, %v7205_v43   ;;  %v1571_v37 = vunpack.c.l.bf16 %v1555_v62  ;;  %v1910_v3 = vunpack.c.l.b16 %v1555_v62  ;;  %v7351_v61 = vld [vmem:[%s10738_s1] sm:$0xff]   ;;  %v1569_v1 = vunpack.c.l.bf16 %v1553_v11 }
 0x269   :  { %v7341_v57 = vpop.permute.xlu2 %371  ;;  %10750 = vst [vmem:[#allocation99_spill] sm:$0xff] %v7351_v61  ;;  %v10474_v49 = vunpack.c.l.bf16 %v7351_v61 }
 0x26a   :  { %10749 = vst [vmem:[#allocation98_spill] sm:$0xff] %v7341_v57  ;;  %v1587_v33 = vmul.f32 %v10472_v56, %v1571_v37  ;;  %v1517_v26 = vmul.f32 %v7220_v28, %v1498_v44  ;;  %v7354_v23 = vpack.c.b16 %v1910_v3, %v1909_v8  ;;  %v10473_v28 = vunpack.c.h.bf16 %v7351_v61  ;;  %5949 = vset.pattern.permute.xlu1 %v10734_v13 }
 0x26b   :  { %v10752_v44 = vmov 8   ;;  %v1908_v3 = vunpack.c.l.b16 %v1553_v11  ;;  %489 = vperm.xlu1 %5949, %v7312_v45   ;;  %v107_v11 = vld [vmem:[%s10348_s4] sm:$0x3] }
 0x26c   :  { %10751 = vst [vmem:[#allocation100_spill] sm:$0xff] %v7354_v23  ;;  %v1593_v62 = vpack.c.bf16 %v1587_v33, %v1586_v22  ;;  %v1536_v14 = vadd.f32 %v7227_v6, %v1517_v26  ;;  %5962 = vset.pattern.permute.xlu0 %v10752_v44  ;;  %v1585_v22 = vmul.f32 %v10473_v28, %v1569_v1  ;;  %v7509_v23 = vld [vmem:[%s10644_s3 + $0x70] sm:$0xff] }
 0x26d   :  { %1082 = vperm.xlu0 %5962, %v7182_v9   ;;  %v127_v61 = vmul.f32 %v7509_v23, %v6607_v60 }
 0x26e   :  { %1606 = vmatpush.bf16.msra.mxu0 %v1593_v62  ;;  %v1552_v42 = vpack.c.bf16 %v1536_v14, %v1536_v14 }
 0x270   :  { %5934 = vset.pattern.permute.xlu2 %v10745_v16  ;;  %v1568_v37 = vunpack.c.l.bf16 %v1552_v42  ;;  %v1907_v56 = vunpack.c.l.b16 %v1552_v42 }
 0x271   :  { %852 = vperm.xlu2 %5934, %v7194_v63   ;;  %v7364_v6 = vpop.permute.xlu2 %243 }
 0x272   :  { %10753 = vst [vmem:[#allocation101_spill] sm:$0xff] %v7364_v6  ;;  %v1584_v8 = vmul.f32 %v10474_v49, %v1568_v37  ;;  %v7370_v33 = vpack.c.b16 %v1908_v3, %v1907_v56  ;;  %v7388_v56 = vld [vmem:[%s10614_s29 + $0x48] sm:$0xff]  ;;  %v7441_v49 = vpop.permute.xlu1 %359 }
 0x273   :  { %5951 = vset.pattern.permute.xlu1 %v10741_v39  ;;  %10770 = vst [vmem:[#allocation118_spill] sm:$0xff] %v7441_v49 }
 0x274   :  { %10754 = vst [vmem:[#allocation102_spill] sm:$0xff] %v7370_v33  ;;  %v1592_v26 = vpack.c.bf16 %v1585_v22, %v1584_v8  ;;  %723 = vperm.xlu1 %5951, %v7238_v15   ;;  %v7417_v8 = vpop.permute.xlu0 %258  ;;  %v420_v33 = vrot.slane %v7509_v23, 1 }
 0x275   :  { %1066 = vperm.xlu0 %5962, %v7288_v5   ;;  %10762 = vst [vmem:[#allocation110_spill] sm:$0xff] %v7417_v8 }
 0x276   :  { %1607 = vmatpush.bf16.msra.mxu0 %v1592_v26  ;;  %v7523_v31 = vsel %vm422_vm1, %v10501_v51, %v420_v33 }
 0x279   :  { %5935 = vset.pattern.permute.xlu2 %v10735_v38  ;;  %5521 = vmatmul.msk.bf16.vlgmr.msra.gmra.mxu0 %vm1596_vm15, %v107_v11  ;;  %v7380_v62 = vpop.permute.xlu2 %513 }
 0x27a   :  { %10755 = vst [vmem:[#allocation103_spill] sm:$0xff] %v7380_v62  ;;  %223 = vperm.xlu2 %5935, %v7312_v45  }
 0x27c   :  { %5953 = vset.pattern.permute.xlu1 %v10732_v47  ;;  %v7423_v26 = vpop.permute.xlu0 %248 }
 0x27d   :  { %961 = vperm.xlu1 %5953, %v7205_v43   ;;  %10764 = vst [vmem:[#allocation112_spill] sm:$0xff] %v7423_v26 }
 0x281   :  { %v7390_v14 = vpop.permute.xlu2 %363 }
 0x282   :  { %10756 = vst [vmem:[#allocation104_spill] sm:$0xff] %v7390_v14  ;;  %228 = vperm.xlu2 %5935, %v7388_v56  }
 0x285   :  { %5955 = vset.pattern.permute.xlu1 %v10742_v4 }
 0x286   :  { %606 = vperm.xlu1 %5955, %v7388_v56  }
 0x289   :  { %v7395_v38 = vpop.permute.xlu2 %626 }
 0x28a   :  { %10757 = vst [vmem:[#allocation105_spill] sm:$0xff] %v7395_v38  ;;  %5937 = vset.pattern.permute.xlu2 %v10734_v13 }
 0x28b   :  { %501 = vperm.xlu2 %5937, %v7288_v5  }
 0x28e   :  { %5958 = vset.pattern.permute.xlu1 %v10752_v44 }
 0x28f   :  { %1070 = vperm.xlu1 %5958, %v7188_v36  }
 0x291   :  { %v7401_v42 = vpop.permute.xlu2 %233 }
 0x292   :  { %10758 = vst [vmem:[#allocation106_spill] sm:$0xff] %v7401_v42 }
 0x293   :  { %5938 = vset.pattern.permute.xlu2 %v10741_v39 }
 0x294   :  { %731 = vperm.xlu2 %5938, %v7188_v36  }
 0x299   :  { %v7406_v1 = vpop.permute.xlu2 %238 }
 0x29a   :  { %10759 = vst [vmem:[#allocation107_spill] sm:$0xff] %v7406_v1 }
 0x29c   :  { %5941 = vset.pattern.permute.xlu2 %v10732_v47 }
 0x29d   :  { %969 = vperm.xlu2 %5941, %v7182_v9  }
 0x2a1   :  { %v7411_v37 = vpop.permute.xlu2 %509 }
 0x2a2   :  { %10760 = vst [vmem:[#allocation108_spill] sm:$0xff] %v7411_v37 }
 0x2a5   :  { %5943 = vset.pattern.permute.xlu2 %v10733_v19  ;;  %v7429_v19 = vpop.permute.xlu0 %517 }
 0x2a6   :  { %347 = vperm.xlu2 %5943, %v7388_v56   ;;  %10766 = vst [vmem:[#allocation114_spill] sm:$0xff] %v7429_v19 }
 0x2a9   :  { %v7415_v3 = vpop.permute.xlu2 %739 }
 0x2aa   :  { %10761 = vst [vmem:[#allocation109_spill] sm:$0xff] %v7415_v3 }
 0x2ad   :  { %v7435_v28 = vpop.permute.xlu0 %505 }
 0x2ae   :  { %5946 = vset.pattern.permute.xlu2 %v10745_v16  ;;  %10768 = vst [vmem:[#allocation116_spill] sm:$0xff] %v7435_v28 }
 0x2af   :  { %844 = vperm.xlu2 %5946, %v7188_v36  }
 0x2b1   :  { %v7421_v22 = vpop.permute.xlu2 %351 }
 0x2b2   :  { %10763 = vst [vmem:[#allocation111_spill] sm:$0xff] %v7421_v22 }
 0x2b5   :  { %v7455_v17 = vpop.permute.xlu0 %497 }
 0x2b6   :  { %10771 = vst [vmem:[#allocation119_spill] sm:$0xff] %v7455_v17 }
 0x2b7   :  { %5948 = vset.pattern.permute.xlu2 %v10752_v44 }
 0x2b8   :  { %1078 = vperm.xlu2 %5948, %v7194_v63   ;;  %v5787_v63 = vld [vmem:[%s10349_s11 + $0x8] sm:$0xff] }
 0x2b9   :  { %v7427_v9 = vpop.permute.xlu2 %355  ;;  %1639 = vmatpush.bf16.msra.mxu1 %v5787_v63  ;;  %v7461_v63 = vpop.permute.xlu1 %965 }
 0x2ba   :  { %10765 = vst [vmem:[#allocation113_spill] sm:$0xff] %v7427_v9 }
 0x2bb   :  { %10773 = vst [vmem:[#allocation121_spill] sm:$0xff] %v7461_v63 }
 0x2bd   :  { %1640 = vmatpush.bf16.msra.mxu1 %v5786_v53  ;;  %v7464_v20 = vpop.permute.xlu0 %743 }
 0x2be   :  { %10774 = vst [vmem:[#allocation122_spill] sm:$0xff] %v7464_v20 }
 0x2c0   :  { %5950 = vset.pattern.permute.xlu2 %v10734_v13  ;;  %v5789_v13 = vld [vmem:[%s10350_s12 + $0x8] sm:$0xff] }
 0x2c1   :  { %493 = vperm.xlu2 %5950, %v7388_v56   ;;  %1672 = vmatpush.bf16.msra.mxu3 %v5789_v13 }
 0x2c2   :  { %v7433_v11 = vpop.permute.xlu2 %622  ;;  %2024 = vmatpush.bf16.msra.mxu2 %v5789_v13  ;;  %v7469_v13 = vpop.permute.xlu1 %343 }
 0x2c3   :  { %10767 = vst [vmem:[#allocation115_spill] sm:$0xff] %v7433_v11 }
 0x2c4   :  { %10776 = vst [vmem:[#allocation124_spill] sm:$0xff] %v7469_v13 }
 0x2c5   :  { %1673 = vmatpush.bf16.msra.mxu3 %v5788_v2  ;;  %v7475_v53 = vpop.permute.xlu0 %735 }
 0x2c6   :  { %2025 = vmatpush.bf16.msra.mxu2 %v5788_v2  ;;  %10778 = vst [vmem:[#allocation126_spill] sm:$0xff] %v7475_v53  ;;  %v7480_v2 = vld [vmem:[%s10644_s3 + $0x60] sm:$0xff] }
 0x2c7   :  { %v10485_v10 = vrot.slane %v7480_v2, 7 }
 0x2c9   :  { %5952 = vset.pattern.permute.xlu2 %v10741_v39 }
 0x2ca   :  { %727 = vperm.xlu2 %5952, %v7288_v5  }
 0x2cb   :  { %v7439_v36 = vpop.permute.xlu2 %852  ;;  %v7487_v40 = vpop.permute.xlu1 %614 }
 0x2cc   :  { %10769 = vst [vmem:[#allocation117_spill] sm:$0xff] %v7439_v36 }
 0x2cd   :  { %10779 = vst [vmem:[#allocation127_spill] sm:$0xff] %v7487_v40  ;;  %v7501_v59 = vpop.permute.xlu0 %630 }
 0x2ce   :  { %10781 = vst [vmem:[#allocation129_spill] sm:$0xff] %v7501_v59 }
 0x2d2   :  { %5954 = vset.pattern.permute.xlu2 %v10742_v4 }
 0x2d3   :  { %602 = vperm.xlu2 %5954, %v7312_v45  }
 0x2d4   :  { %v7459_v58 = vpop.permute.xlu2 %223 }
 0x2d5   :  { %10772 = vst [vmem:[#allocation120_spill] sm:$0xff] %v7459_v58  ;;  %v7534_v51 = vpop.permute.xlu0 %618 }
 0x2d6   :  { %10785 = vst [vmem:[#allocation131_spill] sm:$0xff] %v7534_v51 }
 0x2db   :  { %5956 = vset.pattern.permute.xlu2 %v10745_v16 }
 0x2dc   :  { %836 = vperm.xlu2 %5956, %v7238_v15   ;;  %v7467_v24 = vpop.permute.xlu2 %228 }
 0x2dd   :  { %10775 = vst [vmem:[#allocation123_spill] sm:$0xff] %v7467_v24 }
 0x2e4   :  { %5959 = vset.pattern.permute.xlu2 %v10752_v44 }
 0x2e5   :  { %1074 = vperm.xlu2 %5959, %v7205_v43   ;;  %v7473_v4 = vpop.permute.xlu2 %501  ;;  %v142_v43 = vrot.slane %v7485_v32, 7 }
 0x2e6   :  { %10777 = vst [vmem:[#allocation125_spill] sm:$0xff] %v7473_v4  ;;  %v10786_v4 = vld [vmem:[#allocation73_spill] sm:$0xff] }
 0x2e7   :  { %v7496_v27 = vsel %vm147_vm0, %v10485_v10, %v142_v43  ;;  %v7512_v10 = vpop.permute.xlu1 %848  ;;  %v10787_v9 = vrot.slane %v10786_v4, 7  ;;  %v7555_v4 = vld [vmem:[%s10644_s3 + $0x58] sm:$0xff] }
 0x2e8   :  { %v179_v34 = vmul.f32 %v6586_v54, %v7496_v27  ;;  %10782 = vst [vmem:[#allocation130_spill] sm:$0xff] %v7512_v10 }
 0x2e9   :  { %10789 = vst [vmem:[#allocation132_spill] sm:$0xff] %v7555_v4 }
 0x2ea   :  { %v275_v48 = vmul.f32 %v7307_v35, %v179_v34  ;;  %v388_v34 = vmul.f32 %v7322_v55, %v308_v21  ;;  %v454_v35 = vmul.f32 %v6636_v12, %v7523_v31  ;;  %v7545_v21 = vld [vmem:[%s10644_s3 + $0x50] sm:$0xff]  ;;  %v140_v55 = vrot.slane %v7555_v4, 7 }
 0x2ec   :  { %v291_v40 = vadd.f32 %v275_v48, %v127_v61  ;;  %v534_v48 = vmul.f32 %v7380_v62, %v454_v35  ;;  %v10513_v35 = vrot.slane %v7545_v21, 7 }
 0x2ed   :  { %5961 = vset.pattern.permute.xlu2 %v10741_v39 }
 0x2ee   :  { %719 = vperm.xlu2 %5961, %v7388_v56   ;;  %v7499_v30 = vpop.permute.xlu2 %731  ;;  %v404_v1 = vadd.f32 %v388_v34, %v291_v40 }
 0x2ef   :  { %10780 = vst [vmem:[#allocation128_spill] sm:$0xff] %v7499_v30 }
 0x2f6   :  { %5964 = vset.pattern.permute.xlu2 %v10745_v16  ;;  %v1609_v13 = vpop.f32.mrf.mxu0 }
 0x2f7   :  { %v1613_v58 = vpack.c.bf16 %v1609_v13, %v1609_v13  ;;  %828 = vperm.xlu2 %5964, %v7312_v45   ;;  %v7527_v24 = vpop.permute.xlu2 %969  ;;  %v7540_v13 = vsel %vm147_vm0, %v142_v43, %v10787_v9  ;;  %v10790_v9 = vld [vmem:[#allocation69_spill] sm:$0xff] }
 0x2f8   :  { %10784 = vst [vmem:[#allocation36_spill] sm:$0xff] %v7527_v24  ;;  %v567_v61 = vmul.f32 %v6659_v0, %v7540_v13  ;;  %v10791_v43 = vrot.slane %v10790_v9, 1  ;;  %v7572_v24 = vpop.permute.xlu0 %610 }
 0x2f9   :  { %5530 = vmatmul.msk.bf16.vlgmr.msra.gmra.mxu1 %vm1154_vm2, %v1613_v58  ;;  %5539 = vmatmul.msk.bf16.vlgmr.msra.gmra.mxu3 %vm1154_vm2, %v1613_v58  ;;  %v7550_v58 = vpop.permute.xlu1 %489  ;;  %10793 = vst [vmem:[#allocation133_spill] sm:$0xff] %v7572_v24 }
 0x2fa   :  { %10788 = vst [vmem:[#allocation73_spill] sm:$0xff] %v7550_v58  ;;  %v7561_v40 = vsel %vm422_vm1, %v420_v33, %v10791_v43  ;;  %v550_v58 = vadd.f32 %v534_v48, %v404_v1  ;;  %v647_v18 = vmul.f32 %v7395_v38, %v567_v61  ;;  %v7578_v33 = vsel %vm147_vm0, %v10513_v35, %v140_v55 }
 0x2fb   :  { %v680_v9 = vmul.f32 %v6665_v50, %v7561_v40  ;;  %10794 = vst [vmem:[#allocation134_spill] sm:$0xff] %v7578_v33  ;;  %v177_v48 = vmul.f32 %v6586_v54, %v7578_v33  ;;  %v418_v61 = vrot.slane %v7480_v2, 1  ;;  %v10521_v35 = vrot.slane %v7555_v4, 1 }
 0x2fc   :  { %v663_v43 = vadd.f32 %v647_v18, %v550_v58  ;;  %v7594_v18 = vld [vmem:[%s10644_s3 + $0x78] sm:$0xff] }
 0x2fd   :  { %v906_v58 = vmul.f32 %v7594_v18, %v6726_v29 }
 0x2fe   :  { %v1611_v34 = vpop.f32.mrf.mxu0 }
 0x2ff   :  { %5966 = vset.pattern.permute.xlu2 %v10752_v44  ;;  %v10795_v34 = vld [vmem:[#allocation77_spill] sm:$0xff]  ;;  %v986_v33 = vmul.f32 %v7461_v63, %v906_v58 }
 0x300   :  { %1062 = vperm.xlu2 %5966, %v7238_v15   ;;  %v7566_v62 = vpop.permute.xlu2 %347  ;;  %v760_v15 = vmul.f32 %v7415_v3, %v680_v9  ;;  %v125_v3 = vmul.f32 %v6607_v60, %v7480_v2 }
 0x301   :  { %10792 = vst [vmem:[#allocation69_spill] sm:$0xff] %v7566_v62  ;;  %v793_v62 = vmul.f32 %v6709_v52, %v10795_v34  ;;  %v7583_v1 = vpop.permute.xlu1 %723 }
 0x302   :  { %10796 = vst [vmem:[#allocation77_spill] sm:$0xff] %v7583_v1  ;;  %v776_v38 = vadd.f32 %v760_v15, %v663_v43  ;;  %v273_v43 = vmul.f32 %v7364_v6, %v177_v48  ;;  %v7613_v1 = vpop.permute.xlu0 %856  ;;  %v1019_v48 = vmul.f32 %v7618_v25, %v7030_v7 }
 0x303   :  { %v873_v24 = vmul.f32 %v7439_v36, %v793_v62  ;;  %v306_v62 = vmul.f32 %v10783_v41, %v7555_v4  ;;  %v7610_v36 = vsel %vm422_vm1, %v10521_v35, %v418_v61  ;;  %10799 = vst [vmem:[#allocation137_spill] sm:$0xff] %v7613_v1  ;;  %v10800_v35 = vrot.slane %v7480_v2, 7 }
 0x304   :  { %10798 = vst [vmem:[#allocation136_spill] sm:$0xff] %v7610_v36  ;;  %v289_v6 = vadd.f32 %v273_v43, %v125_v3 }
 0x305   :  { %v889_v15 = vadd.f32 %v873_v24, %v776_v38  ;;  %v452_v24 = vmul.f32 %v6636_v12, %v7610_v36  ;;  %v386_v38 = vmul.f32 %v7441_v49, %v306_v62  ;;  %v7629_v58 = vsel %vm147_vm0, %v140_v55, %v10800_v35 }
 0x306   :  { %v565_v49 = vmul.f32 %v6659_v0, %v7629_v58  ;;  %v10803_v55 = vrot.slane %v7485_v32, 1 }
 0x307   :  { %v1002_v63 = vadd.f32 %v986_v33, %v889_v15  ;;  %v532_v43 = vmul.f32 %v7435_v28, %v452_v24  ;;  %v402_v62 = vadd.f32 %v386_v38, %v289_v6  ;;  %v7656_v24 = vld [vmem:[%s10677_s0] ss:$0 sm:$0xff]  ;;  %v307_v28 = vmul.f32 %v10783_v41, %v7480_v2 }
 0x308   :  { %5968 = vset.pattern.permute.xlu2 %v10732_v47  ;;  %v7645_v35 = vsel %vm422_vm1, %v418_v61, %v10803_v55  ;;  %v645_v6 = vmul.f32 %v7534_v51, %v565_v49  ;;  %v791_v49 = vmul.f32 %v6709_v52, %v7496_v27  ;;  %v178_v55 = vmul.f32 %v6586_v54, %v7629_v58 }
 0x309   :  { %945 = vperm.xlu2 %5968, %v7388_v56   ;;  %v7599_v9 = vpop.permute.xlu2 %844  ;;  %v7632_v1 = vpop.permute.xlu1 %961  ;;  %v548_v20 = vadd.f32 %v532_v43, %v402_v62 }
 0x30a   :  { %10797 = vst [vmem:[#allocation135_spill] sm:$0xff] %v7599_v9  ;;  %v7647_v15 = vpop.permute.xlu0 %840 }
 0x30b   :  { %10801 = vst [vmem:[#allocation138_spill] sm:$0xff] %v7632_v1  ;;  %v661_v62 = vadd.f32 %v645_v6, %v548_v20  ;;  %v126_v20 = vmul.f32 %v6607_v60, %v7485_v32 }
 0x30c   :  { %10804 = vst [vmem:[#allocation140_spill] sm:$0xff] %v7647_v15 }
 0x311   :  { %5970 = vset.pattern.permute.xlu2 %v10752_v44 }
 0x312   :  { %1058 = vperm.xlu2 %5970, %v7388_v56   ;;  %v7635_v4 = vpop.permute.xlu2 %1078  ;;  %v7675_v51 = vpop.permute.xlu0 %957 }
 0x313   :  { %10802 = vst [vmem:[#allocation139_spill] sm:$0xff] %v7635_v4  ;;  %v1099_v3 = vmul.f32 %v7635_v4, %v1019_v48  ;;  %v678_v48 = vmul.f32 %v6665_v50, %v7645_v35  ;;  %v904_v4 = vmul.f32 %v6726_v29, %v7485_v32 }
 0x314   :  { %10808 = vst [vmem:[#allocation144_spill] sm:$0xff] %v7675_v51 }
 0x315   :  { %v1115_v33 = vadd.f32 %v1099_v3, %v1002_v63  ;;  %v7663_v63 = vpop.permute.xlu1 %606  ;;  %v758_v43 = vmul.f32 %v7499_v30, %v678_v48  ;;  %v274_v48 = vmul.f32 %v7423_v26, %v178_v55  ;;  %v453_v30 = vmul.f32 %v6636_v12, %v7645_v35 }
 0x316   :  { %10807 = vst [vmem:[#allocation143_spill] sm:$0xff] %v7663_v63 }
 0x317   :  { %v1131_v36 = vadd.f32 %v7509_v23, %v1115_v33  ;;  %v774_v33 = vadd.f32 %v758_v43, %v661_v62  ;;  %v984_v43 = vmul.f32 %v7675_v51, %v904_v4  ;;  %v1017_v62 = vmul.f32 %v7618_v25, %v7523_v31 }
 0x318   :  { %v533_v55 = vmul.f32 %v7411_v37, %v453_v30  ;;  %v792_v30 = vmul.f32 %v6709_v52, %v7540_v13 }
 0x319   :  { %v7659_v38 = vadd.f32 %v7656_v24, %v1131_v36  ;;  %v871_v36 = vmul.f32 %v7599_v9, %v791_v49  ;;  %v387_v9 = vmul.f32 %v7390_v14, %v307_v28  ;;  %v679_v28 = vmul.f32 %v6665_v50, %v7523_v31 }
 0x31b   :  { %10805 = vst [vmem:[#allocation141_spill] sm:$0xff] %v7659_v38  ;;  %v7661_v61 = vpop.permute.xlu2 %493  ;;  %v1197_v3 = vsel %vm1154_vm2, %v7659_v38, 0.0  ;;  %v887_v6 = vadd.f32 %v871_v36, %v774_v33  ;;  %v290_v38 = vadd.f32 %v274_v48, %v126_v20  ;;  %v566_v33 = vmul.f32 %v6659_v0, %v7496_v27 }
 0x31c   :  { %10806 = vst [vmem:[#allocation142_spill] sm:$0xff] %v7661_v61  ;;  %1198 = vadd.xlane.f32.xlu0 %v1197_v3 }
 0x31d   :  { %v7687_v49 = vpop.permute.xlu1 %1070  ;;  %v1000_v63 = vadd.f32 %v984_v43, %v887_v6  ;;  %v403_v4 = vadd.f32 %v387_v9, %v290_v38  ;;  %v646_v26 = vmul.f32 %v7433_v11, %v566_v33  ;;  %v759_v6 = vmul.f32 %v7475_v53, %v679_v28  ;;  %v10846_v11 = vld [vmem:[#allocation140_spill] sm:$0xff] }
 0x31e   :  { %10810 = vst [vmem:[#allocation146_spill] sm:$0xff] %v7687_v49  ;;  %v1097_v61 = vmul.f32 %v7687_v49, %v1017_v62  ;;  %v872_v38 = vmul.f32 %v7512_v10, %v792_v30  ;;  %v1018_v43 = vmul.f32 %v7618_v25, %v7561_v40 }
 0x31f   :  { %v549_v15 = vadd.f32 %v533_v55, %v403_v4 }
 0x320   :  { %v1113_v36 = vadd.f32 %v1097_v61, %v1000_v63  ;;  %v905_v61 = vmul.f32 %v7509_v23, %v6726_v29 }
 0x321   :  { %v662_v48 = vadd.f32 %v646_v26, %v549_v15 }
 0x322   :  { %v1129_v20 = vadd.f32 %v1113_v36, %v7480_v2  ;;  %v985_v15 = vmul.f32 %v7632_v1, %v905_v61 }
 0x323   :  { %v775_v9 = vadd.f32 %v759_v6, %v662_v48 }
 0x324   :  { %v7682_v3 = vpop.permute.xlu2 %727  ;;  %v7706_v27 = vadd.f32 %v7656_v24, %v1129_v20 }
 0x325   :  { %10809 = vst [vmem:[#allocation145_spill] sm:$0xff] %v7682_v3  ;;  %v888_v26 = vadd.f32 %v872_v38, %v775_v9  ;;  %v5977_v9 = vld [vmem:[%s10351_s13] ss:$0 sm:$0xff] }
 0x326   :  { %v1191_v31 = vsel %vm1154_vm2, %v7706_v27, 0.0 }
 0x327   :  { %v1001_v62 = vadd.f32 %v985_v15, %v888_v26 }
 0x32d   :  { %v7696_v51 = vpop.permute.xlu2 %602 }
 0x32e   :  { %10811 = vst [vmem:[#allocation147_spill] sm:$0xff] %v7696_v51 }
 0x336   :  { %v7711_v63 = vpop.permute.xlu2 %836 }
 0x337   :  { %10812 = vst [vmem:[#allocation148_spill] sm:$0xff] %v7711_v63 }
 0x33b   :  { %1192 = vadd.xlane.f32.xlu2 %v1191_v31 }
 0x33f   :  { %v7718_v55 = vpop.permute.xlu2 %1074 }
 0x340   :  { %10813 = vst [vmem:[#allocation149_spill] sm:$0xff] %v7718_v55  ;;  %v1098_v33 = vmul.f32 %v7718_v55, %v1018_v43 }
 0x342   :  { %v1114_v4 = vadd.f32 %v1098_v33, %v1001_v62 }
 0x344   :  { %v1130_v36 = vadd.f32 %v1114_v4, %v7485_v32 }
 0x346   :  { %v7723_v28 = vadd.f32 %v7656_v24, %v1130_v36 }
 0x348   :  { %v1194_v20 = vsel %vm1154_vm2, %v7723_v28, 0.0 }
 0x349   :  { %1195 = vadd.xlane.f32.xlu0 %v1194_v20 }
 0x376   :  { %v1642_v48 = vpop.f32.mrf.mxu1 }
 0x377   :  { %v1680_v6 = vsel %vm1679_vm3, %v1642_v48, -inf }
 0x378   :  { %v1681_v30 = vrot.slane %v1680_v6, 4 }
 0x37a   :  { %v1682_v38 = vmax.f32 %v1680_v6, %v1681_v30 }
 0x37c   :  { %v1683_v61 = vrot.slane %v1682_v38, 2  ;;  %v1675_v31 = vpop.f32.mrf.mxu3 }
 0x37d   :  { %v1676_v32 = vadd.f32 %v5977_v9, %v1675_v31  ;;  %v123_v31 = vmul.f32 %v6607_v60, %v7545_v21 }
 0x37e   :  { %v1684_v26 = vmax.f32 %v1682_v38, %v1683_v61  ;;  %v1644_v15 = vpop.f32.mrf.mxu1  ;;  %v416_v61 = vrot.slane %v7545_v21, 1 }
 0x37f   :  { %5540 = vmatpush.msk.msrb.mxu3 %vm1744_vm4, %v1676_v32 }
 0x380   :  { %v1685_v43 = vrot.slane %v1684_v26, 1 }
 0x382   :  { %v1686_v62 = vmax.f32 %v1684_v26, %v1685_v43 }
 0x384   :  { %v1687_v33 = vsub.f32 %v1642_v48, %v1686_v62  ;;  %v1677_v4 = vpop.f32.mrf.mxu3  ;;  %v455_v48 = vmul.f32 %v6636_v12, %v7561_v40  ;;  %v568_v40 = vmul.f32 %v6659_v0, %v10795_v34 }
 0x386   :  { %v1688_v36 = vmul.f32 1.442695, %v1687_v33  ;;  %v535_v15 = vmul.f32 %v7429_v19, %v455_v48 }
 0x388   :  { %6005 = vpow2.f32 %v1688_v36 }
 0x38e   :  { %v6006_v20 = vpop.eup %6005 }
 0x38f   :  { %v1690_v55 = vsel %vm1679_vm3, %v6006_v20, 0.0 }
 0x390   :  { %v1691_v49 = vrot.slane %v1690_v55, 4 }
 0x392   :  { %v1692_v1 = vadd.f32 %v1691_v49, %v1690_v55 }
 0x394   :  { %v1693_v6 = vrot.slane %v1692_v1, 2 }
 0x396   :  { %v1694_v30 = vadd.f32 %v1693_v6, %v1692_v1  ;;  %v681_v6 = vmul.f32 %v6665_v50, %v7030_v7 }
 0x398   :  { %v1695_v10 = vrot.slane %v1694_v30, 1 }
 0x39a   :  { %v1696_v53 = vadd.f32 %v1695_v10, %v1694_v30  ;;  %v180_v10 = vmul.f32 %v6586_v54, %v7540_v13  ;;  %v648_v30 = vmul.f32 %v7501_v59, %v568_v40 }
 0x39c   :  { %6007 = vrcp.f32 %v1696_v53  ;;  %v276_v13 = vmul.f32 %v7417_v8, %v180_v10 }
 0x3a2   :  { %v6008_v9 = vpop.eup %6007 }
 0x3a3   :  { %v1698_v38 = vmul.f32 %v6008_v9, %v6006_v20  ;;  %v10818_v9 = vrot.slane %v7545_v21, 7 }
 0x3a5   :  { %1699 = vxpose.xlu1.b32.start.end [1/1] (short) (narrow) %v1698_v38, 32 }
 0x3f8   :  { %5960 = vset.pattern.permute.xlu1 %v10741_v39  ;;  %v7746_v39 = vld [vmem:[%s10644_s3 + $0x48] sm:$0xff] }
 0x3f9   :  { %v138_v53 = vrot.slane %v7746_v39, 7 }
 0x3fb   :  { %v7792_v38 = vsel %vm147_vm0, %v138_v53, %v10818_v9 }
 0x417   :  { %715 = vperm.xlu1 %5960, %v7312_v45  }
 0x41f   :  { %5963 = vset.pattern.permute.xlu1 %v10732_v47 }
 0x420   :  { %953 = vperm.xlu1 %5963, %v7288_v5   ;;  %v309_v5 = vmul.f32 %v7509_v23, %v10783_v41 }
 0x422   :  { %v389_v23 = vmul.f32 %v7341_v57, %v309_v5  ;;  %v563_v5 = vmul.f32 %v6659_v0, %v7792_v38 }
 0x428   :  { %5965 = vset.pattern.permute.xlu1 %v10745_v16  ;;  %v10814_v16 = vld [vmem:[#allocation42_spill] sm:$0xff] }
 0x429   :  { %832 = vperm.xlu1 %5965, %v7388_v56   ;;  %v10815_v1 = vrot.slane %v10814_v16, 7  ;;  %v128_v56 = vmul.f32 %v7594_v18, %v6607_v60  ;;  %v7797_v16 = vpop.permute.xlu2 %719 }
 0x42a   :  { %10819 = vst [vmem:[#allocation42_spill] sm:$0xff] %v7797_v16 }
 0x42b   :  { %v292_v55 = vadd.f32 %v276_v13, %v128_v56  ;;  %v10821_v13 = vld [vmem:[#allocation72_spill] sm:$0xff] }
 0x42d   :  { %v405_v26 = vadd.f32 %v389_v23, %v292_v55  ;;  %v7802_v23 = vpop.permute.xlu0 %949 }
 0x42f   :  { %v551_v20 = vadd.f32 %v535_v15, %v405_v26 }
 0x431   :  { %5967 = vset.pattern.permute.xlu1 %v10732_v47  ;;  %v7755_v47 = vsel %vm147_vm0, %v10815_v1, %v138_v53  ;;  %v10820_v1 = vld [vmem:[#allocation122_spill] sm:$0xff]  ;;  %v664_v7 = vadd.f32 %v648_v30, %v551_v20  ;;  %v10823_v53 = vld [vmem:[#allocation132_spill] sm:$0xff] }
 0x432   :  { %941 = vperm.xlu1 %5967, %v7312_v45   ;;  %v175_v49 = vmul.f32 %v6586_v54, %v7755_v47  ;;  %v761_v56 = vmul.f32 %v10820_v1, %v681_v6  ;;  %v10824_v48 = vrot.slane %v10823_v53, 1  ;;  %v10828_v6 = vld [vmem:[#allocation36_spill] sm:$0xff] }
 0x434   :  { %v271_v32 = vmul.f32 %v7401_v42, %v175_v49  ;;  %v794_v49 = vmul.f32 %v6709_v52, %v10821_v13  ;;  %v777_v40 = vadd.f32 %v761_v56, %v664_v7 }
 0x435   :  { %v7828_v7 = vpop.permute.xlu0 %1082 }
 0x436   :  { %v287_v33 = vadd.f32 %v271_v32, %v123_v31  ;;  %v7808_v31 = vsel %vm422_vm1, %v416_v61, %v10824_v48  ;;  %10832 = vst [vmem:[#allocation132_spill] sm:$0xff] %v7828_v7 }
 0x437   :  { %v676_v15 = vmul.f32 %v6665_v50, %v7808_v31 }
 0x43a   :  { %5969 = vset.pattern.permute.xlu1 %v10752_v44  ;;  %v304_v44 = vmul.f32 %v7746_v39, %v10783_v41 }
 0x43b   :  { %1054 = vperm.xlu1 %5969, %v7312_v45   ;;  %v10816_v45 = vld [vmem:[#allocation51_spill] sm:$0xff] }
 0x43c   :  { %v10817_v43 = vrot.slane %v10816_v45, 1  ;;  %v384_v4 = vmul.f32 %v7421_v22, %v304_v44  ;;  %10822 = vst [vmem:[#allocation51_spill] sm:$0xff] %v7802_v23  ;;  %v10825_v44 = vld [vmem:[#allocation133_spill] sm:$0xff]  ;;  %v6202_v45 = vld [vmem:[%s10644_s3] sm:$0xff] }
 0x43d   :  { %v643_v26 = vmul.f32 %v10825_v44, %v563_v5  ;;  %v10830_v5 = vld [vmem:[#allocation76_spill] sm:$0xff]  ;;  %v7890_v57 = vpop.permute.xlu0 %1066 }
 0x43e   :  { %v7778_v62 = vsel %vm422_vm1, %v10817_v43, %v416_v61  ;;  %v400_v10 = vadd.f32 %v384_v4, %v287_v33  ;;  %v907_v43 = vmul.f32 %v6202_v45, %v6726_v29  ;;  %v10826_v33 = vld [vmem:[#allocation137_spill] sm:$0xff]  ;;  %v1020_v13 = vmul.f32 %v7618_v25, %v10830_v5 }
 0x43f   :  { %v450_v36 = vmul.f32 %v6636_v12, %v7778_v62  ;;  %v874_v4 = vmul.f32 %v10826_v33, %v794_v49  ;;  %v10827_v61 = vld [vmem:[#allocation77_spill] sm:$0xff] }
 0x440   :  { %v756_v20 = vmul.f32 %v10827_v61, %v676_v15  ;;  %v987_v30 = vmul.f32 %v10828_v6, %v907_v43  ;;  %v1100_v15 = vmul.f32 %v7828_v7, %v1020_v13  ;;  %v10855_v61 = vld [vmem:[#allocation48_spill] sm:$0xff] }
 0x441   :  { %v530_v34 = vmul.f32 %v7455_v17, %v450_v36  ;;  %v890_v9 = vadd.f32 %v874_v4, %v777_v40  ;;  %v10833_v4 = vld [vmem:[#allocation136_spill] sm:$0xff] }
 0x442   :  { %v1015_v5 = vmul.f32 %v7618_v25, %v10833_v4  ;;  %10844 = vst [vmem:[#allocation136_spill] sm:$0xff] %v7890_v57 }
 0x443   :  { %v546_v32 = vadd.f32 %v530_v34, %v400_v10  ;;  %v10829_v10 = vld [vmem:[#allocation134_spill] sm:$0xff] }
 0x444   :  { %v789_v34 = vmul.f32 %v6709_v52, %v10829_v10 }
 0x445   :  { %v659_v36 = vadd.f32 %v643_v26, %v546_v32  ;;  %v902_v32 = vmul.f32 %v6726_v29, %v10823_v53  ;;  %v1003_v26 = vadd.f32 %v987_v30, %v890_v9 }
 0x446   :  { %v869_v49 = vmul.f32 %v7711_v63, %v789_v34 }
 0x447   :  { %v772_v56 = vadd.f32 %v756_v20, %v659_v36  ;;  %v982_v43 = vmul.f32 %v7802_v23, %v902_v32  ;;  %v1116_v40 = vadd.f32 %v1100_v15, %v1003_v26  ;;  %v176_v32 = vmul.f32 %v6586_v54, %v7792_v38  ;;  %v10835_v15 = vld [vmem:[#allocation107_spill] sm:$0xff] }
 0x448   :  { %v124_v26 = vmul.f32 %v6607_v60, %v10823_v53 }
 0x449   :  { %v1715_v55 = vpop.trf.xlu1  ;;  %v885_v45 = vadd.f32 %v869_v49, %v772_v56  ;;  %v1132_v34 = vadd.f32 %v7594_v18, %v1116_v40 }
 0x44a   :  { %5541 = vmatmul.msk.f32.vlgmr.msrb.gmra.mxu3 %vm1731_vm5, %v1715_v55  ;;  %v7825_v55 = vpop.permute.xlu2 %828 }
 0x44b   :  { %10831 = vst [vmem:[#allocation72_spill] sm:$0xff] %v7825_v55  ;;  %v998_v20 = vadd.f32 %v982_v43, %v885_v45  ;;  %v7843_v9 = vadd.f32 %v7656_v24, %v1132_v34  ;;  %v272_v45 = vmul.f32 %v10835_v15, %v176_v32  ;;  %v305_v43 = vmul.f32 %v10783_v41, %v7545_v21  ;;  %v10839_v32 = vld [vmem:[#allocation127_spill] sm:$0xff] }
 0x44c   :  { %v451_v34 = vmul.f32 %v6636_v12, %v7808_v31 }
 0x44d   :  { %v1200_v49 = vsel %vm1154_vm2, %v7843_v9, 0.0  ;;  %v288_v40 = vadd.f32 %v272_v45, %v124_v26  ;;  %v677_v26 = vmul.f32 %v6665_v50, %v10833_v4  ;;  %v122_v45 = vmul.f32 %v7746_v39, %v6607_v60 }
 0x44f   :  { %v757_v4 = vmul.f32 %v7682_v3, %v677_v26 }
 0x451   :  { %v1716_v48 = vpop.trf.xlu1 }
 0x452   :  { %5542 = vmatmul.msk.f32.gmra.mxu3 %vm1731_vm5, %v1716_v48  ;;  %v7838_v36 = vpop.permute.xlu2 %1062 }
 0x453   :  { %10834 = vst [vmem:[#allocation134_spill] sm:$0xff] %v7838_v36  ;;  %v1095_v48 = vmul.f32 %v7838_v36, %v1015_v5  ;;  %v10836_v5 = vld [vmem:[#allocation113_spill] sm:$0xff] }
 0x455   :  { %v1111_v30 = vadd.f32 %v1095_v48, %v998_v20  ;;  %v385_v20 = vmul.f32 %v10836_v5, %v305_v43  ;;  %v10840_v43 = vld [vmem:[#allocation123_spill] sm:$0xff] }
 0x457   :  { %v1127_v56 = vadd.f32 %v1111_v30, %v7545_v21  ;;  %v401_v48 = vadd.f32 %v385_v20, %v288_v40  ;;  %v10837_v30 = vld [vmem:[#allocation125_spill] sm:$0xff]  ;;  %v7878_v40 = vld [vmem:[%s10644_s3 + $0x40] sm:$0xff] }
 0x459   :  { %v1717_v33 = vpop.trf.xlu1 }
 0x45a   :  { %5543 = vmatmul.msk.f32.gmra.mxu3 %vm1731_vm5, %v1717_v33  ;;  %v7850_v33 = vadd.f32 %v7656_v24, %v1127_v56  ;;  %v564_v56 = vmul.f32 %v6659_v0, %v10829_v10  ;;  %v303_v10 = vmul.f32 %v7878_v40, %v10783_v41  ;;  %v7892_v6 = vpop.permute.xlu2 %945 }
 0x45c   :  { %v1185_v18 = vsel %vm1154_vm2, %v7850_v33, 0.0  ;;  %v644_v1 = vmul.f32 %v10839_v32, %v564_v56  ;;  %v10842_v56 = vld [vmem:[#allocation69_spill] sm:$0xff] }
 0x45d   :  { %v383_v19 = vmul.f32 %v10842_v56, %v303_v10  ;;  %v10848_v10 = vld [vmem:[#allocation43_spill] sm:$0xff] }
 0x45e   :  { %v173_v3 = vmul.f32 %v6586_v54, %v10848_v10  ;;  %v6204_v10 = vld [vmem:[%s10644_s3 + $0x38] sm:$0xff] }
 0x461   :  { %v1718_v13 = vpop.trf.xlu1 }
 0x462   :  { %5544 = vmatmul.msk.f32.gmra.mxu3 %vm1731_vm5, %v1718_v13  ;;  %v531_v13 = vmul.f32 %v10837_v30, %v451_v34 }
 0x464   :  { %v547_v7 = vadd.f32 %v531_v13, %v401_v48  ;;  %v790_v48 = vmul.f32 %v6709_v52, %v7629_v58  ;;  %v903_v58 = vmul.f32 %v6726_v29, %v7480_v2  ;;  %v10851_v2 = vld [vmem:[#allocation120_spill] sm:$0xff] }
 0x465   :  { %1201 = vadd.xlane.f32.xlu1 %v1200_v49  ;;  %v10838_v49 = vld [vmem:[#allocation50_spill] sm:$0xff] }
 0x466   :  { %v660_v34 = vadd.f32 %v644_v1, %v547_v7  ;;  %10845 = vst [vmem:[#allocation50_spill] sm:$0xff] %v7892_v6  ;;  %v870_v37 = vmul.f32 %v10846_v11, %v790_v48  ;;  %v1016_v1 = vmul.f32 %v7618_v25, %v7645_v35  ;;  %v10850_v11 = vld [vmem:[#allocation143_spill] sm:$0xff]  ;;  %v561_v30 = vmul.f32 %v6659_v0, %v10838_v49 }
 0x468   :  { %v773_v36 = vadd.f32 %v757_v4, %v660_v34  ;;  %v1096_v48 = vmul.f32 %v7890_v57, %v1016_v1  ;;  %v302_v1 = vmul.f32 %v6204_v10, %v10783_v41  ;;  %v10853_v10 = vld [vmem:[#allocation124_spill] sm:$0xff] }
 0x46a   :  { %v886_v34 = vadd.f32 %v870_v37, %v773_v36  ;;  %v1199_v36 = vpop.xlane.xlu0 %1198 }
 0x46d   :  { %1186 = vadd.xlane.f32.xlu1 %v1185_v18  ;;  %v174_v18 = vmul.f32 %v6586_v54, %v10838_v49  ;;  %v787_v49 = vmul.f32 %v6709_v52, %v7755_v47 }
 0x46f   :  { %v270_v59 = vmul.f32 %v10840_v43, %v174_v18  ;;  %v10843_v18 = vld [vmem:[#allocation55_spill] sm:$0xff] }
 0x470   :  { %v449_v8 = vmul.f32 %v6636_v12, %v10843_v18 }
 0x471   :  { %v286_v13 = vadd.f32 %v270_v59, %v122_v45  ;;  %v10847_v59 = vld [vmem:[#allocation142_spill] sm:$0xff]  ;;  %v562_v45 = vmul.f32 %v6659_v0, %v7755_v47 }
 0x472   :  { %v529_v26 = vmul.f32 %v10847_v59, %v449_v8  ;;  %v121_v8 = vmul.f32 %v7878_v40, %v6607_v60  ;;  %v1196_v5 = vpop.xlane.xlu0 %1195 }
 0x473   :  { %v399_v7 = vadd.f32 %v383_v19, %v286_v13  ;;  %v642_v63 = vmul.f32 %v10850_v11, %v562_v45  ;;  %v675_v19 = vmul.f32 %v6665_v50, %v7778_v62  ;;  %v269_v13 = vmul.f32 %v10851_v2, %v173_v3  ;;  %v7928_v3 = vld [vmem:[%s10352_s14 + $0x10] sm:$0xff] }
 0x475   :  { %v545_v35 = vadd.f32 %v529_v26, %v399_v7  ;;  %v7923_v26 = vld [vmem:[%s10352_s14 + $0x18] sm:$0xff]  ;;  %v755_v57 = vmul.f32 %v7797_v16, %v675_v19 }
 0x476   :  { %1809 = vmatpush.msrb.mxu1 %v7923_v26 }
 0x477   :  { %v658_v45 = vadd.f32 %v642_v63, %v545_v35  ;;  %v448_v63 = vmul.f32 %v6636_v12, %v10855_v61  ;;  %v1014_v35 = vmul.f32 %v7618_v25, %v7808_v31  ;;  %v10858_v31 = vld [vmem:[#allocation73_spill] sm:$0xff] }
 0x478   :  { %1810 = vmatpush.msrb.mxu1 %v7928_v3 }
 0x479   :  { %v771_v19 = vadd.f32 %v755_v57, %v658_v45  ;;  %v674_v45 = vmul.f32 %v6665_v50, %v10843_v18 }
 0x489   :  { %v7882_v20 = vpop.permute.xlu1 %715 }
 0x48a   :  { %10841 = vst [vmem:[#allocation76_spill] sm:$0xff] %v7882_v20 }
 0x492   :  { %v7904_v14 = vpop.permute.xlu1 %953 }
 0x493   :  { %10849 = vst [vmem:[#allocation55_spill] sm:$0xff] %v7904_v14  ;;  %v983_v4 = vmul.f32 %v7904_v14, %v903_v58  ;;  %v7918_v58 = vpop.permute.xlu2 %1058  ;;  %v10854_v14 = vld [vmem:[#allocation90_spill] sm:$0xff] }
 0x494   :  { %10852 = vst [vmem:[#allocation43_spill] sm:$0xff] %v7918_v58  ;;  %v1224_v32 = vmul.f32 %v10854_v14, %v1199_v36 }
 0x495   :  { %v999_v37 = vadd.f32 %v983_v4, %v886_v34  ;;  %v901_v34 = vmul.f32 %v6726_v29, %v7545_v21  ;;  %v788_v4 = vmul.f32 %v6709_v52, %v7792_v38 }
 0x497   :  { %v1112_v7 = vadd.f32 %v1096_v48, %v999_v37  ;;  %v285_v48 = vadd.f32 %v269_v13, %v121_v8  ;;  %v382_v37 = vmul.f32 %v10853_v10, %v302_v1  ;;  %v981_v8 = vmul.f32 %v7892_v6, %v901_v34 }
 0x499   :  { %v1128_v23 = vadd.f32 %v1112_v7, %v10823_v53  ;;  %v398_v1 = vadd.f32 %v382_v37, %v285_v48  ;;  %v10857_v53 = vld [vmem:[#allocation141_spill] sm:$0xff]  ;;  %v528_v7 = vmul.f32 %v10858_v31, %v448_v63  ;;  %v641_v63 = vmul.f32 %v7696_v51, %v561_v30 }
 0x49a   :  { %v7952_v36 = vsub.f32 %v10857_v53, %v1224_v32  ;;  %v1223_v32 = vmul.f32 %v10854_v14, %v1196_v5  ;;  %v900_v30 = vmul.f32 %v7746_v39, %v6726_v29 }
 0x49b   :  { %v7944_v21 = vpop.permute.xlu1 %832  ;;  %v7947_v38 = vadd.f32 %v7656_v24, %v1128_v23  ;;  %v1094_v23 = vmul.f32 %v7918_v58, %v1014_v35  ;;  %v544_v37 = vadd.f32 %v528_v7, %v398_v1 }
 0x49c   :  { %10856 = vst [vmem:[#allocation48_spill] sm:$0xff] %v7944_v21  ;;  %v868_v13 = vmul.f32 %v7944_v21, %v788_v4  ;;  %v1193_v4 = vpop.xlane.xlu2 %1192  ;;  %v1256_v48 = vmul.f32 %v7952_v36, %v7952_v36  ;;  %v7974_v5 = vsub.f32 %v7723_v28, %v1223_v32  ;;  %v7998_v32 = vld [vmem:[%s10352_s14 + $0x8] sm:$0xff] }
 0x49d   :  { %v1188_v61 = vsel %vm1154_vm2, %v7947_v38, 0.0  ;;  %v1222_v35 = vmul.f32 %v10854_v14, %v1193_v4  ;;  %v657_v1 = vadd.f32 %v641_v63, %v544_v37  ;;  %1811 = vmatpush.msrb.mxu1 %v7998_v32 }
 0x49e   :  { %v884_v57 = vadd.f32 %v868_v13, %v771_v19  ;;  %1189 = vadd.xlane.f32.xlu2 %v1188_v61  ;;  %v754_v19 = vmul.f32 %v7882_v20, %v674_v45  ;;  %v867_v61 = vmul.f32 %v7825_v55, %v787_v49 }
 0x49f   :  { %v7984_v7 = vsub.f32 %v7706_v27, %v1222_v35 }
 0x4a0   :  { %v997_v34 = vadd.f32 %v981_v8, %v884_v57  ;;  %v1300_v8 = vsel %vm1154_vm2, %v1256_v48, 0.0  ;;  %v1255_v57 = vmul.f32 %v7974_v5, %v7974_v5 }
 0x4a1   :  { %v1254_v4 = vmul.f32 %v7984_v7, %v7984_v7 }
 0x4a2   :  { %v1110_v6 = vadd.f32 %v1094_v23, %v997_v34  ;;  %v770_v23 = vadd.f32 %v754_v19, %v657_v1  ;;  %v1297_v37 = vsel %vm1154_vm2, %v1255_v57, 0.0  ;;  %v8021_v1 = vld [vmem:[%s10353_s5] sm:$0xff] }
 0x4a3   :  { %v1294_v35 = vsel %vm1154_vm2, %v1254_v4, 0.0 }
 0x4a4   :  { %v7970_v13 = vpop.permute.xlu1 %941  ;;  %v1126_v18 = vadd.f32 %v7746_v39, %v1110_v6  ;;  %v1013_v39 = vmul.f32 %v7618_v25, %v7778_v62  ;;  %v883_v34 = vadd.f32 %v867_v61, %v770_v23  ;;  %v8008_v25 = vld [vmem:[%s10352_s14] sm:$0xff] }
 0x4a5   :  { %10859 = vst [vmem:[#allocation141_spill] sm:$0xff] %v7970_v13  ;;  %v980_v45 = vmul.f32 %v7970_v13, %v900_v30  ;;  %1812 = vmatpush.msrb.mxu1 %v8008_v25 }
 0x4a6   :  { %1301 = vadd.xlane.f32.xlu2 %v1300_v8  ;;  %v7980_v47 = vadd.f32 %v7656_v24, %v1126_v18 }
 0x4a7   :  { %v996_v63 = vadd.f32 %v980_v45, %v883_v34 }
 0x4a8   :  { %v1182_v6 = vsel %vm1154_vm2, %v7980_v47, 0.0 }
 0x4a9   :  { %1183 = vadd.xlane.f32.xlu1 %v1182_v6 }
 0x4ad   :  { %v8000_v48 = vpop.permute.xlu1 %1054 }
 0x4ae   :  { %10860 = vst [vmem:[#allocation150_spill] sm:$0xff] %v8000_v48  ;;  %v1093_v49 = vmul.f32 %v8000_v48, %v1013_v39  ;;  %1298 = vadd.xlane.f32.xlu2 %v1297_v37  ;;  %v8039_v39 = vld [vmem:[%s10353_s5 + $0x10] sm:$0xff] }
 0x4b0   :  { %v1109_v62 = vadd.f32 %v1093_v49, %v996_v63 }
 0x4b1   :  { %1295 = vadd.xlane.f32.xlu1 %v1294_v35 }
 0x4b2   :  { %v1125_v19 = vadd.f32 %v7878_v40, %v1109_v62  ;;  %v8028_v40 = vld [vmem:[%s10353_s5 + $0x8] sm:$0xff] }
 0x4b4   :  { %v8014_v18 = vadd.f32 %v7656_v24, %v1125_v19  ;;  %v8053_v19 = vld [vmem:[%s10353_s5 + $0x18] sm:$0xff] }
 0x4b6   :  { %v1179_v8 = vsel %vm1154_vm2, %v8014_v18, 0.0 }
 0x4b7   :  { %1180 = vadd.xlane.f32.xlu0 %v1179_v8 }
 0x4cd   :  { %v1765_v30 = vpop.f32.mrf.mxu3 }
 0x4ce   :  { %v1777_v61 = vmul.f32 %v1765_v30, %v8021_v1 }
 0x4d0   :  { %5545 = vmatmul.msk.f32.vlgmr.msrb.gmra.mxu1 %vm1154_vm2, %v1777_v61 }
 0x4d5   :  { %v1768_v24 = vpop.f32.mrf.mxu3 }
 0x4d6   :  { %v1778_v23 = vmul.f32 %v1768_v24, %v8028_v40 }
 0x4d8   :  { %5546 = vmatmul.msk.f32.gmra.mxu1 %vm1154_vm2, %v1778_v23  ;;  %v1202_v6 = vpop.xlane.xlu1 %1201 }
 0x4d9   :  { %v1225_v57 = vmul.f32 %v10854_v14, %v1202_v6 }
 0x4db   :  { %v8034_v45 = vsub.f32 %v7843_v9, %v1225_v57 }
 0x4dd   :  { %v1771_v34 = vpop.f32.mrf.mxu3  ;;  %v1257_v4 = vmul.f32 %v8034_v45, %v8034_v45 }
 0x4de   :  { %v1779_v37 = vmul.f32 %v1771_v34, %v8039_v39 }
 0x4df   :  { %v1303_v63 = vsel %vm1154_vm2, %v1257_v4, 0.0 }
 0x4e0   :  { %5547 = vmatmul.msk.f32.gmra.mxu1 %vm1154_vm2, %v1779_v37  ;;  %1304 = vadd.xlane.f32.xlu0 %v1303_v63  ;;  %v1187_v49 = vpop.xlane.xlu1 %1186 }
 0x4e1   :  { %v1220_v62 = vmul.f32 %v10854_v14, %v1187_v49 }
 0x4e3   :  { %v8048_v35 = vsub.f32 %v7850_v33, %v1220_v62 }
 0x4e5   :  { %v1774_v8 = vpop.f32.mrf.mxu3  ;;  %v1252_v30 = vmul.f32 %v8048_v35, %v8048_v35 }
 0x4e6   :  { %v1780_v61 = vmul.f32 %v1774_v8, %v8053_v19 }
 0x4e7   :  { %v1288_v24 = vsel %vm1154_vm2, %v1252_v30, 0.0 }
 0x4e8   :  { %5548 = vmatmul.msk.f32.gmra.mxu1 %vm1154_vm2, %v1780_v61  ;;  %1289 = vadd.xlane.f32.xlu0 %v1288_v24 }
 0x511   :  { %v1190_v23 = vpop.xlane.xlu2 %1189 }
 0x512   :  { %v1221_v6 = vmul.f32 %v10854_v14, %v1190_v23 }
 0x514   :  { %v8062_v57 = vsub.f32 %v7947_v38, %v1221_v6 }
 0x516   :  { %v1253_v34 = vmul.f32 %v8062_v57, %v8062_v57 }
 0x518   :  { %v1291_v4 = vsel %vm1154_vm2, %v1253_v34, 0.0 }
 0x519   :  { %1292 = vadd.xlane.f32.xlu1 %v1291_v4  ;;  %v1302_v37 = vpop.xlane.xlu2 %1301 }
 0x51c   :  { %v1184_v63 = vpop.xlane.xlu1 %1183 }
 0x51d   :  { %v1219_v49 = vmul.f32 %v10854_v14, %v1184_v63 }
 0x51f   :  { %v8069_v62 = vsub.f32 %v7980_v47, %v1219_v49 }
 0x521   :  { %v1299_v8 = vpop.xlane.xlu2 %1298  ;;  %v1251_v30 = vmul.f32 %v8069_v62, %v8069_v62 }
 0x522   :  { %v1319_v61 = vmul.f32 %v1299_v8, %v10854_v14 }
 0x523   :  { %v1285_v24 = vsel %vm1154_vm2, %v1251_v30, 0.0 }
 0x524   :  { %v1335_v23 = vadd.f32 1e-05, %v1319_v61  ;;  %1286 = vadd.xlane.f32.xlu0 %v1285_v24  ;;  %v1296_v6 = vpop.xlane.xlu1 %1295 }
 0x525   :  { %v1318_v34 = vmul.f32 %v1296_v6, %v10854_v14 }
 0x526   :  { %6009 = vrsqrt.f32 %v1335_v23  ;;  %vm1474_vm7 = vweird.f32 %v1335_v23 }
 0x527   :  { %v1334_v4 = vadd.f32 1e-05, %v1318_v34 }
 0x529   :  { %6011 = vrsqrt.f32 %v1334_v4  ;;  %vm1464_vm10 = vweird.f32 %v1334_v4 }
 0x52a   :  { %v1181_v63 = vpop.xlane.xlu0 %1180 }
 0x52b   :  { %v1218_v49 = vmul.f32 %v10854_v14, %v1181_v63 }
 0x52c   :  { %v6010_v48 = vpop.eup %6009 }
 0x52d   :  { %v1469_v13 = vmul.f32 %v6010_v48, %v1335_v23  ;;  %v8078_v55 = vsub.f32 %v8014_v18, %v1218_v49  ;;  %vm1475_vm6 = vweird.f32 %v6010_v48 }
 0x52e   :  { %vm1476_vm8 = vmor %vm1474_vm7, %vm1475_vm6 }
 0x52f   :  { %v6012_v51 = vpop.eup %6011  ;;  %v1470_v8 = vmul.f32 %v6010_v48, %v1469_v13  ;;  %v1250_v30 = vmul.f32 %v8078_v55, %v8078_v55  ;;  %v1320_v13 = vmul.f32 %v1302_v37, %v10854_v14 }
 0x530   :  { %v1459_v61 = vmul.f32 %v6012_v51, %v1334_v4  ;;  %vm1465_vm9 = vweird.f32 %v6012_v51 }
 0x531   :  { %v1471_v24 = vmul.f32 0.5, %v1470_v8  ;;  %v1282_v6 = vsel %vm1154_vm2, %v1250_v30, 0.0  ;;  %vm1466_vm11 = vmor %vm1464_vm10, %vm1465_vm9  ;;  %v8088_v8 = vld [vmem:[%s10736_s25] ss:$0 sm:$0xff] }
 0x532   :  { %v1460_v20 = vmul.f32 %v6012_v51, %v1459_v61  ;;  %1283 = vadd.xlane.f32.xlu2 %v1282_v6 }
 0x533   :  { %v1472_v34 = vsub.f32 1.5, %v1471_v24 }
 0x534   :  { %v1461_v58 = vmul.f32 0.5, %v1460_v20 }
 0x535   :  { %v1473_v63 = vmul.f32 %v6010_v48, %v1472_v34 }
 0x536   :  { %v1462_v21 = vsub.f32 1.5, %v1461_v58  ;;  %v1336_v58 = vadd.f32 1e-05, %v1320_v13 }
 0x537   :  { %v1477_v49 = vsel %vm1476_vm8, %v6010_v48, %v1473_v63  ;;  %v8095_v48 = vld [vmem:[%s10737_s27] ss:$0 sm:$0xff] }
 0x538   :  { %v1511_v15 = vmul.f32 %v1477_v49, %v7974_v5  ;;  %v1463_v16 = vmul.f32 %v6012_v51, %v1462_v21  ;;  %6013 = vrsqrt.f32 %v1336_v58  ;;  %vm1484_vm13 = vweird.f32 %v1336_v58 }
 0x53a   :  { %v1530_v20 = vmul.f32 %v8088_v8, %v1511_v15  ;;  %v1467_v30 = vsel %vm1466_vm11, %v6012_v51, %v1463_v16 }
 0x53b   :  { %v1510_v23 = vmul.f32 %v1467_v30, %v7984_v7 }
 0x53c   :  { %v1549_v21 = vadd.f32 %v8095_v48, %v1530_v20 }
 0x53d   :  { %v1529_v5 = vmul.f32 %v8088_v8, %v1510_v23 }
 0x53e   :  { %v8100_v4 = vpack.c.bf16 %v1549_v21, %v1549_v21  ;;  %v6014_v7 = vpop.eup %6013 }
 0x53f   :  { %v1548_v37 = vadd.f32 %v8095_v48, %v1529_v5  ;;  %v1479_v24 = vmul.f32 %v6014_v7, %v1336_v58  ;;  %vm1485_vm12 = vweird.f32 %v6014_v7 }
 0x540   :  { %v2236_v16 = vunpack.c.l.b16 %v8100_v4  ;;  %vm1486_vm14 = vmor %vm1484_vm13, %vm1485_vm12 }
 0x541   :  { %v8102_v61 = vpack.c.bf16 %v1548_v37, %v1548_v37  ;;  %v1480_v6 = vmul.f32 %v6014_v7, %v1479_v24 }
 0x543   :  { %v2235_v51 = vunpack.c.l.b16 %v8102_v61  ;;  %v1481_v63 = vmul.f32 0.5, %v1480_v6 }
 0x545   :  { %v8106_v15 = vpack.c.b16 %v2236_v16, %v2235_v51  ;;  %v1482_v20 = vsub.f32 1.5, %v1481_v63 }
 0x547   :  { %v1483_v21 = vmul.f32 %v6014_v7, %v1482_v20 }
 0x549   :  { %v1487_v5 = vsel %vm1486_vm14, %v6014_v7, %v1483_v21 }
 0x54a   :  { %v1512_v44 = vmul.f32 %v1487_v5, %v7952_v36 }
 0x54c   :  { %v1531_v6 = vmul.f32 %v8088_v8, %v1512_v44  ;;  %v8116_v44 = vld [vmem:[%s10354_s8] sm:$0xff] }
 0x54d   :  { %v1814_v34 = vpop.f32.mrf.mxu1 }
 0x54e   :  { %v1550_v58 = vadd.f32 %v8095_v48, %v1531_v6  ;;  %v10861_v6 = vld [vmem:[#allocation91_spill] sm:$0xff] }
 0x553   :  { %v1305_v49 = vpop.xlane.xlu0 %1304 }
 0x554   :  { %v1321_v13 = vmul.f32 %v1305_v49, %v10854_v14 }
 0x555   :  { %v1817_v30 = vpop.f32.mrf.mxu1 }
 0x556   :  { %v1337_v23 = vadd.f32 1e-05, %v1321_v13 }
 0x558   :  { %6015 = vrsqrt.f32 %v1337_v23  ;;  %vm1494_vm7 = vweird.f32 %v1337_v23 }
 0x55b   :  { %v1290_v20 = vpop.xlane.xlu0 %1289 }
 0x55d   :  { %v1820_v37 = vpop.f32.mrf.mxu1 }
 0x55e   :  { %v6016_v51 = vpop.eup %6015 }
 0x55f   :  { %v1489_v16 = vmul.f32 %v6016_v51, %v1337_v23  ;;  %vm1495_vm6 = vweird.f32 %v6016_v51 }
 0x560   :  { %vm1496_vm8 = vmor %vm1494_vm7, %vm1495_vm6 }
 0x561   :  { %v1490_v24 = vmul.f32 %v6016_v51, %v1489_v16 }
 0x563   :  { %v1491_v17 = vmul.f32 0.5, %v1490_v24 }
 0x565   :  { %v1492_v11 = vsub.f32 1.5, %v1491_v17  ;;  %v1823_v63 = vpop.f32.mrf.mxu1 }
 0x566   :  { %1854 = vmatpush.msra.mxu1 %v1823_v63  ;;  %1888 = vmatpush.msrb.mxu0 %v1823_v63  ;;  %v10862_v63 = vunpack.c.l.bf16 %v10861_v6 }
 0x567   :  { %v1493_v49 = vmul.f32 %v6016_v51, %v1492_v11  ;;  %v1966_v11 = vpack.c.bf16 %v1550_v58, %v1550_v58  ;;  %v10863_v58 = vunpack.c.h.bf16 %v10861_v6 }
 0x568   :  { %1855 = vmatpush.msra.mxu1 %v1820_v37  ;;  %1889 = vmatpush.msrb.mxu0 %v1820_v37  ;;  %v1972_v37 = vunpack.c.l.bf16 %v8102_v61 }
 0x569   :  { %v1497_v7 = vsel %vm1496_vm8, %v6016_v51, %v1493_v49  ;;  %v1974_v21 = vunpack.c.l.bf16 %v1966_v11  ;;  %v6208_v51 = vld [vmem:[%s10349_s11] sm:$0xff]  ;;  %v2237_v16 = vunpack.c.l.b16 %v1966_v11 }
 0x56a   :  { %v1513_v13 = vmul.f32 %v1497_v7, %v8034_v45  ;;  %1856 = vmatpush.msra.mxu1 %v1817_v30  ;;  %1890 = vmatpush.msrb.mxu0 %v1817_v30  ;;  %v6207_v45 = vld [vmem:[%s10349_s11 + $0x8] sm:$0xff]  ;;  %v1316_v30 = vmul.f32 %v1290_v20, %v10854_v14  ;;  %v10864_v20 = vld [vmem:[#allocation93_spill] sm:$0xff] }
 0x56b   :  { %v1982_v49 = vmul.f32 %v10862_v63, %v1974_v21  ;;  %v10865_v11 = vunpack.c.l.bf16 %v10864_v20  ;;  %v8154_v21 = vld [vmem:[%s10354_s8 + $0x10] sm:$0xff] }
 0x56c   :  { %v1532_v17 = vmul.f32 %v8088_v8, %v1513_v13  ;;  %1857 = vmatpush.msra.mxu1 %v1814_v34  ;;  %1891 = vmatpush.msrb.mxu0 %v1814_v34  ;;  %v8129_v34 = vld [vmem:[%s10354_s8 + $0x8] sm:$0xff]  ;;  %v1973_v13 = vunpack.c.l.bf16 %v8100_v4  ;;  %v1332_v61 = vadd.f32 1e-05, %v1316_v30 }
 0x56d   :  { %5549 = vmatmul.msk.f32.vlgmr.msra.gmra.mxu1 %vm1154_vm2, %v8116_v44 }
 0x56e   :  { %v1551_v36 = vadd.f32 %v8095_v48, %v1532_v17  ;;  %2011 = vmatpush.bf16.msrb.mxu1 %v6207_v45  ;;  %v1980_v45 = vmul.f32 %v10865_v11, %v1972_v37  ;;  %6017 = vrsqrt.f32 %v1332_v61  ;;  %vm1444_vm10 = vweird.f32 %v1332_v61 }
 0x570   :  { %v1967_v23 = vpack.c.bf16 %v1551_v36, %v1551_v36 }
 0x572   :  { %v1975_v5 = vunpack.c.l.bf16 %v1967_v23  ;;  %2012 = vmatpush.bf16.msrb.mxu1 %v6208_v51  ;;  %v2238_v24 = vunpack.c.l.b16 %v1967_v23 }
 0x574   :  { %v1983_v7 = vmul.f32 %v10863_v58, %v1975_v5  ;;  %v8141_v17 = vpack.c.b16 %v2238_v24, %v2237_v16  ;;  %v8162_v5 = vld [vmem:[%s10354_s8 + $0x18] sm:$0xff] }
 0x575   :  { %5550 = vmatmul.msk.f32.gmra.mxu1 %vm1154_vm2, %v8129_v34 }
 0x576   :  { %2154 = vmatpush.msra.mxu1 %v7923_v26  ;;  %v1987_v36 = vpack.c.bf16 %v1983_v7, %v1982_v49  ;;  %v10866_v26 = vunpack.c.h.bf16 %v10864_v20 }
 0x578   :  { %2155 = vmatpush.msra.mxu1 %v7928_v3  ;;  %1992 = vmatpush.bf16.msra.mxu0 %v1987_v36  ;;  %v1981_v23 = vmul.f32 %v10866_v26, %v1973_v13  ;;  %v6018_v3 = vpop.eup %6017 }
 0x579   :  { %v1439_v30 = vmul.f32 %v6018_v3, %v1332_v61  ;;  %vm1445_vm9 = vweird.f32 %v6018_v3  ;;  %v8173_v61 = vld [vmem:[%s10355_s9] sm:$0x1] }
 0x57a   :  { %2156 = vmatpush.msra.mxu1 %v7998_v32  ;;  %v1986_v4 = vpack.c.bf16 %v1981_v23, %v1980_v45  ;;  %vm1446_vm11 = vmor %vm1444_vm10, %vm1445_vm9  ;;  %5553 = vmatmul.msk.f32.vlgmr.msrb.gmra.mxu0 %vm1154_vm2, %v8173_v61 }
 0x57b   :  { %v1440_v32 = vmul.f32 %v6018_v3, %v1439_v30 }
 0x57c   :  { %2157 = vmatpush.msra.mxu1 %v8008_v25  ;;  %1993 = vmatpush.bf16.msra.mxu0 %v1986_v4 }
 0x57d   :  { %5551 = vmatmul.msk.f32.gmra.mxu1 %vm1154_vm2, %v8154_v21  ;;  %v1441_v37 = vmul.f32 0.5, %v1440_v32 }
 0x57f   :  { %v1442_v25 = vsub.f32 1.5, %v1441_v37 }
 0x581   :  { %v1443_v6 = vmul.f32 %v6018_v3, %v1442_v25 }
 0x583   :  { %v1447_v63 = vsel %vm1446_vm11, %v6018_v3, %v1443_v6 }
 0x584   :  { %v1508_v36 = vmul.f32 %v1447_v63, %v8048_v35 }
 0x585   :  { %5552 = vmatmul.msk.f32.gmra.mxu1 %vm1154_vm2, %v8162_v5 }
 0x586   :  { %v1527_v26 = vmul.f32 %v8088_v8, %v1508_v36 }
 0x588   :  { %v1546_v35 = vadd.f32 %v8095_v48, %v1527_v26 }
 0x58a   :  { %v1962_v6 = vpack.c.bf16 %v1546_v35, %v1546_v35 }
 0x58c   :  { %v1293_v51 = vpop.xlane.xlu1 %1292 }
 0x58d   :  { %v1317_v16 = vmul.f32 %v1293_v51, %v10854_v14 }
 0x58f   :  { %v1333_v24 = vadd.f32 1e-05, %v1317_v16 }
 0x591   :  { %6019 = vrsqrt.f32 %v1333_v24  ;;  %vm1454_vm13 = vweird.f32 %v1333_v24 }
 0x597   :  { %v6020_v49 = vpop.eup %6019  ;;  %v1287_v58 = vpop.xlane.xlu0 %1286 }
 0x598   :  { %v1449_v7 = vmul.f32 %v6020_v49, %v1333_v24  ;;  %v1315_v13 = vmul.f32 %v1287_v58, %v10854_v14  ;;  %vm1455_vm12 = vweird.f32 %v6020_v49 }
 0x599   :  { %vm1456_vm14 = vmor %vm1454_vm13, %vm1455_vm12 }
 0x59a   :  { %v1450_v20 = vmul.f32 %v6020_v49, %v1449_v7  ;;  %v1331_v11 = vadd.f32 1e-05, %v1315_v13 }
 0x59c   :  { %v1451_v45 = vmul.f32 0.5, %v1450_v20  ;;  %6021 = vrsqrt.f32 %v1331_v11  ;;  %v1970_v20 = vunpack.c.l.bf16 %v1962_v6  ;;  %vm1434_vm7 = vweird.f32 %v1331_v11 }
 0x59e   :  { %v1452_v23 = vsub.f32 1.5, %v1451_v45  ;;  %v2233_v45 = vunpack.c.l.b16 %v1962_v6 }
 0x5a0   :  { %v1453_v4 = vmul.f32 %v6020_v49, %v1452_v23  ;;  %v10867_v23 = vld [vmem:[#allocation97_spill] sm:$0xff] }
 0x5a1   :  { %v10869_v35 = vunpack.c.h.bf16 %v10867_v23 }
 0x5a2   :  { %v6022_v3 = vpop.eup %6021  ;;  %v1457_v30 = vsel %vm1456_vm14, %v6020_v49, %v1453_v4  ;;  %v10868_v4 = vunpack.c.l.bf16 %v10867_v23 }
 0x5a3   :  { %v1509_v32 = vmul.f32 %v1457_v30, %v8062_v57  ;;  %v1429_v37 = vmul.f32 %v6022_v3, %v1331_v11  ;;  %vm1435_vm6 = vweird.f32 %v6022_v3 }
 0x5a4   :  { %v1978_v30 = vmul.f32 %v10868_v4, %v1970_v20  ;;  %vm1436_vm8 = vmor %vm1434_vm7, %vm1435_vm6 }
 0x5a5   :  { %v1528_v51 = vmul.f32 %v8088_v8, %v1509_v32  ;;  %v1430_v16 = vmul.f32 %v6022_v3, %v1429_v37  ;;  %v1284_v25 = vpop.xlane.xlu2 %1283 }
 0x5a6   :  { %v1314_v63 = vmul.f32 %v1284_v25, %v10854_v14 }
 0x5a7   :  { %v1431_v58 = vmul.f32 0.5, %v1430_v16  ;;  %v1547_v7 = vadd.f32 %v8095_v48, %v1528_v51 }
 0x5a8   :  { %v1330_v13 = vadd.f32 1e-05, %v1314_v63 }
 0x5a9   :  { %v1432_v24 = vsub.f32 1.5, %v1431_v58  ;;  %v1963_v36 = vpack.c.bf16 %v1547_v7, %v1547_v7 }
 0x5aa   :  { %6023 = vrsqrt.f32 %v1330_v13  ;;  %vm1424_vm10 = vweird.f32 %v1330_v13 }
 0x5ab   :  { %v1433_v49 = vmul.f32 %v6022_v3, %v1432_v24  ;;  %v1971_v57 = vunpack.c.l.bf16 %v1963_v36  ;;  %v2234_v26 = vunpack.c.l.b16 %v1963_v36 }
 0x5ad   :  { %v1979_v32 = vmul.f32 %v10869_v35, %v1971_v57  ;;  %v8186_v37 = vpack.c.b16 %v2234_v26, %v2233_v45  ;;  %v1437_v51 = vsel %vm1436_vm8, %v6022_v3, %v1433_v49 }
 0x5ae   :  { %v1507_v6 = vmul.f32 %v1437_v51, %v8069_v62 }
 0x5af   :  { %v1985_v16 = vpack.c.bf16 %v1979_v32, %v1978_v30  ;;  %v10870_v32 = vld [vmem:[#allocation99_spill] sm:$0xff] }
 0x5b0   :  { %v6024_v25 = vpop.eup %6023  ;;  %v1526_v11 = vmul.f32 %v8088_v8, %v1507_v6  ;;  %v10871_v51 = vunpack.c.l.bf16 %v10870_v32 }
 0x5b1   :  { %v1419_v63 = vmul.f32 %v6024_v25, %v1330_v13  ;;  %1994 = vmatpush.bf16.msra.mxu0 %v1985_v16  ;;  %vm1425_vm9 = vweird.f32 %v6024_v25  ;;  %v10872_v13 = vunpack.c.h.bf16 %v10870_v32 }
 0x5b2   :  { %vm1426_vm11 = vmor %vm1424_vm10, %vm1425_vm9  ;;  %v1545_v20 = vadd.f32 %v8095_v48, %v1526_v11 }
 0x5b3   :  { %v1420_v58 = vmul.f32 %v6024_v25, %v1419_v63 }
 0x5b4   :  { %v1961_v57 = vpack.c.bf16 %v1545_v20, %v1545_v20  ;;  %v10874_v20 = vld [vmem:[#allocation100_spill] sm:$0xff] }
 0x5b5   :  { %v1421_v7 = vmul.f32 0.5, %v1420_v58 }
 0x5b6   :  { %v1969_v23 = vunpack.c.l.bf16 %v1961_v57  ;;  %v2232_v35 = vunpack.c.l.b16 %v1961_v57 }
 0x5b7   :  { %v1422_v24 = vsub.f32 1.5, %v1421_v7 }
 0x5b8   :  { %v1977_v63 = vmul.f32 %v10872_v13, %v1969_v23  ;;  %v8217_v23 = vld [vmem:[%s10356_s15] sm:$0x1] }
 0x5b9   :  { %v1423_v36 = vmul.f32 %v6024_v25, %v1422_v24 }
 0x5bb   :  { %v1427_v45 = vsel %vm1426_vm11, %v6024_v25, %v1423_v36  ;;  %v10873_v36 = vld [vmem:[#allocation102_spill] sm:$0xff] }
 0x5bc   :  { %v1506_v3 = vmul.f32 %v1427_v45, %v8078_v55  ;;  %v6209_v55 = vld [vmem:[%s10348_s4] sm:$0x3] }
 0x5bd   :  { %v10875_v45 = vld [vmem:[#allocation94_spill] sm:$0xff] }
 0x5be   :  { %v1525_v49 = vmul.f32 %v8088_v8, %v1506_v3  ;;  %v10876_v3 = vld [vmem:[#allocation92_spill] sm:$0xff] }
 0x5c0   :  { %v1544_v26 = vadd.f32 %v8095_v48, %v1525_v49 }
 0x5c2   :  { %v1960_v62 = vpack.c.bf16 %v1544_v26, %v1544_v26 }
 0x5c4   :  { %v1968_v4 = vunpack.c.l.bf16 %v1960_v62  ;;  %v2231_v30 = vunpack.c.l.b16 %v1960_v62 }
 0x5c6   :  { %v1976_v16 = vmul.f32 %v10871_v51, %v1968_v4  ;;  %v8198_v6 = vpack.c.b16 %v2232_v35, %v2231_v30  ;;  %v10877_v51 = vld [vmem:[#allocation89_spill] sm:$0xff] }
 0x5c8   :  { %v1984_v25 = vpack.c.bf16 %v1977_v63, %v1976_v16 }
 0x5ca   :  { %1995 = vmatpush.bf16.msra.mxu0 %v1984_v25 }
 0x5cd   :  { %5558 = vmatmul.msk.bf16.vlgmr.msra.gmra.mxu0 %vm1596_vm15, %v6209_v55  ;;  %v10878_v55 = vld [vmem:[#allocation86_spill] sm:$0xff] }
 0x5ea   :  { %v1859_v8 = vpop.f32.mrf.mxu1 }
 0x5f2   :  { %v1862_v48 = vpop.f32.mrf.mxu1 }
 0x5f3   :  { %v1896_v24 = vpack.c.bf16 %v1862_v48, %v1859_v8 }
 0x5f7   :  { %v1893_v49 = vpop.f32.mrf.mxu0 }
 0x5f8   :  { %v1894_v4 = vadd.f32 %v1893_v49, %v8217_v23 }
 0x5fa   :  { %v1865_v58 = vpop.f32.mrf.mxu1  ;;  %v8220_v30 = vperm.slane %v1894_v4, 0  ;;  %v10882_v4 = vld [vmem:[#allocation68_spill] sm:$0xff] }
 0x602   :  { %v1868_v7 = vpop.f32.mrf.mxu1 }
 0x603   :  { %v1897_v11 = vpack.c.bf16 %v1868_v7, %v1865_v58 }
 0x605   :  { %1937 = vmatpush.bf16.msra.mxu3 %v1897_v11  ;;  %v10879_v11 = vld [vmem:[#allocation83_spill] sm:$0xff] }
 0x609   :  { %1938 = vmatpush.bf16.msra.mxu3 %v1896_v24 }
 0x60c   :  { %5554 = vmatmul.msk.bf16.vlgmr.msra.gmra.mxu3 %vm1154_vm2, %v10873_v36 }
 0x61c   :  { %5555 = vmatmul.msk.bf16.gmra.mxu3 %vm1154_vm2, %v10874_v20 }
 0x62c   :  { %5556 = vmatmul.msk.bf16.gmra.mxu3 %vm1154_vm2, %v10875_v45 }
 0x63c   :  { %5557 = vmatmul.msk.bf16.gmra.mxu3 %vm1154_vm2, %v10876_v3  ;;  %v10880_v3 = vld [vmem:[#allocation87_spill] sm:$0xff] }
 0x64a   :  { %v1997_v57 = vpop.f32.mrf.mxu0 }
 0x64b   :  { %v2001_v26 = vpack.c.bf16 %v1997_v57, %v1997_v57 }
 0x64d   :  { %5559 = vmatmul.msk.bf16.vlgmr.msrb.gmra.mxu1 %vm1154_vm2, %v2001_v26  ;;  %5560 = vmatmul.msk.bf16.vlgmr.msra.gmra.mxu2 %vm1154_vm2, %v2001_v26 }
 0x652   :  { %v1999_v62 = vpop.f32.mrf.mxu0 }
 0x68f   :  { %v1940_v35 = vpop.f32.mrf.mxu3 }
 0x690   :  { %v1941_v32 = vadd.f32 %v1940_v35, %v8220_v30 }
 0x692   :  { %v8224_v16 = vadd.f32 %v1941_v32, %v10877_v51 }
 0x694   :  { %v2302_v13 = vsel %vm1154_vm2, %v8224_v16, 0.0 }
 0x695   :  { %2303 = vadd.xlane.f32.xlu2 %v2302_v13 }
 0x697   :  { %v1942_v63 = vpop.f32.mrf.mxu3 }
 0x698   :  { %v1943_v25 = vadd.f32 %v1942_v63, %v8220_v30  ;;  %v10884_v63 = vld [vmem:[#allocation63_spill] sm:$0xff] }
 0x69a   :  { %v8230_v8 = vadd.f32 %v1943_v25, %v10878_v55 }
 0x69c   :  { %v2305_v48 = vsel %vm1154_vm2, %v8230_v8, 0.0 }
 0x69d   :  { %2306 = vadd.xlane.f32.xlu0 %v2305_v48 }
 0x69f   :  { %v1945_v58 = vpop.f32.mrf.mxu3 }
 0x6a0   :  { %v1946_v7 = vadd.f32 %v1945_v58, %v8220_v30 }
 0x6a2   :  { %v8236_v24 = vadd.f32 %v1946_v7, %v10879_v11 }
 0x6a4   :  { %v2308_v36 = vsel %vm1154_vm2, %v8236_v24, 0.0 }
 0x6a5   :  { %2309 = vadd.xlane.f32.xlu2 %v2308_v36 }
 0x6a7   :  { %v1947_v20 = vpop.f32.mrf.mxu3 }
 0x6a8   :  { %v1948_v45 = vadd.f32 %v1947_v20, %v8220_v30 }
 0x6aa   :  { %v8242_v49 = vadd.f32 %v1948_v45, %v10880_v3  ;;  %v6210_v45 = vld [vmem:[%s10351_s13] ss:$0 sm:$0xff] }
 0x6ac   :  { %10881 = vst [vmem:[#allocation91_spill] sm:$0xff] %v8242_v49  ;;  %v2311_v57 = vsel %vm1154_vm2, %v8242_v49, 0.0 }
 0x6ad   :  { %2312 = vadd.xlane.f32.xlu0 %v2311_v57 }
 0x6af   :  { %v1950_v26 = vpop.f32.mrf.mxu3 }
 0x6b0   :  { %v1951_v62 = vadd.f32 %v1950_v26, %v8220_v30 }
 0x6b2   :  { %v8248_v35 = vadd.f32 %v1951_v62, %v10882_v4 }
 0x6b4   :  { %10883 = vst [vmem:[#allocation93_spill] sm:$0xff] %v8248_v35  ;;  %v2314_v32 = vsel %vm1154_vm2, %v8248_v35, 0.0 }
 0x6b5   :  { %2315 = vadd.xlane.f32.xlu2 %v2314_v32 }
 0x6b7   :  { %v1952_v51 = vpop.f32.mrf.mxu3 }
 0x6b8   :  { %v1953_v13 = vadd.f32 %v1952_v51, %v8220_v30 }
 0x6ba   :  { %v8254_v25 = vadd.f32 %v1953_v13, %v10884_v63 }
 0x6bc   :  { %v2317_v55 = vsel %vm1154_vm2, %v8254_v25, 0.0 }
 0x6bd   :  { %2318 = vadd.xlane.f32.xlu0 %v2317_v55 }
 0x6ca   :  { %v2014_v48 = vpop.f32.mrf.mxu1 }
 0x6cb   :  { %v2031_v58 = vsel %vm1679_vm3, %v2014_v48, -inf }
 0x6cc   :  { %v2032_v7 = vrot.slane %v2031_v58, 4 }
 0x6ce   :  { %v2033_v11 = vmax.f32 %v2031_v58, %v2032_v7 }
 0x6d0   :  { %v2034_v36 = vrot.slane %v2033_v11, 2  ;;  %v2027_v20 = vpop.f32.mrf.mxu2 }
 0x6d1   :  { %v2028_v3 = vadd.f32 %v6210_v45, %v2027_v20 }
 0x6d2   :  { %v2035_v57 = vmax.f32 %v2033_v11, %v2034_v36  ;;  %v2016_v26 = vpop.f32.mrf.mxu1 }
 0x6d3   :  { %5561 = vmatpush.msk.msrb.mxu0 %vm1744_vm4, %v2028_v3 }
 0x6d4   :  { %v2036_v62 = vrot.slane %v2035_v57, 1 }
 0x6d6   :  { %v2037_v4 = vmax.f32 %v2035_v57, %v2036_v62 }
 0x6d8   :  { %v2038_v32 = vsub.f32 %v2014_v48, %v2037_v4  ;;  %v2029_v51 = vpop.f32.mrf.mxu2  ;;  %v1955_v48 = vpop.f32.mrf.mxu3 }
 0x6d9   :  { %v1956_v26 = vadd.f32 %v1955_v48, %v8220_v30 }
 0x6da   :  { %v2039_v13 = vmul.f32 1.442695, %v2038_v32 }
 0x6dc   :  { %6025 = vpow2.f32 %v2039_v13 }
 0x6e0   :  { %v1957_v32 = vpop.f32.mrf.mxu3 }
 0x6e1   :  { %v1958_v13 = vadd.f32 %v1957_v32, %v8220_v30 }
 0x6e2   :  { %v6026_v63 = vpop.eup %6025 }
 0x6e3   :  { %v2041_v55 = vsel %vm1679_vm3, %v6026_v63, 0.0 }
 0x6e4   :  { %v2042_v58 = vrot.slane %v2041_v55, 4 }
 0x6e6   :  { %v2043_v7 = vadd.f32 %v2042_v58, %v2041_v55 }
 0x6e8   :  { %v2044_v22 = vrot.slane %v2043_v7, 2 }
 0x6ea   :  { %v2045_v42 = vadd.f32 %v2044_v22, %v2043_v7 }
 0x6ec   :  { %v2046_v31 = vrot.slane %v2045_v42, 1 }
 0x6ee   :  { %v2047_v59 = vadd.f32 %v2046_v31, %v2045_v42  ;;  %v10885_v31 = vld [vmem:[#allocation58_spill] sm:$0xff] }
 0x6ef   :  { %v8274_v62 = vadd.f32 %v1956_v26, %v10885_v31 }
 0x6f0   :  { %6027 = vrcp.f32 %v2047_v59 }
 0x6f6   :  { %v6028_v11 = vpop.eup %6027 }
 0x6f7   :  { %v2049_v36 = vmul.f32 %v6028_v11, %v6026_v63  ;;  %v2320_v63 = vsel %vm1154_vm2, %v8274_v62, 0.0  ;;  %v10886_v11 = vld [vmem:[#allocation60_spill] sm:$0xff] }
 0x6f9   :  { %2050 = vxpose.xlu1.b32.start.end [1/1] (short) (narrow) %v2049_v36, 32  ;;  %v8287_v36 = vadd.f32 %v1958_v13, %v10886_v11 }
 0x6fb   :  { %v2323_v48 = vsel %vm1154_vm2, %v8287_v36, 0.0 }
 0x708   :  { %v2304_v20 = vpop.xlane.xlu2 %2303 }
 0x709   :  { %v2350_v45 = vmul.f32 %v2304_v20, %v10854_v14 }
 0x70b   :  { %v8266_v3 = vsub.f32 %v8224_v16, %v2350_v45 }
 0x70d   :  { %v2382_v57 = vmul.f32 %v8266_v3, %v8266_v3 }
 0x70f   :  { %v2398_v22 = vsel %vm1154_vm2, %v2382_v57, 0.0 }
 0x710   :  { %2399 = vadd.xlane.f32.xlu2 %v2398_v22  ;;  %v2307_v42 = vpop.xlane.xlu0 %2306 }
 0x711   :  { %v2351_v59 = vmul.f32 %v2307_v42, %v10854_v14 }
 0x713   :  { %v8277_v4 = vsub.f32 %v8230_v8, %v2351_v59 }
 0x715   :  { %v2383_v51 = vmul.f32 %v8277_v4, %v8277_v4 }
 0x717   :  { %v2401_v55 = vsel %vm1154_vm2, %v2383_v51, 0.0 }
 0x718   :  { %2321 = vadd.xlane.f32.xlu2 %v2320_v63  ;;  %v2310_v58 = vpop.xlane.xlu2 %2309  ;;  %2402 = vadd.xlane.f32.xlu0 %v2401_v55 }
 0x719   :  { %v2352_v7 = vmul.f32 %v2310_v58, %v10854_v14 }
 0x71b   :  { %v8290_v20 = vsub.f32 %v8236_v24, %v2352_v7 }
 0x71d   :  { %v2384_v45 = vmul.f32 %v8290_v20, %v8290_v20 }
 0x71f   :  { %v2404_v30 = vsel %vm1154_vm2, %v2384_v45, 0.0 }
 0x720   :  { %2405 = vadd.xlane.f32.xlu2 %v2404_v30  ;;  %2324 = vadd.xlane.f32.xlu0 %v2323_v48  ;;  %v2313_v57 = vpop.xlane.xlu0 %2312 }
 0x721   :  { %v2353_v26 = vmul.f32 %v2313_v57, %v10854_v14 }
 0x723   :  { %v8299_v22 = vsub.f32 %v8242_v49, %v2353_v26 }
 0x725   :  { %v2385_v42 = vmul.f32 %v8299_v22, %v8299_v22 }
 0x727   :  { %v2407_v59 = vsel %vm1154_vm2, %v2385_v42, 0.0 }
 0x728   :  { %2408 = vadd.xlane.f32.xlu0 %v2407_v59  ;;  %v2316_v31 = vpop.xlane.xlu2 %2315 }
 0x729   :  { %v2354_v32 = vmul.f32 %v2316_v31, %v10854_v14 }
 0x72b   :  { %v8306_v51 = vsub.f32 %v8248_v35, %v2354_v32 }
 0x72d   :  { %v2386_v13 = vmul.f32 %v8306_v51, %v8306_v51 }
 0x72f   :  { %v2410_v63 = vsel %vm1154_vm2, %v2386_v13, 0.0 }
 0x730   :  { %v8323_v32 = vpop.xlane.xlu0 %2318 }
 0x771   :  { %2411 = vadd.xlane.f32.xlu1 %v2410_v63 }
 0x783   :  { %v2400_v13 = vpop.xlane.xlu2 %2399 }
 0x79d   :  { %v2066_v55 = vpop.trf.xlu1 }
 0x79e   :  { %5562 = vmatmul.msk.f32.vlgmr.msrb.gmra.mxu0 %vm1731_vm5, %v2066_v55 }
 0x7a5   :  { %v2067_v58 = vpop.trf.xlu1 }
 0x7a6   :  { %5563 = vmatmul.msk.f32.gmra.mxu0 %vm1731_vm5, %v2067_v58 }
 0x7ad   :  { %v2068_v7 = vpop.trf.xlu1 }
 0x7ae   :  { %5564 = vmatmul.msk.f32.gmra.mxu0 %vm1731_vm5, %v2068_v7  ;;  %v8329_v7 = vpop.xlane.xlu2 %2321 }
 0x7b5   :  { %v2069_v11 = vpop.trf.xlu1 }
 0x7b6   :  { %5565 = vmatmul.msk.f32.gmra.mxu0 %vm1731_vm5, %v2069_v11 }
 0x81b   :  { %v2114_v45 = vpop.f32.mrf.mxu0 }
 0x81c   :  { %v2126_v30 = vmul.f32 %v2114_v45, %v8021_v1  ;;  %v2403_v1 = vpop.xlane.xlu0 %2402 }
 0x81d   :  { %v2447_v63 = vmul.f32 %v2403_v1, %v10854_v14 }
 0x81e   :  { %5566 = vmatmul.msk.f32.vlgmr.msra.gmra.mxu1 %vm1154_vm2, %v2126_v30  ;;  %v5791_v30 = vld [vmem:[%s10359_s18 + $0x8] sm:$0xff] }
 0x81f   :  { %v2463_v58 = vadd.f32 1e-05, %v2447_v63  ;;  %5853 = vmatpush.bf16.msrb.mxu1 %v5791_v30 }
 0x821   :  { %6029 = vrsqrt.f32 %v2463_v58  ;;  %vm2494_vm14 = vweird.f32 %v2463_v58 }
 0x823   :  { %v2117_v48 = vpop.f32.mrf.mxu0 }
 0x824   :  { %v2127_v57 = vmul.f32 %v2117_v48, %v8028_v40  ;;  %v2446_v40 = vmul.f32 %v2400_v13, %v10854_v14  ;;  %v8327_v55 = vpop.xlane.xlu0 %2324  ;;  %v2406_v48 = vpop.xlane.xlu2 %2405 }
 0x826   :  { %5567 = vmatmul.msk.f32.gmra.mxu1 %vm1154_vm2, %v2127_v57 }
 0x82b   :  { %v2120_v26 = vpop.f32.mrf.mxu0 }
 0x82c   :  { %v2128_v42 = vmul.f32 %v2120_v26, %v8039_v39  ;;  %v2462_v39 = vadd.f32 1e-05, %v2446_v40  ;;  %v2409_v11 = vpop.xlane.xlu0 %2408 }
 0x82d   :  { %v2449_v26 = vmul.f32 %v2409_v11, %v10854_v14 }
 0x82e   :  { %5568 = vmatmul.msk.f32.gmra.mxu1 %vm1154_vm2, %v2128_v42  ;;  %6031 = vrsqrt.f32 %v2462_v39  ;;  %vm2484_vm7 = vweird.f32 %v2462_v39 }
 0x82f   :  { %v2465_v13 = vadd.f32 1e-05, %v2449_v26 }
 0x831   :  { %6033 = vrsqrt.f32 %v2465_v13  ;;  %vm2514_vm11 = vweird.f32 %v2465_v13 }
 0x833   :  { %v2123_v59 = vpop.f32.mrf.mxu0 }
 0x834   :  { %v2129_v31 = vmul.f32 %v2123_v59, %v8053_v19  ;;  %v6030_v19 = vpop.eup %6029  ;;  %v2448_v59 = vmul.f32 %v2406_v48, %v10854_v14 }
 0x835   :  { %v6032_v57 = vpop.eup %6031  ;;  %v2489_v42 = vmul.f32 %v6030_v19, %v2463_v58  ;;  %vm2495_vm12 = vweird.f32 %v6030_v19 }
 0x836   :  { %5569 = vmatmul.msk.f32.gmra.mxu1 %vm1154_vm2, %v2129_v31  ;;  %v5790_v31 = vld [vmem:[%s10359_s18] sm:$0xff]  ;;  %v2479_v1 = vmul.f32 %v6032_v57, %v2462_v39  ;;  %v2464_v40 = vadd.f32 1e-05, %v2448_v59  ;;  %vm2485_vm13 = vweird.f32 %v6032_v57  ;;  %vm2496_vm6 = vmor %vm2494_vm14, %vm2495_vm12 }
 0x837   :  { %5854 = vmatpush.bf16.msrb.mxu1 %v5790_v31  ;;  %v2490_v63 = vmul.f32 %v6030_v19, %v2489_v42  ;;  %v6034_v29 = vpop.eup %6033  ;;  %vm2486_vm8 = vmor %vm2484_vm7, %vm2485_vm13 }
 0x838   :  { %v2480_v56 = vmul.f32 %v6032_v57, %v2479_v1  ;;  %6035 = vrsqrt.f32 %v2464_v40  ;;  %v2509_v0 = vmul.f32 %v6034_v29, %v2465_v13  ;;  %vm2515_vm9 = vweird.f32 %v6034_v29 }
 0x839   :  { %v2491_v2 = vmul.f32 0.5, %v2490_v63  ;;  %vm2516_vm12 = vmor %vm2514_vm11, %vm2515_vm9  ;;  %vm2504_vm13 = vweird.f32 %v2464_v40 }
 0x83a   :  { %v2481_v10 = vmul.f32 0.5, %v2480_v56  ;;  %v2510_v59 = vmul.f32 %v6034_v29, %v2509_v0 }
 0x83b   :  { %v2492_v11 = vsub.f32 1.5, %v2491_v2 }
 0x83c   :  { %v2482_v52 = vsub.f32 1.5, %v2481_v10  ;;  %v2511_v10 = vmul.f32 0.5, %v2510_v59 }
 0x83d   :  { %v2493_v50 = vmul.f32 %v6030_v19, %v2492_v11 }
 0x83e   :  { %v6036_v48 = vpop.eup %6035  ;;  %v2483_v49 = vmul.f32 %v6032_v57, %v2482_v52  ;;  %v8343_v52 = vld [vmem:[%s10357_s16] ss:$0 sm:$0xff] }
 0x83f   :  { %v2499_v26 = vmul.f32 %v6036_v48, %v2464_v40  ;;  %v2497_v42 = vsel %vm2496_vm6, %v6030_v19, %v2493_v50  ;;  %vm2505_vm10 = vweird.f32 %v6036_v48 }
 0x840   :  { %v2487_v63 = vsel %vm2486_vm8, %v6032_v57, %v2483_v49  ;;  %v2639_v2 = vmul.f32 %v2497_v42, %v8277_v4  ;;  %v2512_v49 = vsub.f32 1.5, %v2511_v10  ;;  %v8350_v4 = vld [vmem:[%s10358_s17] ss:$0 sm:$0xff]  ;;  %vm2506_vm14 = vmor %vm2504_vm13, %vm2505_vm10 }
 0x841   :  { %v2500_v56 = vmul.f32 %v6036_v48, %v2499_v26  ;;  %v2638_v58 = vmul.f32 %v2487_v63, %v8266_v3 }
 0x842   :  { %v2658_v0 = vmul.f32 %v8343_v52, %v2639_v2  ;;  %v2513_v39 = vmul.f32 %v6034_v29, %v2512_v49 }
 0x843   :  { %v2501_v50 = vmul.f32 0.5, %v2500_v56  ;;  %v2355_v56 = vmul.f32 %v8323_v32, %v10854_v14 }
 0x844   :  { %v2517_v11 = vsel %vm2516_vm12, %v6034_v29, %v2513_v39  ;;  %v2357_v39 = vmul.f32 %v8327_v55, %v10854_v14 }
 0x845   :  { %v2502_v3 = vsub.f32 1.5, %v2501_v50 }
 0x89b   :  { %v2159_v45 = vpop.f32.mrf.mxu1 }
 0x8a3   :  { %v2162_v43 = vpop.f32.mrf.mxu1 }
 0x8ab   :  { %v2165_v35 = vpop.f32.mrf.mxu1 }
 0x8b3   :  { %v2168_v1 = vpop.f32.mrf.mxu1 }
 0x8b4   :  { %2183 = vmatpush.msrb.mxu2 %v2168_v1  ;;  %2212 = vmatpush.msra.mxu0 %v2168_v1 }
 0x8b6   :  { %2184 = vmatpush.msrb.mxu2 %v2165_v35  ;;  %2213 = vmatpush.msra.mxu0 %v2165_v35  ;;  %v2657_v35 = vmul.f32 %v8343_v52, %v2638_v58 }
 0x8b8   :  { %2185 = vmatpush.msrb.mxu2 %v2162_v43  ;;  %2214 = vmatpush.msra.mxu0 %v2162_v43  ;;  %v2677_v43 = vadd.f32 %v8350_v4, %v2658_v0  ;;  %v2676_v19 = vadd.f32 %v8350_v4, %v2657_v35  ;;  %v2356_v0 = vmul.f32 %v8329_v7, %v10854_v14 }
 0x8ba   :  { %2186 = vmatpush.msrb.mxu2 %v2159_v45  ;;  %2215 = vmatpush.msra.mxu0 %v2159_v45  ;;  %v2503_v45 = vmul.f32 %v6036_v48, %v2502_v3  ;;  %v2692_v57 = vpack.c.bf16 %v2677_v43, %v2676_v19  ;;  %v8411_v3 = vsub.f32 %v8274_v62, %v2356_v0 }
 0x8bb   :  { %5570 = vmatmul.msk.f32.vlgmr.msrb.gmra.mxu2 %vm1154_vm2, %v8116_v44  ;;  %5574 = vmatmul.msk.f32.vlgmr.msra.gmra.mxu0 %vm1154_vm2, %v8173_v61  ;;  %v2641_v61 = vmul.f32 %v2517_v11, %v8299_v22 }
 0x8bc   :  { %2750 = vmatpush.bf16.msrb.mxu0 %v5791_v30  ;;  %v2507_v44 = vsel %vm2506_vm14, %v6036_v48, %v2503_v45  ;;  %v2388_v7 = vmul.f32 %v8411_v3, %v8411_v3 }
 0x8bd   :  { %v2640_v30 = vmul.f32 %v2507_v44, %v8290_v20  ;;  %v2660_v26 = vmul.f32 %v8343_v52, %v2641_v61 }
 0x8bf   :  { %v2679_v29 = vadd.f32 %v8350_v4, %v2660_v26 }
 0x8c0   :  { %2751 = vmatpush.bf16.msrb.mxu0 %v5790_v31  ;;  %v2659_v31 = vmul.f32 %v8343_v52, %v2640_v30 }
 0x8c2   :  { %v2678_v13 = vadd.f32 %v8350_v4, %v2659_v31 }
 0x8c3   :  { %5571 = vmatmul.msk.f32.gmra.mxu2 %vm1154_vm2, %v8129_v34  ;;  %5587 = vmatmul.msk.bf16.vlgmr.msrb.gmra.mxu0 %vm1154_vm2, %v2692_v57  ;;  %v2416_v57 = vsel %vm1154_vm2, %v2388_v7, 0.0 }
 0x8c4   :  { %v2693_v40 = vpack.c.bf16 %v2679_v29, %v2678_v13 }
 0x8cb   :  { %5572 = vmatmul.msk.f32.gmra.mxu2 %vm1154_vm2, %v8154_v21 }
 0x8d3   :  { %5573 = vmatmul.msk.f32.gmra.mxu2 %vm1154_vm2, %v8162_v5  ;;  %5588 = vmatmul.msk.bf16.gmra.mxu0 %vm1154_vm2, %v2693_v40 }
 0x938   :  { %v2217_v21 = vpop.f32.mrf.mxu0 }
 0x939   :  { %v2218_v5 = vadd.f32 %v2217_v21, %v8217_v23 }
 0x93b   :  { %v8382_v1 = vperm.slane %v2218_v5, 0 }
 0x93e   :  { %v2188_v34 = vpop.f32.mrf.mxu2 }
 0x946   :  { %v2191_v22 = vpop.f32.mrf.mxu2 }
 0x947   :  { %v2220_v59 = vpack.c.bf16 %v2191_v22, %v2188_v34  ;;  %v2412_v34 = vpop.xlane.xlu1 %2411 }
 0x94e   :  { %v2194_v20 = vpop.f32.mrf.mxu2 }
 0x956   :  { %v2197_v48 = vpop.f32.mrf.mxu2 }
 0x957   :  { %v2221_v42 = vpack.c.bf16 %v2197_v48, %v2194_v20 }
 0x959   :  { %2261 = vmatpush.bf16.msrb.mxu3 %v2221_v42 }
 0x95d   :  { %2262 = vmatpush.bf16.msrb.mxu3 %v2220_v59 }
 0x960   :  { %5575 = vmatmul.msk.bf16.vlgmr.msrb.gmra.mxu3 %vm1154_vm2, %v8198_v6 }
 0x970   :  { %5576 = vmatmul.msk.bf16.gmra.mxu3 %vm1154_vm2, %v8186_v37  ;;  %v8391_v37 = vsub.f32 %v8254_v25, %v2355_v56 }
 0x972   :  { %v2387_v10 = vmul.f32 %v8391_v37, %v8391_v37 }
 0x974   :  { %v2413_v58 = vsel %vm1154_vm2, %v2387_v10, 0.0 }
 0x980   :  { %5577 = vmatmul.msk.bf16.gmra.mxu3 %vm1154_vm2, %v8106_v15 }
 0x990   :  { %5578 = vmatmul.msk.bf16.gmra.mxu3 %vm1154_vm2, %v8141_v17 }
 0x9e3   :  { %v2264_v63 = vpop.f32.mrf.mxu3 }
 0x9e4   :  { %v2265_v6 = vadd.f32 %v2264_v63, %v8382_v1 }
 0x9e6   :  { %v8388_v2 = vadd.f32 %v2265_v6, %v8014_v18 }
 0x9e8   :  { %v2326_v15 = vsel %vm1154_vm2, %v8388_v2, 0.0 }
 0x9e9   :  { %2327 = vadd.xlane.f32.xlu2 %v2326_v15 }
 0x9eb   :  { %v2266_v17 = vpop.f32.mrf.mxu3 }
 0x9ec   :  { %v2267_v23 = vadd.f32 %v2266_v17, %v8382_v1 }
 0x9ee   :  { %v8399_v32 = vadd.f32 %v2267_v23, %v7980_v47 }
 0x9f0   :  { %v2329_v18 = vsel %vm1154_vm2, %v8399_v32, 0.0 }
 0x9f1   :  { %2330 = vadd.xlane.f32.xlu0 %v2329_v18  ;;  %2414 = vadd.xlane.f32.xlu2 %v2413_v58 }
 0x9f3   :  { %v2269_v50 = vpop.f32.mrf.mxu3 }
 0x9f4   :  { %v2270_v49 = vadd.f32 %v2269_v50, %v8382_v1 }
 0x9f6   :  { %v8408_v35 = vadd.f32 %v2270_v49, %v7850_v33  ;;  %v8424_v33 = vsub.f32 %v8287_v36, %v2357_v39 }
 0x9f8   :  { %v2332_v47 = vsel %vm1154_vm2, %v8408_v35, 0.0  ;;  %v2389_v61 = vmul.f32 %v8424_v33, %v8424_v33 }
 0x9f9   :  { %2333 = vadd.xlane.f32.xlu0 %v2332_v47 }
 0x9fa   :  { %v2419_v26 = vsel %vm1154_vm2, %v2389_v61, 0.0 }
 0x9fb   :  { %v2271_v43 = vpop.f32.mrf.mxu3 }
 0x9fc   :  { %v2272_v19 = vadd.f32 %v2271_v43, %v8382_v1 }
 0x9fe   :  { %v8421_v45 = vadd.f32 %v2272_v19, %v7947_v38 }
 0xa00   :  { %v2335_v11 = vsel %vm1154_vm2, %v8421_v45, 0.0 }
 0xa01   :  { %2417 = vadd.xlane.f32.xlu0 %v2416_v57  ;;  %2336 = vadd.xlane.f32.xlu2 %v2335_v11 }
 0xa03   :  { %v2274_v44 = vpop.f32.mrf.mxu3 }
 0xa04   :  { %v2275_v55 = vadd.f32 %v2274_v44, %v8382_v1 }
 0xa06   :  { %v8433_v30 = vadd.f32 %v2275_v55, %v7706_v27  ;;  %v2450_v27 = vmul.f32 %v2412_v34, %v10854_v14 }
 0xa08   :  { %v2338_v38 = vsel %vm1154_vm2, %v8433_v30, 0.0  ;;  %v2466_v22 = vadd.f32 1e-05, %v2450_v27 }
 0xa09   :  { %2339 = vadd.xlane.f32.xlu0 %v2338_v38  ;;  %2420 = vadd.xlane.f32.xlu2 %v2419_v26 }
 0xa0a   :  { %6037 = vrsqrt.f32 %v2466_v22  ;;  %vm2524_vm7 = vweird.f32 %v2466_v22 }
 0xa0b   :  { %v2276_v31 = vpop.f32.mrf.mxu3 }
 0xa0c   :  { %v2277_v29 = vadd.f32 %v2276_v31, %v8382_v1 }
 0xa0e   :  { %v8440_v13 = vadd.f32 %v2277_v29, %v7723_v28 }
 0xa10   :  { %v2341_v40 = vsel %vm1154_vm2, %v8440_v13, 0.0  ;;  %v6038_v48 = vpop.eup %6037 }
 0xa11   :  { %2342 = vadd.xlane.f32.xlu2 %v2341_v40  ;;  %v2519_v5 = vmul.f32 %v6038_v48, %v2466_v22  ;;  %vm2525_vm6 = vweird.f32 %v6038_v48 }
 0xa12   :  { %vm2526_vm8 = vmor %vm2524_vm7, %vm2525_vm6 }
 0xa13   :  { %v2279_v59 = vpop.f32.mrf.mxu3  ;;  %v2520_v6 = vmul.f32 %v6038_v48, %v2519_v5 }
 0xa14   :  { %v2280_v63 = vadd.f32 %v2279_v59, %v8382_v1 }
 0xa15   :  { %v2521_v0 = vmul.f32 0.5, %v2520_v6 }
 0xa16   :  { %v8456_v18 = vadd.f32 %v2280_v63, %v10857_v53 }
 0xa17   :  { %v2522_v7 = vsub.f32 1.5, %v2521_v0 }
 0xa18   :  { %v2344_v39 = vsel %vm1154_vm2, %v8456_v18, 0.0 }
 0xa19   :  { %v2523_v61 = vmul.f32 %v6038_v48, %v2522_v7 }
 0xa1b   :  { %v2281_v49 = vpop.f32.mrf.mxu3  ;;  %v2527_v40 = vsel %vm2526_vm8, %v6038_v48, %v2523_v61 }
 0xa1c   :  { %v2282_v43 = vadd.f32 %v2281_v49, %v8382_v1  ;;  %v2642_v22 = vmul.f32 %v2527_v40, %v8306_v51 }
 0xa1e   :  { %v8469_v44 = vadd.f32 %v2282_v43, %v7843_v9 }
 0xa20   :  { %10887 = vst [vmem:[#allocation97_spill] sm:$0xff] %v8469_v44  ;;  %v2347_v31 = vsel %vm1154_vm2, %v8469_v44, 0.0 }
 0xa5c   :  { %v2328_v20 = vpop.xlane.xlu2 %2327 }
 0xa5d   :  { %v2358_v42 = vmul.f32 %v2328_v20, %v10854_v14 }
 0xa5f   :  { %v8447_v21 = vsub.f32 %v8388_v2, %v2358_v42 }
 0xa61   :  { %v2390_v28 = vmul.f32 %v8447_v21, %v8447_v21 }
 0xa63   :  { %v2422_v56 = vsel %vm1154_vm2, %v2390_v28, 0.0 }
 0xa64   :  { %2423 = vadd.xlane.f32.xlu0 %v2422_v56  ;;  %v2415_v15 = vpop.xlane.xlu2 %2414  ;;  %v2331_v17 = vpop.xlane.xlu0 %2330 }
 0xa65   :  { %v2451_v23 = vmul.f32 %v2415_v15, %v10854_v14  ;;  %v2359_v10 = vmul.f32 %v2331_v17, %v10854_v14  ;;  %v2661_v17 = vmul.f32 %v8343_v52, %v2642_v22 }
 0xa67   :  { %v2467_v58 = vadd.f32 1e-05, %v2451_v23  ;;  %v8459_v50 = vsub.f32 %v8399_v32, %v2359_v10 }
 0xa69   :  { %6039 = vrsqrt.f32 %v2467_v58  ;;  %v2391_v47 = vmul.f32 %v8459_v50, %v8459_v50  ;;  %vm2534_vm10 = vweird.f32 %v2467_v58 }
 0xa6b   :  { %v2425_v19 = vsel %vm1154_vm2, %v2391_v47, 0.0 }
 0xa6c   :  { %2345 = vadd.xlane.f32.xlu0 %v2344_v39  ;;  %2426 = vadd.xlane.f32.xlu2 %v2425_v19  ;;  %v2334_v53 = vpop.xlane.xlu0 %2333 }
 0xa6d   :  { %v2360_v57 = vmul.f32 %v2334_v53, %v10854_v14 }
 0xa6f   :  { %v6040_v11 = vpop.eup %6039  ;;  %v8472_v55 = vsub.f32 %v8408_v35, %v2360_v57 }
 0xa70   :  { %v2529_v1 = vmul.f32 %v6040_v11, %v2467_v58  ;;  %vm2535_vm9 = vweird.f32 %v6040_v11 }
 0xa71   :  { %v2392_v38 = vmul.f32 %v8472_v55, %v8472_v55  ;;  %vm2536_vm11 = vmor %vm2534_vm10, %vm2535_vm9 }
 0xa72   :  { %v2530_v26 = vmul.f32 %v6040_v11, %v2529_v1 }
 0xa73   :  { %v2428_v29 = vsel %vm1154_vm2, %v2392_v38, 0.0 }
 0xa74   :  { %v2531_v9 = vmul.f32 0.5, %v2530_v26  ;;  %v2337_v34 = vpop.xlane.xlu2 %2336  ;;  %2348 = vadd.xlane.f32.xlu2 %v2347_v31  ;;  %2429 = vadd.xlane.f32.xlu0 %v2428_v29  ;;  %v2418_v27 = vpop.xlane.xlu0 %2417 }
 0xa75   :  { %v2361_v20 = vmul.f32 %v2337_v34, %v10854_v14  ;;  %v2452_v42 = vmul.f32 %v2418_v27, %v10854_v14 }
 0xa76   :  { %v2532_v59 = vsub.f32 1.5, %v2531_v9 }
 0xa77   :  { %v8483_v5 = vsub.f32 %v8421_v45, %v2361_v20  ;;  %v2468_v28 = vadd.f32 1e-05, %v2452_v42 }
 0xa78   :  { %v2533_v63 = vmul.f32 %v6040_v11, %v2532_v59 }
 0xa79   :  { %6041 = vrsqrt.f32 %v2468_v28  ;;  %v2393_v48 = vmul.f32 %v8483_v5, %v8483_v5  ;;  %vm2544_vm13 = vweird.f32 %v2468_v28 }
 0xa7a   :  { %v2537_v56 = vsel %vm2536_vm11, %v6040_v11, %v2533_v63 }
 0xa7b   :  { %v2643_v6 = vmul.f32 %v2537_v56, %v8391_v37  ;;  %v2431_v15 = vsel %vm1154_vm2, %v2393_v48, 0.0  ;;  %v2680_v37 = vadd.f32 %v8350_v4, %v2661_v17 }
 0xa7c   :  { %v2421_v23 = vpop.xlane.xlu2 %2420  ;;  %2432 = vadd.xlane.f32.xlu2 %v2431_v15  ;;  %v2340_v51 = vpop.xlane.xlu0 %2339 }
 0xa7d   :  { %v2453_v10 = vmul.f32 %v2421_v23, %v10854_v14  ;;  %v2362_v0 = vmul.f32 %v2340_v51, %v10854_v14  ;;  %v2662_v58 = vmul.f32 %v8343_v52, %v2643_v6 }
 0xa7f   :  { %v6042_v49 = vpop.eup %6041  ;;  %v2469_v47 = vadd.f32 1e-05, %v2453_v10  ;;  %v8494_v43 = vsub.f32 %v8433_v30, %v2362_v0  ;;  %v2681_v39 = vadd.f32 %v8350_v4, %v2662_v58 }
 0xa80   :  { %v2539_v19 = vmul.f32 %v6042_v49, %v2468_v28  ;;  %vm2545_vm12 = vweird.f32 %v6042_v49 }
 0xa81   :  { %6043 = vrsqrt.f32 %v2469_v47  ;;  %v2694_v7 = vpack.c.bf16 %v2681_v39, %v2680_v37  ;;  %v2394_v53 = vmul.f32 %v8494_v43, %v8494_v43  ;;  %vm2546_vm14 = vmor %vm2544_vm13, %vm2545_vm12  ;;  %vm2554_vm7 = vweird.f32 %v2469_v47 }
 0xa82   :  { %v2540_v57 = vmul.f32 %v6042_v49, %v2539_v19 }
 0xa83   :  { %5589 = vmatmul.msk.bf16.gmra.mxu0 %vm1154_vm2, %v2694_v7  ;;  %v2434_v11 = vsel %vm1154_vm2, %v2394_v53, 0.0 }
 0xa84   :  { %v2541_v61 = vmul.f32 0.5, %v2540_v57  ;;  %v2343_v1 = vpop.xlane.xlu2 %2342  ;;  %2435 = vadd.xlane.f32.xlu0 %v2434_v11 }
 0xa85   :  { %v2363_v38 = vmul.f32 %v2343_v1, %v10854_v14 }
 0xa86   :  { %v2542_v26 = vsub.f32 1.5, %v2541_v61 }
 0xa87   :  { %v6044_v31 = vpop.eup %6043  ;;  %v8504_v29 = vsub.f32 %v8440_v13, %v2363_v38 }
 0xa88   :  { %v2543_v40 = vmul.f32 %v6042_v49, %v2542_v26  ;;  %v2549_v9 = vmul.f32 %v6044_v31, %v2469_v47  ;;  %vm2555_vm6 = vweird.f32 %v6044_v31 }
 0xa89   :  { %v2395_v34 = vmul.f32 %v8504_v29, %v8504_v29  ;;  %vm2556_vm8 = vmor %vm2554_vm7, %vm2555_vm6 }
 0xa8a   :  { %v2550_v27 = vmul.f32 %v6044_v31, %v2549_v9  ;;  %v2547_v42 = vsel %vm2546_vm14, %v6042_v49, %v2543_v40 }
 0xa8b   :  { %v2437_v20 = vsel %vm1154_vm2, %v2395_v34, 0.0  ;;  %v2644_v63 = vmul.f32 %v2547_v42, %v8411_v3 }
 0xa8c   :  { %v2551_v59 = vmul.f32 0.5, %v2550_v27  ;;  %2438 = vadd.xlane.f32.xlu2 %v2437_v20 }
 0xa8d   :  { %v2663_v15 = vmul.f32 %v8343_v52, %v2644_v63 }
 0xa8e   :  { %v2552_v22 = vsub.f32 1.5, %v2551_v59 }
 0xa8f   :  { %v2682_v17 = vadd.f32 %v8350_v4, %v2663_v15 }
 0xa90   :  { %v2553_v48 = vmul.f32 %v6044_v31, %v2552_v22 }
 0xa92   :  { %v2557_v56 = vsel %vm2556_vm8, %v6044_v31, %v2553_v48 }
 0xa93   :  { %v2645_v6 = vmul.f32 %v2557_v56, %v8424_v33 }
 0xa95   :  { %v2664_v28 = vmul.f32 %v8343_v52, %v2645_v6 }
 0xa97   :  { %v2683_v23 = vadd.f32 %v8350_v4, %v2664_v28 }
 0xa99   :  { %v2695_v51 = vpack.c.bf16 %v2683_v23, %v2682_v17 }
 0xa9b   :  { %5590 = vmatmul.msk.bf16.gmra.mxu0 %vm1154_vm2, %v2695_v51 }
 0xad7   :  { %v2424_v10 = vpop.xlane.xlu0 %2423 }
 0xad8   :  { %v2454_v3 = vmul.f32 %v2424_v10, %v10854_v14 }
 0xada   :  { %v2470_v0 = vadd.f32 1e-05, %v2454_v3 }
 0xadc   :  { %6045 = vrsqrt.f32 %v2470_v0  ;;  %vm2564_vm10 = vweird.f32 %v2470_v0 }
 0xadf   :  { %v2427_v58 = vpop.xlane.xlu2 %2426  ;;  %v2346_v49 = vpop.xlane.xlu0 %2345 }
 0xae0   :  { %v2455_v33 = vmul.f32 %v2427_v58, %v10854_v14  ;;  %v2364_v47 = vmul.f32 %v2346_v49, %v10854_v14 }
 0xae2   :  { %v6046_v37 = vpop.eup %6045  ;;  %v2471_v39 = vadd.f32 1e-05, %v2455_v33  ;;  %v8520_v19 = vsub.f32 %v8456_v18, %v2364_v47 }
 0xae3   :  { %v2559_v7 = vmul.f32 %v6046_v37, %v2470_v0  ;;  %vm2565_vm9 = vweird.f32 %v6046_v37 }
 0xae4   :  { %6047 = vrsqrt.f32 %v2471_v39  ;;  %v2396_v53 = vmul.f32 %v8520_v19, %v8520_v19  ;;  %vm2566_vm11 = vmor %vm2564_vm10, %vm2565_vm9  ;;  %vm2574_vm13 = vweird.f32 %v2471_v39 }
 0xae5   :  { %v2560_v57 = vmul.f32 %v6046_v37, %v2559_v7 }
 0xae6   :  { %v2440_v11 = vsel %vm1154_vm2, %v2396_v53, 0.0 }
 0xae7   :  { %v2561_v61 = vmul.f32 0.5, %v2560_v57  ;;  %v2349_v1 = vpop.xlane.xlu2 %2348  ;;  %2441 = vadd.xlane.f32.xlu0 %v2440_v11  ;;  %v2430_v38 = vpop.xlane.xlu0 %2429 }
 0xae8   :  { %v2365_v26 = vmul.f32 %v2349_v1, %v10854_v14  ;;  %v2456_v31 = vmul.f32 %v2430_v38, %v10854_v14 }
 0xae9   :  { %v2562_v40 = vsub.f32 1.5, %v2561_v61 }
 0xaea   :  { %v6048_v9 = vpop.eup %6047  ;;  %v8528_v34 = vsub.f32 %v8469_v44, %v2365_v26  ;;  %v2472_v27 = vadd.f32 1e-05, %v2456_v31  ;;  %v10920_v44 = vld [vmem:[#allocation15_spill] sm:$0xff] }
 0xaeb   :  { %v2563_v20 = vmul.f32 %v6046_v37, %v2562_v40  ;;  %v2569_v42 = vmul.f32 %v6048_v9, %v2471_v39  ;;  %vm2575_vm12 = vweird.f32 %v6048_v9 }
 0xaec   :  { %6049 = vrsqrt.f32 %v2472_v27  ;;  %v2397_v59 = vmul.f32 %v8528_v34, %v8528_v34  ;;  %vm2576_vm14 = vmor %vm2574_vm13, %vm2575_vm12  ;;  %vm2584_vm7 = vweird.f32 %v2472_v27 }
 0xaed   :  { %v2570_v22 = vmul.f32 %v6048_v9, %v2569_v42  ;;  %v2567_v48 = vsel %vm2566_vm11, %v6046_v37, %v2563_v20 }
 0xaee   :  { %v2443_v63 = vsel %vm1154_vm2, %v2397_v59, 0.0  ;;  %v2646_v23 = vmul.f32 %v2567_v48, %v8447_v21 }
 0xaef   :  { %v2571_v56 = vmul.f32 0.5, %v2570_v22  ;;  %2444 = vadd.xlane.f32.xlu2 %v2443_v63  ;;  %v2433_v6 = vpop.xlane.xlu2 %2432 }
 0xaf0   :  { %v2457_v15 = vmul.f32 %v2433_v6, %v10854_v14  ;;  %v2665_v33 = vmul.f32 %v8343_v52, %v2646_v23 }
 0xaf1   :  { %v2572_v28 = vsub.f32 1.5, %v2571_v56 }
 0xaf2   :  { %v6050_v17 = vpop.eup %6049  ;;  %v2473_v51 = vadd.f32 1e-05, %v2457_v15  ;;  %v2684_v39 = vadd.f32 %v8350_v4, %v2665_v33 }
 0xaf3   :  { %v2573_v10 = vmul.f32 %v6048_v9, %v2572_v28  ;;  %v2579_v3 = vmul.f32 %v6050_v17, %v2472_v27  ;;  %vm2585_vm6 = vweird.f32 %v6050_v17 }
 0xaf4   :  { %6051 = vrsqrt.f32 %v2473_v51  ;;  %vm2586_vm8 = vmor %vm2584_vm7, %vm2585_vm6  ;;  %vm2594_vm10 = vweird.f32 %v2473_v51 }
 0xaf5   :  { %v2577_v0 = vsel %vm2576_vm14, %v6048_v9, %v2573_v10  ;;  %v2580_v58 = vmul.f32 %v6050_v17, %v2579_v3 }
 0xaf6   :  { %v2647_v49 = vmul.f32 %v2577_v0, %v8459_v50 }
 0xaf7   :  { %v2581_v47 = vmul.f32 0.5, %v2580_v58  ;;  %v2436_v37 = vpop.xlane.xlu0 %2435 }
 0xaf8   :  { %v2458_v7 = vmul.f32 %v2436_v37, %v10854_v14  ;;  %v2666_v53 = vmul.f32 %v8343_v52, %v2647_v49 }
 0xaf9   :  { %v2582_v57 = vsub.f32 1.5, %v2581_v47 }
 0xafa   :  { %v6052_v21 = vpop.eup %6051  ;;  %v2474_v11 = vadd.f32 1e-05, %v2458_v7  ;;  %v2685_v61 = vadd.f32 %v8350_v4, %v2666_v53 }
 0xafb   :  { %v2583_v1 = vmul.f32 %v6050_v17, %v2582_v57  ;;  %v2589_v38 = vmul.f32 %v6052_v21, %v2473_v51  ;;  %vm2595_vm9 = vweird.f32 %v6052_v21 }
 0xafc   :  { %6053 = vrsqrt.f32 %v2474_v11  ;;  %v2696_v50 = vpack.c.bf16 %v2685_v61, %v2684_v39  ;;  %vm2596_vm11 = vmor %vm2594_vm10, %vm2595_vm9  ;;  %vm2604_vm13 = vweird.f32 %v2474_v11 }
 0xafd   :  { %v2590_v26 = vmul.f32 %v6052_v21, %v2589_v38  ;;  %v2587_v31 = vsel %vm2586_vm8, %v6050_v17, %v2583_v1 }
 0xafe   :  { %5591 = vmatmul.msk.bf16.gmra.mxu0 %vm1154_vm2, %v2696_v50  ;;  %v2648_v22 = vmul.f32 %v2587_v31, %v8472_v55  ;;  %v2753_v50 = vpop.f32.mrf.mxu0  ;;  %v5797_v31 = vld [vmem:[%s10361_s20 + $0x28] sm:$0xff] }
 0xaff   :  { %v2591_v40 = vmul.f32 0.5, %v2590_v26  ;;  %v2439_v9 = vpop.xlane.xlu2 %2438 }
 0xb00   :  { %v2459_v20 = vmul.f32 %v2439_v9, %v10854_v14  ;;  %v2667_v15 = vmul.f32 %v8343_v52, %v2648_v22 }
 0xb01   :  { %v2592_v42 = vsub.f32 1.5, %v2591_v40 }
 0xb02   :  { %v6054_v59 = vpop.eup %6053  ;;  %v2475_v63 = vadd.f32 1e-05, %v2459_v20  ;;  %v2686_v0 = vadd.f32 %v8350_v4, %v2667_v15  ;;  %v5794_v15 = vld [vmem:[%s10361_s20 + $0x10] sm:$0xff] }
 0xb03   :  { %v2593_v48 = vmul.f32 %v6052_v21, %v2592_v42  ;;  %v2599_v56 = vmul.f32 %v6054_v59, %v2474_v11  ;;  %vm2605_vm12 = vweird.f32 %v6054_v59  ;;  %v5796_v42 = vld [vmem:[%s10361_s20 + $0x20] sm:$0xff] }
 0xb04   :  { %6055 = vrsqrt.f32 %v2475_v63  ;;  %vm2606_vm14 = vmor %vm2604_vm13, %vm2605_vm12  ;;  %vm2614_vm7 = vweird.f32 %v2475_v63 }
 0xb05   :  { %v2597_v27 = vsel %vm2596_vm11, %v6052_v21, %v2593_v48  ;;  %v2600_v6 = vmul.f32 %v6054_v59, %v2599_v56  ;;  %v8577_v56 = vld [vmem:[%s10360_s19] ss:$0 sm:$0xff] }
 0xb06   :  { %v2649_v28 = vmul.f32 %v2597_v27, %v8483_v5  ;;  %v2755_v26 = vpop.f32.mrf.mxu0 }
 0xb07   :  { %v2601_v17 = vmul.f32 0.5, %v2600_v6 }
 0xb08   :  { %v2668_v23 = vmul.f32 %v8343_v52, %v2649_v28  ;;  %v8583_v28 = vadd.f32 %v8577_v56, %v2755_v26 }
 0xb09   :  { %v2602_v10 = vsub.f32 1.5, %v2601_v17 }
 0xb0a   :  { %v6056_v3 = vpop.eup %6055  ;;  %v2687_v55 = vadd.f32 %v8350_v4, %v2668_v23  ;;  %v8586_v23 = vadd.f32 %v8577_v56, %v2753_v50 }
 0xb0b   :  { %v2603_v58 = vmul.f32 %v6054_v59, %v2602_v10  ;;  %v2609_v51 = vmul.f32 %v6056_v3, %v2475_v63  ;;  %vm2615_vm6 = vweird.f32 %v6056_v3 }
 0xb0c   :  { %v2697_v49 = vpack.c.bf16 %v2687_v55, %v2686_v0  ;;  %vm2616_vm8 = vmor %vm2614_vm7, %vm2615_vm6  ;;  %v2810_v0 = vmul.f32 0.044715, %v8583_v28 }
 0xb0d   :  { %v2610_v33 = vmul.f32 %v6056_v3, %v2609_v51  ;;  %v2607_v47 = vsel %vm2606_vm14, %v6054_v59, %v2603_v58  ;;  %v5795_v59 = vld [vmem:[%s10361_s20 + $0x18] sm:$0xff]  ;;  %v2809_v58 = vmul.f32 0.044715, %v8586_v23 }
 0xb0e   :  { %5592 = vmatmul.msk.bf16.vlgmr.msrb.gmra.mxu1 %vm1154_vm2, %v2697_v49  ;;  %v2650_v7 = vmul.f32 %v2607_v47, %v8494_v43  ;;  %v5799_v43 = vld [vmem:[%s10361_s20 + $0x38] sm:$0xff]  ;;  %v2758_v63 = vpop.f32.mrf.mxu0  ;;  %v5792_v47 = vld [vmem:[%s10361_s20] sm:$0xff] }
 0xb0f   :  { %v2611_v5 = vmul.f32 0.5, %v2610_v33  ;;  %3013 = vmatpush.bf16.msra.mxu1 %v5799_v43 }
 0xb10   :  { %v2669_v39 = vmul.f32 %v8343_v52, %v2650_v7 }
 0xb11   :  { %v2612_v37 = vsub.f32 1.5, %v2611_v5  ;;  %v2826_v5 = vmul.f32 %v2810_v0, %v8583_v28 }
 0xb12   :  { %v2688_v61 = vadd.f32 %v8350_v4, %v2669_v39 }
 0xb13   :  { %v2613_v53 = vmul.f32 %v6056_v3, %v2612_v37 }
 0xb15   :  { %v2617_v57 = vsel %vm2616_vm8, %v6056_v3, %v2613_v53  ;;  %v5793_v3 = vld [vmem:[%s10361_s20 + $0x8] sm:$0xff]  ;;  %v2825_v53 = vmul.f32 %v2809_v58, %v8586_v23 }
 0xb16   :  { %v2651_v21 = vmul.f32 %v2617_v57, %v8504_v29  ;;  %v5798_v29 = vld [vmem:[%s10361_s20 + $0x30] sm:$0xff]  ;;  %v2760_v33 = vpop.f32.mrf.mxu0 }
 0xb17   :  { %3014 = vmatpush.bf16.msra.mxu1 %v5798_v29  ;;  %v2761_v43 = vadd.f32 %v8577_v56, %v2760_v33 }
 0xb18   :  { %v2670_v11 = vmul.f32 %v8343_v52, %v2651_v21  ;;  %v2842_v21 = vmul.f32 %v2826_v5, %v8583_v28  ;;  %v2794_v5 = vmul.f32 0.5, %v8583_v28 }
 0xb1a   :  { %v2689_v1 = vadd.f32 %v8350_v4, %v2670_v11  ;;  %v2858_v26 = vadd.f32 %v2842_v21, %v8583_v28 }
 0xb1b   :  { %3015 = vmatpush.bf16.msra.mxu1 %v5797_v31  ;;  %v2759_v31 = vadd.f32 %v8577_v56, %v2758_v63 }
 0xb1c   :  { %v2698_v38 = vpack.c.bf16 %v2689_v1, %v2688_v61  ;;  %v2841_v61 = vmul.f32 %v2825_v53, %v8586_v23 }
 0xb1e   :  { %5593 = vmatmul.msk.bf16.gmra.mxu1 %vm1154_vm2, %v2698_v38  ;;  %v2763_v38 = vpop.f32.mrf.mxu0 }
 0xb1f   :  { %3016 = vmatpush.bf16.msra.mxu1 %v5796_v42 }
 0xb23   :  { %3017 = vmatpush.bf16.msra.mxu1 %v5795_v59  ;;  %v2812_v59 = vmul.f32 0.044715, %v2761_v43 }
 0xb27   :  { %3018 = vmatpush.bf16.msra.mxu1 %v5794_v15 }
 0xb2b   :  { %3019 = vmatpush.bf16.msra.mxu1 %v5793_v3 }
 0xb2f   :  { %3020 = vmatpush.bf16.msra.mxu1 %v5792_v47 }
 0xb5a   :  { %v2442_v40 = vpop.xlane.xlu0 %2441 }
 0xb5b   :  { %v2460_v9 = vmul.f32 %v2442_v40, %v10854_v14  ;;  %v2857_v40 = vadd.f32 %v2841_v61, %v8586_v23 }
 0xb5d   :  { %v2476_v20 = vadd.f32 1e-05, %v2460_v9 }
 0xb5f   :  { %6057 = vrsqrt.f32 %v2476_v20  ;;  %vm2624_vm10 = vweird.f32 %v2476_v20 }
 0xb62   :  { %v2445_v22 = vpop.xlane.xlu2 %2444 }
 0xb63   :  { %v2461_v48 = vmul.f32 %v2445_v22, %v10854_v14  ;;  %v2874_v22 = vmul.f32 0.7978846, %v2858_v26  ;;  %v10919_v14 = vld [vmem:[#allocation10_spill] sm:$0xff] }
 0xb65   :  { %v6058_v27 = vpop.eup %6057  ;;  %v2477_v6 = vadd.f32 1e-05, %v2461_v48  ;;  %v2811_v48 = vmul.f32 0.044715, %v2759_v31 }
 0xb66   :  { %v2619_v17 = vmul.f32 %v6058_v27, %v2476_v20  ;;  %vm2625_vm9 = vweird.f32 %v6058_v27 }
 0xb67   :  { %6059 = vrsqrt.f32 %v2477_v6  ;;  %vm2626_vm11 = vmor %vm2624_vm10, %vm2625_vm9  ;;  %vm2634_vm13 = vweird.f32 %v2477_v6  ;;  %v2827_v63 = vmul.f32 %v2811_v48, %v2759_v31 }
 0xb68   :  { %v2620_v10 = vmul.f32 %v6058_v27, %v2619_v17  ;;  %v2828_v17 = vmul.f32 %v2812_v59, %v2761_v43  ;;  %6061 = vtanh.f32 %v2874_v22 }
 0xb69   :  { %v2843_v0 = vmul.f32 %v2827_v63, %v2759_v31 }
 0xb6a   :  { %v2621_v55 = vmul.f32 0.5, %v2620_v10  ;;  %v2765_v10 = vpop.f32.mrf.mxu0 }
 0xb6b   :  { %v2859_v47 = vadd.f32 %v2843_v0, %v2759_v31 }
 0xb6c   :  { %v2622_v51 = vsub.f32 1.5, %v2621_v55 }
 0xb6d   :  { %v6060_v49 = vpop.eup %6059 }
 0xb6e   :  { %v2623_v37 = vmul.f32 %v6058_v27, %v2622_v51  ;;  %v2629_v7 = vmul.f32 %v6060_v49, %v2477_v6  ;;  %vm2635_vm12 = vweird.f32 %v6060_v49  ;;  %v6062_v55 = vpop.eup %6061  ;;  %v2766_v51 = vadd.f32 %v8577_v56, %v2765_v10 }
 0xb6f   :  { %vm2636_vm14 = vmor %vm2634_vm13, %vm2635_vm12  ;;  %v2906_v33 = vadd.f32 1.0, %v6062_v55 }
 0xb70   :  { %v2630_v57 = vmul.f32 %v6060_v49, %v2629_v7  ;;  %v2627_v39 = vsel %vm2626_vm11, %v6058_v27, %v2623_v37  ;;  %v2873_v27 = vmul.f32 0.7978846, %v2857_v40  ;;  %v2814_v7 = vmul.f32 0.044715, %v2766_v51 }
 0xb71   :  { %v2652_v50 = vmul.f32 %v2627_v39, %v8520_v19  ;;  %v2922_v21 = vmul.f32 %v2906_v33, %v2794_v5  ;;  %v2875_v39 = vmul.f32 0.7978846, %v2859_v47 }
 0xb72   :  { %v2631_v11 = vmul.f32 0.5, %v2630_v57  ;;  %6063 = vtanh.f32 %v2873_v27  ;;  %v2793_v57 = vmul.f32 0.5, %v8586_v23 }
 0xb73   :  { %v2671_v42 = vmul.f32 %v8343_v52, %v2652_v50 }
 0xb74   :  { %v2632_v1 = vsub.f32 1.5, %v2631_v11 }
 0xb75   :  { %v2690_v6 = vadd.f32 %v8350_v4, %v2671_v42 }
 0xb76   :  { %v2633_v29 = vmul.f32 %v6060_v49, %v2632_v1  ;;  %v2830_v1 = vmul.f32 %v2814_v7, %v2766_v51 }
 0xb78   :  { %v2637_v9 = vsel %vm2636_vm14, %v6060_v49, %v2633_v29  ;;  %v6064_v58 = vpop.eup %6063  ;;  %v2768_v49 = vpop.f32.mrf.mxu0  ;;  %v2846_v40 = vmul.f32 %v2830_v1, %v2766_v51 }
 0xb79   :  { %v2653_v20 = vmul.f32 %v2637_v9, %v8528_v34  ;;  %v2844_v34 = vmul.f32 %v2828_v17, %v2761_v43  ;;  %v2905_v37 = vadd.f32 1.0, %v6064_v58  ;;  %v2769_v23 = vadd.f32 %v8577_v56, %v2768_v49 }
 0xb7a   :  { %v2862_v42 = vadd.f32 %v2846_v40, %v2766_v51  ;;  %v2795_v17 = vmul.f32 0.5, %v2759_v31 }
 0xb7b   :  { %v2672_v19 = vmul.f32 %v8343_v52, %v2653_v20  ;;  %v2860_v52 = vadd.f32 %v2844_v34, %v2761_v43  ;;  %v2921_v61 = vmul.f32 %v2905_v37, %v2793_v57  ;;  %v2815_v10 = vmul.f32 0.044715, %v2769_v23 }
 0xb7d   :  { %v2691_v15 = vadd.f32 %v8350_v4, %v2672_v19  ;;  %v2764_v4 = vadd.f32 %v8577_v56, %v2763_v38  ;;  %v2876_v53 = vmul.f32 0.7978846, %v2860_v52  ;;  %v2937_v50 = vpack.c.bf16 %v2922_v21, %v2921_v61 }
 0xb7e   :  { %v2796_v19 = vmul.f32 0.5, %v2761_v43  ;;  %v2831_v58 = vmul.f32 %v2815_v10, %v2769_v23  ;;  %v2798_v21 = vmul.f32 0.5, %v2766_v51 }
 0xb7f   :  { %v2699_v3 = vpack.c.bf16 %v2691_v15, %v2690_v6  ;;  %v2813_v11 = vmul.f32 0.044715, %v2764_v4  ;;  %6065 = vtanh.f32 %v2876_v53  ;;  %v2878_v15 = vmul.f32 0.7978846, %v2862_v42 }
 0xb80   :  { %6067 = vtanh.f32 %v2875_v39  ;;  %v2770_v26 = vpop.f32.mrf.mxu0  ;;  %v2847_v47 = vmul.f32 %v2831_v58, %v2769_v23  ;;  %v2797_v1 = vmul.f32 0.5, %v2764_v4 }
 0xb81   :  { %5594 = vmatmul.msk.bf16.gmra.mxu1 %vm1154_vm2, %v2699_v3  ;;  %v2829_v29 = vmul.f32 %v2813_v11, %v2764_v4  ;;  %v2771_v20 = vadd.f32 %v8577_v56, %v2770_v26  ;;  %6069 = vtanh.f32 %v2878_v15 }
 0xb82   :  { %v2863_v57 = vadd.f32 %v2847_v47, %v2769_v23 }
 0xb83   :  { %v2845_v9 = vmul.f32 %v2829_v29, %v2764_v4  ;;  %v2816_v6 = vmul.f32 0.044715, %v2771_v20 }
 0xb84   :  { %v2879_v26 = vmul.f32 0.7978846, %v2863_v57 }
 0xb85   :  { %v6066_v38 = vpop.eup %6065  ;;  %v2861_v22 = vadd.f32 %v2845_v9, %v2764_v4  ;;  %v2832_v0 = vmul.f32 %v2816_v6, %v2771_v20 }
 0xb86   :  { %v6068_v28 = vpop.eup %6067  ;;  %v2908_v59 = vadd.f32 1.0, %v6066_v38 }
 0xb87   :  { %v2907_v27 = vadd.f32 1.0, %v6068_v28  ;;  %v2877_v3 = vmul.f32 0.7978846, %v2861_v22  ;;  %v2848_v52 = vmul.f32 %v2832_v0, %v2771_v20  ;;  %v6070_v49 = vpop.eup %6069  ;;  %v2799_v0 = vmul.f32 0.5, %v2769_v23 }
 0xb88   :  { %v2773_v48 = vpop.f32.mrf.mxu0  ;;  %v2924_v63 = vmul.f32 %v2908_v59, %v2796_v19  ;;  %v2910_v31 = vadd.f32 1.0, %v6070_v49 }
 0xb89   :  { %v2923_v34 = vmul.f32 %v2907_v27, %v2795_v17  ;;  %6071 = vtanh.f32 %v2877_v3  ;;  %v2864_v7 = vadd.f32 %v2848_v52, %v2771_v20  ;;  %v2774_v53 = vadd.f32 %v8577_v56, %v2773_v48 }
 0xb8b   :  { %v2938_v55 = vpack.c.bf16 %v2924_v63, %v2923_v34  ;;  %v2778_v5 = vpop.f32.mrf.mxu1  ;;  %v2880_v61 = vmul.f32 0.7978846, %v2864_v7  ;;  %v2817_v29 = vmul.f32 0.044715, %v2774_v53  ;;  %v2800_v63 = vmul.f32 0.5, %v2771_v20 }
 0xb8c   :  { %v2779_v4 = vadd.f32 %v8577_v56, %v2778_v5 }
 0xb8d   :  { %6073 = vtanh.f32 %v2880_v61  ;;  %v2833_v42 = vmul.f32 %v2817_v29, %v2774_v53 }
 0xb8e   :  { %6075 = vtanh.f32 %v2879_v26  ;;  %v2819_v58 = vmul.f32 0.044715, %v2779_v4 }
 0xb8f   :  { %v6072_v43 = vpop.eup %6071  ;;  %v2849_v48 = vmul.f32 %v2833_v42, %v2774_v53 }
 0xb90   :  { %v2775_v33 = vpop.f32.mrf.mxu0  ;;  %v2909_v39 = vadd.f32 1.0, %v6072_v43  ;;  %v2835_v43 = vmul.f32 %v2819_v58, %v2779_v4 }
 0xb91   :  { %3021 = vmatmul.bf16.vlgmr.msra.gmra.mxu1 %v2937_v50  ;;  %v2776_v37 = vadd.f32 %v8577_v56, %v2775_v33  ;;  %v2926_v50 = vmul.f32 %v2910_v31, %v2798_v21  ;;  %v2865_v15 = vadd.f32 %v2849_v48, %v2774_v53 }
 0xb92   :  { %v2925_v40 = vmul.f32 %v2909_v39, %v2797_v1  ;;  %v2851_v57 = vmul.f32 %v2835_v43, %v2779_v4 }
 0xb93   :  { %v2818_v11 = vmul.f32 0.044715, %v2776_v37  ;;  %v2780_v9 = vpop.f32.mrf.mxu1  ;;  %v6074_v22 = vpop.eup %6073  ;;  %v2881_v52 = vmul.f32 0.7978846, %v2865_v15  ;;  %v2802_v1 = vmul.f32 0.5, %v2776_v37 }
 0xb94   :  { %v2939_v28 = vpack.c.bf16 %v2926_v50, %v2925_v40  ;;  %v6076_v19 = vpop.eup %6075  ;;  %v2781_v51 = vadd.f32 %v8577_v56, %v2780_v9  ;;  %v2912_v6 = vadd.f32 1.0, %v6074_v22  ;;  %v2867_v61 = vadd.f32 %v2851_v57, %v2779_v4 }
 0xb95   :  { %v2834_v38 = vmul.f32 %v2818_v11, %v2776_v37  ;;  %v2911_v10 = vadd.f32 1.0, %v6076_v19  ;;  %v2801_v40 = vmul.f32 0.5, %v2774_v53 }
 0xb96   :  { %v2820_v3 = vmul.f32 0.044715, %v2781_v51 }
 0xb97   :  { %v2850_v59 = vmul.f32 %v2834_v38, %v2776_v37  ;;  %v2927_v33 = vmul.f32 %v2911_v10, %v2799_v0  ;;  %v2804_v10 = vmul.f32 0.5, %v2781_v51 }
 0xb98   :  { %v2836_v49 = vmul.f32 %v2820_v3, %v2781_v51 }
 0xb99   :  { %v2866_v27 = vadd.f32 %v2850_v59, %v2776_v37 }
 0xb9a   :  { %v2852_v7 = vmul.f32 %v2836_v49, %v2781_v51 }
 0xb9b   :  { %v2783_v17 = vpop.f32.mrf.mxu1  ;;  %v2882_v34 = vmul.f32 0.7978846, %v2866_v27 }
 0xb9c   :  { %v2868_v39 = vadd.f32 %v2852_v7, %v2781_v51  ;;  %v2784_v23 = vadd.f32 %v8577_v56, %v2783_v17 }
 0xb9d   :  { %6077 = vtanh.f32 %v2882_v34  ;;  %v2803_v34 = vmul.f32 0.5, %v2779_v4 }
 0xb9e   :  { %6079 = vtanh.f32 %v2881_v52  ;;  %v2884_v26 = vmul.f32 0.7978846, %v2868_v39  ;;  %v2821_v9 = vmul.f32 0.044715, %v2784_v23 }
 0xba0   :  { %6081 = vtanh.f32 %v2884_v26  ;;  %v2837_v48 = vmul.f32 %v2821_v9, %v2784_v23 }
 0xba1   :  { %3026 = vmatmul.bf16.gmra.mxu1 %v2938_v55  ;;  %v2928_v55 = vmul.f32 %v2912_v6, %v2800_v63 }
 0xba2   :  { %v2853_v6 = vmul.f32 %v2837_v48, %v2784_v23 }
 0xba3   :  { %v2940_v47 = vpack.c.bf16 %v2928_v55, %v2927_v33  ;;  %v2785_v31 = vpop.f32.mrf.mxu1  ;;  %v6078_v5 = vpop.eup %6077 }
 0xba4   :  { %v6080_v21 = vpop.eup %6079  ;;  %v2786_v20 = vadd.f32 %v8577_v56, %v2785_v31  ;;  %v2914_v11 = vadd.f32 1.0, %v6078_v5  ;;  %v2869_v63 = vadd.f32 %v2853_v6, %v2784_v23  ;;  %v2805_v31 = vmul.f32 0.5, %v2784_v23  ;;  %v8628_v23 = vld [vmem:[%s10362_s21] ss:$0 sm:$0xff] }
 0xba5   :  { %v2913_v50 = vadd.f32 1.0, %v6080_v21 }
 0xba6   :  { %v2822_v29 = vmul.f32 0.044715, %v2786_v20  ;;  %v2930_v38 = vmul.f32 %v2914_v11, %v2802_v1  ;;  %v6082_v27 = vpop.eup %6081  ;;  %v2885_v55 = vmul.f32 0.7978846, %v2869_v63  ;;  %v2806_v43 = vmul.f32 0.5, %v2786_v20 }
 0xba7   :  { %v2929_v42 = vmul.f32 %v2913_v50, %v2801_v40  ;;  %v2916_v37 = vadd.f32 1.0, %v6082_v27 }
 0xba8   :  { %v2838_v59 = vmul.f32 %v2822_v29, %v2786_v20 }
 0xba9   :  { %v2941_v22 = vpack.c.bf16 %v2930_v38, %v2929_v42  ;;  %v2932_v0 = vmul.f32 %v2916_v37, %v2804_v10 }
 0xbaa   :  { %v2854_v19 = vmul.f32 %v2838_v59, %v2786_v20 }
 0xbac   :  { %v2870_v17 = vadd.f32 %v2854_v19, %v2786_v20 }
 0xbae   :  { %v2886_v53 = vmul.f32 0.7978846, %v2870_v17 }
 0xbb1   :  { %3031 = vmatmul.bf16.gmra.mxu1 %v2939_v28  ;;  %v2883_v28 = vmul.f32 0.7978846, %v2867_v61 }
 0xbb3   :  { %6083 = vtanh.f32 %v2883_v28 }
 0xbb4   :  { %6085 = vtanh.f32 %v2886_v53 }
 0xbb5   :  { %6087 = vtanh.f32 %v2885_v55 }
 0xbb9   :  { %v6084_v15 = vpop.eup %6083 }
 0xbba   :  { %v2915_v3 = vadd.f32 1.0, %v6084_v15  ;;  %v6086_v33 = vpop.eup %6085 }
 0xbbb   :  { %v6088_v49 = vpop.eup %6087 }
 0xbbc   :  { %v2931_v58 = vmul.f32 %v2915_v3, %v2803_v34  ;;  %v2917_v7 = vadd.f32 1.0, %v6088_v49 }
 0xbbe   :  { %v2942_v52 = vpack.c.bf16 %v2932_v0, %v2931_v58  ;;  %v2933_v57 = vmul.f32 %v2917_v7, %v2805_v31  ;;  %v10888_v7 = vld [vmem:[#allocation13_spill] sm:$0xff] }
 0xbc1   :  { %3036 = vmatmul.bf16.gmra.mxu1 %v2940_v47  ;;  %v2918_v47 = vadd.f32 1.0, %v6086_v33 }
 0xbc3   :  { %v2934_v5 = vmul.f32 %v2918_v47, %v2806_v43 }
 0xbc5   :  { %v2943_v21 = vpack.c.bf16 %v2934_v5, %v2933_v57 }
 0xbd1   :  { %3041 = vmatmul.bf16.gmra.mxu1 %v2941_v22 }
 0xbe1   :  { %3046 = vmatmul.bf16.gmra.mxu1 %v2942_v52 }
 0xbf1   :  { %3051 = vmatmul.bf16.gmra.mxu1 %v2943_v21 }
 0xbfe   :  { %v2788_v51 = vpop.f32.mrf.mxu1 }
 0xbff   :  { %v2789_v4 = vadd.f32 %v8577_v56, %v2788_v51  ;;  %v10891_v51 = vld [vmem:[#allocation12_spill] sm:$0xff] }
 0xc01   :  { %v2823_v39 = vmul.f32 0.044715, %v2789_v4  ;;  %v2807_v63 = vmul.f32 0.5, %v2789_v4 }
 0xc03   :  { %v2839_v11 = vmul.f32 %v2823_v39, %v2789_v4 }
 0xc05   :  { %v2855_v61 = vmul.f32 %v2839_v11, %v2789_v4 }
 0xc06   :  { %v2790_v1 = vpop.f32.mrf.mxu1 }
 0xc07   :  { %v2791_v50 = vadd.f32 %v8577_v56, %v2790_v1  ;;  %v2871_v26 = vadd.f32 %v2855_v61, %v2789_v4 }
 0xc09   :  { %v2824_v29 = vmul.f32 0.044715, %v2791_v50  ;;  %v2887_v20 = vmul.f32 0.7978846, %v2871_v26  ;;  %v2808_v10 = vmul.f32 0.5, %v2791_v50 }
 0xc0b   :  { %v2840_v40 = vmul.f32 %v2824_v29, %v2791_v50  ;;  %6089 = vtanh.f32 %v2887_v20  ;;  %v10892_v29 = vld [vmem:[#allocation30_spill] sm:$0xff] }
 0xc0c   :  { %v10894_v20 = vld [vmem:[#allocation38_spill] sm:$0xff] }
 0xc0d   :  { %v2856_v38 = vmul.f32 %v2840_v40, %v2791_v50  ;;  %v10893_v40 = vld [vmem:[#allocation91_spill] sm:$0xff] }
 0xc0e   :  { %v3022_v9 = vpop.f32.mrf.mxu1 }
 0xc0f   :  { %v2872_v28 = vadd.f32 %v2856_v38, %v2791_v50  ;;  %v3023_v59 = vadd.f32 %v8628_v23, %v3022_v9 }
 0xc11   :  { %v2888_v42 = vmul.f32 0.7978846, %v2872_v28  ;;  %v6090_v48 = vpop.eup %6089  ;;  %v8632_v56 = vadd.f32 %v3023_v59, %v8224_v16 }
 0xc12   :  { %v2919_v15 = vadd.f32 1.0, %v6090_v48  ;;  %v10895_v48 = vld [vmem:[#allocation8_spill] sm:$0xff] }
 0xc13   :  { %6091 = vtanh.f32 %v2888_v42  ;;  %v10583_v17 = vrot.slane %v8632_v56, 7 }
 0xc14   :  { %v2935_v34 = vmul.f32 %v2919_v15, %v2807_v63 }
 0xc16   :  { %v3024_v22 = vpop.f32.mrf.mxu1 }
 0xc17   :  { %v3025_v19 = vadd.f32 %v8628_v23, %v3024_v22 }
 0xc19   :  { %v8636_v27 = vadd.f32 %v3025_v19, %v8230_v8  ;;  %v6092_v6 = vpop.eup %6091 }
 0xc1a   :  { %v2920_v3 = vadd.f32 1.0, %v6092_v6 }
 0xc1b   :  { %v3095_v37 = vrot.slane %v8636_v27, 7  ;;  %v3176_v33 = vmul.f32 %v8636_v27, %v10783_v41  ;;  %v10584_v49 = vrot.slane %v8636_v27, 1 }
 0xc1c   :  { %v2936_v0 = vmul.f32 %v2920_v3, %v2808_v10  ;;  %v10897_v3 = vld [vmem:[#allocation47_spill] sm:$0xff] }
 0xc1d   :  { %v8644_v16 = vsel %vm147_vm0, %v10583_v17, %v3095_v37  ;;  %v3192_v4 = vmul.f32 %v3176_v33, %v10891_v51 }
 0xc1e   :  { %v3027_v53 = vpop.f32.mrf.mxu1  ;;  %v3128_v55 = vmul.f32 %v8644_v16, %v6586_v54  ;;  %v2944_v58 = vpack.c.bf16 %v2936_v0, %v2935_v34  ;;  %v10898_v34 = vld [vmem:[#allocation40_spill] sm:$0xff] }
 0xc1f   :  { %v3028_v8 = vadd.f32 %v8628_v23, %v3027_v53 }
 0xc20   :  { %3056 = vmatmul.bf16.gmra.mxu1 %v2944_v58  ;;  %v3144_v31 = vmul.f32 %v3128_v55, %v10888_v7 }
 0xc21   :  { %v8650_v52 = vadd.f32 %v3028_v8, %v8236_v24  ;;  %v10899_v8 = vld [vmem:[#allocation22_spill] sm:$0xff] }
 0xc23   :  { %v3080_v47 = vmul.f32 %v8650_v52, %v6607_v60  ;;  %v3096_v43 = vrot.slane %v8650_v52, 7  ;;  %v3224_v5 = vrot.slane %v8650_v52, 1  ;;  %v3177_v28 = vmul.f32 %v8650_v52, %v10783_v41 }
 0xc25   :  { %v8662_v57 = vsel %vm147_vm0, %v3095_v37, %v3096_v43  ;;  %v3160_v24 = vadd.f32 %v3144_v31, %v3080_v47  ;;  %v8668_v21 = vsel %vm422_vm1, %v10584_v49, %v3224_v5  ;;  %v3193_v55 = vmul.f32 %v3177_v28, %v10899_v8  ;;  %v10900_v31 = vld [vmem:[#allocation61_spill] sm:$0xff]  ;;  %v10905_v28 = vld [vmem:[#allocation2_spill] sm:$0xff] }
 0xc26   :  { %10889 = vst [vmem:[#allocation99_spill] sm:$0xff] %v8662_v57  ;;  %v3029_v39 = vpop.f32.mrf.mxu1  ;;  %v3256_v11 = vmul.f32 %v8668_v21, %v6636_v12  ;;  %v3129_v1 = vmul.f32 %v8662_v57, %v6586_v54  ;;  %v3304_v9 = vmul.f32 %v8662_v57, %v10894_v20 }
 0xc27   :  { %10890 = vst [vmem:[#allocation102_spill] sm:$0xff] %v8668_v21  ;;  %v3030_v61 = vadd.f32 %v8628_v23, %v3029_v39  ;;  %v3208_v50 = vadd.f32 %v3192_v4, %v3160_v24  ;;  %v10901_v24 = vld [vmem:[#allocation44_spill] sm:$0xff]  ;;  %v10902_v4 = vld [vmem:[#allocation93_spill] sm:$0xff]  ;;  %v10921_v21 = vld [vmem:[#allocation62_spill] sm:$0xff] }
 0xc28   :  { %v3272_v26 = vmul.f32 %v3256_v11, %v10892_v29  ;;  %v3145_v19 = vmul.f32 %v3129_v1, %v10895_v48  ;;  %v3320_v53 = vmul.f32 %v3304_v9, %v10897_v3  ;;  %v10904_v29 = vld [vmem:[#allocation31_spill] sm:$0xff] }
 0xc29   :  { %v8678_v38 = vadd.f32 %v3030_v61, %v10893_v40  ;;  %v10903_v61 = vld [vmem:[#allocation45_spill] sm:$0xff] }
 0xc2a   :  { %v3288_v6 = vadd.f32 %v3272_v26, %v3208_v50 }
 0xc2b   :  { %v3081_v42 = vmul.f32 %v8678_v38, %v6607_v60  ;;  %v3097_v59 = vrot.slane %v8678_v38, 7  ;;  %v3225_v22 = vrot.slane %v8678_v38, 1  ;;  %v3448_v1 = vmul.f32 %v8678_v38, %v10903_v61 }
 0xc2c   :  { %v3336_v7 = vadd.f32 %v3320_v53, %v3288_v6 }
 0xc2d   :  { %v3122_v15 = vsel %vm147_vm0, %v3096_v43, %v3097_v59  ;;  %v8693_v37 = vsel %vm422_vm1, %v3224_v5, %v3225_v22  ;;  %v3161_v63 = vadd.f32 %v3145_v19, %v3081_v42  ;;  %v3178_v43 = vmul.f32 %v8678_v38, %v10783_v41  ;;  %v10906_v19 = vld [vmem:[#allocation4_spill] sm:$0xff] }
 0xc2e   :  { %10896 = vst [vmem:[#allocation100_spill] sm:$0xff] %v8693_v37  ;;  %v3032_v10 = vpop.f32.mrf.mxu1  ;;  %v3352_v0 = vmul.f32 %v8693_v37, %v10898_v34  ;;  %v3130_v33 = vmul.f32 %v3122_v15, %v6586_v54  ;;  %v3257_v47 = vmul.f32 %v8693_v37, %v6636_v12  ;;  %v3400_v51 = vmul.f32 %v3122_v15, %v10901_v24 }
 0xc2f   :  { %v3033_v58 = vadd.f32 %v8628_v23, %v3032_v10  ;;  %v3209_v50 = vadd.f32 %v3193_v55, %v3161_v63  ;;  %v3194_v6 = vmul.f32 %v3178_v43, %v10906_v19  ;;  %v10907_v10 = vld [vmem:[#allocation59_spill] sm:$0xff]  ;;  %v3305_v53 = vmul.f32 %v3122_v15, %v10894_v20 }
 0xc30   :  { %v3368_v5 = vmul.f32 %v3352_v0, %v10900_v31  ;;  %v3273_v26 = vmul.f32 %v3257_v47, %v10904_v29  ;;  %v3146_v42 = vmul.f32 %v3130_v33, %v10905_v28  ;;  %v3416_v3 = vmul.f32 %v3400_v51, %v10907_v10  ;;  %v8735_v51 = vld [vmem:[%s10647_s10 + $0x8] ss:$0 sm:$0xff]  ;;  %v10909_v29 = vld [vmem:[#allocation16_spill] sm:$0xff] }
 0xc31   :  { %v8708_v39 = vadd.f32 %v3033_v58, %v10902_v4  ;;  %v10910_v28 = vld [vmem:[#allocation32_spill] sm:$0xff]  ;;  %v10912_v10 = vld [vmem:[#allocation11_spill] sm:$0xff] }
 0xc32   :  { %v3384_v11 = vadd.f32 %v3368_v5, %v3336_v7  ;;  %v3289_v7 = vadd.f32 %v3273_v26, %v3209_v50  ;;  %v10908_v5 = vld [vmem:[#allocation79_spill] sm:$0xff]  ;;  %v10911_v26 = vld [vmem:[#allocation74_spill] sm:$0xff] }
 0xc33   :  { %v3082_v40 = vmul.f32 %v8708_v39, %v6607_v60  ;;  %v3098_v9 = vrot.slane %v8708_v39, 7  ;;  %v3226_v48 = vrot.slane %v8708_v39, 1  ;;  %v3179_v8 = vmul.f32 %v8708_v39, %v10783_v41 }
 0xc34   :  { %v3432_v43 = vadd.f32 %v3416_v3, %v3384_v11 }
 0xc35   :  { %v3121_v63 = vsel %vm147_vm0, %v3097_v59, %v3098_v9  ;;  %v3162_v0 = vadd.f32 %v3146_v42, %v3082_v40  ;;  %v3249_v55 = vsel %vm422_vm1, %v3225_v22, %v3226_v48  ;;  %v3464_v59 = vmul.f32 %v3448_v1, %v10908_v5 }
 0xc36   :  { %v3034_v58 = vpop.f32.mrf.mxu1  ;;  %v3131_v33 = vmul.f32 %v3121_v63, %v6586_v54  ;;  %v3258_v47 = vmul.f32 %v3249_v55, %v6636_v12  ;;  %v3306_v15 = vmul.f32 %v3121_v63, %v10894_v20  ;;  %v3496_v22 = vmul.f32 %v8735_v51, %v3249_v55 }
 0xc37   :  { %v3035_v31 = vadd.f32 %v8628_v23, %v3034_v58  ;;  %v3210_v4 = vadd.f32 %v3194_v6, %v3162_v0  ;;  %v3321_v42 = vmul.f32 %v3305_v53, %v10910_v28  ;;  %v3353_v11 = vmul.f32 %v3249_v55, %v10898_v34  ;;  %v10913_v58 = vld [vmem:[#allocation3_spill] sm:$0xff] }
 0xc38   :  { %v3274_v40 = vmul.f32 %v3258_v47, %v10909_v29  ;;  %v3512_v19 = vmul.f32 %v3496_v22, %v10911_v26  ;;  %v3449_v1 = vmul.f32 %v8708_v39, %v10903_v61  ;;  %v3195_v3 = vmul.f32 %v3179_v8, %v10912_v10  ;;  %v10915_v29 = vld [vmem:[#allocation49_spill] sm:$0xff]  ;;  %v10917_v10 = vld [vmem:[#allocation23_spill] sm:$0xff] }
 0xc39   :  { %v8742_v50 = vadd.f32 %v3035_v31, %v8254_v25  ;;  %v3147_v5 = vmul.f32 %v3131_v33, %v10913_v58  ;;  %v3480_v17 = vadd.f32 %v3464_v59, %v3432_v43  ;;  %v3337_v6 = vadd.f32 %v3321_v42, %v3289_v7  ;;  %v10914_v25 = vld [vmem:[#allocation14_spill] sm:$0xff] }
 0xc3a   :  { %v3322_v47 = vmul.f32 %v3306_v15, %v10914_v25  ;;  %v3290_v31 = vadd.f32 %v3274_v40, %v3210_v4  ;;  %v3369_v28 = vmul.f32 %v3353_v11, %v10915_v29  ;;  %v3401_v26 = vmul.f32 %v3121_v63, %v10901_v24  ;;  %v10918_v25 = vld [vmem:[#allocation5_spill] sm:$0xff] }
 0xc3b   :  { %v3083_v0 = vmul.f32 %v8742_v50, %v6607_v60  ;;  %v3099_v53 = vrot.slane %v8742_v50, 7  ;;  %v3227_v55 = vrot.slane %v8742_v50, 1  ;;  %v3528_v22 = vadd.f32 %v3512_v19, %v3480_v17 }
 0xc3c   :  { %v3180_v33 = vmul.f32 %v8742_v50, %v10783_v41  ;;  %v3450_v63 = vmul.f32 %v8742_v50, %v10903_v61  ;;  %v3385_v37 = vadd.f32 %v3369_v28, %v3337_v6 }
 0xc3d   :  { %v3163_v8 = vadd.f32 %v3147_v5, %v3083_v0  ;;  %v3120_v43 = vsel %vm147_vm0, %v3098_v9, %v3099_v53  ;;  %v3248_v7 = vsel %vm422_vm1, %v3226_v48, %v3227_v55  ;;  %v10916_v9 = vld [vmem:[#allocation70_spill] sm:$0xff]  ;;  %v3338_v48 = vadd.f32 %v3322_v47, %v3290_v31 }
 0xc3e   :  { %v3037_v59 = vpop.f32.mrf.mxu1  ;;  %v3132_v42 = vmul.f32 %v3120_v43, %v6586_v54  ;;  %v3354_v15 = vmul.f32 %v3248_v7, %v10898_v34  ;;  %v3402_v17 = vmul.f32 %v3120_v43, %v10901_v24  ;;  %v3259_v40 = vmul.f32 %v3248_v7, %v6636_v12 }
 0xc3f   :  { %v3038_v4 = vadd.f32 %v8628_v23, %v3037_v59  ;;  %v3307_v11 = vmul.f32 %v3120_v43, %v10894_v20  ;;  %v8771_v19 = vmul.f32 %v3449_v1, %v10916_v9  ;;  %v3211_v5 = vadd.f32 %v3195_v3, %v3163_v8  ;;  %v10922_v9 = vld [vmem:[#allocation65_spill] sm:$0xff]  ;;  %v10923_v8 = vld [vmem:[#allocation46_spill] sm:$0xff] }
 0xc40   :  { %v3370_v58 = vmul.f32 %v3354_v15, %v10917_v10  ;;  %v3544_v0 = vadd.f32 %v3528_v22, %v8650_v52  ;;  %v3196_v29 = vmul.f32 %v3180_v33, %v10918_v25  ;;  %v3275_v59 = vmul.f32 %v3259_v40, %v10919_v14  ;;  %v8791_v14 = vld [vmem:[%s10677_s0] ss:$0 sm:$0xff] }
 0xc41   :  { %v8777_v49 = vadd.f32 %v3038_v4, %v8274_v62  ;;  %v3148_v57 = vmul.f32 %v3132_v42, %v10920_v44  ;;  %v3418_v1 = vmul.f32 %v3402_v17, %v10921_v21  ;;  %v3466_v47 = vmul.f32 %v3450_v63, %v10922_v9  ;;  %v10925_v21 = vld [vmem:[#allocation71_spill] sm:$0xff] }
 0xc42   :  { %v3386_v43 = vadd.f32 %v3370_v58, %v3338_v48  ;;  %v3323_v62 = vmul.f32 %v3307_v11, %v10923_v8  ;;  %v3291_v15 = vadd.f32 %v3275_v59, %v3211_v5  ;;  %v8794_v44 = vadd.f32 %v8791_v14, %v3544_v0  ;;  %v10926_v0 = vld [vmem:[#allocation27_spill] sm:$0xff]  ;;  %v10928_v59 = vld [vmem:[#allocation34_spill] sm:$0xff] }
 0xc43   :  { %v3084_v3 = vmul.f32 %v8777_v49, %v6607_v60  ;;  %v3100_v31 = vrot.slane %v8777_v49, 7  ;;  %v3228_v22 = vrot.slane %v8777_v49, 1  ;;  %v3417_v6 = vmul.f32 %v3401_v26, %v10925_v21 }
 0xc44   :  { %v3434_v33 = vadd.f32 %v3418_v1, %v3386_v43  ;;  %10924 = vst [vmem:[#allocation94_spill] sm:$0xff] %v8794_v44  ;;  %v3181_v28 = vmul.f32 %v8777_v49, %v10783_v41  ;;  %v3451_v26 = vmul.f32 %v8777_v49, %v10903_v61  ;;  %v8819_v8 = vsel %vm1154_vm2, %v8794_v44, 0.0 }
 0xc45   :  { %v3247_v42 = vsel %vm422_vm1, %v3227_v55, %v3228_v22  ;;  %v3119_v17 = vsel %vm147_vm0, %v3099_v53, %v3100_v31  ;;  %v3164_v63 = vadd.f32 %v3148_v57, %v3084_v3  ;;  %v3339_v55 = vadd.f32 %v3323_v62, %v3291_v15  ;;  %v10927_v53 = vld [vmem:[#allocation64_spill] sm:$0xff]  ;;  %v10929_v62 = vld [vmem:[#allocation7_spill] sm:$0xff] }
 0xc46   :  { %v3039_v4 = vpop.f32.mrf.mxu1  ;;  %v3260_v40 = vmul.f32 %v3247_v42, %v6636_v12  ;;  %v3355_v11 = vmul.f32 %v3247_v42, %v10898_v34  ;;  %v3498_v48 = vmul.f32 %v8735_v51, %v3247_v42  ;;  %v3482_v58 = vadd.f32 %v3466_v47, %v3434_v33 }
 0xc47   :  { %v3040_v10 = vadd.f32 %v8628_v23, %v3039_v4  ;;  %v3133_v5 = vmul.f32 %v3119_v17, %v6586_v54  ;;  %v3403_v1 = vmul.f32 %v3119_v17, %v10901_v24  ;;  %v3212_v3 = vadd.f32 %v3196_v29, %v3164_v63  ;;  %v10931_v29 = vld [vmem:[#allocation54_spill] sm:$0xff] }
 0xc48   :  { %v3276_v25 = vmul.f32 %v3260_v40, %v10926_v0  ;;  %v3514_v57 = vmul.f32 %v3498_v48, %v10927_v53  ;;  %v3371_v43 = vmul.f32 %v3355_v11, %v10928_v59  ;;  %v8822_v47 = vmul.f32 %v8735_v51, %v3248_v7 }
 0xc49   :  { %v8815_v9 = vadd.f32 %v3040_v10, %v8287_v36  ;;  %v3197_v33 = vmul.f32 %v3181_v28, %v10929_v62  ;;  %v3308_v42 = vmul.f32 %v3119_v17, %v10894_v20  ;;  %v10930_v36 = vld [vmem:[#allocation18_spill] sm:$0xff]  ;;  %v3467_v63 = vmul.f32 %v3451_v26, %v10931_v29  ;;  %v10932_v10 = vld [vmem:[#allocation53_spill] sm:$0xff]  ;;  %v10936_v29 = vld [vmem:[#allocation56_spill] sm:$0xff] }
 0xc4a   :  { %v3530_v15 = vadd.f32 %v3514_v57, %v3482_v58  ;;  %v3387_v21 = vadd.f32 %v3371_v43, %v3339_v55  ;;  %v3149_v11 = vmul.f32 %v3133_v5, %v10930_v36  ;;  %v3419_v0 = vmul.f32 %v3403_v1, %v10932_v10  ;;  %v10935_v36 = vld [vmem:[#allocation124_spill] sm:$0xff] }
 0xc4b   :  { %v3101_v4 = vrot.slane %v8815_v9, 7  ;;  %v3229_v40 = vrot.slane %v8815_v9, 1  ;;  %v3292_v7 = vadd.f32 %v3276_v25, %v3212_v3  ;;  %v8832_v53 = vadd.f32 %v3417_v6, %v3385_v37  ;;  %v10933_v6 = vld [vmem:[#allocation6_spill] sm:$0xff]  ;;  %v10934_v3 = vld [vmem:[#allocation21_spill] sm:$0xff] }
 0xc4c   :  { %v3546_v48 = vadd.f32 %v3530_v15, %v8708_v39  ;;  %v3085_v28 = vmul.f32 %v8815_v9, %v6607_v60  ;;  %v3182_v17 = vmul.f32 %v8815_v9, %v10783_v41  ;;  %v3435_v37 = vadd.f32 %v3419_v0, %v3387_v21 }
 0xc4d   :  { %v3246_v58 = vsel %vm422_vm1, %v3228_v22, %v3229_v40  ;;  %v3118_v5 = vsel %vm147_vm0, %v3100_v31, %v3101_v4  ;;  %v3324_v25 = vmul.f32 %v3308_v42, %v10933_v6  ;;  %v3452_v10 = vmul.f32 %v8815_v9, %v10903_v61 }
 0xc4e   :  { %v3042_v26 = vpop.f32.mrf.mxu1  ;;  %v8843_v39 = vadd.f32 %v8791_v14, %v3546_v48  ;;  %v3356_v55 = vmul.f32 %v3246_v58, %v10898_v34  ;;  %v3261_v59 = vmul.f32 %v3246_v58, %v6636_v12  ;;  %v3499_v43 = vmul.f32 %v8735_v51, %v3246_v58 }
 0xc4f   :  { %v3043_v57 = vadd.f32 %v8628_v23, %v3042_v26  ;;  %v3134_v22 = vmul.f32 %v3118_v5, %v6586_v54  ;;  %v3340_v1 = vadd.f32 %v3324_v25, %v3292_v7  ;;  %v3404_v15 = vmul.f32 %v3118_v5, %v10901_v24 }
 0xc50   :  { %v3590_v31 = vsel %vm1154_vm2, %v8843_v39, 0.0  ;;  %v3372_v62 = vmul.f32 %v3356_v55, %v10934_v3  ;;  %v8856_v21 = vmul.f32 %v3182_v17, %v10935_v36  ;;  %v3515_v48 = vmul.f32 %v3499_v43, %v10936_v29  ;;  %v10937_v17 = vld [vmem:[#allocation9_spill] sm:$0xff]  ;;  %v10938_v3 = vld [vmem:[#allocation120_spill] sm:$0xff] }
 0xc51   :  { %v8859_v42 = vadd.f32 %v3043_v57, %v8388_v2  ;;  %3591 = vadd.xlane.f32.xlu0 %v3590_v31  ;;  %v3483_v0 = vadd.f32 %v3467_v63, %v3435_v37  ;;  %v3165_v26 = vadd.f32 %v3149_v11, %v3085_v28  ;;  %v3309_v7 = vmul.f32 %v3118_v5, %v10894_v20  ;;  %v10939_v31 = vld [vmem:[#allocation25_spill] sm:$0xff]  ;;  %v10940_v28 = vld [vmem:[#allocation26_spill] sm:$0xff] }
 0xc52   :  { %v3388_v58 = vadd.f32 %v3372_v62, %v3340_v1  ;;  %v3277_v25 = vmul.f32 %v3261_v59, %v10937_v17  ;;  %v3150_v2 = vmul.f32 %v3134_v22, %v10938_v3  ;;  %v3420_v36 = vmul.f32 %v3404_v15, %v10939_v31  ;;  %v10941_v15 = vld [vmem:[#allocation37_spill] sm:$0xff]  ;;  %v10944_v3 = vld [vmem:[#allocation19_spill] sm:$0xff] }
 0xc53   :  { %v3102_v55 = vrot.slane %v8859_v42, 7  ;;  %v3230_v6 = vrot.slane %v8859_v42, 1  ;;  %v3183_v57 = vmul.f32 %v8859_v42, %v10783_v41  ;;  %v3531_v43 = vadd.f32 %v3515_v48, %v3483_v0  ;;  %v10945_v31 = vld [vmem:[#allocation35_spill] sm:$0xff] }
 0xc54   :  { %v3213_v29 = vadd.f32 %v3197_v33, %v3165_v26  ;;  %v3086_v11 = vmul.f32 %v8859_v42, %v6607_v60  ;;  %v3468_v5 = vmul.f32 %v3452_v10, %v10940_v28  ;;  %v3436_v62 = vadd.f32 %v3420_v36, %v3388_v58  ;;  %v10942_v26 = vld [vmem:[#allocation69_spill] sm:$0xff]  ;;  %v10946_v28 = vld [vmem:[#allocation123_spill] sm:$0xff] }
 0xc55   :  { %v3245_v63 = vsel %vm422_vm1, %v3229_v40, %v3230_v6  ;;  %v8879_v37 = vsel %vm147_vm0, %v3101_v4, %v3102_v55  ;;  %v3547_v22 = vadd.f32 %v3531_v43, %v8742_v50  ;;  %v3325_v33 = vmul.f32 %v3309_v7, %v10941_v15 }
 0xc56   :  { %v3044_v59 = vpop.f32.mrf.mxu1  ;;  %v3357_v1 = vmul.f32 %v3245_v63, %v10898_v34  ;;  %v3500_v0 = vmul.f32 %v8735_v51, %v3245_v63  ;;  %v3135_v40 = vmul.f32 %v8879_v37, %v6586_v54  ;;  %v3293_v10 = vadd.f32 %v3277_v25, %v3213_v29 }
 0xc57   :  { %v3045_v48 = vadd.f32 %v8628_v23, %v3044_v59  ;;  %v3199_v17 = vmul.f32 %v3183_v57, %v10942_v26  ;;  %v8890_v4 = vadd.f32 %v8791_v14, %v3547_v22  ;;  %v3405_v58 = vmul.f32 %v8879_v37, %v10901_v24 }
 0xc58   :  { %v3373_v50 = vmul.f32 %v3357_v1, %v10944_v3  ;;  %v3262_v43 = vmul.f32 %v3245_v63, %v6636_v12  ;;  %v3516_v36 = vmul.f32 %v3500_v0, %v10945_v31  ;;  %v3453_v25 = vmul.f32 %v8859_v42, %v10903_v61  ;;  %v10947_v63 = vld [vmem:[#allocation17_spill] sm:$0xff] }
 0xc59   :  { %10943 = vst [vmem:[#allocation92_spill] sm:$0xff] %v8890_v4  ;;  %v8896_v7 = vadd.f32 %v3045_v48, %v8399_v32  ;;  %v3593_v57 = vsel %vm1154_vm2, %v8890_v4, 0.0  ;;  %v3484_v29 = vadd.f32 %v3468_v5, %v3436_v62  ;;  %v3151_v59 = vmul.f32 %v3135_v40, %v10946_v28  ;;  %v10948_v3 = vld [vmem:[#allocation85_spill] sm:$0xff] }
 0xc5a   :  { %v3341_v22 = vadd.f32 %v3325_v33, %v3293_v10  ;;  %3594 = vadd.xlane.f32.xlu2 %v3593_v57  ;;  %v3421_v48 = vmul.f32 %v3405_v58, %v10947_v63  ;;  %v3513_v31 = vmul.f32 %v8822_v47, %v10948_v3  ;;  %v3166_v4 = vadd.f32 %v3150_v2, %v3086_v11  ;;  %v10949_v33 = vld [vmem:[#allocation24_spill] sm:$0xff]  ;;  %v10953_v63 = vld [vmem:[#allocation57_spill] sm:$0xff] }
 0xc5b   :  { %v3087_v1 = vmul.f32 %v8896_v7, %v6607_v60  ;;  %v3103_v32 = vrot.slane %v8896_v7, 7  ;;  %v3231_v15 = vrot.slane %v8896_v7, 1  ;;  %v3532_v0 = vadd.f32 %v3516_v36, %v3484_v29  ;;  %v10951_v29 = vld [vmem:[#allocation142_spill] sm:$0xff] }
 0xc5c   :  { %v3389_v26 = vadd.f32 %v3373_v50, %v3341_v22  ;;  %v3469_v40 = vmul.f32 %v3453_v25, %v10949_v33  ;;  %v3184_v57 = vmul.f32 %v8896_v7, %v10783_v41  ;;  %v3481_v47 = vadd.f32 %v8771_v19, %v8832_v53 }
 0xc5d   :  { %v8914_v5 = vsel %vm147_vm0, %v3102_v55, %v3103_v32  ;;  %v3244_v62 = vsel %vm422_vm1, %v3230_v6, %v3231_v15  ;;  %v3167_v10 = vadd.f32 %v3151_v59, %v3087_v1  ;;  %v3548_v50 = vadd.f32 %v3532_v0, %v8777_v49  ;;  %v10952_v1 = vld [vmem:[#allocation73_spill] sm:$0xff] }
 0xc5e   :  { %v3047_v58 = vpop.f32.mrf.mxu1  ;;  %v3263_v36 = vmul.f32 %v3244_v62, %v6636_v12  ;;  %v3136_v2 = vmul.f32 %v8914_v5, %v6586_v54  ;;  %v3437_v6 = vadd.f32 %v3421_v48, %v3389_v26  ;;  %v3501_v11 = vmul.f32 %v8735_v51, %v3244_v62 }
 0xc5f   :  { %v3048_v55 = vadd.f32 %v8628_v23, %v3047_v58  ;;  %v8930_v25 = vadd.f32 %v8791_v14, %v3548_v50  ;;  %v3529_v59 = vadd.f32 %v3513_v31, %v3481_v47  ;;  %v3215_v49 = vadd.f32 %v3199_v17, %v3167_v10  ;;  %v10954_v31 = vld [vmem:[#allocation106_spill] sm:$0xff] }
 0xc60   :  { %v3279_v28 = vmul.f32 %v3263_v36, %v10951_v29  ;;  %v3278_v19 = vmul.f32 %v3262_v43, %v10952_v1  ;;  %v3485_v53 = vadd.f32 %v3469_v40, %v3437_v6  ;;  %v3517_v0 = vmul.f32 %v3501_v11, %v10953_v63  ;;  %v10955_v40 = vld [vmem:[#allocation111_spill] sm:$0xff] }
 0xc61   :  { %10950 = vst [vmem:[#allocation89_spill] sm:$0xff] %v8930_v25  ;;  %v8934_v22 = vadd.f32 %v3048_v55, %v8408_v35  ;;  %v3596_v48 = vsel %vm1154_vm2, %v8930_v25, 0.0  ;;  %v3311_v3 = vmul.f32 %v8914_v5, %v10894_v20  ;;  %v3214_v33 = vadd.f32 %v8856_v21, %v3166_v4  ;;  %v10971_v25 = vld [vmem:[#allocation148_spill] sm:$0xff] }
 0xc62   :  { %v3295_v26 = vadd.f32 %v3279_v28, %v3215_v49  ;;  %v3152_v10 = vmul.f32 %v3136_v2, %v10954_v31  ;;  %3597 = vadd.xlane.f32.xlu0 %v3596_v48  ;;  %v3200_v58 = vmul.f32 %v3184_v57, %v10955_v40  ;;  %v8950_v50 = vmul.f32 %v3244_v62, %v10898_v34  ;;  %v10956_v2 = vld [vmem:[#allocation143_spill] sm:$0xff]  ;;  %v10960_v48 = vld [vmem:[#allocation133_spill] sm:$0xff]  ;;  %v10961_v40 = vld [vmem:[#allocation42_spill] sm:$0xff] }
 0xc63   :  { %v3088_v17 = vmul.f32 %v8934_v22, %v6607_v60  ;;  %v3104_v35 = vrot.slane %v8934_v22, 7  ;;  %v3232_v43 = vrot.slane %v8934_v22, 1  ;;  %v3533_v36 = vadd.f32 %v3517_v0, %v3485_v53  ;;  %v10959_v53 = vld [vmem:[#allocation119_spill] sm:$0xff] }
 0xc64   :  { %v3545_v47 = vadd.f32 %v3529_v59, %v8678_v38  ;;  %v3327_v6 = vmul.f32 %v3311_v3, %v10956_v2  ;;  %v3185_v11 = vmul.f32 %v8934_v22, %v10783_v41 }
 0xc65   :  { %v3115_v21 = vsel %vm147_vm0, %v3103_v32, %v3104_v35  ;;  %v3168_v4 = vadd.f32 %v3152_v10, %v3088_v17  ;;  %v8957_v55 = vsel %vm422_vm1, %v3231_v15, %v3232_v43  ;;  %v3549_v29 = vadd.f32 %v3533_v36, %v8815_v9 }
 0xc66   :  { %v3049_v57 = vpop.f32.mrf.mxu1  ;;  %v3137_v62 = vmul.f32 %v3115_v21, %v6586_v54  ;;  %v3264_v38 = vmul.f32 %v8957_v55, %v6636_v12  ;;  %v3312_v59 = vmul.f32 %v3115_v21, %v10894_v20  ;;  %v3343_v15 = vadd.f32 %v3327_v6, %v3295_v26  ;;  %v10963_v6 = vld [vmem:[#allocation113_spill] sm:$0xff] }
 0xc67   :  { %v3050_v32 = vadd.f32 %v8628_v23, %v3049_v57  ;;  %v3216_v28 = vadd.f32 %v3200_v58, %v3168_v4  ;;  %v8969_v49 = vadd.f32 %v8791_v14, %v3549_v29  ;;  %v8972_v1 = vadd.f32 %v8791_v14, %v3545_v47  ;;  %v10962_v4 = vld [vmem:[#allocation107_spill] sm:$0xff] }
 0xc68   :  { %v3280_v63 = vmul.f32 %v3264_v38, %v10959_v53  ;;  %v3359_v9 = vmul.f32 %v8957_v55, %v10898_v34  ;;  %v3328_v3 = vmul.f32 %v3312_v59, %v10960_v48  ;;  %v3407_v17 = vmul.f32 %v3115_v21, %v10901_v24 }
 0xc69   :  { %10957 = vst [vmem:[#allocation86_spill] sm:$0xff] %v8969_v49  ;;  %v8978_v0 = vadd.f32 %v3050_v32, %v8421_v45  ;;  %v3455_v26 = vmul.f32 %v8934_v22, %v10903_v61  ;;  %v3599_v31 = vsel %vm1154_vm2, %v8969_v49, 0.0  ;;  %v8987_v36 = vadd.f32 %v3278_v19, %v3214_v33 }
 0xc6a   :  { %10958 = vst [vmem:[#allocation83_spill] sm:$0xff] %v8972_v1  ;;  %v3296_v10 = vadd.f32 %v3280_v63, %v3216_v28  ;;  %v3375_v58 = vmul.f32 %v3359_v9, %v10961_v40  ;;  %v3153_v2 = vmul.f32 %v3137_v62, %v10962_v4  ;;  %3600 = vadd.xlane.f32.xlu2 %v3599_v31  ;;  %v10964_v63 = vld [vmem:[#allocation48_spill] sm:$0xff]  ;;  %v10965_v31 = vld [vmem:[#allocation125_spill] sm:$0xff] }
 0xc6b   :  { %v3089_v47 = vmul.f32 %v8978_v0, %v6607_v60  ;;  %v3105_v45 = vrot.slane %v8978_v0, 7  ;;  %v3233_v21 = vrot.slane %v8978_v0, 1  ;;  %3585 = vadd.xlane.f32.xlu0 %v8819_v8  ;;  %v3201_v57 = vmul.f32 %v3185_v11, %v10963_v6  ;;  %v10966_v40 = vld [vmem:[#allocation77_spill] sm:$0xff] }
 0xc6c   :  { %v3186_v29 = vmul.f32 %v8978_v0, %v10783_v41  ;;  %v3344_v38 = vadd.f32 %v3328_v3, %v3296_v10  ;;  %v3391_v19 = vadd.f32 %v3375_v58, %v3343_v15  ;;  %v3456_v62 = vmul.f32 %v8978_v0, %v10903_v61 }
 0xc6d   :  { %v3114_v33 = vsel %vm147_vm0, %v3104_v35, %v3105_v45  ;;  %v3169_v32 = vadd.f32 %v3153_v2, %v3089_v47  ;;  %v3242_v28 = vsel %vm422_vm1, %v3232_v43, %v3233_v21  ;;  %v3423_v9 = vmul.f32 %v3407_v17, %v10964_v63  ;;  %v10967_v47 = vld [vmem:[#allocation50_spill] sm:$0xff] }
 0xc6e   :  { %v3052_v59 = vpop.f32.mrf.mxu1  ;;  %v3265_v8 = vmul.f32 %v3242_v28, %v6636_v12  ;;  %v3313_v11 = vmul.f32 %v3114_v33, %v10894_v20  ;;  %v3360_v53 = vmul.f32 %v3242_v28, %v10898_v34  ;;  %v3138_v35 = vmul.f32 %v3114_v33, %v6586_v54  ;;  %v10968_v2 = vld [vmem:[#allocation118_spill] sm:$0xff] }
 0xc6f   :  { %v3053_v15 = vadd.f32 %v8628_v23, %v3052_v59  ;;  %v3217_v48 = vadd.f32 %v3201_v57, %v3169_v32  ;;  %v3408_v3 = vmul.f32 %v3114_v33, %v10901_v24  ;;  %v3587_v43 = vsel %vm1154_vm2, %v8972_v1, 0.0  ;;  %v10969_v59 = vld [vmem:[#allocation51_spill] sm:$0xff] }
 0xc70   :  { %v3281_v10 = vmul.f32 %v3265_v8, %v10965_v31  ;;  %v3376_v58 = vmul.f32 %v3360_v53, %v10966_v40  ;;  %v3471_v4 = vmul.f32 %v3455_v26, %v10967_v47  ;;  %v3202_v6 = vmul.f32 %v3186_v29, %v10968_v2  ;;  %v10970_v32 = vld [vmem:[#allocation127_spill] sm:$0xff]  ;;  %v10972_v26 = vld [vmem:[#allocation101_spill] sm:$0xff] }
 0xc71   :  { %v9018_v17 = vadd.f32 %v3053_v15, %v8433_v30  ;;  %v3472_v63 = vmul.f32 %v3456_v62, %v10969_v59  ;;  %v3439_v44 = vadd.f32 %v3423_v9, %v3391_v19  ;;  %v3329_v33 = vmul.f32 %v3313_v11, %v10970_v32 }
 0xc72   :  { %v3297_v57 = vadd.f32 %v3281_v10, %v3217_v48  ;;  %v3392_v49 = vadd.f32 %v3376_v58, %v3344_v38  ;;  %v3424_v1 = vmul.f32 %v3408_v3, %v10971_v25  ;;  %v3154_v31 = vmul.f32 %v3138_v35, %v10972_v26  ;;  %3588 = vadd.xlane.f32.xlu2 %v3587_v43  ;;  %v10974_v58 = vld [vmem:[#allocation116_spill] sm:$0xff]  ;;  %v10977_v26 = vld [vmem:[#allocation131_spill] sm:$0xff] }
 0xc73   :  { %v3090_v8 = vmul.f32 %v9018_v17, %v6607_v60  ;;  %v3106_v53 = vrot.slane %v9018_v17, 7  ;;  %v3234_v29 = vrot.slane %v9018_v17, 1  ;;  %v3187_v30 = vmul.f32 %v9018_v17, %v10783_v41 }
 0xc74   :  { %v3345_v19 = vadd.f32 %v3329_v33, %v3297_v57  ;;  %v3440_v62 = vadd.f32 %v3424_v1, %v3392_v49  ;;  %v3487_v9 = vadd.f32 %v3471_v4, %v3439_v44  ;;  %v3457_v15 = vmul.f32 %v9018_v17, %v10903_v61  ;;  %v10975_v4 = vld [vmem:[#allocation145_spill] sm:$0xff] }
 0xc75   :  { %v3113_v38 = vsel %vm147_vm0, %v3105_v45, %v3106_v53  ;;  %v3170_v25 = vadd.f32 %v3154_v31, %v3090_v8  ;;  %v3241_v11 = vsel %vm422_vm1, %v3233_v21, %v3234_v29  ;;  %v3503_v49 = vmul.f32 %v8735_v51, %v3242_v28  ;;  %v10973_v21 = vld [vmem:[#allocation104_spill] sm:$0xff]  ;;  %v10976_v28 = vld [vmem:[#allocation55_spill] sm:$0xff] }
 0xc76   :  { %v3054_v35 = vpop.f32.mrf.mxu1  ;;  %v3266_v48 = vmul.f32 %v3241_v11, %v6636_v12  ;;  %v3314_v3 = vmul.f32 %v3113_v38, %v10894_v20  ;;  %v3361_v43 = vmul.f32 %v3241_v11, %v10898_v34  ;;  %v3139_v1 = vmul.f32 %v3113_v38, %v6586_v54 }
 0xc77   :  { %v3055_v44 = vadd.f32 %v8628_v23, %v3054_v35  ;;  %v3218_v45 = vadd.f32 %v3202_v6, %v3170_v25  ;;  %v3409_v10 = vmul.f32 %v3113_v38, %v10901_v24  ;;  %v3203_v40 = vmul.f32 %v3187_v30, %v10973_v21  ;;  %v10978_v30 = vld [vmem:[#allocation140_spill] sm:$0xff] }
 0xc78   :  { %v3282_v47 = vmul.f32 %v3266_v48, %v10974_v58  ;;  %v3377_v2 = vmul.f32 %v3361_v43, %v10975_v4  ;;  %v3310_v59 = vmul.f32 %v8879_v37, %v10894_v20  ;;  %v3473_v32 = vmul.f32 %v3457_v15, %v10976_v28  ;;  %v10979_v37 = vld [vmem:[#allocation112_spill] sm:$0xff] }
 0xc79   :  { %v9049_v57 = vadd.f32 %v3055_v44, %v8440_v13  ;;  %v3488_v33 = vadd.f32 %v3472_v63, %v3440_v62  ;;  %v3504_v8 = vmul.f32 %v8735_v51, %v3241_v11  ;;  %v3330_v31 = vmul.f32 %v3314_v3, %v10977_v26  ;;  %v10980_v11 = vld [vmem:[#allocation43_spill] sm:$0xff] }
 0xc7a   :  { %v3298_v6 = vadd.f32 %v3282_v47, %v3218_v45  ;;  %v3393_v38 = vadd.f32 %v3377_v2, %v3345_v19  ;;  %v3425_v25 = vmul.f32 %v3409_v10, %v10978_v30  ;;  %v3155_v43 = vmul.f32 %v3139_v1, %v10979_v37  ;;  %v10981_v45 = vld [vmem:[#allocation134_spill] sm:$0xff] }
 0xc7b   :  { %v3091_v35 = vmul.f32 %v9049_v57, %v6607_v60  ;;  %v3107_v48 = vrot.slane %v9049_v57, 7  ;;  %v10601_v13 = vrot.slane %v9049_v57, 1  ;;  %v3458_v63 = vmul.f32 %v9049_v57, %v10903_v61 }
 0xc7c   :  { %v3346_v44 = vadd.f32 %v3330_v31, %v3298_v6  ;;  %v3441_v62 = vadd.f32 %v3425_v25, %v3393_v38  ;;  %v3519_v15 = vmul.f32 %v3503_v49, %v10980_v11  ;;  %v3520_v10 = vmul.f32 %v3504_v8, %v10981_v45  ;;  %v10982_v49 = vld [vmem:[#allocation76_spill] sm:$0xff]  ;;  %v10983_v6 = vld [vmem:[#allocation147_spill] sm:$0xff] }
 0xc7d   :  { %v3112_v19 = vsel %vm147_vm0, %v3106_v53, %v3107_v48  ;;  %v3171_v3 = vadd.f32 %v3155_v43, %v3091_v35  ;;  %v3240_v1 = vsel %vm422_vm1, %v3234_v29, %v10601_v13  ;;  %v3374_v4 = vmul.f32 %v8950_v50, %v10982_v49  ;;  %v10984_v31 = vld [vmem:[#allocation108_spill] sm:$0xff]  ;;  %v10985_v29 = vld [vmem:[#allocation115_spill] sm:$0xff]  ;;  %v10991_v49 = vld [vmem:[#allocation141_spill] sm:$0xff] }
 0xc7e   :  { %v3267_v21 = vmul.f32 %v3240_v1, %v6636_v12  ;;  %v3315_v58 = vmul.f32 %v3112_v19, %v10894_v20  ;;  %v3362_v47 = vmul.f32 %v3240_v1, %v10898_v34  ;;  %v3410_v53 = vmul.f32 %v3112_v19, %v10901_v24  ;;  %v10986_v8 = vld [vmem:[#allocation128_spill] sm:$0xff]  ;;  %v10988_v43 = vld [vmem:[#allocation135_spill] sm:$0xff] }
 0xc7f   :  { %v3219_v2 = vadd.f32 %v3203_v40, %v3171_v3  ;;  %v3489_v28 = vadd.f32 %v3473_v32, %v3441_v62  ;;  %v3326_v26 = vmul.f32 %v3310_v59, %v10983_v6  ;;  %v10987_v35 = vld [vmem:[#allocation144_spill] sm:$0xff]  ;;  %v3505_v45 = vmul.f32 %v8735_v51, %v3240_v1 }
 0xc80   :  { %v3283_v38 = vmul.f32 %v3267_v21, %v10984_v31  ;;  %v3331_v30 = vmul.f32 %v3315_v58, %v10985_v29  ;;  %v3378_v25 = vmul.f32 %v3362_v47, %v10986_v8  ;;  %v3474_v37 = vmul.f32 %v3458_v63, %v10987_v35  ;;  %v10989_v62 = vld [vmem:[#allocation136_spill] sm:$0xff] }
 0xc81   :  { %v3426_v11 = vmul.f32 %v3410_v53, %v10988_v43  ;;  %v3536_v13 = vadd.f32 %v3520_v10, %v3488_v33  ;;  %v3535_v50 = vadd.f32 %v3519_v15, %v3487_v9  ;;  %v3342_v32 = vadd.f32 %v3326_v26, %v8987_v36  ;;  %v10990_v15 = vld [vmem:[#allocation72_spill] sm:$0xff] }
 0xc82   :  { %v3299_v40 = vadd.f32 %v3283_v38, %v3219_v2  ;;  %v3394_v3 = vadd.f32 %v3378_v25, %v3346_v44  ;;  %v3406_v59 = vmul.f32 %v8914_v5, %v10901_v24  ;;  %v3521_v21 = vmul.f32 %v3505_v45, %v10989_v62  ;;  %v10996_v62 = vld [vmem:[#allocation33_spill] sm:$0xff] }
 0xc83   :  { %v9090_v58 = vadd.f32 %v3536_v13, %v8934_v22  ;;  %v9093_v63 = vadd.f32 %v3535_v50, %v8896_v7  ;;  %v3454_v1 = vmul.f32 %v8896_v7, %v10903_v61  ;;  %v3390_v44 = vadd.f32 %v3374_v4, %v3342_v32  ;;  %v10992_v7 = vld [vmem:[#allocation150_spill] sm:$0xff]  ;;  %v10994_v50 = vld [vmem:[#allocation29_spill] sm:$0xff] }
 0xc84   :  { %v9097_v33 = vadd.f32 %v3331_v30, %v3299_v40  ;;  %v3442_v9 = vadd.f32 %v3426_v11, %v3394_v3  ;;  %v3422_v36 = vmul.f32 %v3406_v59, %v10990_v15  ;;  %v3537_v10 = vadd.f32 %v3521_v21, %v3489_v28  ;;  %v10999_v15 = vld [vmem:[#allocation80_spill] sm:$0xff] }
 0xc85   :  { %v3470_v2 = vmul.f32 %v3454_v1, %v10991_v49  ;;  %v3502_v22 = vmul.f32 %v8735_v51, %v8957_v55  ;;  %v10602_v28 = vrot.slane %v8632_v56, 1  ;;  %v10993_v31 = vrot.slane %v8636_v27, 1  ;;  %v10997_v1 = vld [vmem:[#allocation67_spill] sm:$0xff] }
 0xc86   :  { %v9100_v47 = vadd.f32 %v3474_v37, %v3442_v9  ;;  %v3438_v5 = vadd.f32 %v3422_v36, %v3390_v44  ;;  %v9106_v13 = vadd.f32 %v3537_v10, %v8978_v0  ;;  %v3175_v55 = vmul.f32 %v8632_v56, %v10783_v41 }
 0xc87   :  { %v3518_v6 = vmul.f32 %v3502_v22, %v10992_v7  ;;  %v3252_v38 = vsel %vm422_vm1, %v10602_v28, %v10993_v31  ;;  %v3461_v0 = vmul.f32 %v8632_v56, %v10903_v61  ;;  %v3446_v25 = vmul.f32 %v8636_v27, %v10903_v61  ;;  %v11001_v22 = vld [vmem:[#allocation96_spill] sm:$0xff]  ;;  %v11002_v7 = vld [vmem:[#allocation102_spill] sm:$0xff] }
 0xc88   :  { %v3486_v53 = vadd.f32 %v3470_v2, %v3438_v5  ;;  %v3255_v30 = vmul.f32 %v3252_v38, %v6636_v12  ;;  %v3350_v8 = vmul.f32 %v3252_v38, %v10898_v34  ;;  %v3140_v37 = vmul.f32 %v3112_v19, %v6586_v54  ;;  %v10995_v19 = vld [vmem:[#allocation36_spill] sm:$0xff]  ;;  %v11000_v5 = vld [vmem:[#allocation95_spill] sm:$0xff] }
 0xc89   :  { %v9133_v43 = vmul.f32 %v8632_v56, %v6607_v60  ;;  %v3188_v11 = vmul.f32 %v9049_v57, %v10783_v41  ;;  %v3398_v45 = vmul.f32 %v8644_v16, %v10901_v24  ;;  %v9140_v40 = vmul.f32 %v3175_v55, %v10994_v50  ;;  %v11004_v55 = vld [vmem:[#allocation78_spill] sm:$0xff] }
 0xc8a   :  { %v3534_v26 = vadd.f32 %v3518_v6, %v3486_v53  ;;  %v9144_v3 = vmul.f32 %v8636_v27, %v6607_v60  ;;  %v9150_v59 = vmul.f32 %v3461_v0, %v10995_v19  ;;  %v9153_v21 = vmul.f32 %v3255_v30, %v10996_v62 }
 0xc8b   :  { %v9162_v36 = vmul.f32 %v3446_v25, %v10999_v15  ;;  %v3156_v49 = vmul.f32 %v3140_v37, %v11000_v5  ;;  %v3204_v53 = vmul.f32 %v3188_v11, %v11001_v22  ;;  %v3351_v6 = vmul.f32 %v11002_v7, %v10898_v34  ;;  %v11006_v15 = vld [vmem:[#allocation103_spill] sm:$0xff]  ;;  %v11008_v22 = vld [vmem:[#allocation98_spill] sm:$0xff] }
 0xc8c   :  { %v9110_v4 = vadd.f32 %v3534_v26, %v8859_v42  ;;  %v3303_v42 = vmul.f32 %v8644_v16, %v10894_v20  ;;  %v10998_v16 = vld [vmem:[#allocation75_spill] sm:$0xff]  ;;  %v9175_v0 = vmul.f32 %v3398_v45, %v11004_v55  ;;  %v9188_v37 = vmul.f32 %v8735_v51, %v3252_v38  ;;  %v11009_v55 = vld [vmem:[#allocation97_spill] sm:$0xff] }
 0xc8d   :  { %v9159_v44 = vmul.f32 %v3350_v8, %v10998_v16  ;;  %v11003_v26 = vld [vmem:[#allocation99_spill] sm:$0xff]  ;;  %v11005_v8 = vrot.slane %v9049_v57, 1  ;;  %v9198_v16 = vmul.f32 %v8650_v52, %v10903_v61 }
 0xc8e   :  { %v9156_v9 = vmul.f32 %v3303_v42, %v10997_v1  ;;  %v3399_v31 = vmul.f32 %v11003_v26, %v10901_v24 }
 0xc9d   :  { %v3057_v29 = vpop.f32.mrf.mxu1 }
 0xc9e   :  { %v3058_v35 = vadd.f32 %v8628_v23, %v3057_v29 }
 0xca0   :  { %v9147_v32 = vadd.f32 %v3058_v35, %v8456_v18 }
 0xca2   :  { %v3092_v10 = vmul.f32 %v9147_v32, %v6607_v60  ;;  %v3108_v18 = vrot.slane %v9147_v32, 7  ;;  %v3236_v2 = vrot.slane %v9147_v32, 1  ;;  %v3189_v42 = vmul.f32 %v9147_v32, %v10783_v41 }
 0xca4   :  { %v3111_v29 = vsel %vm147_vm0, %v3107_v48, %v3108_v18  ;;  %v3172_v30 = vadd.f32 %v3156_v49, %v3092_v10  ;;  %v3239_v25 = vsel %vm422_vm1, %v11005_v8, %v3236_v2  ;;  %v11007_v10 = vld [vmem:[#allocation126_spill] sm:$0xff]  ;;  %v3459_v49 = vmul.f32 %v9147_v32, %v10903_v61 }
 0xca5   :  { %v3059_v35 = vpop.f32.mrf.mxu1  ;;  %v3268_v11 = vmul.f32 %v3239_v25, %v6636_v12  ;;  %v3316_v45 = vmul.f32 %v3111_v29, %v10894_v20  ;;  %v3363_v50 = vmul.f32 %v3239_v25, %v10898_v34  ;;  %v3141_v19 = vmul.f32 %v3111_v29, %v6586_v54  ;;  %v11010_v8 = vld [vmem:[#allocation66_spill] sm:$0xff] }
 0xca6   :  { %v3060_v48 = vadd.f32 %v8628_v23, %v3059_v35  ;;  %v3220_v62 = vadd.f32 %v3204_v53, %v3172_v30  ;;  %v3411_v1 = vmul.f32 %v3111_v29, %v10901_v24  ;;  %v3205_v26 = vmul.f32 %v3189_v42, %v11008_v22  ;;  %v11011_v29 = vld [vmem:[#allocation82_spill] sm:$0xff]  ;;  %v11012_v35 = vld [vmem:[#allocation105_spill] sm:$0xff] }
 0xca7   :  { %v3284_v38 = vmul.f32 %v3268_v11, %v11006_v15  ;;  %v3379_v5 = vmul.f32 %v3363_v50, %v11007_v10  ;;  %v9209_v53 = vmul.f32 %v3351_v6, %v11010_v8  ;;  %v9212_v30 = vmul.f32 %v3399_v31, %v11011_v29  ;;  %v11013_v50 = vld [vmem:[#allocation130_spill] sm:$0xff] }
 0xca8   :  { %v9206_v23 = vadd.f32 %v3060_v48, %v11009_v55  ;;  %v3332_v28 = vmul.f32 %v3316_v45, %v11012_v35  ;;  %v3427_v15 = vmul.f32 %v3411_v1, %v11013_v50  ;;  %v11014_v48 = vld [vmem:[#allocation110_spill] sm:$0xff]  ;;  %v11016_v45 = vrot.slane %v8632_v56, 7 }
 0xca9   :  { %v3300_v52 = vadd.f32 %v3284_v38, %v3220_v62  ;;  %v3395_v11 = vadd.f32 %v3379_v5, %v9097_v33  ;;  %v3157_v22 = vmul.f32 %v3141_v19, %v11014_v48  ;;  %v11015_v31 = vld [vmem:[#allocation138_spill] sm:$0xff]  ;;  %v3506_v62 = vmul.f32 %v8735_v51, %v3239_v25 }
 0xcaa   :  { %v3093_v10 = vmul.f32 %v9206_v23, %v6607_v60  ;;  %v3109_v42 = vrot.slane %v9206_v23, 7  ;;  %v3237_v6 = vrot.slane %v9206_v23, 1  ;;  %v3475_v29 = vmul.f32 %v3459_v49, %v11015_v31 }
 0xcab   :  { %v3348_v55 = vadd.f32 %v3332_v28, %v3300_v52  ;;  %v3443_v8 = vadd.f32 %v3427_v15, %v3395_v11  ;;  %v3174_v19 = vmul.f32 %v9206_v23, %v10783_v41  ;;  %v11017_v25 = vrot.slane %v8632_v56, 1  ;;  %v11018_v41 = vld [vmem:[#allocation20_spill] sm:$0xff] }
 0xcac   :  { %v3110_v33 = vsel %vm147_vm0, %v3108_v18, %v3109_v42  ;;  %v3125_v60 = vsel %vm147_vm0, %v3109_v42, %v11016_v45  ;;  %v3173_v1 = vadd.f32 %v3157_v22, %v3093_v10  ;;  %v3238_v5 = vsel %vm422_vm1, %v3236_v2, %v3237_v6  ;;  %v11019_v15 = vld [vmem:[#allocation28_spill] sm:$0xff]  ;;  %v11020_v42 = vld [vmem:[#allocation114_spill] sm:$0xff] }
 0xcad   :  { %v3126_v38 = vmul.f32 %v3110_v33, %v6586_v54  ;;  %v3127_v28 = vmul.f32 %v3125_v60, %v6586_v54  ;;  %v3253_v18 = vsel %vm422_vm1, %v3237_v6, %v11017_v25  ;;  %v3302_v52 = vmul.f32 %v3125_v60, %v10894_v20  ;;  %v11021_v6 = vld [vmem:[#allocation146_spill] sm:$0xff]  ;;  %v11024_v25 = vld [vmem:[#allocation129_spill] sm:$0xff] }
 0xcae   :  { %v3254_v49 = vmul.f32 %v3253_v18, %v6636_v12  ;;  %v3221_v35 = vadd.f32 %v3205_v26, %v3173_v1  ;;  %v3269_v11 = vmul.f32 %v3238_v5, %v6636_v12  ;;  %v3317_v54 = vmul.f32 %v3110_v33, %v10894_v20  ;;  %v11022_v26 = vld [vmem:[#allocation39_spill] sm:$0xff] }
 0xcaf   :  { %v3143_v50 = vmul.f32 %v3127_v28, %v11018_v41  ;;  %v3142_v10 = vmul.f32 %v3126_v38, %v11019_v15  ;;  %v3365_v2 = vmul.f32 %v3253_v18, %v10898_v34  ;;  %v3413_v46 = vmul.f32 %v3125_v60, %v10901_v24  ;;  %v11023_v38 = vld [vmem:[#allocation41_spill] sm:$0xff] }
 0xcb0   :  { %v3285_v48 = vmul.f32 %v3269_v11, %v11020_v42  ;;  %v3460_v22 = vmul.f32 %v9206_v23, %v10903_v61  ;;  %v3522_v31 = vmul.f32 %v3506_v62, %v11021_v6  ;;  %v3190_v45 = vmul.f32 %v3174_v19, %v11022_v26  ;;  %v11025_v42 = vld [vmem:[#allocation52_spill] sm:$0xff]  ;;  %v11026_v6 = vld [vmem:[#allocation122_spill] sm:$0xff] }
 0xcb1   :  { %v3159_v12 = vadd.f32 %v3143_v50, %v9144_v3  ;;  %v3158_v1 = vadd.f32 %v3142_v10, %v9133_v43  ;;  %v3270_v28 = vmul.f32 %v3254_v49, %v11023_v38  ;;  %v3333_v41 = vmul.f32 %v3317_v54, %v11024_v25  ;;  %v11027_v3 = vld [vmem:[#allocation137_spill] sm:$0xff] }
 0xcb2   :  { %v3301_v20 = vadd.f32 %v3285_v48, %v3221_v35  ;;  %v3364_v11 = vmul.f32 %v3238_v5, %v10898_v34  ;;  %v3412_v60 = vmul.f32 %v3110_v33, %v10901_v24  ;;  %v3318_v62 = vmul.f32 %v3302_v52, %v11025_v42  ;;  %v11028_v43 = vld [vmem:[#allocation109_spill] sm:$0xff] }
 0xcb3   :  { %v3207_v15 = vadd.f32 %v9140_v40, %v3159_v12  ;;  %v3206_v61 = vadd.f32 %v3190_v45, %v3158_v1  ;;  %v3381_v19 = vmul.f32 %v3365_v2, %v11026_v6  ;;  %v3429_v50 = vmul.f32 %v3413_v46, %v11027_v3  ;;  %v11029_v48 = vld [vmem:[#allocation117_spill] sm:$0xff]  ;;  %v11037_v6 = vld [vmem:[#allocation88_spill] sm:$0xff] }
 0xcb4   :  { %v3349_v26 = vadd.f32 %v3333_v41, %v3301_v20  ;;  %v3380_v10 = vmul.f32 %v3364_v11, %v11028_v43  ;;  %v3491_v49 = vadd.f32 %v3475_v29, %v3443_v8  ;;  %v3508_v34 = vmul.f32 %v8735_v51, %v3253_v18  ;;  %v11030_v8 = vld [vmem:[#allocation149_spill] sm:$0xff]  ;;  %v11034_v11 = vld [vmem:[#allocation139_spill] sm:$0xff]  ;;  %v11038_v43 = vld [vmem:[#allocation90_spill] sm:$0xff] }
 0xcb5   :  { %v3287_v35 = vadd.f32 %v9153_v21, %v3207_v15  ;;  %v3286_v54 = vadd.f32 %v3270_v28, %v3206_v61  ;;  %v3507_v24 = vmul.f32 %v8735_v51, %v3238_v5  ;;  %v3428_v45 = vmul.f32 %v3412_v60, %v11029_v48  ;;  %v11031_v38 = vld [vmem:[#allocation121_spill] sm:$0xff]  ;;  %v11032_v28 = vld [vmem:[#allocation100_spill] sm:$0xff] }
 0xcb6   :  { %v3397_v33 = vadd.f32 %v3381_v19, %v3349_v26  ;;  %v3396_v40 = vadd.f32 %v3380_v10, %v3348_v55  ;;  %v3538_v52 = vadd.f32 %v3522_v31, %v9100_v47  ;;  %v3494_v46 = vmul.f32 %v8735_v51, %v11002_v7  ;;  %v11033_v7 = vld [vmem:[#allocation132_spill] sm:$0xff] }
 0xcb7   :  { %v3335_v2 = vadd.f32 %v9156_v9, %v3287_v35  ;;  %v3334_v12 = vadd.f32 %v3318_v62, %v3286_v54  ;;  %v3523_v29 = vmul.f32 %v3507_v24, %v11030_v8  ;;  %v3476_v18 = vmul.f32 %v3460_v22, %v11031_v38 }
 0xcb8   :  { %v3445_v21 = vadd.f32 %v3429_v50, %v3397_v33  ;;  %v3444_v1 = vadd.f32 %v3428_v45, %v3396_v40  ;;  %v9275_v5 = vadd.f32 %v3538_v52, %v9018_v17  ;;  %v3495_v47 = vmul.f32 %v8735_v51, %v11032_v28  ;;  %v11035_v17 = vld [vmem:[#allocation81_spill] sm:$0xff]  ;;  %v11042_v28 = vld [vmem:[#allocation92_spill] sm:$0xff] }
 0xcb9   :  { %v3383_v55 = vadd.f32 %v9209_v53, %v3335_v2  ;;  %v3382_v9 = vadd.f32 %v9159_v44, %v3334_v12  ;;  %v3539_v31 = vadd.f32 %v3523_v29, %v3491_v49  ;;  %v3525_v25 = vmul.f32 %v9188_v37, %v11033_v7  ;;  %v11039_v33 = vld [vmem:[#allocation89_spill] sm:$0xff]  ;;  %v11040_v29 = vld [vmem:[#allocation86_spill] sm:$0xff] }
 0xcba   :  { %v3493_v20 = vadd.f32 %v9150_v59, %v3445_v21  ;;  %v3492_v41 = vadd.f32 %v3476_v18, %v3444_v1  ;;  %v3524_v60 = vmul.f32 %v3508_v34, %v11034_v11  ;;  %v3463_v15 = vmul.f32 %v9198_v16, %v11035_v17  ;;  %v11036_v59 = vld [vmem:[#allocation84_spill] sm:$0xff]  ;;  %v11041_v1 = vld [vmem:[#allocation94_spill] sm:$0xff] }
 0xcbb   :  { %v3431_v22 = vadd.f32 %v9212_v30, %v3383_v55  ;;  %v3430_v53 = vadd.f32 %v9175_v0, %v3382_v9  ;;  %v9290_v51 = vadd.f32 %v3539_v31, %v9049_v57  ;;  %v3511_v62 = vmul.f32 %v3495_v47, %v11036_v59 }
 0xcbc   :  { %v3541_v44 = vadd.f32 %v3525_v25, %v3493_v20  ;;  %v3540_v61 = vadd.f32 %v3524_v60, %v3492_v41  ;;  %v3510_v19 = vmul.f32 %v3494_v46, %v11037_v6  ;;  %v11043_v25 = vld [vmem:[#allocation83_spill] sm:$0xff] }
 0xcbd   :  { %v3479_v42 = vadd.f32 %v3463_v15, %v3431_v22  ;;  %v3478_v37 = vadd.f32 %v9162_v36, %v3430_v53 }
 0xcbe   :  { %v3557_v26 = vadd.f32 %v3541_v44, %v9206_v23  ;;  %v3556_v30 = vadd.f32 %v3540_v61, %v9147_v32 }
 0xcbf   :  { %v3527_v3 = vadd.f32 %v3511_v62, %v3479_v42  ;;  %v3526_v16 = vadd.f32 %v3510_v19, %v3478_v37 }
 0xcc1   :  { %v3543_v0 = vadd.f32 %v3527_v3, %v8636_v27  ;;  %v3542_v57 = vadd.f32 %v3526_v16, %v8632_v56  ;;  %v9366_v16 = vadd.f32 %v8791_v14, %v3557_v26  ;;  %v9384_v26 = vadd.f32 %v8791_v14, %v9275_v5 }
 0xcc2   :  { %v9396_v5 = vadd.f32 %v8791_v14, %v9106_v13 }
 0xcc3   :  { %v9301_v49 = vadd.f32 %v8791_v14, %v3543_v0  ;;  %v9304_v36 = vadd.f32 %v8791_v14, %v3542_v57  ;;  %v9369_v0 = vadd.f32 %v8791_v14, %v3556_v30 }
 0xcc4   :  { %v3592_v50 = vpop.xlane.xlu0 %3591 }
 0xcc5   :  { %v3630_v10 = vmul.f32 %v3592_v50, %v11038_v43  ;;  %v3581_v32 = vsel %vm1154_vm2, %v9301_v49, 0.0  ;;  %v3578_v27 = vsel %vm1154_vm2, %v9304_v36, 0.0  ;;  %v3623_v50 = vsel %vm1154_vm2, %v9366_v16, 0.0 }
 0xcc6   :  { %3582 = vadd.xlane.f32.xlu2 %v3581_v32  ;;  %3579 = vadd.xlane.f32.xlu0 %v3578_v27  ;;  %v9380_v27 = vadd.f32 %v8791_v14, %v9290_v51 }
 0xcc7   :  { %v9307_v35 = vsub.f32 %v8843_v39, %v3630_v10  ;;  %v3620_v10 = vsel %vm1154_vm2, %v9369_v0, 0.0 }
 0xcc9   :  { %v3662_v56 = vmul.f32 %v9307_v35, %v9307_v35 }
 0xccb   :  { %v3686_v23 = vsel %vm1154_vm2, %v3662_v56, 0.0 }
 0xccd   :  { %v3595_v54 = vpop.xlane.xlu2 %3594 }
 0xcce   :  { %3687 = vadd.xlane.f32.xlu0 %v3686_v23  ;;  %v3631_v8 = vmul.f32 %v3595_v54, %v11038_v43  ;;  %v3617_v23 = vsel %vm1154_vm2, %v9380_v27, 0.0  ;;  %v3614_v54 = vsel %vm1154_vm2, %v9384_v26, 0.0 }
 0xcd0   :  { %v9337_v47 = vsub.f32 %v11042_v28, %v3631_v8 }
 0xcd2   :  { %v3663_v11 = vmul.f32 %v9337_v47, %v9337_v47 }
 0xcd4   :  { %v3689_v17 = vsel %vm1154_vm2, %v3663_v11, 0.0 }
 0xcd5   :  { %v3598_v34 = vpop.xlane.xlu0 %3597 }
 0xcd6   :  { %v3632_v24 = vmul.f32 %v3598_v34, %v11038_v43 }
 0xcd8   :  { %v9318_v40 = vsub.f32 %v11039_v33, %v3632_v24  ;;  %v9400_v24 = vadd.f32 %v8791_v14, %v9090_v58 }
 0xcda   :  { %v3664_v48 = vmul.f32 %v9318_v40, %v9318_v40  ;;  %v3608_v13 = vsel %vm1154_vm2, %v9400_v24, 0.0 }
 0xcdc   :  { %v3692_v45 = vsel %vm1154_vm2, %v3664_v48, 0.0 }
 0xcdd   :  { %v3601_v52 = vpop.xlane.xlu2 %3600  ;;  %3693 = vadd.xlane.f32.xlu0 %v3692_v45 }
 0xcde   :  { %v3586_v2 = vpop.xlane.xlu0 %3585  ;;  %v3633_v12 = vmul.f32 %v3601_v52, %v11038_v43 }
 0xcdf   :  { %v3628_v46 = vmul.f32 %v3586_v2, %v11038_v43 }
 0xce0   :  { %v9327_v21 = vsub.f32 %v11040_v29, %v3633_v12 }
 0xce1   :  { %v9330_v38 = vsub.f32 %v11041_v1, %v3628_v46  ;;  %v3611_v46 = vsel %vm1154_vm2, %v9396_v5, 0.0 }
 0xce2   :  { %v3665_v18 = vmul.f32 %v9327_v21, %v9327_v21 }
 0xce3   :  { %v3660_v55 = vmul.f32 %v9330_v38, %v9330_v38 }
 0xce4   :  { %v3695_v9 = vsel %vm1154_vm2, %v3665_v18, 0.0 }
 0xce5   :  { %v3680_v31 = vsel %vm1154_vm2, %v3660_v55, 0.0  ;;  %v3589_v20 = vpop.xlane.xlu2 %3588  ;;  %3696 = vadd.xlane.f32.xlu2 %v3695_v9  ;;  %v6213_v9 = vld [vmem:[%s10677_s0] ss:$0 sm:$0xff] }
 0xce6   :  { %3681 = vadd.xlane.f32.xlu0 %v3680_v31  ;;  %v3629_v7 = vmul.f32 %v3589_v20, %v11038_v43  ;;  %v9417_v31 = vadd.f32 %v6213_v9, %v9093_v63  ;;  %v9420_v20 = vadd.f32 %v6213_v9, %v9110_v4 }
 0xce8   :  { %v9343_v41 = vsub.f32 %v11043_v25, %v3629_v7  ;;  %v3602_v63 = vsel %vm1154_vm2, %v9420_v20, 0.0 }
 0xcea   :  { %v3661_v60 = vmul.f32 %v9343_v41, %v9343_v41 }
 0xcec   :  { %v3683_v22 = vsel %vm1154_vm2, %v3661_v60, 0.0 }
 0xced   :  { %3684 = vadd.xlane.f32.xlu1 %v3683_v22  ;;  %3690 = vadd.xlane.f32.xlu2 %v3689_v17 }
 0xd39   :  { %v3583_v15 = vpop.xlane.xlu2 %3582  ;;  %v3580_v53 = vpop.xlane.xlu0 %3579 }
 0xd3a   :  { %v3627_v44 = vmul.f32 %v3583_v15, %v11038_v43  ;;  %v3626_v61 = vmul.f32 %v3580_v53, %v11038_v43 }
 0xd3c   :  { %v9354_v42 = vsub.f32 %v9301_v49, %v3627_v44  ;;  %v9357_v59 = vsub.f32 %v9304_v36, %v3626_v61  ;;  %v3605_v44 = vsel %vm1154_vm2, %v9417_v31, 0.0 }
 0xd3e   :  { %v3659_v62 = vmul.f32 %v9354_v42, %v9354_v42  ;;  %v3658_v37 = vmul.f32 %v9357_v59, %v9357_v59 }
 0xd40   :  { %v3677_v6 = vsel %vm1154_vm2, %v3659_v62, 0.0  ;;  %v3674_v19 = vsel %vm1154_vm2, %v3658_v37, 0.0 }
 0xd41   :  { %3678 = vadd.xlane.f32.xlu0 %v3677_v6  ;;  %3675 = vadd.xlane.f32.xlu2 %v3674_v19  ;;  %v3688_v3 = vpop.xlane.xlu0 %3687 }
 0xd42   :  { %v3726_v57 = vmul.f32 %v3688_v3, %v11038_v43 }
 0xd44   :  { %v9376_v32 = vadd.f32 1e-05, %v3726_v57 }
 0xd46   :  { %6093 = vrsqrt.f32 %v9376_v32  ;;  %vm3800_vm8 = vweird.f32 %v9376_v32 }
 0xd49   :  { %3624 = vadd.xlane.f32.xlu0 %v3623_v50  ;;  %3621 = vadd.xlane.f32.xlu2 %v3620_v10 }
 0xd4c   :  { %v9392_v51 = vpop.eup %6093 }
 0xd4d   :  { %v3795_v48 = vmul.f32 %v9392_v51, %v9376_v32  ;;  %vm3801_vm7 = vweird.f32 %v9392_v51 }
 0xd4e   :  { %vm9443_vm9 = vmor %vm3800_vm8, %vm3801_vm7 }
 0xd4f   :  { %v3796_v14 = vmul.f32 %v9392_v51, %v3795_v48 }
 0xd50   :  { %v3694_v30 = vpop.xlane.xlu0 %3693 }
 0xd51   :  { %v3728_v56 = vmul.f32 %v3694_v30, %v11038_v43  ;;  %3618 = vadd.xlane.f32.xlu0 %v3617_v23  ;;  %3615 = vadd.xlane.f32.xlu2 %v3614_v54  ;;  %v3797_v11 = vmul.f32 0.5, %v3796_v14 }
 0xd53   :  { %v3744_v34 = vadd.f32 1e-05, %v3728_v56  ;;  %v3798_v62 = vsub.f32 1.5, %v3797_v11  ;;  %v9436_v56 = vld [vmem:[%s10736_s25 + $0x1] ss:$0 sm:$0xff] }
 0xd55   :  { %6095 = vrsqrt.f32 %v3744_v34  ;;  %vm3820_vm1 = vweird.f32 %v3744_v34  ;;  %v3799_v23 = vmul.f32 %v9392_v51, %v3798_v62 }
 0xd58   :  { %v3697_v45 = vpop.xlane.xlu2 %3696 }
 0xd59   :  { %v3682_v52 = vpop.xlane.xlu0 %3681  ;;  %v3729_v2 = vmul.f32 %v3697_v45, %v11038_v43  ;;  %3612 = vadd.xlane.f32.xlu0 %v3611_v46  ;;  %3609 = vadd.xlane.f32.xlu2 %v3608_v13  ;;  %v9450_v13 = vld [vmem:[%s10737_s27 + $0x1] ss:$0 sm:$0xff] }
 0xd5a   :  { %v3724_v12 = vmul.f32 %v3682_v52, %v11038_v43 }
 0xd5b   :  { %v6096_v8 = vpop.eup %6095  ;;  %v3745_v58 = vadd.f32 1e-05, %v3729_v2 }
 0xd5c   :  { %v9411_v18 = vadd.f32 1e-05, %v3724_v12  ;;  %v3815_v55 = vmul.f32 %v6096_v8, %v3744_v34  ;;  %vm3821_vm0 = vweird.f32 %v6096_v8 }
 0xd5d   :  { %6097 = vrsqrt.f32 %v3745_v58  ;;  %vm3822_vm6 = vmor %vm3820_vm1, %vm3821_vm0  ;;  %vm3830_vm12 = vweird.f32 %v3745_v58 }
 0xd5e   :  { %v3816_v7 = vmul.f32 %v6096_v8, %v3815_v55  ;;  %6099 = vrsqrt.f32 %v9411_v18  ;;  %vm3780_vm14 = vweird.f32 %v9411_v18 }
 0xd60   :  { %v3817_v60 = vmul.f32 0.5, %v3816_v7  ;;  %v3685_v22 = vpop.xlane.xlu1 %3684  ;;  %v3691_v17 = vpop.xlane.xlu2 %3690 }
 0xd61   :  { %v3725_v15 = vmul.f32 %v3685_v22, %v11038_v43  ;;  %v3727_v53 = vmul.f32 %v3691_v17, %v11038_v43  ;;  %3606 = vadd.xlane.f32.xlu0 %v3605_v44  ;;  %3603 = vadd.xlane.f32.xlu2 %v3602_v63 }
 0xd62   :  { %v3818_v61 = vsub.f32 1.5, %v3817_v60 }
 0xd63   :  { %v6098_v4 = vpop.eup %6097  ;;  %v3741_v37 = vadd.f32 1e-05, %v3725_v15  ;;  %v9429_v6 = vadd.f32 1e-05, %v3727_v53 }
 0xd64   :  { %v6100_v19 = vpop.eup %6099  ;;  %v3819_v3 = vmul.f32 %v6096_v8, %v3818_v61  ;;  %v3825_v57 = vmul.f32 %v6098_v4, %v3745_v58  ;;  %vm3831_vm10 = vweird.f32 %v6098_v4 }
 0xd65   :  { %v3775_v50 = vmul.f32 %v6100_v19, %v9411_v18  ;;  %6101 = vrsqrt.f32 %v3741_v37  ;;  %vm3781_vm11 = vweird.f32 %v6100_v19  ;;  %vm3832_vm13 = vmor %vm3830_vm12, %vm3831_vm10  ;;  %v9464_v18 = vld [vmem:[%s10738_s1 + $0x38] sm:$0xff]   ;;  %vm3790_vm7 = vweird.f32 %v3741_v37 }
 0xd66   :  { %v3823_v10 = vsel %vm3822_vm6, %v6096_v8, %v3819_v3  ;;  %v3826_v30 = vmul.f32 %v6098_v4, %v3825_v57  ;;  %6103 = vrsqrt.f32 %v9429_v6  ;;  %vm3782_vm0 = vmor %vm3780_vm14, %vm3781_vm11  ;;  %v5844_v57 = vunpack.c.l.bf16 %v9464_v18 }
 0xd67   :  { %v3920_v54 = vmul.f32 %v3823_v10, %v9318_v40  ;;  %v3776_v34 = vmul.f32 %v6100_v19, %v3775_v50  ;;  %v3803_v40 = vsel %vm9443_vm9, %v9392_v51, %v3799_v23  ;;  %v5845_v50 = vunpack.c.h.bf16 %v9464_v18 }
 0xd68   :  { %v3827_v48 = vmul.f32 0.5, %v3826_v30  ;;  %v3918_v60 = vmul.f32 %v3803_v40, %v9307_v35  ;;  %vm3810_vm9 = vweird.f32 %v9429_v6 }
 0xd69   :  { %v3939_v45 = vmul.f32 %v9436_v56, %v3920_v54  ;;  %v3777_v52 = vmul.f32 0.5, %v3776_v34 }
 0xd6a   :  { %v3828_v12 = vsub.f32 1.5, %v3827_v48  ;;  %v3937_v62 = vmul.f32 %v9436_v56, %v3918_v60 }
 0xd6b   :  { %v6102_v46 = vpop.eup %6101  ;;  %v3778_v32 = vsub.f32 1.5, %v3777_v52  ;;  %v3958_v9 = vadd.f32 %v9450_v13, %v3939_v45 }
 0xd6c   :  { %v6104_v8 = vpop.eup %6103  ;;  %v3829_v14 = vmul.f32 %v6098_v4, %v3828_v12  ;;  %v3785_v55 = vmul.f32 %v6102_v46, %v3741_v37  ;;  %vm3791_vm1 = vweird.f32 %v6102_v46  ;;  %v3956_v34 = vadd.f32 %v9450_v13, %v3937_v62 }
 0xd6d   :  { %v3779_v7 = vmul.f32 %v6100_v19, %v3778_v32  ;;  %v3805_v11 = vmul.f32 %v6104_v8, %v9429_v6  ;;  %v3974_v61 = vpack.c.bf16 %v3958_v9, %v3958_v9  ;;  %vm3811_vm6 = vweird.f32 %v6104_v8  ;;  %vm3792_vm8 = vmor %vm3790_vm7, %vm3791_vm1  ;;  %v9485_v32 = vld [vmem:[%s10738_s1 + $0x30] sm:$0xff]  }
 0xd6e   :  { %v3833_v22 = vsel %vm3832_vm13, %v6098_v4, %v3829_v14  ;;  %v3786_v17 = vmul.f32 %v6102_v46, %v3785_v55  ;;  %vm3812_vm10 = vmor %vm3810_vm9, %vm3811_vm6  ;;  %v5840_v55 = vunpack.c.l.bf16 %v9485_v32 }
 0xd6f   :  { %v3921_v51 = vmul.f32 %v3833_v22, %v9327_v21  ;;  %v3783_v15 = vsel %vm3782_vm0, %v6100_v19, %v3779_v7  ;;  %v3806_v53 = vmul.f32 %v6104_v8, %v3805_v11  ;;  %v3991_v23 = vunpack.c.l.bf16 %v3974_v61 }
 0xd70   :  { %v3787_v44 = vmul.f32 0.5, %v3786_v17  ;;  %v3916_v35 = vmul.f32 %v3783_v15, %v9330_v38  ;;  %v4330_v7 = vunpack.c.l.b16 %v3974_v61  ;;  %v5841_v22 = vunpack.c.h.bf16 %v9485_v32  ;;  %v9495_v15 = vld [vmem:[%s10738_s1 + $0x28] sm:$0xff]  }
 0xd71   :  { %v3940_v58 = vmul.f32 %v9436_v56, %v3921_v51  ;;  %v3807_v63 = vmul.f32 0.5, %v3806_v53  ;;  %v4007_v12 = vmul.f32 %v5844_v57, %v3991_v23  ;;  %v11047_v32 = vunpack.c.h.bf16 %v9495_v15 }
 0xd72   :  { %v3788_v4 = vsub.f32 1.5, %v3787_v44  ;;  %v3935_v38 = vmul.f32 %v9436_v56, %v3916_v35  ;;  %v10606_v35 = vunpack.c.l.bf16 %v9495_v15 }
 0xd73   :  { %v3959_v21 = vadd.f32 %v9450_v13, %v3940_v58  ;;  %v3808_v19 = vsub.f32 1.5, %v3807_v63  ;;  %v10605_v58 = vunpack.c.h.bf16 %v9495_v15 }
 0xd74   :  { %v3789_v3 = vmul.f32 %v6102_v46, %v3788_v4 }
 0xd75   :  { %v3809_v10 = vmul.f32 %v6104_v8, %v3808_v19  ;;  %v3975_v30 = vpack.c.bf16 %v3959_v21, %v3959_v21 }
 0xd76   :  { %v3793_v54 = vsel %vm3792_vm8, %v6102_v46, %v3789_v3  ;;  %v3972_v46 = vpack.c.bf16 %v3956_v34, %v3956_v34 }
 0xd77   :  { %v3917_v48 = vmul.f32 %v3793_v54, %v9343_v41  ;;  %v3813_v45 = vsel %vm3812_vm10, %v6104_v8, %v3809_v10  ;;  %v3992_v37 = vunpack.c.l.bf16 %v3975_v30  ;;  %v3954_v41 = vadd.f32 %v9450_v13, %v3935_v38 }
 0xd78   :  { %v3919_v52 = vmul.f32 %v3813_v45, %v9337_v47  ;;  %v4331_v11 = vunpack.c.l.b16 %v3975_v30  ;;  %v3989_v17 = vunpack.c.l.bf16 %v3972_v46  ;;  %v4328_v30 = vunpack.c.l.b16 %v3972_v46 }
 0xd79   :  { %v3936_v2 = vmul.f32 %v9436_v56, %v3917_v48  ;;  %v4008_v6 = vmul.f32 %v5845_v50, %v3992_v37  ;;  %v3970_v51 = vpack.c.bf16 %v3954_v41, %v3954_v41 }
 0xd7a   :  { %v3938_v40 = vmul.f32 %v9436_v56, %v3919_v52  ;;  %v9497_v53 = vpack.c.b16 %v4331_v11, %v4330_v7  ;;  %v4005_v61 = vmul.f32 %v5840_v55, %v3989_v17 }
 0xd7b   :  { %v4012_v8 = vpack.c.bf16 %v4008_v6, %v4007_v12  ;;  %v3955_v47 = vadd.f32 %v9450_v13, %v3936_v2  ;;  %v3987_v4 = vunpack.c.l.bf16 %v3970_v51  ;;  %v4326_v3 = vunpack.c.l.b16 %v3970_v51 }
 0xd7c   :  { %v3957_v14 = vadd.f32 %v9450_v13, %v3938_v40 }
 0xd7d   :  { %4017 = vmatpush.bf16.msra.mxu2 %v4012_v8  ;;  %v3971_v9 = vpack.c.bf16 %v3955_v47, %v3955_v47  ;;  %v4003_v38 = vmul.f32 %v10606_v35, %v3987_v4 }
 0xd7e   :  { %v3973_v60 = vpack.c.bf16 %v3957_v14, %v3957_v14 }
 0xd7f   :  { %v3988_v63 = vunpack.c.l.bf16 %v3971_v9  ;;  %v4327_v10 = vunpack.c.l.b16 %v3971_v9 }
 0xd80   :  { %v3990_v44 = vunpack.c.l.bf16 %v3973_v60  ;;  %v4329_v23 = vunpack.c.l.b16 %v3973_v60 }
 0xd81   :  { %v4004_v19 = vmul.f32 %v10605_v58, %v3988_v63  ;;  %v9509_v54 = vpack.c.b16 %v4327_v10, %v4326_v3 }
 0xd82   :  { %v4006_v62 = vmul.f32 %v5841_v22, %v3990_v44  ;;  %v9511_v34 = vpack.c.b16 %v4329_v23, %v4328_v30 }
 0xd83   :  { %v4010_v48 = vpack.c.bf16 %v4004_v19, %v4003_v38 }
 0xd84   :  { %v4011_v21 = vpack.c.bf16 %v4006_v62, %v4005_v61 }
 0xd86   :  { %4018 = vmatpush.bf16.msra.mxu2 %v4011_v21 }
 0xd8a   :  { %4019 = vmatpush.bf16.msra.mxu2 %v4010_v48 }
 0xdb4   :  { %v3676_v45 = vpop.xlane.xlu2 %3675  ;;  %v3679_v37 = vpop.xlane.xlu0 %3678 }
 0xdb5   :  { %v3722_v52 = vmul.f32 %v3676_v45, %v11038_v43  ;;  %v3723_v2 = vmul.f32 %v3679_v37, %v11038_v43 }
 0xdb7   :  { %v3738_v12 = vadd.f32 1e-05, %v3722_v52  ;;  %v3739_v6 = vadd.f32 1e-05, %v3723_v2 }
 0xdb9   :  { %6105 = vrsqrt.f32 %v3738_v12  ;;  %vm3760_vm13 = vweird.f32 %v3738_v12  ;;  %vm3770_vm0 = vweird.f32 %v3739_v6 }
 0xdba   :  { %6107 = vrsqrt.f32 %v3739_v6 }
 0xdbc   :  { %v3625_v40 = vpop.xlane.xlu0 %3624  ;;  %v3622_v46 = vpop.xlane.xlu2 %3621 }
 0xdbd   :  { %v3641_v41 = vmul.f32 %v3625_v40, %v11038_v43  ;;  %v3640_v8 = vmul.f32 %v3622_v46, %v11038_v43 }
 0xdbf   :  { %v6106_v47 = vpop.eup %6105  ;;  %v9518_v14 = vsub.f32 %v9366_v16, %v3641_v41  ;;  %v9521_v9 = vsub.f32 %v9369_v0, %v3640_v8 }
 0xdc0   :  { %v6108_v7 = vpop.eup %6107  ;;  %v3755_v11 = vmul.f32 %v6106_v47, %v3738_v12  ;;  %vm3761_vm11 = vweird.f32 %v6106_v47 }
 0xdc1   :  { %v3765_v60 = vmul.f32 %v6108_v7, %v3739_v6  ;;  %v3673_v17 = vmul.f32 %v9518_v14, %v9518_v14  ;;  %v3672_v51 = vmul.f32 %v9521_v9, %v9521_v9  ;;  %vm3771_vm12 = vweird.f32 %v6108_v7  ;;  %vm3762_vm14 = vmor %vm3760_vm13, %vm3761_vm11 }
 0xdc2   :  { %v3756_v44 = vmul.f32 %v6106_v47, %v3755_v11  ;;  %vm3772_vm1 = vmor %vm3770_vm0, %vm3771_vm12 }
 0xdc3   :  { %v3766_v63 = vmul.f32 %v6108_v7, %v3765_v60  ;;  %v3719_v61 = vsel %vm1154_vm2, %v3673_v17, 0.0  ;;  %v3716_v62 = vsel %vm1154_vm2, %v3672_v51, 0.0 }
 0xdc4   :  { %v3757_v4 = vmul.f32 0.5, %v3756_v44  ;;  %3720 = vadd.xlane.f32.xlu0 %v3719_v61  ;;  %v3619_v21 = vpop.xlane.xlu0 %3618  ;;  %3717 = vadd.xlane.f32.xlu2 %v3716_v62  ;;  %v3616_v19 = vpop.xlane.xlu2 %3615 }
 0xdc5   :  { %v3767_v3 = vmul.f32 0.5, %v3766_v63  ;;  %v3639_v10 = vmul.f32 %v3619_v21, %v11038_v43  ;;  %v3638_v30 = vmul.f32 %v3616_v19, %v11038_v43 }
 0xdc6   :  { %v3758_v23 = vsub.f32 1.5, %v3757_v4 }
 0xdc7   :  { %v3768_v38 = vsub.f32 1.5, %v3767_v3  ;;  %v9532_v48 = vsub.f32 %v9380_v27, %v3639_v10  ;;  %v9535_v45 = vsub.f32 %v9384_v26, %v3638_v30 }
 0xdc8   :  { %v3759_v37 = vmul.f32 %v6106_v47, %v3758_v23 }
 0xdc9   :  { %v3769_v52 = vmul.f32 %v6108_v7, %v3768_v38  ;;  %v3671_v2 = vmul.f32 %v9532_v48, %v9532_v48  ;;  %v3670_v40 = vmul.f32 %v9535_v45, %v9535_v45 }
 0xdca   :  { %v3763_v46 = vsel %vm3762_vm14, %v6106_v47, %v3759_v37 }
 0xdcb   :  { %v3914_v41 = vmul.f32 %v3763_v46, %v9357_v59  ;;  %v3773_v8 = vsel %vm3772_vm1, %v6108_v7, %v3769_v52  ;;  %v3713_v11 = vsel %vm1154_vm2, %v3671_v2, 0.0  ;;  %v3710_v60 = vsel %vm1154_vm2, %v3670_v40, 0.0  ;;  %v9552_v59 = vld [vmem:[%s10738_s1 + $0x20] sm:$0xff]  }
 0xdcc   :  { %v3915_v12 = vmul.f32 %v3773_v8, %v9354_v42  ;;  %3714 = vadd.xlane.f32.xlu0 %v3713_v11  ;;  %v3613_v17 = vpop.xlane.xlu0 %3612  ;;  %3711 = vadd.xlane.f32.xlu2 %v3710_v60  ;;  %v3610_v6 = vpop.xlane.xlu2 %3609  ;;  %v10604_v3 = vunpack.c.l.bf16 %v9552_v59  ;;  %v10603_v30 = vunpack.c.h.bf16 %v9552_v59 }
 0xdcd   :  { %v3933_v51 = vmul.f32 %v9436_v56, %v3914_v41  ;;  %v3637_v44 = vmul.f32 %v3613_v17, %v11038_v43  ;;  %v3636_v47 = vmul.f32 %v3610_v6, %v11038_v43 }
 0xdce   :  { %v3934_v63 = vmul.f32 %v9436_v56, %v3915_v12 }
 0xdcf   :  { %v9555_v7 = vsub.f32 %v9396_v5, %v3637_v44  ;;  %v9558_v42 = vsub.f32 %v9400_v24, %v3636_v47  ;;  %v3952_v61 = vadd.f32 %v9450_v13, %v3933_v51 }
 0xdd0   :  { %v3953_v62 = vadd.f32 %v9450_v13, %v3934_v63 }
 0xdd1   :  { %v3669_v4 = vmul.f32 %v9555_v7, %v9555_v7  ;;  %v3668_v21 = vmul.f32 %v9558_v42, %v9558_v42  ;;  %v3968_v19 = vpack.c.bf16 %v3952_v61, %v3952_v61 }
 0xdd2   :  { %v3969_v10 = vpack.c.bf16 %v3953_v62, %v3953_v62 }
 0xdd3   :  { %v3707_v23 = vsel %vm1154_vm2, %v3669_v4, 0.0  ;;  %v3704_v38 = vsel %vm1154_vm2, %v3668_v21, 0.0  ;;  %v3985_v37 = vunpack.c.l.bf16 %v3968_v19  ;;  %v4324_v52 = vunpack.c.l.b16 %v3968_v19  ;;  %v9593_v4 = vld [vmem:[%s10348_s4] sm:$0x3] }
 0xdd4   :  { %3708 = vadd.xlane.f32.xlu0 %v3707_v23  ;;  %v3607_v2 = vpop.xlane.xlu0 %3606  ;;  %3705 = vadd.xlane.f32.xlu2 %v3704_v38  ;;  %v3604_v40 = vpop.xlane.xlu2 %3603  ;;  %v3986_v46 = vunpack.c.l.bf16 %v3969_v10  ;;  %v4325_v41 = vunpack.c.l.b16 %v3969_v10 }
 0xdd5   :  { %v3635_v8 = vmul.f32 %v3607_v2, %v11038_v43  ;;  %v3634_v11 = vmul.f32 %v3604_v40, %v11038_v43  ;;  %v4001_v60 = vmul.f32 %v10604_v3, %v3985_v37 }
 0xdd6   :  { %v4002_v12 = vmul.f32 %v10603_v30, %v3986_v46  ;;  %v9576_v17 = vpack.c.b16 %v4325_v41, %v4324_v52 }
 0xdd7   :  { %v9579_v6 = vsub.f32 %v9417_v31, %v3635_v8  ;;  %v9582_v51 = vsub.f32 %v9420_v20, %v3634_v11 }
 0xdd8   :  { %v4009_v44 = vpack.c.bf16 %v4002_v12, %v4001_v60 }
 0xdd9   :  { %v3667_v47 = vmul.f32 %v9579_v6, %v9579_v6  ;;  %v3666_v63 = vmul.f32 %v9582_v51, %v9582_v51 }
 0xdda   :  { %4020 = vmatpush.bf16.msra.mxu2 %v4009_v44 }
 0xddb   :  { %v3701_v61 = vsel %vm1154_vm2, %v3667_v47, 0.0  ;;  %v3698_v62 = vsel %vm1154_vm2, %v3666_v63, 0.0 }
 0xddc   :  { %3702 = vadd.xlane.f32.xlu0 %v3701_v61  ;;  %3699 = vadd.xlane.f32.xlu2 %v3698_v62 }
 0xddd   :  { %5637 = vmatmul.msk.bf16.vlgmr.msra.gmra.mxu2 %vm1596_vm15, %v9593_v4 }
 0xe37   :  { %v3721_v21 = vpop.xlane.xlu0 %3720  ;;  %v3718_v19 = vpop.xlane.xlu2 %3717 }
 0xe38   :  { %v3737_v10 = vmul.f32 %v3721_v21, %v11038_v43  ;;  %v3736_v23 = vmul.f32 %v3718_v19, %v11038_v43 }
 0xe3a   :  { %v3753_v38 = vadd.f32 1e-05, %v3737_v10  ;;  %v3752_v37 = vadd.f32 1e-05, %v3736_v23 }
 0xe3c   :  { %6109 = vrsqrt.f32 %v3753_v38  ;;  %vm3910_vm8 = vweird.f32 %v3753_v38  ;;  %vm3900_vm10 = vweird.f32 %v3752_v37 }
 0xe3d   :  { %6111 = vrsqrt.f32 %v3752_v37 }
 0xe3f   :  { %v3715_v52 = vpop.xlane.xlu0 %3714  ;;  %v3712_v2 = vpop.xlane.xlu2 %3711 }
 0xe40   :  { %v3735_v40 = vmul.f32 %v3715_v52, %v11038_v43  ;;  %v3734_v46 = vmul.f32 %v3712_v2, %v11038_v43  ;;  %v5801_v2 = vld [vmem:[%s10349_s11 + $0x18] sm:$0xff] }
 0xe41   :  { %4053 = vmatpush.bf16.msrb.mxu2 %v5801_v2  ;;  %4428 = vmatpush.bf16.msra.mxu0 %v5801_v2  ;;  %v5802_v2 = vld [vmem:[%s10350_s12 + $0x10] sm:$0xff] }
 0xe42   :  { %v6110_v41 = vpop.eup %6109  ;;  %v9601_v8 = vadd.f32 1e-05, %v3735_v40  ;;  %v9603_v11 = vadd.f32 1e-05, %v3734_v46 }
 0xe43   :  { %v6112_v60 = vpop.eup %6111  ;;  %v3905_v12 = vmul.f32 %v6110_v41, %v3753_v38  ;;  %vm3911_vm6 = vweird.f32 %v6110_v41 }
 0xe44   :  { %v3895_v44 = vmul.f32 %v6112_v60, %v3752_v37  ;;  %6113 = vrsqrt.f32 %v9601_v8  ;;  %vm3901_vm7 = vweird.f32 %v6112_v60  ;;  %vm3912_vm9 = vmor %vm3910_vm8, %vm3911_vm6  ;;  %vm3890_vm14 = vweird.f32 %v9601_v8 }
 0xe45   :  { %v3906_v47 = vmul.f32 %v6110_v41, %v3905_v12  ;;  %6115 = vrsqrt.f32 %v9603_v11  ;;  %vm3902_vm11 = vmor %vm3900_vm10, %vm3901_vm7  ;;  %vm3880_vm1 = vweird.f32 %v9603_v11 }
 0xe46   :  { %v3896_v63 = vmul.f32 %v6112_v60, %v3895_v44 }
 0xe47   :  { %v3907_v61 = vmul.f32 0.5, %v3906_v47  ;;  %v3709_v62 = vpop.xlane.xlu0 %3708  ;;  %v3706_v21 = vpop.xlane.xlu2 %3705  ;;  %v5803_v47 = vld [vmem:[%s10350_s12 + $0x18] sm:$0xff] }
 0xe48   :  { %v3897_v19 = vmul.f32 0.5, %v3896_v63  ;;  %v3733_v10 = vmul.f32 %v3709_v62, %v11038_v43  ;;  %v3732_v23 = vmul.f32 %v3706_v21, %v11038_v43  ;;  %v5800_v21 = vld [vmem:[%s10349_s11 + $0x10] sm:$0xff]  ;;  %4441 = vmatpush.bf16.msrb.mxu1 %v5803_v47 }
 0xe49   :  { %v3908_v52 = vsub.f32 1.5, %v3907_v61  ;;  %4054 = vmatpush.bf16.msrb.mxu2 %v5800_v21  ;;  %4429 = vmatpush.bf16.msra.mxu0 %v5800_v21 }
 0xe4a   :  { %v9612_v40 = vpop.eup %6113  ;;  %v3898_v46 = vsub.f32 1.5, %v3897_v19  ;;  %v9614_v12 = vadd.f32 1e-05, %v3733_v10  ;;  %v9616_v44 = vadd.f32 1e-05, %v3732_v23 }
 0xe4b   :  { %v6116_v63 = vpop.eup %6115  ;;  %v3909_v62 = vmul.f32 %v6110_v41, %v3908_v52  ;;  %v3885_v61 = vmul.f32 %v9612_v40, %v9601_v8  ;;  %vm3891_vm12 = vweird.f32 %v9612_v40 }
 0xe4c   :  { %v3899_v19 = vmul.f32 %v6112_v60, %v3898_v46  ;;  %v3875_v10 = vmul.f32 %v6116_v63, %v9603_v11  ;;  %6117 = vrsqrt.f32 %v9614_v12  ;;  %4442 = vmatpush.bf16.msrb.mxu1 %v5802_v2  ;;  %vm3881_vm13 = vweird.f32 %v6116_v63  ;;  %vm3892_vm0 = vmor %vm3890_vm14, %vm3891_vm12 }
 0xe4d   :  { %v3913_v23 = vsel %vm3912_vm9, %v6110_v41, %v3909_v62  ;;  %v3886_v38 = vmul.f32 %v9612_v40, %v3885_v61  ;;  %6119 = vrsqrt.f32 %v9616_v44  ;;  %4088 = vmatpush.bf16.msra.mxu2 %v5803_v47  ;;  %vm3882_vm6 = vmor %vm3880_vm1, %vm3881_vm13  ;;  %vm3870_vm8 = vweird.f32 %v9614_v12 }
 0xe4e   :  { %v3903_v52 = vsel %vm3902_vm11, %v6112_v60, %v3899_v19  ;;  %v3876_v30 = vmul.f32 %v6116_v63, %v3875_v10  ;;  %v3929_v37 = vmul.f32 %v3913_v23, %v9518_v14  ;;  %vm3860_vm10 = vweird.f32 %v9616_v44 }
 0xe4f   :  { %v3928_v46 = vmul.f32 %v3903_v52, %v9521_v9  ;;  %v3887_v3 = vmul.f32 0.5, %v3886_v38  ;;  %v3703_v58 = vpop.xlane.xlu0 %3702  ;;  %v3700_v35 = vpop.xlane.xlu2 %3699 }
 0xe50   :  { %v3877_v41 = vmul.f32 0.5, %v3876_v30  ;;  %v3731_v62 = vmul.f32 %v3703_v58, %v11038_v43  ;;  %v3730_v61 = vmul.f32 %v3700_v35, %v11038_v43  ;;  %v3948_v30 = vmul.f32 %v9436_v56, %v3929_v37 }
 0xe51   :  { %v3888_v60 = vsub.f32 1.5, %v3887_v3  ;;  %v3947_v14 = vmul.f32 %v9436_v56, %v3928_v46  ;;  %4089 = vmatpush.bf16.msra.mxu2 %v5802_v2 }
 0xe52   :  { %v6118_v19 = vpop.eup %6117  ;;  %v3878_v9 = vsub.f32 1.5, %v3877_v41  ;;  %v9641_v10 = vadd.f32 1e-05, %v3731_v62  ;;  %v9643_v23 = vadd.f32 1e-05, %v3730_v61  ;;  %v3967_v41 = vadd.f32 %v9450_v13, %v3948_v30 }
 0xe53   :  { %v6120_v21 = vpop.eup %6119  ;;  %v3889_v58 = vmul.f32 %v9612_v40, %v3888_v60  ;;  %v3865_v35 = vmul.f32 %v6118_v19, %v9614_v12  ;;  %v3966_v8 = vadd.f32 %v9450_v13, %v3947_v14  ;;  %vm3871_vm7 = vweird.f32 %v6118_v19 }
 0xe54   :  { %v3879_v3 = vmul.f32 %v6116_v63, %v3878_v9  ;;  %v3855_v47 = vmul.f32 %v6120_v21, %v9616_v44  ;;  %6121 = vrsqrt.f32 %v9641_v10  ;;  %vm3861_vm9 = vweird.f32 %v6120_v21  ;;  %vm3872_vm11 = vmor %vm3870_vm8, %vm3871_vm7 }
 0xe55   :  { %v3893_v38 = vsel %vm3892_vm0, %v9612_v40, %v3889_v58  ;;  %v3866_v52 = vmul.f32 %v6118_v19, %v3865_v35  ;;  %6123 = vrsqrt.f32 %v9643_v23  ;;  %v9660_v58 = vpack.c.bf16 %v3966_v8, %v3966_v8  ;;  %vm3862_vm12 = vmor %vm3860_vm10, %vm3861_vm9 }
 0xe56   :  { %v3883_v37 = vsel %vm3882_vm6, %v6116_v63, %v3879_v3  ;;  %v3856_v46 = vmul.f32 %v6120_v21, %v3855_v47  ;;  %v3927_v11 = vmul.f32 %v3893_v38, %v9532_v48  ;;  %v9664_v35 = vpack.c.bf16 %v3967_v41, %v3967_v41 }
 0xe57   :  { %v3867_v62 = vmul.f32 0.5, %v3866_v52  ;;  %v3926_v61 = vmul.f32 %v3883_v37, %v9535_v45  ;;  %v4654_v37 = vunpack.c.l.b16 %v9660_v58  ;;  %vm3850_vm0 = vweird.f32 %v9641_v10 }
 0xe58   :  { %v3857_v60 = vmul.f32 0.5, %v3856_v46  ;;  %v3946_v48 = vmul.f32 %v9436_v56, %v3927_v11  ;;  %v4655_v41 = vunpack.c.l.b16 %v9664_v35  ;;  %vm3840_vm1 = vweird.f32 %v9643_v23 }
 0xe59   :  { %v3868_v2 = vsub.f32 1.5, %v3867_v62  ;;  %v3945_v45 = vmul.f32 %v9436_v56, %v3926_v61 }
 0xe5a   :  { %v6122_v40 = vpop.eup %6121  ;;  %v3858_v9 = vsub.f32 1.5, %v3857_v60 }
 0xe5b   :  { %v6124_v14 = vpop.eup %6123  ;;  %v3869_v63 = vmul.f32 %v6118_v19, %v3868_v2  ;;  %v3845_v30 = vmul.f32 %v6122_v40, %v9641_v10  ;;  %v3964_v60 = vadd.f32 %v9450_v13, %v3945_v45  ;;  %v3965_v2 = vadd.f32 %v9450_v13, %v3946_v48 }
 0xe5c   :  { %v3859_v3 = vmul.f32 %v6120_v21, %v3858_v9  ;;  %v3835_v12 = vmul.f32 %v6124_v14, %v9643_v23  ;;  %vm3851_vm13 = vweird.f32 %v6122_v40  ;;  %vm3841_vm14 = vweird.f32 %v6124_v14 }
 0xe5d   :  { %v3873_v47 = vsel %vm3872_vm11, %v6118_v19, %v3869_v63  ;;  %v3846_v38 = vmul.f32 %v6122_v40, %v3845_v30  ;;  %v9675_v63 = vpack.c.bf16 %v3964_v60, %v3964_v60  ;;  %v9677_v30 = vpack.c.bf16 %v3965_v2, %v3965_v2  ;;  %vm3852_vm6 = vmor %vm3850_vm0, %vm3851_vm13 }
 0xe5e   :  { %v3863_v52 = vsel %vm3862_vm12, %v6120_v21, %v3859_v3  ;;  %v3836_v8 = vmul.f32 %v6124_v14, %v3835_v12  ;;  %v3925_v44 = vmul.f32 %v3873_v47, %v9555_v7  ;;  %v9679_v7 = vpack.c.b16 %v4655_v41, %v4654_v37  ;;  %vm3842_vm7 = vmor %vm3840_vm1, %vm3841_vm14 }
 0xe5f   :  { %v3847_v46 = vmul.f32 0.5, %v3846_v38  ;;  %v3924_v62 = vmul.f32 %v3863_v52, %v9558_v42  ;;  %v4652_v12 = vunpack.c.l.b16 %v9675_v63  ;;  %v4653_v38 = vunpack.c.l.b16 %v9677_v30 }
 0xe60   :  { %v3837_v11 = vmul.f32 0.5, %v3836_v8  ;;  %v4022_v61 = vpop.f32.mrf.mxu2  ;;  %v3944_v42 = vmul.f32 %v9436_v56, %v3925_v44 }
 0xe61   :  { %v3848_v19 = vsub.f32 1.5, %v3847_v46  ;;  %v4026_v21 = vpack.c.bf16 %v4022_v61, %v4022_v61  ;;  %v3943_v48 = vmul.f32 %v9436_v56, %v3924_v62  ;;  %v9689_v8 = vpack.c.b16 %v4653_v38, %v4652_v12 }
 0xe62   :  { %v3838_v9 = vsub.f32 1.5, %v3837_v11  ;;  %v3963_v46 = vadd.f32 %v9450_v13, %v3944_v42 }
 0xe63   :  { %v3849_v3 = vmul.f32 %v6122_v40, %v3848_v19  ;;  %5650 = vmatmul.msk.bf16.vlgmr.msrb.gmra.mxu2 %vm1154_vm2, %v4026_v21  ;;  %v3962_v44 = vadd.f32 %v9450_v13, %v3943_v48 }
 0xe64   :  { %v3839_v45 = vmul.f32 %v6124_v14, %v3838_v9  ;;  %v9697_v62 = vpack.c.bf16 %v3963_v46, %v3963_v46 }
 0xe65   :  { %v3853_v47 = vsel %vm3852_vm6, %v6122_v40, %v3849_v3  ;;  %v9695_v41 = vpack.c.bf16 %v3962_v44, %v3962_v44 }
 0xe66   :  { %v3843_v52 = vsel %vm3842_vm7, %v6124_v14, %v3839_v45  ;;  %v3923_v10 = vmul.f32 %v3853_v47, %v9579_v6  ;;  %v4651_v61 = vunpack.c.l.b16 %v9697_v62 }
 0xe67   :  { %v3922_v23 = vmul.f32 %v3843_v52, %v9582_v51  ;;  %v4650_v14 = vunpack.c.l.b16 %v9695_v41 }
 0xe68   :  { %v4024_v37 = vpop.f32.mrf.mxu2  ;;  %v3942_v40 = vmul.f32 %v9436_v56, %v3923_v10 }
 0xe69   :  { %v3941_v11 = vmul.f32 %v9436_v56, %v3922_v23  ;;  %v9703_v6 = vpack.c.b16 %v4651_v61, %v4650_v14 }
 0xe6a   :  { %v3961_v60 = vadd.f32 %v9450_v13, %v3942_v40 }
 0xe6b   :  { %v3960_v51 = vadd.f32 %v9450_v13, %v3941_v11 }
 0xe6c   :  { %v9709_v19 = vpack.c.bf16 %v3961_v60, %v3961_v60 }
 0xe6d   :  { %v9707_v2 = vpack.c.bf16 %v3960_v51, %v3960_v51 }
 0xe6e   :  { %v4649_v56 = vunpack.c.l.b16 %v9709_v19 }
 0xe6f   :  { %v4648_v9 = vunpack.c.l.b16 %v9707_v2 }
 0xe71   :  { %v9714_v3 = vpack.c.b16 %v4649_v56, %v4648_v9 }
 0xe73   :  { %5664 = vmatmul.msk.bf16.vlgmr.msra.gmra.mxu2 %vm1154_vm2, %v4026_v21  ;;  %v9720_v21 = vld [vmem:[%s10351_s13 + $0x1] ss:$0 sm:$0xff] }
 0xee6   :  { %v4056_v42 = vpop.f32.mrf.mxu2 }
 0xee7   :  { %v4095_v48 = vsel %vm1679_vm3, %v4056_v42, -inf }
 0xee8   :  { %v4096_v45 = vrot.slane %v4095_v48, 4 }
 0xeea   :  { %v4097_v12 = vmax.f32 %v4095_v48, %v4096_v45 }
 0xeec   :  { %v4098_v47 = vrot.slane %v4097_v12, 2 }
 0xeee   :  { %v4099_v38 = vmax.f32 %v4097_v12, %v4098_v47  ;;  %v4058_v13 = vpop.f32.mrf.mxu2  ;;  %v5673_v12 = vld [vmem:[%s10352_s14 + $0x38] sm:$0xff]  ;;  %v5672_v47 = vld [vmem:[%s10352_s14 + $0x30] sm:$0xff] }
 0xeef   :  { %4223 = vmatpush.msra.mxu3 %v5673_v12  ;;  %4571 = vmatpush.msrb.mxu0 %v5673_v12 }
 0xef0   :  { %v4100_v52 = vrot.slane %v4099_v38, 1 }
 0xef1   :  { %4224 = vmatpush.msra.mxu3 %v5672_v47  ;;  %4572 = vmatpush.msrb.mxu0 %v5672_v47 }
 0xef2   :  { %v4101_v10 = vmax.f32 %v4099_v38, %v4100_v52 }
 0xef4   :  { %v4102_v23 = vsub.f32 %v4056_v42, %v4101_v10 }
 0xef6   :  { %v4103_v37 = vmul.f32 1.442695, %v4102_v23  ;;  %v4091_v44 = vpop.f32.mrf.mxu2  ;;  %v5671_v23 = vld [vmem:[%s10352_s14 + $0x28] sm:$0xff] }
 0xef7   :  { %v4092_v46 = vadd.f32 %v9720_v21, %v4091_v44  ;;  %4225 = vmatpush.msra.mxu3 %v5671_v23  ;;  %4573 = vmatpush.msrb.mxu0 %v5671_v23  ;;  %v4390_v23 = vunpack.c.l.bf16 %v9677_v30  ;;  %v4388_v30 = vunpack.c.l.bf16 %v9697_v62  ;;  %v9806_v62 = vld [vmem:[%s10354_s8 + $0x28] sm:$0xff] }
 0xef8   :  { %6125 = vpow2.f32 %v4103_v37  ;;  %v5670_v37 = vld [vmem:[%s10352_s14 + $0x20] sm:$0xff] }
 0xef9   :  { %5665 = vmatpush.msk.msrb.mxu2 %vm1744_vm4, %v4092_v46  ;;  %4226 = vmatpush.msra.mxu3 %v5670_v37  ;;  %v9744_v46 = vld [vmem:[%s10353_s5] sm:$0xff] }
 0xefa   :  { %4574 = vmatpush.msrb.mxu0 %v5670_v37 }
 0xefe   :  { %v6126_v40 = vpop.eup %6125  ;;  %v4093_v11 = vpop.f32.mrf.mxu2 }
 0xeff   :  { %v4105_v14 = vsel %vm1679_vm3, %v6126_v40, 0.0 }
 0xf00   :  { %v4106_v61 = vrot.slane %v4105_v14, 4 }
 0xf02   :  { %v4107_v51 = vadd.f32 %v4106_v61, %v4105_v14  ;;  %v9751_v14 = vld [vmem:[%s10353_s5 + $0x8] sm:$0xff] }
 0xf04   :  { %v4108_v60 = vrot.slane %v4107_v51, 2 }
 0xf06   :  { %v4109_v9 = vadd.f32 %v4108_v60, %v4107_v51  ;;  %v9758_v60 = vld [vmem:[%s10353_s5 + $0x10] sm:$0xff] }
 0xf08   :  { %v4110_v56 = vrot.slane %v4109_v9, 1 }
 0xf0a   :  { %v4111_v48 = vadd.f32 %v4110_v56, %v4109_v9 }
 0xf0c   :  { %6127 = vrcp.f32 %v4111_v48  ;;  %v9765_v48 = vld [vmem:[%s10353_s5 + $0x18] sm:$0xff] }
 0xf12   :  { %v6128_v45 = vpop.eup %6127 }
 0xf13   :  { %v4113_v42 = vmul.f32 %v6128_v45, %v6126_v40 }
 0xf15   :  { %4114 = vxpose.xlu1.b32.start.end [1/1] (short) (narrow) %v4113_v42, 32 }
 0xfb9   :  { %v4130_v38 = vpop.trf.xlu1 }
 0xfba   :  { %5666 = vmatmul.msk.f32.vlgmr.msrb.gmra.mxu2 %vm1731_vm5, %v4130_v38  ;;  %v4391_v38 = vunpack.c.l.bf16 %v9660_v58  ;;  %v9780_v58 = vld [vmem:[%s10355_s9 + $0x1] sm:$0x1] }
 0xfbc   :  { %v4399_v37 = vmul.f32 %v5844_v57, %v4391_v38  ;;  %v4398_v57 = vmul.f32 %v5841_v22, %v4390_v23  ;;  %v4396_v22 = vmul.f32 %v11047_v32, %v4388_v30 }
 0xfc1   :  { %v4131_v13 = vpop.trf.xlu1 }
 0xfc2   :  { %5667 = vmatmul.msk.f32.gmra.mxu2 %vm1731_vm5, %v4131_v13  ;;  %v4392_v13 = vunpack.c.l.bf16 %v9664_v35  ;;  %v9785_v35 = vld [vmem:[%s10354_s8 + $0x20] sm:$0xff] }
 0xfc9   :  { %v4132_v52 = vpop.trf.xlu1 }
 0xfca   :  { %5668 = vmatmul.msk.f32.gmra.mxu2 %vm1731_vm5, %v4132_v52 }
 0xfd1   :  { %v4133_v10 = vpop.trf.xlu1 }
 0xfd2   :  { %5669 = vmatmul.msk.f32.gmra.mxu2 %vm1731_vm5, %v4133_v10  ;;  %v4389_v10 = vunpack.c.l.bf16 %v9675_v63 }
 0xfd4   :  { %v4397_v63 = vmul.f32 %v5840_v55, %v4389_v10  ;;  %v11046_v55 = vunpack.c.l.bf16 %v9495_v15 }
0x103d   :  { %v4178_v44 = vpop.f32.mrf.mxu2 }
0x103e   :  { %v4190_v40 = vmul.f32 %v9744_v46, %v4178_v44  ;;  %v4400_v44 = vmul.f32 %v5845_v50, %v4392_v13  ;;  %v4387_v50 = vunpack.c.l.bf16 %v9695_v41  ;;  %v4386_v41 = vunpack.c.l.bf16 %v9709_v19  ;;  %v9824_v19 = vld [vmem:[%s10354_s8 + $0x38] sm:$0xff] }
0x1040   :  { %5674 = vmatmul.msk.f32.vlgmr.msra.gmra.mxu3 %vm1154_vm2, %v4190_v40  ;;  %v4404_v18 = vpack.c.bf16 %v4400_v44, %v4399_v37  ;;  %v4403_v40 = vpack.c.bf16 %v4398_v57, %v4397_v63 }
0x1045   :  { %v4181_v11 = vpop.f32.mrf.mxu2 }
0x1046   :  { %v4191_v61 = vmul.f32 %v9751_v14, %v4181_v11  ;;  %v4395_v11 = vmul.f32 %v11046_v55, %v4387_v50 }
0x1048   :  { %5675 = vmatmul.msk.f32.gmra.mxu3 %vm1154_vm2, %v4191_v61  ;;  %v4385_v61 = vunpack.c.l.bf16 %v9707_v2  ;;  %v9817_v2 = vld [vmem:[%s10354_s8 + $0x30] sm:$0xff] }
0x104d   :  { %v4184_v51 = vpop.f32.mrf.mxu2 }
0x104e   :  { %v4192_v9 = vmul.f32 %v9758_v60, %v4184_v51  ;;  %v4402_v51 = vpack.c.bf16 %v4396_v22, %v4395_v11 }
0x1050   :  { %5676 = vmatmul.msk.f32.gmra.mxu3 %vm1154_vm2, %v4192_v9  ;;  %v11048_v9 = vunpack.c.l.bf16 %v9552_v59 }
0x1055   :  { %v4187_v56 = vpop.f32.mrf.mxu2 }
0x1056   :  { %v4193_v45 = vmul.f32 %v9765_v48, %v4187_v56  ;;  %v4393_v56 = vmul.f32 %v11048_v9, %v4385_v61 }
0x1058   :  { %5677 = vmatmul.msk.f32.gmra.mxu3 %vm1154_vm2, %v4193_v45  ;;  %v11049_v45 = vunpack.c.h.bf16 %v9552_v59 }
0x10c3   :  { %v4228_v42 = vpop.f32.mrf.mxu3 }
0x10cb   :  { %v4231_v12 = vpop.f32.mrf.mxu3 }
0x10d3   :  { %v4234_v47 = vpop.f32.mrf.mxu3 }
0x10db   :  { %v4237_v52 = vpop.f32.mrf.mxu3 }
0x10dc   :  { %4269 = vmatpush.msra.mxu2 %v4237_v52  ;;  %4305 = vmatpush.msrb.mxu3 %v4237_v52 }
0x10de   :  { %4270 = vmatpush.msra.mxu2 %v4234_v47  ;;  %4306 = vmatpush.msrb.mxu3 %v4234_v47 }
0x10e0   :  { %4271 = vmatpush.msra.mxu2 %v4231_v12  ;;  %4307 = vmatpush.msrb.mxu3 %v4231_v12 }
0x10e2   :  { %4272 = vmatpush.msra.mxu2 %v4228_v42  ;;  %4308 = vmatpush.msrb.mxu3 %v4228_v42  ;;  %v4394_v42 = vmul.f32 %v11049_v45, %v4386_v41 }
0x10e3   :  { %5682 = vmatmul.msk.f32.vlgmr.msra.gmra.mxu2 %vm1154_vm2, %v9785_v35  ;;  %5688 = vmatmul.msk.f32.vlgmr.msrb.gmra.mxu3 %vm1154_vm2, %v9780_v58 }
0x10e4   :  { %4409 = vmatpush.bf16.msrb.mxu2 %v4404_v18  ;;  %v4401_v15 = vpack.c.bf16 %v4394_v42, %v4393_v56 }
0x10e8   :  { %4410 = vmatpush.bf16.msrb.mxu2 %v4403_v40 }
0x10eb   :  { %5683 = vmatmul.msk.f32.gmra.mxu2 %vm1154_vm2, %v9806_v62 }
0x10ec   :  { %4411 = vmatpush.bf16.msrb.mxu2 %v4402_v51 }
0x10f0   :  { %4412 = vmatpush.bf16.msrb.mxu2 %v4401_v15 }
0x10f3   :  { %5684 = vmatmul.msk.f32.gmra.mxu2 %vm1154_vm2, %v9817_v2 }
0x10fb   :  { %5685 = vmatmul.msk.f32.gmra.mxu2 %vm1154_vm2, %v9824_v19 }
0x1103   :  { %5693 = vmatmul.msk.bf16.vlgmr.msrb.gmra.mxu2 %vm1596_vm15, %v9593_v4  ;;  %v9843_v4 = vld [vmem:[%s10356_s15 + $0x1] sm:$0x1] }
0x1166   :  { %v4274_v59 = vpop.f32.mrf.mxu2 }
0x116e   :  { %v4277_v12 = vpop.f32.mrf.mxu2 }
0x116f   :  { %v4313_v52 = vpack.c.bf16 %v4277_v12, %v4274_v59 }
0x1176   :  { %v4280_v47 = vpop.f32.mrf.mxu2 }
0x117e   :  { %v4283_v38 = vpop.f32.mrf.mxu2 }
0x117f   :  { %v4314_v13 = vpack.c.bf16 %v4283_v38, %v4280_v47 }
0x1181   :  { %4354 = vmatpush.bf16.msra.mxu3 %v4314_v13 }
0x1185   :  { %4355 = vmatpush.bf16.msra.mxu3 %v4313_v52 }
0x1186   :  { %v4414_v10 = vpop.f32.mrf.mxu2 }
0x1187   :  { %v4418_v23 = vpack.c.bf16 %v4414_v10, %v4414_v10 }
0x1188   :  { %5689 = vmatmul.msk.bf16.vlgmr.msra.gmra.mxu3 %vm1154_vm2, %v9576_v17  ;;  %v4310_v17 = vpop.f32.mrf.mxu3 }
0x1189   :  { %5694 = vmatmul.msk.bf16.vlgmr.msra.gmra.mxu0 %vm1154_vm2, %v4418_v23  ;;  %5695 = vmatmul.msk.bf16.vlgmr.msrb.gmra.mxu1 %vm1154_vm2, %v4418_v23  ;;  %v4311_v44 = vadd.f32 %v9843_v4, %v4310_v17 }
0x118b   :  { %v9847_v18 = vperm.slane %v4311_v44, 0 }
0x118e   :  { %v4416_v37 = vpop.f32.mrf.mxu2 }
0x1198   :  { %5690 = vmatmul.msk.bf16.gmra.mxu3 %vm1154_vm2, %v9509_v54 }
0x11a8   :  { %5691 = vmatmul.msk.bf16.gmra.mxu3 %vm1154_vm2, %v9511_v34 }
0x11b8   :  { %5692 = vmatmul.msk.bf16.gmra.mxu3 %vm1154_vm2, %v9497_v53 }
0x1206   :  { %v4431_v63 = vpop.f32.mrf.mxu0  ;;  %v4444_v30 = vpop.f32.mrf.mxu1 }
0x1207   :  { %v4448_v57 = vsel %vm1679_vm3, %v4431_v63, -inf  ;;  %v4445_v34 = vadd.f32 %v9720_v21, %v4444_v30 }
0x1208   :  { %v4449_v54 = vrot.slane %v4448_v57, 4 }
0x1209   :  { %5696 = vmatpush.msk.msra.mxu2 %vm1744_vm4, %v4445_v34 }
0x120a   :  { %v4450_v50 = vmax.f32 %v4448_v57, %v4449_v54 }
0x120b   :  { %v4357_v40 = vpop.f32.mrf.mxu3 }
0x120c   :  { %v4451_v53 = vrot.slane %v4450_v50, 2  ;;  %v4358_v55 = vadd.f32 %v4357_v40, %v9847_v18 }
0x120e   :  { %v4452_v11 = vmax.f32 %v4450_v50, %v4451_v53  ;;  %v9853_v32 = vadd.f32 %v4358_v55, %v9304_v36  ;;  %v4433_v22 = vpop.f32.mrf.mxu0  ;;  %v4446_v9 = vpop.f32.mrf.mxu1 }
0x1210   :  { %v4453_v61 = vrot.slane %v4452_v11, 1  ;;  %v4721_v41 = vsel %vm1154_vm2, %v9853_v32, 0.0 }
0x1211   :  { %4722 = vadd.xlane.f32.xlu2 %v4721_v41 }
0x1212   :  { %v4454_v51 = vmax.f32 %v4452_v11, %v4453_v61 }
0x1213   :  { %v4359_v56 = vpop.f32.mrf.mxu3 }
0x1214   :  { %v4455_v21 = vsub.f32 %v4431_v63, %v4454_v51  ;;  %v4360_v45 = vadd.f32 %v4359_v56, %v9847_v18 }
0x1216   :  { %v4456_v42 = vmul.f32 1.442695, %v4455_v21  ;;  %v9859_v15 = vadd.f32 %v4360_v45, %v9301_v49 }
0x1218   :  { %6129 = vpow2.f32 %v4456_v42  ;;  %v4724_v36 = vsel %vm1154_vm2, %v9859_v15, 0.0 }
0x1219   :  { %4725 = vadd.xlane.f32.xlu0 %v4724_v36 }
0x121b   :  { %v4362_v59 = vpop.f32.mrf.mxu3 }
0x121c   :  { %v4363_v12 = vadd.f32 %v4362_v59, %v9847_v18 }
0x121e   :  { %v6130_v47 = vpop.eup %6129  ;;  %v9865_v38 = vadd.f32 %v4363_v12, %v11041_v1 }
0x121f   :  { %v4458_v13 = vsel %vm1679_vm3, %v6130_v47, 0.0 }
0x1220   :  { %v4459_v52 = vrot.slane %v4458_v13, 4  ;;  %v4727_v10 = vsel %vm1154_vm2, %v9865_v38, 0.0 }
0x1221   :  { %4728 = vadd.xlane.f32.xlu2 %v4727_v10 }
0x1222   :  { %v4460_v49 = vadd.f32 %v4459_v52, %v4458_v13 }
0x1223   :  { %v4364_v23 = vpop.f32.mrf.mxu3 }
0x1224   :  { %v4461_v37 = vrot.slane %v4460_v49, 2  ;;  %v4365_v17 = vadd.f32 %v4364_v23, %v9847_v18 }
0x1226   :  { %v4462_v44 = vadd.f32 %v4461_v37, %v4460_v49  ;;  %v9872_v63 = vadd.f32 %v4365_v17, %v11043_v25 }
0x1228   :  { %v4463_v57 = vrot.slane %v4462_v44, 1  ;;  %v4730_v1 = vsel %vm1154_vm2, %v9872_v63, 0.0 }
0x1229   :  { %4731 = vadd.xlane.f32.xlu0 %v4730_v1 }
0x122a   :  { %v4464_v54 = vadd.f32 %v4463_v57, %v4462_v44 }
0x122b   :  { %v4367_v50 = vpop.f32.mrf.mxu3 }
0x122c   :  { %v4368_v30 = vadd.f32 %v4367_v50, %v9847_v18  ;;  %6131 = vrcp.f32 %v4464_v54 }
0x122e   :  { %v9878_v34 = vadd.f32 %v4368_v30, %v8843_v39 }
0x1230   :  { %v4733_v40 = vsel %vm1154_vm2, %v9878_v34, 0.0 }
0x1231   :  { %4734 = vadd.xlane.f32.xlu2 %v4733_v40 }
0x1232   :  { %v6132_v53 = vpop.eup %6131 }
0x1233   :  { %v4369_v25 = vpop.f32.mrf.mxu3  ;;  %v4466_v55 = vmul.f32 %v6132_v53, %v6130_v47 }
0x1234   :  { %v4370_v11 = vadd.f32 %v4369_v25, %v9847_v18 }
0x1235   :  { %4467 = vxpose.xlu1.b32.start.end [1/1] (short) (narrow) %v4466_v55, 32 }
0x1236   :  { %v9884_v22 = vadd.f32 %v4370_v11, %v11042_v28 }
0x1238   :  { %v4736_v61 = vsel %vm1154_vm2, %v9884_v22, 0.0 }
0x1239   :  { %4737 = vadd.xlane.f32.xlu0 %v4736_v61 }
0x123b   :  { %v4372_v41 = vpop.f32.mrf.mxu3 }
0x123c   :  { %v4373_v50 = vadd.f32 %v4372_v41, %v9847_v18 }
0x123e   :  { %v9924_v30 = vadd.f32 %v4373_v50, %v11039_v33 }
0x1240   :  { %v4739_v40 = vsel %vm1154_vm2, %v9924_v30, 0.0 }
0x1243   :  { %v4374_v56 = vpop.f32.mrf.mxu3 }
0x1244   :  { %v4375_v45 = vadd.f32 %v4374_v56, %v9847_v18 }
0x1246   :  { %v9898_v59 = vadd.f32 %v4375_v45, %v11040_v29 }
0x1248   :  { %v4742_v52 = vsel %vm1154_vm2, %v9898_v59, 0.0 }
0x1284   :  { %v4723_v39 = vpop.xlane.xlu2 %4722 }
0x1285   :  { %v4769_v51 = vmul.f32 %v4723_v39, %v11038_v43 }
0x1287   :  { %v9890_v9 = vsub.f32 %v9853_v32, %v4769_v51 }
0x1289   :  { %v4801_v21 = vmul.f32 %v9890_v9, %v9890_v9 }
0x128b   :  { %v4817_v28 = vsel %vm1154_vm2, %v4801_v21, 0.0 }
0x128c   :  { %v4726_v42 = vpop.xlane.xlu0 %4725  ;;  %4818 = vadd.xlane.f32.xlu2 %v4817_v28 }
0x128d   :  { %v4770_v36 = vmul.f32 %v4726_v42, %v11038_v43 }
0x128f   :  { %v9901_v12 = vsub.f32 %v9859_v15, %v4770_v36 }
0x1291   :  { %v4802_v47 = vmul.f32 %v9901_v12, %v9901_v12 }
0x1293   :  { %v4820_v13 = vsel %vm1154_vm2, %v4802_v47, 0.0 }
0x1294   :  { %4821 = vadd.xlane.f32.xlu0 %v4820_v13  ;;  %4743 = vadd.xlane.f32.xlu2 %v4742_v52  ;;  %v4729_v10 = vpop.xlane.xlu2 %4728 }
0x1295   :  { %v4771_v49 = vmul.f32 %v4729_v10, %v11038_v43 }
0x1297   :  { %v9910_v23 = vsub.f32 %v9865_v38, %v4771_v49 }
0x1299   :  { %v4803_v29 = vmul.f32 %v9910_v23, %v9910_v23 }
0x129b   :  { %v4823_v37 = vsel %vm1154_vm2, %v4803_v29, 0.0 }
0x129c   :  { %v4732_v17 = vpop.xlane.xlu0 %4731  ;;  %4824 = vadd.xlane.f32.xlu0 %v4823_v37 }
0x129d   :  { %v4772_v44 = vmul.f32 %v4732_v17, %v11038_v43 }
0x129f   :  { %v9917_v57 = vsub.f32 %v9872_v63, %v4772_v44 }
0x12a1   :  { %v4804_v1 = vmul.f32 %v9917_v57, %v9917_v57 }
0x12a3   :  { %v4826_v54 = vsel %vm1154_vm2, %v4804_v1, 0.0 }
0x12a4   :  { %4827 = vadd.xlane.f32.xlu2 %v4826_v54  ;;  %v9940_v45 = vpop.xlane.xlu2 %4734 }
0x12ad   :  { %4740 = vadd.xlane.f32.xlu1 %v4739_v40 }
0x12d9   :  { %v4483_v53 = vpop.trf.xlu1 }
0x12da   :  { %5697 = vmatmul.msk.f32.vlgmr.msra.gmra.mxu2 %vm1731_vm5, %v4483_v53 }
0x12e1   :  { %v4484_v25 = vpop.trf.xlu1 }
0x12e2   :  { %5698 = vmatmul.msk.f32.gmra.mxu2 %vm1731_vm5, %v4484_v25 }
0x12e9   :  { %v4485_v55 = vpop.trf.xlu1 }
0x12ea   :  { %5699 = vmatmul.msk.f32.gmra.mxu2 %vm1731_vm5, %v4485_v55 }
0x12f1   :  { %v4486_v11 = vpop.trf.xlu1 }
0x12f2   :  { %5700 = vmatmul.msk.f32.gmra.mxu2 %vm1731_vm5, %v4486_v11 }
0x12ff   :  { %v4819_v28 = vpop.xlane.xlu2 %4818 }
0x1300   :  { %v4865_v36 = vmul.f32 %v4819_v28, %v11038_v43 }
0x1307   :  { %v9946_v13 = vpop.xlane.xlu2 %4743 }
0x1317   :  { %v4828_v52 = vpop.xlane.xlu2 %4827 }
0x1318   :  { %v4868_v37 = vmul.f32 %v4828_v52, %v11038_v43 }
0x131a   :  { %v4884_v54 = vadd.f32 1e-05, %v4868_v37 }
0x131c   :  { %vm4933_vm12 = vweird.f32 %v4884_v54 }
0x135d   :  { %v4531_v18 = vpop.f32.mrf.mxu2 }
0x135e   :  { %v4543_v33 = vmul.f32 %v9744_v46, %v4531_v18  ;;  %v9942_v46 = vpop.xlane.xlu0 %4737 }
0x1360   :  { %5701 = vmatmul.msk.f32.vlgmr.msrb.gmra.mxu0 %vm1154_vm2, %v4543_v33 }
0x1365   :  { %v4534_v61 = vpop.f32.mrf.mxu2 }
0x1366   :  { %v4544_v41 = vmul.f32 %v9751_v14, %v4534_v61  ;;  %v4822_v42 = vpop.xlane.xlu0 %4821 }
0x1367   :  { %v4866_v14 = vmul.f32 %v4822_v42, %v11038_v43 }
0x1368   :  { %5702 = vmatmul.msk.f32.gmra.mxu0 %vm1154_vm2, %v4544_v41 }
0x1369   :  { %v4882_v47 = vadd.f32 1e-05, %v4866_v14 }
0x136b   :  { %6133 = vrsqrt.f32 %v4882_v47  ;;  %vm4913_vm4 = vweird.f32 %v4882_v47 }
0x136d   :  { %v4537_v39 = vpop.f32.mrf.mxu2 }
0x136e   :  { %v4545_v51 = vmul.f32 %v9758_v60, %v4537_v39  ;;  %v4881_v60 = vadd.f32 1e-05, %v4865_v36  ;;  %v4825_v49 = vpop.xlane.xlu0 %4824 }
0x136f   :  { %v4867_v44 = vmul.f32 %v4825_v49, %v11038_v43 }
0x1370   :  { %5703 = vmatmul.msk.f32.gmra.mxu0 %vm1154_vm2, %v4545_v51  ;;  %6135 = vrsqrt.f32 %v4881_v60  ;;  %vm4903_vm8 = vweird.f32 %v4881_v60 }
0x1371   :  { %v9950_v40 = vadd.f32 1e-05, %v4867_v44  ;;  %6137 = vrsqrt.f32 %v4884_v54 }
0x1373   :  { %6139 = vrsqrt.f32 %v9950_v40  ;;  %vm4923_vm14 = vweird.f32 %v9950_v40 }
0x1375   :  { %v4540_v56 = vpop.f32.mrf.mxu2 }
0x1376   :  { %v4546_v21 = vmul.f32 %v9765_v48, %v4540_v56  ;;  %v6134_v48 = vpop.eup %6133 }
0x1377   :  { %v6136_v29 = vpop.eup %6135  ;;  %v4908_v17 = vmul.f32 %v6134_v48, %v4882_v47  ;;  %vm4914_vm15 = vweird.f32 %v6134_v48  ;;  %v9958_v47 = vld [vmem:[%s10357_s16 + $0x1] ss:$0 sm:$0xff] }
0x1378   :  { %5704 = vmatmul.msk.f32.gmra.mxu0 %vm1154_vm2, %v4546_v21  ;;  %v4898_v1 = vmul.f32 %v6136_v29, %v4881_v60  ;;  %v6138_v33 = vpop.eup %6137  ;;  %vm4904_vm3 = vweird.f32 %v6136_v29  ;;  %vm4915_vm5 = vmor %vm4913_vm4, %vm4914_vm15 }
0x1379   :  { %v4909_v50 = vmul.f32 %v6134_v48, %v4908_v17  ;;  %v6140_v39 = vpop.eup %6139  ;;  %v4928_v56 = vmul.f32 %v6138_v33, %v4884_v54  ;;  %vm4905_vm9 = vmor %vm4903_vm8, %vm4904_vm3  ;;  %vm4934_vm10 = vweird.f32 %v6138_v33 }
0x137a   :  { %v4899_v25 = vmul.f32 %v6136_v29, %v4898_v1  ;;  %v4918_v28 = vmul.f32 %v6140_v39, %v9950_v40  ;;  %v9968_v1 = vld [vmem:[%s10358_s17 + $0x1] ss:$0 sm:$0xff]  ;;  %vm4924_vm11 = vweird.f32 %v6140_v39  ;;  %vm4935_vm13 = vmor %vm4933_vm12, %vm4934_vm10 }
0x137b   :  { %v4910_v55 = vmul.f32 0.5, %v4909_v50  ;;  %v4929_v14 = vmul.f32 %v6138_v33, %v4928_v56  ;;  %vm4925_vm0 = vmor %vm4923_vm14, %vm4924_vm11 }
0x137c   :  { %v4900_v11 = vmul.f32 0.5, %v4899_v25  ;;  %v4919_v49 = vmul.f32 %v6140_v39, %v4918_v28  ;;  %v5810_v28 = vld [vmem:[%s10361_s20 + $0x60] sm:$0xff] }
0x137d   :  { %v4911_v18 = vsub.f32 1.5, %v4910_v55  ;;  %v4930_v17 = vmul.f32 0.5, %v4929_v14 }
0x137e   :  { %v4901_v41 = vsub.f32 1.5, %v4900_v11 }
0x137f   :  { %v4912_v51 = vmul.f32 %v6134_v48, %v4911_v18 }
0x1380   :  { %v4902_v21 = vmul.f32 %v6136_v29, %v4901_v41 }
0x1381   :  { %v4916_v42 = vsel %vm4915_vm5, %v6134_v48, %v4912_v51  ;;  %v4920_v48 = vmul.f32 0.5, %v4919_v49 }
0x1382   :  { %v4906_v52 = vsel %vm4905_vm9, %v6136_v29, %v4902_v21  ;;  %v5058_v37 = vmul.f32 %v4916_v42, %v9901_v12  ;;  %v5805_v29 = vld [vmem:[%s10359_s18 + $0x18] sm:$0xff]  ;;  %v4931_v12 = vsub.f32 1.5, %v4930_v17  ;;  %v10009_v21 = vld [vmem:[%s10360_s19 + $0x1] ss:$0 sm:$0xff]  ;;  %v5808_v17 = vld [vmem:[%s10361_s20 + $0x50] sm:$0xff] }
0x1383   :  { %v5057_v60 = vmul.f32 %v4906_v52, %v9890_v9  ;;  %v4921_v9 = vsub.f32 1.5, %v4920_v48  ;;  %v5809_v52 = vld [vmem:[%s10361_s20 + $0x58] sm:$0xff] }
0x1384   :  { %v5077_v44 = vmul.f32 %v9958_v47, %v5058_v37  ;;  %v4932_v25 = vmul.f32 %v6138_v33, %v4931_v12 }
0x1385   :  { %v5076_v50 = vmul.f32 %v9958_v47, %v5057_v60  ;;  %v4922_v11 = vmul.f32 %v6140_v39, %v4921_v9 }
0x1387   :  { %v5095_v55 = vadd.f32 %v9968_v1, %v5076_v50  ;;  %v4926_v18 = vsel %vm4925_vm0, %v6140_v39, %v4922_v11  ;;  %v5807_v50 = vld [vmem:[%s10361_s20 + $0x48] sm:$0xff] }
0x1388   :  { %v5059_v41 = vmul.f32 %v4926_v18, %v9910_v23  ;;  %v5813_v23 = vld [vmem:[%s10361_s20 + $0x78] sm:$0xff] }
0x1389   :  { %5436 = vmatpush.bf16.msra.mxu0 %v5813_v23 }
0x138a   :  { %v5078_v54 = vmul.f32 %v9958_v47, %v5059_v41 }
0x13dd   :  { %v4576_v10 = vpop.f32.mrf.mxu0 }
0x13e5   :  { %v4579_v53 = vpop.f32.mrf.mxu0 }
0x13ed   :  { %v4582_v61 = vpop.f32.mrf.mxu0 }
0x13f5   :  { %v4585_v36 = vpop.f32.mrf.mxu0 }
0x13f6   :  { %4600 = vmatpush.msra.mxu1 %v4585_v36  ;;  %4629 = vmatpush.msrb.mxu2 %v4585_v36 }
0x13f8   :  { %4601 = vmatpush.msra.mxu1 %v4582_v61  ;;  %4630 = vmatpush.msrb.mxu2 %v4582_v61 }
0x13fa   :  { %4602 = vmatpush.msra.mxu1 %v4579_v53  ;;  %4631 = vmatpush.msrb.mxu2 %v4579_v53  ;;  %v5804_v53 = vld [vmem:[%s10359_s18 + $0x10] sm:$0xff] }
0x13fc   :  { %4603 = vmatpush.msra.mxu1 %v4576_v10  ;;  %4632 = vmatpush.msrb.mxu2 %v4576_v10  ;;  %v5096_v10 = vadd.f32 %v9968_v1, %v5077_v44 }
0x13fd   :  { %5705 = vmatmul.msk.f32.vlgmr.msra.gmra.mxu1 %vm1154_vm2, %v9785_v35  ;;  %5709 = vmatmul.msk.f32.vlgmr.msrb.gmra.mxu2 %vm1154_vm2, %v9780_v58  ;;  %v4936_v58 = vsel %vm4935_vm13, %v6138_v33, %v4932_v25  ;;  %v5097_v33 = vadd.f32 %v9968_v1, %v5078_v54 }
0x13fe   :  { %5171 = vmatpush.bf16.msra.mxu2 %v5805_v29  ;;  %v5111_v35 = vpack.c.bf16 %v5096_v10, %v5095_v55  ;;  %v5060_v61 = vmul.f32 %v4936_v58, %v9917_v57  ;;  %v5806_v55 = vld [vmem:[%s10361_s20 + $0x40] sm:$0xff] }
0x1400   :  { %v5079_v51 = vmul.f32 %v9958_v47, %v5060_v61 }
0x1402   :  { %5172 = vmatpush.bf16.msra.mxu2 %v5804_v53  ;;  %v5098_v40 = vadd.f32 %v9968_v1, %v5079_v51 }
0x1404   :  { %v5112_v56 = vpack.c.bf16 %v5098_v40, %v5097_v33 }
0x1405   :  { %5706 = vmatmul.msk.f32.gmra.mxu1 %vm1154_vm2, %v9806_v62  ;;  %5729 = vmatmul.msk.bf16.vlgmr.msra.gmra.mxu2 %vm1154_vm2, %v5111_v35 }
0x140d   :  { %5707 = vmatmul.msk.f32.gmra.mxu1 %vm1154_vm2, %v9817_v2  ;;  %v5812_v2 = vld [vmem:[%s10361_s20 + $0x70] sm:$0xff] }
0x140e   :  { %5437 = vmatpush.bf16.msra.mxu0 %v5812_v2 }
0x1415   :  { %5708 = vmatmul.msk.f32.gmra.mxu1 %vm1154_vm2, %v9824_v19  ;;  %5730 = vmatmul.msk.bf16.gmra.mxu2 %vm1154_vm2, %v5112_v56  ;;  %v5811_v19 = vld [vmem:[%s10361_s20 + $0x68] sm:$0xff] }
0x1416   :  { %5438 = vmatpush.bf16.msra.mxu0 %v5811_v19 }
0x141a   :  { %5439 = vmatpush.bf16.msra.mxu0 %v5810_v28 }
0x141e   :  { %5440 = vmatpush.bf16.msra.mxu0 %v5809_v52 }
0x1422   :  { %5441 = vmatpush.bf16.msra.mxu0 %v5808_v17 }
0x1426   :  { %5442 = vmatpush.bf16.msra.mxu0 %v5807_v50 }
0x142a   :  { %5443 = vmatpush.bf16.msra.mxu0 %v5806_v55 }
0x147a   :  { %v4605_v62 = vpop.f32.mrf.mxu1 }
0x1480   :  { %v10001_v57 = vpop.f32.mrf.mxu2 }
0x1482   :  { %v4608_v39 = vpop.f32.mrf.mxu1 }
0x1483   :  { %v4637_v11 = vpack.c.bf16 %v4608_v39, %v4605_v62 }
0x1488   :  { %v5174_v42 = vpop.f32.mrf.mxu2 }
0x1489   :  { %v5175_v14 = vadd.f32 %v10009_v21, %v5174_v42 }
0x148a   :  { %v4611_v36 = vpop.f32.mrf.mxu1 }
0x148b   :  { %v5230_v49 = vmul.f32 0.044715, %v5175_v14  ;;  %v5214_v28 = vmul.f32 0.5, %v5175_v14 }
0x148d   :  { %v5246_v37 = vmul.f32 %v5230_v49, %v5175_v14 }
0x148f   :  { %v5262_v60 = vmul.f32 %v5246_v37, %v5175_v14 }
0x1490   :  { %v5176_v48 = vpop.f32.mrf.mxu2 }
0x1491   :  { %v5278_v29 = vadd.f32 %v5262_v60, %v5175_v14  ;;  %v5177_v44 = vadd.f32 %v10009_v21, %v5176_v48 }
0x1492   :  { %v4614_v12 = vpop.f32.mrf.mxu1 }
0x1493   :  { %v5231_v9 = vmul.f32 0.044715, %v5177_v44  ;;  %v4638_v53 = vpack.c.bf16 %v4614_v12, %v4611_v36  ;;  %v5294_v10 = vmul.f32 0.7978846, %v5278_v29  ;;  %v5215_v42 = vmul.f32 0.5, %v5177_v44 }
0x1495   :  { %v5247_v25 = vmul.f32 %v5231_v9, %v5177_v44  ;;  %4678 = vmatpush.bf16.msrb.mxu3 %v4638_v53  ;;  %6141 = vtanh.f32 %v5294_v10 }
0x1497   :  { %v5263_v35 = vmul.f32 %v5247_v25, %v5177_v44 }
0x1498   :  { %v5179_v58 = vpop.f32.mrf.mxu2 }
0x1499   :  { %v5279_v18 = vadd.f32 %v5263_v35, %v5177_v44  ;;  %v5180_v61 = vadd.f32 %v10009_v21, %v5179_v58  ;;  %4679 = vmatpush.bf16.msrb.mxu3 %v4637_v11  ;;  %v4773_v58 = vmul.f32 %v9940_v45, %v11038_v43  ;;  %v4774_v45 = vmul.f32 %v9942_v46, %v11038_v43 }
0x149b   :  { %v5295_v41 = vmul.f32 0.7978846, %v5279_v18  ;;  %v5232_v51 = vmul.f32 0.044715, %v5180_v61  ;;  %v6142_v40 = vpop.eup %6141  ;;  %v5216_v14 = vmul.f32 0.5, %v5180_v61 }
0x149c   :  { %5710 = vmatmul.msk.bf16.vlgmr.msrb.gmra.mxu3 %vm1154_vm2, %v9714_v3  ;;  %v5326_v2 = vadd.f32 1.0, %v6142_v40 }
0x149d   :  { %6143 = vtanh.f32 %v5295_v41  ;;  %v5248_v54 = vmul.f32 %v5232_v51, %v5180_v61  ;;  %v10049_v41 = vsub.f32 %v9878_v34, %v4773_v58 }
0x149e   :  { %v5342_v37 = vmul.f32 %v5326_v2, %v5214_v28 }
0x149f   :  { %v5264_v33 = vmul.f32 %v5248_v54, %v5180_v61  ;;  %v4805_v54 = vmul.f32 %v10049_v41, %v10049_v41 }
0x14a0   :  { %v5181_v56 = vpop.f32.mrf.mxu2 }
0x14a1   :  { %v5182_v62 = vadd.f32 %v10009_v21, %v5181_v56  ;;  %v5280_v23 = vadd.f32 %v5264_v33, %v5180_v61  ;;  %v10069_v56 = vsub.f32 %v9884_v22, %v4774_v45 }
0x14a3   :  { %v6144_v39 = vpop.eup %6143  ;;  %v5233_v19 = vmul.f32 0.044715, %v5182_v62  ;;  %v5296_v49 = vmul.f32 0.7978846, %v5280_v23  ;;  %v5217_v44 = vmul.f32 0.5, %v5182_v62  ;;  %v4741_v23 = vpop.xlane.xlu1 %4740  ;;  %v4806_v28 = vmul.f32 %v10069_v56, %v10069_v56 }
0x14a4   :  { %v5327_v36 = vadd.f32 1.0, %v6144_v39 }
0x14a5   :  { %v5249_v52 = vmul.f32 %v5233_v19, %v5182_v62  ;;  %6145 = vtanh.f32 %v5296_v49  ;;  %v4832_v49 = vsel %vm1154_vm2, %v4806_v28, 0.0 }
0x14a6   :  { %v5343_v17 = vmul.f32 %v5327_v36, %v5215_v42 }
0x14a7   :  { %v5265_v60 = vmul.f32 %v5249_v52, %v5182_v62 }
0x14a8   :  { %v5358_v3 = vpack.c.bf16 %v5343_v17, %v5342_v37 }
0x14a9   :  { %v5281_v48 = vadd.f32 %v5265_v60, %v5182_v62  ;;  %v4829_v62 = vsel %vm1154_vm2, %v4805_v54, 0.0 }
0x14aa   :  { %5444 = vmatmul.bf16.vlgmr.msra.gmra.mxu0 %v5358_v3 }
0x14ab   :  { %v5297_v29 = vmul.f32 0.7978846, %v5281_v48  ;;  %v6146_v12 = vpop.eup %6145 }
0x14ac   :  { %5711 = vmatmul.msk.bf16.gmra.mxu3 %vm1154_vm2, %v9703_v6  ;;  %v5328_v50 = vadd.f32 1.0, %v6146_v12  ;;  %v4635_v6 = vadd.f32 %v9843_v4, %v10001_v57 }
0x14ad   :  { %6147 = vtanh.f32 %v5297_v29 }
0x14ae   :  { %v5344_v10 = vmul.f32 %v5328_v50, %v5216_v14  ;;  %v10040_v11 = vperm.slane %v4635_v6, 0 }
0x14b3   :  { %v6148_v9 = vpop.eup %6147 }
0x14b4   :  { %v5329_v53 = vadd.f32 1.0, %v6148_v9 }
0x14b6   :  { %v5345_v25 = vmul.f32 %v5329_v53, %v5217_v44 }
0x14b8   :  { %v5359_v55 = vpack.c.bf16 %v5345_v25, %v5344_v10 }
0x14ba   :  { %5449 = vmatmul.bf16.gmra.mxu0 %v5359_v55 }
0x14bc   :  { %5712 = vmatmul.msk.bf16.gmra.mxu3 %vm1154_vm2, %v9689_v8  ;;  %v10056_v8 = vld [vmem:[%s10362_s21 + $0x1] ss:$0 sm:$0xff] }
0x14cc   :  { %5713 = vmatmul.msk.bf16.gmra.mxu3 %vm1154_vm2, %v9679_v7 }
0x151f   :  { %v4681_v35 = vpop.f32.mrf.mxu3 }
0x1520   :  { %v4682_v18 = vadd.f32 %v4681_v35, %v10040_v11 }
0x1522   :  { %v10046_v61 = vadd.f32 %v4682_v18, %v9420_v20 }
0x1524   :  { %v4745_v7 = vsel %vm1154_vm2, %v10046_v61, 0.0 }
0x1525   :  { %4746 = vadd.xlane.f32.xlu0 %v4745_v7 }
0x1527   :  { %v4683_v4 = vpop.f32.mrf.mxu3  ;;  %v5445_v57 = vpop.f32.mrf.mxu0 }
0x1528   :  { %v4684_v20 = vadd.f32 %v4683_v4, %v10040_v11  ;;  %v5446_v51 = vadd.f32 %v10056_v8, %v5445_v57 }
0x152a   :  { %v10065_v40 = vadd.f32 %v4684_v20, %v9417_v31  ;;  %v5485_v33 = vadd.f32 %v5446_v51, %v9853_v32  ;;  %v4775_v32 = vmul.f32 %v4741_v23, %v11038_v43 }
0x152c   :  { %5501 = vst.msk [vmem:[%s10363_s22] sm:$0xff] %vm1154_vm2, %v5485_v33  ;;  %v4748_v46 = vsel %vm1154_vm2, %v10065_v40, 0.0  ;;  %v10088_v52 = vsub.f32 %v9924_v30, %v4775_v32 }
0x152d   :  { %4749 = vadd.xlane.f32.xlu2 %v4748_v46  ;;  %4830 = vadd.xlane.f32.xlu0 %v4829_v62 }
0x152e   :  { %v4807_v48 = vmul.f32 %v10088_v52, %v10088_v52 }
0x152f   :  { %v4686_v31 = vpop.f32.mrf.mxu3  ;;  %v5447_v2 = vpop.f32.mrf.mxu0 }
0x1530   :  { %v4687_v39 = vadd.f32 %v4686_v31, %v10040_v11  ;;  %v5448_v19 = vadd.f32 %v10056_v8, %v5447_v2  ;;  %v4835_v9 = vsel %vm1154_vm2, %v4807_v48, 0.0 }
0x1532   :  { %v10084_v42 = vadd.f32 %v4687_v39, %v9400_v24  ;;  %v5486_v36 = vadd.f32 %v5448_v19, %v9859_v15  ;;  %v4776_v15 = vmul.f32 %v9946_v13, %v11038_v43 }
0x1534   :  { %5502 = vst.msk [vmem:[%s10363_s22 + $0x8] sm:$0xff] %vm1154_vm2, %v5486_v36  ;;  %v4751_v37 = vsel %vm1154_vm2, %v10084_v42, 0.0  ;;  %v10108_v50 = vsub.f32 %v9898_v59, %v4776_v15 }
0x1535   :  { %4833 = vadd.xlane.f32.xlu2 %v4832_v49  ;;  %4752 = vadd.xlane.f32.xlu0 %v4751_v37 }
0x1536   :  { %v4808_v53 = vmul.f32 %v10108_v50, %v10108_v50 }
0x1537   :  { %v4688_v17 = vpop.f32.mrf.mxu3  ;;  %v5450_v24 = vpop.f32.mrf.mxu0 }
0x1538   :  { %v4689_v60 = vadd.f32 %v4688_v17, %v10040_v11  ;;  %v5451_v3 = vadd.f32 %v10056_v8, %v5450_v24  ;;  %v4838_v6 = vsel %vm1154_vm2, %v4808_v53, 0.0 }
0x153a   :  { %v10104_v29 = vadd.f32 %v4689_v60, %v9396_v5  ;;  %v5487_v12 = vadd.f32 %v5451_v3, %v9865_v38 }
0x153c   :  { %5503 = vst.msk [vmem:[%s10363_s22 + $0x10] sm:$0xff] %vm1154_vm2, %v5487_v12  ;;  %v4754_v13 = vsel %vm1154_vm2, %v10104_v29, 0.0 }
0x153d   :  { %4755 = vadd.xlane.f32.xlu2 %v4754_v13  ;;  %4836 = vadd.xlane.f32.xlu0 %v4835_v9 }
0x153f   :  { %v4691_v14 = vpop.f32.mrf.mxu3  ;;  %v5452_v5 = vpop.f32.mrf.mxu0 }
0x1540   :  { %v4692_v44 = vadd.f32 %v4691_v14, %v10040_v11  ;;  %v5453_v38 = vadd.f32 %v10056_v8, %v5452_v5 }
0x1542   :  { %v10122_v10 = vadd.f32 %v4692_v44, %v9384_v26  ;;  %v5488_v25 = vadd.f32 %v5453_v38, %v9872_v63 }
0x1544   :  { %5504 = vst.msk [vmem:[%s10363_s22 + $0x18] sm:$0xff] %vm1154_vm2, %v5488_v25  ;;  %v4757_v55 = vsel %vm1154_vm2, %v10122_v10, 0.0 }
0x1545   :  { %4758 = vadd.xlane.f32.xlu0 %v4757_v55  ;;  %4839 = vadd.xlane.f32.xlu2 %v4838_v6 }
0x1547   :  { %v4693_v35 = vpop.f32.mrf.mxu3 }
0x1548   :  { %v4694_v58 = vadd.f32 %v4693_v35, %v10040_v11 }
0x154a   :  { %v10134_v26 = vadd.f32 %v4694_v58, %v9380_v27 }
0x154c   :  { %v4760_v63 = vsel %vm1154_vm2, %v10134_v26, 0.0 }
0x154d   :  { %4761 = vadd.xlane.f32.xlu2 %v4760_v63 }
0x154f   :  { %v4696_v4 = vpop.f32.mrf.mxu3 }
0x1550   :  { %v4697_v20 = vadd.f32 %v4696_v4, %v10040_v11 }
0x1552   :  { %v10149_v62 = vadd.f32 %v4697_v20, %v9369_v0 }
0x1554   :  { %v4763_v19 = vsel %vm1154_vm2, %v10149_v62, 0.0 }
0x1557   :  { %v4698_v2 = vpop.f32.mrf.mxu3 }
0x1558   :  { %v4699_v39 = vadd.f32 %v4698_v2, %v10040_v11 }
0x155a   :  { %v10163_v24 = vadd.f32 %v4699_v39, %v9366_v16 }
0x155c   :  { %v4766_v13 = vsel %vm1154_vm2, %v10163_v24, 0.0 }
0x1598   :  { %v4747_v18 = vpop.xlane.xlu0 %4746 }
0x1599   :  { %v4777_v7 = vmul.f32 %v4747_v18, %v11038_v43 }
0x159b   :  { %v10140_v57 = vsub.f32 %v10046_v61, %v4777_v7 }
0x159d   :  { %v4809_v45 = vmul.f32 %v10140_v57, %v10140_v57 }
0x159f   :  { %v4841_v51 = vsel %vm1154_vm2, %v4809_v45, 0.0 }
0x15a0   :  { %4842 = vadd.xlane.f32.xlu0 %v4841_v51  ;;  %v4831_v27 = vpop.xlane.xlu0 %4830  ;;  %v4750_v54 = vpop.xlane.xlu2 %4749 }
0x15a1   :  { %v4869_v33 = vmul.f32 %v4831_v27, %v11038_v43  ;;  %v4778_v46 = vmul.f32 %v4750_v54, %v11038_v43 }
0x15a3   :  { %v4885_v23 = vadd.f32 1e-05, %v4869_v33  ;;  %v10152_v31 = vsub.f32 %v10065_v40, %v4778_v46 }
0x15a5   :  { %6149 = vrsqrt.f32 %v4885_v23  ;;  %v4810_v32 = vmul.f32 %v10152_v31, %v10152_v31  ;;  %vm4943_vm6 = vweird.f32 %v4885_v23 }
0x15a7   :  { %v4844_v28 = vsel %vm1154_vm2, %v4810_v32, 0.0 }
0x15a8   :  { %4764 = vadd.xlane.f32.xlu0 %v4763_v19  ;;  %v4753_v36 = vpop.xlane.xlu0 %4752  ;;  %4845 = vadd.xlane.f32.xlu2 %v4844_v28  ;;  %v4834_v0 = vpop.xlane.xlu2 %4833 }
0x15a9   :  { %v4779_v49 = vmul.f32 %v4753_v36, %v11038_v43  ;;  %v4870_v37 = vmul.f32 %v4834_v0, %v11038_v43 }
0x15ab   :  { %v6150_v17 = vpop.eup %6149  ;;  %v10166_v15 = vsub.f32 %v10084_v42, %v4779_v49  ;;  %v4886_v11 = vadd.f32 1e-05, %v4870_v37 }
0x15ac   :  { %v4938_v60 = vmul.f32 %v6150_v17, %v4885_v23  ;;  %vm4944_vm1 = vweird.f32 %v6150_v17 }
0x15ad   :  { %6151 = vrsqrt.f32 %v4886_v11  ;;  %v4811_v3 = vmul.f32 %v10166_v15, %v10166_v15  ;;  %vm4945_vm7 = vmor %vm4943_vm6, %vm4944_vm1  ;;  %vm4953_vm3 = vweird.f32 %v4886_v11 }
0x15ae   :  { %v4939_v48 = vmul.f32 %v6150_v17, %v4938_v60 }
0x15af   :  { %v4847_v12 = vsel %vm1154_vm2, %v4811_v3, 0.0 }
0x15b0   :  { %v4940_v9 = vmul.f32 0.5, %v4939_v48  ;;  %4848 = vadd.xlane.f32.xlu0 %v4847_v12  ;;  %v4837_v14 = vpop.xlane.xlu0 %4836  ;;  %4767 = vadd.xlane.f32.xlu2 %v4766_v13  ;;  %v4756_v16 = vpop.xlane.xlu2 %4755 }
0x15b1   :  { %v4871_v5 = vmul.f32 %v4837_v14, %v11038_v43  ;;  %v4780_v44 = vmul.f32 %v4756_v16, %v11038_v43 }
0x15b2   :  { %v4941_v38 = vsub.f32 1.5, %v4940_v9 }
0x15b3   :  { %v6152_v53 = vpop.eup %6151  ;;  %v4887_v25 = vadd.f32 1e-05, %v4871_v5  ;;  %v10176_v55 = vsub.f32 %v10104_v29, %v4780_v44 }
0x15b4   :  { %v4942_v6 = vmul.f32 %v6150_v17, %v4941_v38  ;;  %v4948_v35 = vmul.f32 %v6152_v53, %v4886_v11  ;;  %vm4954_vm15 = vweird.f32 %v6152_v53 }
0x15b5   :  { %6153 = vrsqrt.f32 %v4887_v25  ;;  %v4812_v58 = vmul.f32 %v10176_v55, %v10176_v55  ;;  %vm4955_vm4 = vmor %vm4953_vm3, %vm4954_vm15  ;;  %vm4963_vm8 = vweird.f32 %v4887_v25 }
0x15b6   :  { %v4949_v63 = vmul.f32 %v6152_v53, %v4948_v35  ;;  %v4946_v7 = vsel %vm4945_vm7, %v6150_v17, %v4942_v6 }
0x15b7   :  { %v4850_v18 = vsel %vm1154_vm2, %v4812_v58, 0.0  ;;  %v5061_v46 = vmul.f32 %v4946_v7, %v10049_v41 }
0x15b8   :  { %v4950_v4 = vmul.f32 0.5, %v4949_v63  ;;  %v4759_v45 = vpop.xlane.xlu0 %4758  ;;  %4851 = vadd.xlane.f32.xlu2 %v4850_v18  ;;  %v4840_v20 = vpop.xlane.xlu2 %4839 }
0x15b9   :  { %v4781_v51 = vmul.f32 %v4759_v45, %v11038_v43  ;;  %v4872_v27 = vmul.f32 %v4840_v20, %v11038_v43  ;;  %v5080_v41 = vmul.f32 %v9958_v47, %v5061_v46 }
0x15ba   :  { %v4951_v54 = vsub.f32 1.5, %v4950_v4 }
0x15bb   :  { %v6154_v33 = vpop.eup %6153  ;;  %v10185_v23 = vsub.f32 %v10122_v10, %v4781_v51  ;;  %v4888_v2 = vadd.f32 1e-05, %v4872_v27  ;;  %v5099_v13 = vadd.f32 %v9968_v1, %v5080_v41 }
0x15bc   :  { %v4952_v32 = vmul.f32 %v6152_v53, %v4951_v54  ;;  %v4958_v39 = vmul.f32 %v6154_v33, %v4887_v25  ;;  %vm4964_vm5 = vweird.f32 %v6154_v33 }
0x15bd   :  { %6155 = vrsqrt.f32 %v4888_v2  ;;  %v4813_v19 = vmul.f32 %v10185_v23, %v10185_v23  ;;  %vm4965_vm9 = vmor %vm4963_vm8, %vm4964_vm5  ;;  %vm4973_vm11 = vweird.f32 %v4888_v2 }
0x15be   :  { %v4956_v28 = vsel %vm4955_vm4, %v6152_v53, %v4952_v32  ;;  %v4959_v36 = vmul.f32 %v6154_v33, %v4958_v39 }
0x15bf   :  { %v5062_v0 = vmul.f32 %v4956_v28, %v10069_v56  ;;  %v4853_v49 = vsel %vm1154_vm2, %v4813_v19, 0.0 }
0x15c0   :  { %v4960_v37 = vmul.f32 0.5, %v4959_v36  ;;  %4854 = vadd.xlane.f32.xlu0 %v4853_v49  ;;  %v4762_v17 = vpop.xlane.xlu2 %4761 }
0x15c1   :  { %v4782_v60 = vmul.f32 %v4762_v17, %v11038_v43  ;;  %v5081_v11 = vmul.f32 %v9958_v47, %v5062_v0 }
0x15c2   :  { %v4961_v3 = vsub.f32 1.5, %v4960_v37 }
0x15c3   :  { %v6156_v48 = vpop.eup %6155  ;;  %v10195_v12 = vsub.f32 %v10134_v26, %v4782_v60  ;;  %v5100_v56 = vadd.f32 %v9968_v1, %v5081_v11 }
0x15c4   :  { %v4962_v9 = vmul.f32 %v6154_v33, %v4961_v3  ;;  %v4968_v14 = vmul.f32 %v6156_v48, %v4888_v2  ;;  %vm4974_vm10 = vweird.f32 %v6156_v48 }
0x15c5   :  { %v5113_v16 = vpack.c.bf16 %v5100_v56, %v5099_v13  ;;  %v4814_v5 = vmul.f32 %v10195_v12, %v10195_v12  ;;  %vm4975_vm12 = vmor %vm4973_vm11, %vm4974_vm10 }
0x15c6   :  { %v4969_v44 = vmul.f32 %v6156_v48, %v4968_v14  ;;  %v4966_v53 = vsel %vm4965_vm9, %v6154_v33, %v4962_v9 }
0x15c7   :  { %5731 = vmatmul.msk.bf16.gmra.mxu2 %vm1154_vm2, %v5113_v16  ;;  %v4856_v38 = vsel %vm1154_vm2, %v4814_v5, 0.0  ;;  %v5063_v58 = vmul.f32 %v4966_v53, %v10088_v52 }
0x15c8   :  { %v4970_v6 = vmul.f32 0.5, %v4969_v44  ;;  %4857 = vadd.xlane.f32.xlu2 %v4856_v38 }
0x15c9   :  { %v5082_v25 = vmul.f32 %v9958_v47, %v5063_v58 }
0x15ca   :  { %v4971_v35 = vsub.f32 1.5, %v4970_v6 }
0x15cb   :  { %v5101_v45 = vadd.f32 %v9968_v1, %v5082_v25 }
0x15cc   :  { %v4972_v63 = vmul.f32 %v6156_v48, %v4971_v35 }
0x15ce   :  { %v4976_v18 = vsel %vm4975_vm12, %v6156_v48, %v4972_v63 }
0x15cf   :  { %v5064_v7 = vmul.f32 %v4976_v18, %v10108_v50 }
0x15d1   :  { %v5083_v4 = vmul.f32 %v9958_v47, %v5064_v7 }
0x15d3   :  { %v5102_v20 = vadd.f32 %v9968_v1, %v5083_v4 }
0x15d5   :  { %v5114_v51 = vpack.c.bf16 %v5102_v20, %v5101_v45 }
0x15d7   :  { %5732 = vmatmul.msk.bf16.gmra.mxu2 %vm1154_vm2, %v5114_v51 }
0x1613   :  { %v4843_v27 = vpop.xlane.xlu0 %4842 }
0x1614   :  { %v4873_v52 = vmul.f32 %v4843_v27, %v11038_v43 }
0x1616   :  { %v4889_v54 = vadd.f32 1e-05, %v4873_v52 }
0x1618   :  { %6157 = vrsqrt.f32 %v4889_v54  ;;  %vm4983_vm14 = vweird.f32 %v4889_v54 }
0x161b   :  { %v4765_v33 = vpop.xlane.xlu0 %4764  ;;  %v4846_v46 = vpop.xlane.xlu2 %4845 }
0x161c   :  { %v4783_v50 = vmul.f32 %v4765_v33, %v11038_v43  ;;  %v4874_v2 = vmul.f32 %v4846_v46, %v11038_v43 }
0x161e   :  { %v6158_v32 = vpop.eup %6157  ;;  %v10214_v39 = vsub.f32 %v10149_v62, %v4783_v50  ;;  %v4890_v19 = vadd.f32 1e-05, %v4874_v2 }
0x161f   :  { %v4978_v28 = vmul.f32 %v6158_v32, %v4889_v54  ;;  %vm4984_vm13 = vweird.f32 %v6158_v32 }
0x1620   :  { %6159 = vrsqrt.f32 %v4890_v19  ;;  %v4815_v36 = vmul.f32 %v10214_v39, %v10214_v39  ;;  %vm4985_vm0 = vmor %vm4983_vm14, %vm4984_vm13  ;;  %vm4993_vm6 = vweird.f32 %v4890_v19 }
0x1621   :  { %v4979_v0 = vmul.f32 %v6158_v32, %v4978_v28 }
0x1622   :  { %v4859_v49 = vsel %vm1154_vm2, %v4815_v36, 0.0 }
0x1623   :  { %v4980_v41 = vmul.f32 0.5, %v4979_v0  ;;  %4860 = vadd.xlane.f32.xlu0 %v4859_v49  ;;  %v4849_v37 = vpop.xlane.xlu0 %4848  ;;  %v4768_v17 = vpop.xlane.xlu2 %4767 }
0x1624   :  { %v4875_v60 = vmul.f32 %v4849_v37, %v11038_v43  ;;  %v4784_v11 = vmul.f32 %v4768_v17, %v11038_v43 }
0x1625   :  { %v4981_v3 = vsub.f32 1.5, %v4980_v41 }
0x1626   :  { %v6160_v48 = vpop.eup %6159  ;;  %v4891_v13 = vadd.f32 1e-05, %v4875_v60  ;;  %v10222_v56 = vsub.f32 %v10163_v24, %v4784_v11 }
0x1627   :  { %v4982_v9 = vmul.f32 %v6158_v32, %v4981_v3  ;;  %v4988_v14 = vmul.f32 %v6160_v48, %v4890_v19  ;;  %vm4994_vm1 = vweird.f32 %v6160_v48 }
0x1628   :  { %6161 = vrsqrt.f32 %v4891_v13  ;;  %v4816_v16 = vmul.f32 %v10222_v56, %v10222_v56  ;;  %vm4995_vm7 = vmor %vm4993_vm6, %vm4994_vm1  ;;  %vm5003_vm3 = vweird.f32 %v4891_v13 }
0x1629   :  { %v4989_v5 = vmul.f32 %v6160_v48, %v4988_v14  ;;  %v4986_v38 = vsel %vm4985_vm0, %v6158_v32, %v4982_v9 }
0x162a   :  { %v4862_v44 = vsel %vm1154_vm2, %v4816_v16, 0.0  ;;  %v5065_v18 = vmul.f32 %v4986_v38, %v10140_v57 }
0x162b   :  { %v4990_v53 = vmul.f32 0.5, %v4989_v5  ;;  %4863 = vadd.xlane.f32.xlu2 %v4862_v44  ;;  %v4852_v6 = vpop.xlane.xlu2 %4851 }
0x162c   :  { %v4876_v35 = vmul.f32 %v4852_v6, %v11038_v43  ;;  %v5084_v27 = vmul.f32 %v9958_v47, %v5065_v18 }
0x162d   :  { %v4991_v58 = vsub.f32 1.5, %v4990_v53 }
0x162e   :  { %v6162_v63 = vpop.eup %6161  ;;  %v4892_v7 = vadd.f32 1e-05, %v4876_v35  ;;  %v5103_v32 = vadd.f32 %v9968_v1, %v5084_v27 }
0x162f   :  { %v4992_v25 = vmul.f32 %v6160_v48, %v4991_v58  ;;  %v4998_v4 = vmul.f32 %v6162_v63, %v4891_v13  ;;  %vm5004_vm15 = vweird.f32 %v6162_v63 }
0x1630   :  { %6163 = vrsqrt.f32 %v4892_v7  ;;  %vm5005_vm4 = vmor %vm5003_vm3, %vm5004_vm15  ;;  %vm5013_vm8 = vweird.f32 %v4892_v7 }
0x1631   :  { %v4996_v45 = vsel %vm4995_vm7, %v6160_v48, %v4992_v25  ;;  %v4999_v20 = vmul.f32 %v6162_v63, %v4998_v4 }
0x1632   :  { %v5066_v51 = vmul.f32 %v4996_v45, %v10152_v31 }
0x1633   :  { %v5000_v52 = vmul.f32 0.5, %v4999_v20  ;;  %v4855_v54 = vpop.xlane.xlu0 %4854 }
0x1634   :  { %v4877_v33 = vmul.f32 %v4855_v54, %v11038_v43  ;;  %v5085_v46 = vmul.f32 %v9958_v47, %v5066_v51 }
0x1635   :  { %v5001_v50 = vsub.f32 1.5, %v5000_v52 }
0x1636   :  { %v6164_v57 = vpop.eup %6163  ;;  %v4893_v2 = vadd.f32 1e-05, %v4877_v33  ;;  %v5104_v19 = vadd.f32 %v9968_v1, %v5085_v46 }
0x1637   :  { %v5002_v28 = vmul.f32 %v6162_v63, %v5001_v50  ;;  %v5008_v36 = vmul.f32 %v6164_v57, %v4892_v7  ;;  %vm5014_vm5 = vweird.f32 %v6164_v57 }
0x1638   :  { %6165 = vrsqrt.f32 %v4893_v2  ;;  %v5115_v31 = vpack.c.bf16 %v5104_v19, %v5103_v32  ;;  %vm5015_vm9 = vmor %vm5013_vm8, %vm5014_vm5  ;;  %vm5023_vm11 = vweird.f32 %v4893_v2 }
0x1639   :  { %v5009_v0 = vmul.f32 %v6164_v57, %v5008_v36  ;;  %v5006_v49 = vsel %vm5005_vm4, %v6162_v63, %v5002_v28 }
0x163a   :  { %5733 = vmatmul.msk.bf16.gmra.mxu2 %vm1154_vm2, %v5115_v31  ;;  %v5067_v3 = vmul.f32 %v5006_v49, %v10166_v15 }
0x163b   :  { %v5010_v41 = vmul.f32 0.5, %v5009_v0  ;;  %v4858_v37 = vpop.xlane.xlu2 %4857 }
0x163c   :  { %v4878_v17 = vmul.f32 %v4858_v37, %v11038_v43  ;;  %v5086_v44 = vmul.f32 %v9958_v47, %v5067_v3 }
0x163d   :  { %v5011_v60 = vsub.f32 1.5, %v5010_v41 }
0x163e   :  { %v6166_v11 = vpop.eup %6165  ;;  %v4894_v48 = vadd.f32 1e-05, %v4878_v17  ;;  %v5105_v58 = vadd.f32 %v9968_v1, %v5086_v44 }
0x163f   :  { %v5012_v9 = vmul.f32 %v6164_v57, %v5011_v60  ;;  %v5018_v14 = vmul.f32 %v6166_v11, %v4893_v2  ;;  %vm5024_vm10 = vweird.f32 %v6166_v11 }
0x1640   :  { %6167 = vrsqrt.f32 %v4894_v48  ;;  %vm5025_vm12 = vmor %vm5023_vm11, %vm5024_vm10  ;;  %vm5033_vm14 = vweird.f32 %v4894_v48 }
0x1641   :  { %v5016_v13 = vsel %vm5015_vm9, %v6164_v57, %v5012_v9  ;;  %v5019_v16 = vmul.f32 %v6166_v11, %v5018_v14 }
0x1642   :  { %v5068_v5 = vmul.f32 %v5016_v13, %v10176_v55 }
0x1643   :  { %v5020_v38 = vmul.f32 0.5, %v5019_v16 }
0x1644   :  { %v5087_v53 = vmul.f32 %v9958_v47, %v5068_v5 }
0x1645   :  { %v5021_v6 = vsub.f32 1.5, %v5020_v38 }
0x1646   :  { %v6168_v35 = vpop.eup %6167  ;;  %v5106_v15 = vadd.f32 %v9968_v1, %v5087_v53 }
0x1647   :  { %v5022_v63 = vmul.f32 %v6166_v11, %v5021_v6  ;;  %v5028_v18 = vmul.f32 %v6168_v35, %v4894_v48  ;;  %vm5034_vm13 = vweird.f32 %v6168_v35 }
0x1648   :  { %v5116_v7 = vpack.c.bf16 %v5106_v15, %v5105_v58  ;;  %vm5035_vm0 = vmor %vm5033_vm14, %vm5034_vm13 }
0x1649   :  { %v5029_v25 = vmul.f32 %v6168_v35, %v5028_v18  ;;  %v5026_v55 = vsel %vm5025_vm12, %v6166_v11, %v5022_v63 }
0x164a   :  { %v5184_v4 = vpop.f32.mrf.mxu2  ;;  %5734 = vmatmul.msk.bf16.gmra.mxu2 %vm1154_vm2, %v5116_v7  ;;  %v5069_v52 = vmul.f32 %v5026_v55, %v10185_v23 }
0x164b   :  { %v5030_v45 = vmul.f32 0.5, %v5029_v25  ;;  %v5185_v20 = vadd.f32 %v10009_v21, %v5184_v4 }
0x164c   :  { %v5088_v32 = vmul.f32 %v9958_v47, %v5069_v52 }
0x164d   :  { %v5031_v51 = vsub.f32 1.5, %v5030_v45  ;;  %v5234_v27 = vmul.f32 0.044715, %v5185_v20  ;;  %v5218_v6 = vmul.f32 0.5, %v5185_v20 }
0x164e   :  { %v5107_v0 = vadd.f32 %v9968_v1, %v5088_v32 }
0x164f   :  { %v5032_v54 = vmul.f32 %v6168_v35, %v5031_v51  ;;  %v5250_v33 = vmul.f32 %v5234_v27, %v5185_v20 }
0x1651   :  { %v5036_v46 = vsel %vm5035_vm0, %v6168_v35, %v5032_v54  ;;  %v5266_v50 = vmul.f32 %v5250_v33, %v5185_v20 }
0x1652   :  { %v5070_v57 = vmul.f32 %v5036_v46, %v10195_v12  ;;  %v5186_v2 = vpop.f32.mrf.mxu2 }
0x1653   :  { %v5187_v19 = vadd.f32 %v10009_v21, %v5186_v2  ;;  %v5282_v28 = vadd.f32 %v5266_v50, %v5185_v20 }
0x1654   :  { %v5089_v36 = vmul.f32 %v9958_v47, %v5070_v57 }
0x1655   :  { %v5235_v31 = vmul.f32 0.044715, %v5187_v19  ;;  %v5298_v41 = vmul.f32 0.7978846, %v5282_v28  ;;  %v5219_v35 = vmul.f32 0.5, %v5187_v19 }
0x1656   :  { %v5108_v23 = vadd.f32 %v9968_v1, %v5089_v36 }
0x1657   :  { %v5251_v49 = vmul.f32 %v5235_v31, %v5187_v19  ;;  %6169 = vtanh.f32 %v5298_v41 }
0x1658   :  { %v5117_v37 = vpack.c.bf16 %v5108_v23, %v5107_v0 }
0x1659   :  { %v5267_v17 = vmul.f32 %v5251_v49, %v5187_v19 }
0x165a   :  { %v5189_v60 = vpop.f32.mrf.mxu2  ;;  %5735 = vmatmul.msk.bf16.gmra.mxu2 %vm1154_vm2, %v5117_v37 }
0x165b   :  { %v5190_v12 = vadd.f32 %v10009_v21, %v5189_v60  ;;  %v5283_v11 = vadd.f32 %v5267_v17, %v5187_v19 }
0x165d   :  { %v5236_v3 = vmul.f32 0.044715, %v5190_v12  ;;  %v5299_v48 = vmul.f32 0.7978846, %v5283_v11  ;;  %v6170_v47 = vpop.eup %6169  ;;  %v5220_v54 = vmul.f32 0.5, %v5190_v12 }
0x165e   :  { %v5330_v44 = vadd.f32 1.0, %v6170_v47 }
0x165f   :  { %v5252_v9 = vmul.f32 %v5236_v3, %v5190_v12  ;;  %6171 = vtanh.f32 %v5299_v48 }
0x1660   :  { %v5346_v18 = vmul.f32 %v5330_v44, %v5218_v6 }
0x1661   :  { %v5268_v14 = vmul.f32 %v5252_v9, %v5190_v12 }
0x1662   :  { %v5191_v13 = vpop.f32.mrf.mxu2 }
0x1663   :  { %v5192_v16 = vadd.f32 %v10009_v21, %v5191_v13  ;;  %v5284_v5 = vadd.f32 %v5268_v14, %v5190_v12 }
0x1665   :  { %v6172_v38 = vpop.eup %6171  ;;  %v5237_v53 = vmul.f32 0.044715, %v5192_v16  ;;  %v5300_v63 = vmul.f32 0.7978846, %v5284_v5  ;;  %v5221_v33 = vmul.f32 0.5, %v5192_v16 }
0x1666   :  { %v5331_v58 = vadd.f32 1.0, %v6172_v38 }
0x1667   :  { %v5253_v15 = vmul.f32 %v5237_v53, %v5192_v16  ;;  %6173 = vtanh.f32 %v5300_v63 }
0x1668   :  { %v5347_v7 = vmul.f32 %v5331_v58, %v5219_v35 }
0x1669   :  { %v5269_v25 = vmul.f32 %v5253_v15, %v5192_v16 }
0x166a   :  { %v5360_v4 = vpack.c.bf16 %v5347_v7, %v5346_v18 }
0x166b   :  { %v5285_v55 = vadd.f32 %v5269_v25, %v5192_v16  ;;  %v6219_v16 = vld [vmem:[%s10357_s16 + $0x1] ss:$0 sm:$0xff] }
0x166c   :  { %5454 = vmatmul.bf16.gmra.mxu0 %v5360_v4 }
0x166d   :  { %v5301_v45 = vmul.f32 0.7978846, %v5285_v55  ;;  %v6174_v51 = vpop.eup %6173 }
0x166e   :  { %v5332_v27 = vadd.f32 1.0, %v6174_v51 }
0x166f   :  { %6175 = vtanh.f32 %v5301_v45 }
0x1670   :  { %v5348_v20 = vmul.f32 %v5332_v27, %v5220_v54 }
0x1675   :  { %v6176_v52 = vpop.eup %6175 }
0x1676   :  { %v5333_v46 = vadd.f32 1.0, %v6176_v52 }
0x1678   :  { %v5349_v50 = vmul.f32 %v5333_v46, %v5221_v33 }
0x167a   :  { %v5361_v57 = vpack.c.bf16 %v5349_v50, %v5348_v20 }
0x167c   :  { %5459 = vmatmul.bf16.gmra.mxu0 %v5361_v57 }
0x1696   :  { %v4861_v2 = vpop.xlane.xlu0 %4860 }
0x1697   :  { %v4879_v32 = vmul.f32 %v4861_v2, %v11038_v43 }
0x1699   :  { %v4895_v19 = vadd.f32 1e-05, %v4879_v32 }
0x169b   :  { %6177 = vrsqrt.f32 %v4895_v19  ;;  %vm5043_vm6 = vweird.f32 %v4895_v19 }
0x169e   :  { %v4864_v28 = vpop.xlane.xlu2 %4863 }
0x169f   :  { %v4880_v36 = vmul.f32 %v4864_v28, %v11038_v43 }
0x16a1   :  { %v6178_v31 = vpop.eup %6177  ;;  %v4896_v0 = vadd.f32 1e-05, %v4880_v36 }
0x16a2   :  { %v5038_v23 = vmul.f32 %v6178_v31, %v4895_v19  ;;  %vm5044_vm1 = vweird.f32 %v6178_v31 }
0x16a3   :  { %6179 = vrsqrt.f32 %v4896_v0  ;;  %vm5045_vm7 = vmor %vm5043_vm6, %vm5044_vm1  ;;  %vm5053_vm3 = vweird.f32 %v4896_v0 }
0x16a4   :  { %v5039_v49 = vmul.f32 %v6178_v31, %v5038_v23 }
0x16a6   :  { %v5040_v41 = vmul.f32 0.5, %v5039_v49 }
0x16a8   :  { %v5041_v37 = vsub.f32 1.5, %v5040_v41 }
0x16a9   :  { %v6180_v17 = vpop.eup %6179 }
0x16aa   :  { %v5042_v60 = vmul.f32 %v6178_v31, %v5041_v37  ;;  %v5048_v12 = vmul.f32 %v6180_v17, %v4896_v0  ;;  %vm5054_vm15 = vweird.f32 %v6180_v17 }
0x16ab   :  { %vm5055_vm4 = vmor %vm5053_vm3, %vm5054_vm15 }
0x16ac   :  { %v5049_v11 = vmul.f32 %v6180_v17, %v5048_v12  ;;  %v5046_v3 = vsel %vm5045_vm7, %v6178_v31, %v5042_v60 }
0x16ad   :  { %v5071_v43 = vmul.f32 %v5046_v3, %v10214_v39 }
0x16ae   :  { %v5050_v48 = vmul.f32 0.5, %v5049_v11 }
0x16af   :  { %v5090_v5 = vmul.f32 %v6219_v16, %v5071_v43 }
0x16b0   :  { %v5051_v9 = vsub.f32 1.5, %v5050_v48 }
0x16b1   :  { %v5109_v38 = vadd.f32 %v9968_v1, %v5090_v5 }
0x16b2   :  { %v5052_v47 = vmul.f32 %v6180_v17, %v5051_v9 }
0x16b4   :  { %v5056_v14 = vsel %vm5055_vm4, %v6180_v17, %v5052_v47 }
0x16b5   :  { %v5072_v13 = vmul.f32 %v5056_v14, %v10222_v56 }
0x16b7   :  { %v5091_v44 = vmul.f32 %v6219_v16, %v5072_v13  ;;  %v6220_v16 = vld [vmem:[%s10360_s19 + $0x1] ss:$0 sm:$0xff] }
0x16b9   :  { %v5110_v53 = vadd.f32 %v9968_v1, %v5091_v44 }
0x16bb   :  { %v5118_v6 = vpack.c.bf16 %v5110_v53, %v5109_v38 }
0x16bd   :  { %v5194_v35 = vpop.f32.mrf.mxu2  ;;  %5736 = vmatmul.msk.bf16.gmra.mxu2 %vm1154_vm2, %v5118_v6 }
0x16be   :  { %v5195_v39 = vadd.f32 %v10009_v21, %v5194_v35 }
0x16c0   :  { %v5238_v58 = vmul.f32 0.044715, %v5195_v39  ;;  %v5222_v36 = vmul.f32 0.5, %v5195_v39 }
0x16c2   :  { %v5254_v15 = vmul.f32 %v5238_v58, %v5195_v39 }
0x16c4   :  { %v5270_v63 = vmul.f32 %v5254_v15, %v5195_v39 }
0x16c5   :  { %v5196_v56 = vpop.f32.mrf.mxu2 }
0x16c6   :  { %v5197_v18 = vadd.f32 %v10009_v21, %v5196_v56  ;;  %v5286_v7 = vadd.f32 %v5270_v63, %v5195_v39 }
0x16c8   :  { %v5239_v25 = vmul.f32 0.044715, %v5197_v18  ;;  %v5302_v55 = vmul.f32 0.7978846, %v5286_v7  ;;  %v5223_v31 = vmul.f32 0.5, %v5197_v18 }
0x16ca   :  { %v5255_v4 = vmul.f32 %v5239_v25, %v5197_v18  ;;  %6181 = vtanh.f32 %v5302_v55 }
0x16cc   :  { %v5271_v45 = vmul.f32 %v5255_v4, %v5197_v18 }
0x16cd   :  { %v5199_v51 = vpop.f32.mrf.mxu2 }
0x16ce   :  { %v5200_v1 = vadd.f32 %v10009_v21, %v5199_v51  ;;  %v5287_v27 = vadd.f32 %v5271_v45, %v5197_v18 }
0x16d0   :  { %v5240_v52 = vmul.f32 0.044715, %v5200_v1  ;;  %v5303_v54 = vmul.f32 0.7978846, %v5287_v27  ;;  %v6182_v46 = vpop.eup %6181  ;;  %v5224_v35 = vmul.f32 0.5, %v5200_v1 }
0x16d1   :  { %v5334_v32 = vadd.f32 1.0, %v6182_v46 }
0x16d2   :  { %v5256_v33 = vmul.f32 %v5240_v52, %v5200_v1  ;;  %6183 = vtanh.f32 %v5303_v54 }
0x16d3   :  { %v5350_v41 = vmul.f32 %v5334_v32, %v5222_v36 }
0x16d4   :  { %v5272_v20 = vmul.f32 %v5256_v33, %v5200_v1 }
0x16d5   :  { %v5201_v50 = vpop.f32.mrf.mxu2 }
0x16d6   :  { %v5202_v57 = vadd.f32 %v10009_v21, %v5201_v50  ;;  %v5288_v2 = vadd.f32 %v5272_v20, %v5200_v1 }
0x16d8   :  { %v6184_v19 = vpop.eup %6183  ;;  %v5241_v28 = vmul.f32 0.044715, %v5202_v57  ;;  %v5304_v49 = vmul.f32 0.7978846, %v5288_v2  ;;  %v5225_v39 = vmul.f32 0.5, %v5202_v57 }
0x16d9   :  { %v5335_v0 = vadd.f32 1.0, %v6184_v19 }
0x16da   :  { %v5257_v23 = vmul.f32 %v5241_v28, %v5202_v57  ;;  %6185 = vtanh.f32 %v5304_v49 }
0x16db   :  { %v5351_v37 = vmul.f32 %v5335_v0, %v5223_v31 }
0x16dc   :  { %v5273_v17 = vmul.f32 %v5257_v23, %v5202_v57 }
0x16dd   :  { %v5204_v60 = vpop.f32.mrf.mxu2  ;;  %v5362_v12 = vpack.c.bf16 %v5351_v37, %v5350_v41 }
0x16de   :  { %v5205_v11 = vadd.f32 %v10009_v21, %v5204_v60  ;;  %v5289_v3 = vadd.f32 %v5273_v17, %v5202_v57 }
0x16df   :  { %5464 = vmatmul.bf16.gmra.mxu0 %v5362_v12 }
0x16e0   :  { %v5242_v48 = vmul.f32 0.044715, %v5205_v11  ;;  %v5305_v9 = vmul.f32 0.7978846, %v5289_v3  ;;  %v6186_v47 = vpop.eup %6185  ;;  %v5226_v20 = vmul.f32 0.5, %v5205_v11 }
0x16e1   :  { %v5336_v38 = vadd.f32 1.0, %v6186_v47 }
0x16e2   :  { %v5258_v43 = vmul.f32 %v5242_v48, %v5205_v11  ;;  %6187 = vtanh.f32 %v5305_v9 }
0x16e3   :  { %v5352_v18 = vmul.f32 %v5336_v38, %v5224_v35 }
0x16e4   :  { %v5274_v14 = vmul.f32 %v5258_v43, %v5205_v11 }
0x16e5   :  { %v5206_v13 = vpop.f32.mrf.mxu2 }
0x16e6   :  { %v5207_v5 = vadd.f32 %v6220_v16, %v5206_v13  ;;  %v5290_v44 = vadd.f32 %v5274_v14, %v5205_v11 }
0x16e8   :  { %v6188_v53 = vpop.eup %6187  ;;  %v5243_v6 = vmul.f32 0.044715, %v5207_v5  ;;  %v5306_v56 = vmul.f32 0.7978846, %v5290_v44  ;;  %v5227_v50 = vmul.f32 0.5, %v5207_v5 }
0x16e9   :  { %v5455_v21 = vpop.f32.mrf.mxu0  ;;  %v5337_v58 = vadd.f32 1.0, %v6188_v53 }
0x16ea   :  { %v5259_v15 = vmul.f32 %v5243_v6, %v5207_v5  ;;  %v5456_v63 = vadd.f32 %v10056_v8, %v5455_v21  ;;  %6189 = vtanh.f32 %v5306_v56 }
0x16eb   :  { %v5353_v7 = vmul.f32 %v5337_v58, %v5225_v39 }
0x16ec   :  { %v5489_v25 = vadd.f32 %v5456_v63, %v9878_v34  ;;  %v5275_v4 = vmul.f32 %v5259_v15, %v5207_v5  ;;  %v6221_v15 = vld [vmem:[%s10362_s21 + $0x1] ss:$0 sm:$0xff] }
0x16ed   :  { %v5363_v55 = vpack.c.bf16 %v5353_v7, %v5352_v18 }
0x16ee   :  { %5505 = vst.msk [vmem:[%s10363_s22 + $0x20] sm:$0xff] %vm1154_vm2, %v5489_v25  ;;  %v5291_v45 = vadd.f32 %v5275_v4, %v5207_v5 }
0x16ef   :  { %5469 = vmatmul.bf16.gmra.mxu0 %v5363_v55 }
0x16f0   :  { %v5307_v51 = vmul.f32 0.7978846, %v5291_v45  ;;  %v6190_v52 = vpop.eup %6189 }
0x16f1   :  { %v5457_v1 = vpop.f32.mrf.mxu0  ;;  %v5338_v34 = vadd.f32 1.0, %v6190_v52 }
0x16f2   :  { %v5458_v27 = vadd.f32 %v10056_v8, %v5457_v1  ;;  %6191 = vtanh.f32 %v5307_v51 }
0x16f3   :  { %v5354_v32 = vmul.f32 %v5338_v34, %v5226_v20 }
0x16f4   :  { %v5490_v54 = vadd.f32 %v5458_v27, %v9884_v22 }
0x16f6   :  { %5506 = vst.msk [vmem:[%s10363_s22 + $0x28] sm:$0xff] %vm1154_vm2, %v5490_v54 }
0x16f8   :  { %v6192_v33 = vpop.eup %6191 }
0x16f9   :  { %v5460_v46 = vpop.f32.mrf.mxu0  ;;  %v5339_v57 = vadd.f32 1.0, %v6192_v33 }
0x16fa   :  { %v5461_v2 = vadd.f32 %v10056_v8, %v5460_v46 }
0x16fb   :  { %v5355_v19 = vmul.f32 %v5339_v57, %v5227_v50 }
0x16fc   :  { %v5491_v28 = vadd.f32 %v5461_v2, %v9924_v30 }
0x16fd   :  { %v5364_v36 = vpack.c.bf16 %v5355_v19, %v5354_v32 }
0x16fe   :  { %5507 = vst.msk [vmem:[%s10363_s22 + $0x30] sm:$0xff] %vm1154_vm2, %v5491_v28 }
0x16ff   :  { %5474 = vmatmul.bf16.gmra.mxu0 %v5364_v36 }
0x1701   :  { %v5462_v22 = vpop.f32.mrf.mxu0 }
0x1702   :  { %v5463_v31 = vadd.f32 %v10056_v8, %v5462_v22 }
0x1704   :  { %v5492_v0 = vadd.f32 %v5463_v31, %v9898_v59 }
0x1706   :  { %5508 = vst.msk [vmem:[%s10363_s22 + $0x38] sm:$0xff] %vm1154_vm2, %v5492_v0 }
0x1740   :  { %v5209_v23 = vpop.f32.mrf.mxu2 }
0x1741   :  { %v5210_v49 = vadd.f32 %v6220_v16, %v5209_v23 }
0x1743   :  { %v5244_v30 = vmul.f32 0.044715, %v5210_v49  ;;  %v5228_v44 = vmul.f32 0.5, %v5210_v49 }
0x1745   :  { %v5260_v41 = vmul.f32 %v5244_v30, %v5210_v49 }
0x1747   :  { %v5276_v37 = vmul.f32 %v5260_v41, %v5210_v49 }
0x1748   :  { %v5211_v17 = vpop.f32.mrf.mxu2 }
0x1749   :  { %v5212_v60 = vadd.f32 %v6220_v16, %v5211_v17  ;;  %v5292_v12 = vadd.f32 %v5276_v37, %v5210_v49 }
0x174b   :  { %v5245_v11 = vmul.f32 0.044715, %v5212_v60  ;;  %v5308_v48 = vmul.f32 0.7978846, %v5292_v12  ;;  %v5229_v38 = vmul.f32 0.5, %v5212_v60 }
0x174d   :  { %v5261_v3 = vmul.f32 %v5245_v11, %v5212_v60  ;;  %6193 = vtanh.f32 %v5308_v48 }
0x174f   :  { %v5277_v9 = vmul.f32 %v5261_v3, %v5212_v60 }
0x1751   :  { %v5293_v43 = vadd.f32 %v5277_v9, %v5212_v60 }
0x1753   :  { %v5309_v59 = vmul.f32 0.7978846, %v5293_v43  ;;  %v6194_v47 = vpop.eup %6193 }
0x1754   :  { %v5340_v14 = vadd.f32 1.0, %v6194_v47 }
0x1755   :  { %6195 = vtanh.f32 %v5309_v59 }
0x1756   :  { %v5356_v21 = vmul.f32 %v5340_v14, %v5228_v44 }
0x175b   :  { %v6196_v13 = vpop.eup %6195 }
0x175c   :  { %v5465_v5 = vpop.f32.mrf.mxu0  ;;  %v5341_v53 = vadd.f32 1.0, %v6196_v13 }
0x175d   :  { %v5466_v6 = vadd.f32 %v10056_v8, %v5465_v5 }
0x175e   :  { %v5357_v16 = vmul.f32 %v5341_v53, %v5229_v38 }
0x175f   :  { %v5493_v35 = vadd.f32 %v5466_v6, %v10046_v61 }
0x1760   :  { %v5365_v39 = vpack.c.bf16 %v5357_v16, %v5356_v21 }
0x1761   :  { %5509 = vst.msk [vmem:[%s10363_s22 + $0x40] sm:$0xff] %vm1154_vm2, %v5493_v35 }
0x1762   :  { %5479 = vmatmul.bf16.gmra.mxu0 %v5365_v39 }
0x1764   :  { %v5467_v58 = vpop.f32.mrf.mxu0 }
0x1765   :  { %v5468_v63 = vadd.f32 %v6221_v15, %v5467_v58 }
0x1767   :  { %v5494_v56 = vadd.f32 %v5468_v63, %v10065_v40 }
0x1769   :  { %5510 = vst.msk [vmem:[%s10363_s22 + $0x48] sm:$0xff] %vm1154_vm2, %v5494_v56 }
0x176c   :  { %v5470_v61 = vpop.f32.mrf.mxu0 }
0x176d   :  { %v5471_v8 = vadd.f32 %v6221_v15, %v5470_v61 }
0x176f   :  { %v5495_v18 = vadd.f32 %v5471_v8, %v10084_v42 }
0x1771   :  { %5511 = vst.msk [vmem:[%s10363_s22 + $0x50] sm:$0xff] %vm1154_vm2, %v5495_v18 }
0x1774   :  { %v5472_v7 = vpop.f32.mrf.mxu0 }
0x1775   :  { %v5473_v25 = vadd.f32 %v6221_v15, %v5472_v7 }
0x1777   :  { %v5496_v4 = vadd.f32 %v5473_v25, %v10104_v29 }
0x1779   :  { %5512 = vst.msk [vmem:[%s10363_s22 + $0x58] sm:$0xff] %vm1154_vm2, %v5496_v4 }
0x177c   :  { %v5475_v40 = vpop.f32.mrf.mxu0 }
0x177d   :  { %v5476_v55 = vadd.f32 %v6221_v15, %v5475_v40 }
0x177f   :  { %v5497_v45 = vadd.f32 %v5476_v55, %v10122_v10 }
0x1781   :  { %5513 = vst.msk [vmem:[%s10363_s22 + $0x60] sm:$0xff] %vm1154_vm2, %v5497_v45 }
0x1784   :  { %v5477_v42 = vpop.f32.mrf.mxu0 }
0x1785   :  { %v5478_v51 = vadd.f32 %v6221_v15, %v5477_v42 }
0x1787   :  { %v5498_v1 = vadd.f32 %v5478_v51, %v10134_v26 }
0x1789   :  { %5514 = vst.msk [vmem:[%s10363_s22 + $0x68] sm:$0xff] %vm1154_vm2, %v5498_v1 }
0x17df   :  { %v5480_v29 = vpop.f32.mrf.mxu0 }
0x17e0   :  { %v5481_v27 = vadd.f32 %v6221_v15, %v5480_v29 }
0x17e2   :  { %v5499_v52 = vadd.f32 %v5481_v27, %v10149_v62 }
0x17e4   :  { %5515 = vst.msk [vmem:[%s10363_s22 + $0x70] sm:$0xff] %vm1154_vm2, %v5499_v52 }
0x17e7   :  { %v5482_v10 = vpop.f32.mrf.mxu0 }
0x17e8   :  { %v5483_v54 = vadd.f32 %v6221_v15, %v5482_v10 }
0x17ea   :  { %v5500_v34 = vadd.f32 %v5483_v54, %v10163_v24 }
0x17ec   :  { %5516 = vst.msk [vmem:[%s10363_s22 + $0x78] sm:$0xff] %vm1154_vm2, %v5500_v34 }

</bundles_post_ra>
